<compile_context>
chip_gen: v7x
topology: tpu7x:2x2x1
jax: 0.10.0
libtpu: 0.0.40
codegen_flags: <defaults>
</compile_context>

<pallas_src>
import jax
import jax.numpy as jnp
from jax.experimental import pallas as pl
from jax.experimental.pallas import tpu as pltpu


def _resblock_kernel(xp_ref, w1_ref, s1_ref, o1_ref, w2_ref, s2_ref, o2_ref,
                     out_ref, hpad_ref):
    """One image per grid step.

    xp_ref   : (1, H+2, W+2, Cp) bf16  spatially padded, channel-padded input
    w{1,2}   : (9, Cp, Cp)       bf16  per-tap (C_in, C_out) conv weights
    s/o{1,2} : (1, Cp)           f32   folded BN scale / bias
    out_ref  : (1, H, W, Cp)     f32   result
    hpad_ref : (H+2, W+2, Cp)    bf16  VMEM scratch for the padded intermediate
    """
    _, H, W, Cp = out_ref.shape
    HW = H * W

    def conv3x3(patch_fn, w_ref):
        # 9 shifted matmuls, bf16 operands -> f32 accumulation on the MXU.
        acc = jnp.zeros((HW, Cp), jnp.float32)
        for dy in range(3):
            for dx in range(3):
                acc = acc + jnp.dot(patch_fn(dy, dx), w_ref[dy * 3 + dx],
                                    preferred_element_type=jnp.float32)
        return acc

    # ---- conv1 + folded BN1 + ReLU -------------------------------------
    def x_patch(dy, dx):
        # bf16 straight into the dot (no upcast of the matmul operand).
        return xp_ref[0, dy:dy + H, dx:dx + W, :].reshape(HW, Cp)

    h = conv3x3(x_patch, w1_ref)
    h = jnp.maximum(h * s1_ref[...] + o1_ref[...], 0.0)        # f32 VPU tail

    # Stage h (bf16) with a zero halo for the second conv.  Zeroed every step:
    # with "parallel" batch semantics each core must see a clean halo, so no
    # program_id==0 trick here.  Full unmasked zero stores, then overwrite the
    # interior (the halo-only alternative needs masked sub-sublane stores on
    # packed bf16 and saves almost nothing).
    hpad_ref[...] = jnp.zeros(hpad_ref.shape, hpad_ref.dtype)
    hpad_ref[1:H + 1, 1:W + 1, :] = h.reshape(H, W, Cp).astype(hpad_ref.dtype)

    # ---- conv2 + folded BN2 + residual + ReLU --------------------------
    def h_patch(dy, dx):
        # Already bf16: native MXU operand, no per-tap cast.
        return hpad_ref[dy:dy + H, dx:dx + W, :].reshape(HW, Cp)

    h2 = conv3x3(h_patch, w2_ref)
    residual = xp_ref[0, 1:H + 1, 1:W + 1, :].reshape(HW, Cp).astype(
        jnp.float32)
    out = jnp.maximum(h2 * s2_ref[...] + o2_ref[...] + residual, 0.0)
    out_ref[...] = out.reshape(1, H, W, Cp)


def _round_up(n, m):
    return ((n + m - 1) // m) * m


def resblock_forward(x_nchw, w1_oihw, bn1, w2_oihw, bn2, *, eps=1e-5):
    """x_nchw: (B, C, H, W) f32.  w*_oihw: (C, C, 3, 3) f32 (PyTorch layout).
    bn* = (gamma, beta, running_mean, running_var), each (C,) f32.
    Returns (B, C, H, W) f32."""
    B, C, H, W = x_nchw.shape
    Cp = max(_round_up(C, 128), 128)            # lane-dense channel width

    def fold_bn(p):
        g, b, m, v = p
        s = g / jnp.sqrt(v + eps)
        o = b - m * s
        sp = jnp.zeros((1, Cp), jnp.float32).at[0, :C].set(s)
        op = jnp.zeros((1, Cp), jnp.float32).at[0, :C].set(o)
        return sp, op

    def prep_w(w_oihw):
        # OIHW -> per-tap (C_in, C_out), zero-padded to (9, Cp, Cp), bf16
        # (halves the dominant weight DMA).
        w_hwio = jnp.transpose(w_oihw, (2, 3, 1, 0)).reshape(9, C, C)
        wp = jnp.zeros((9, Cp, Cp), jnp.float32).at[:, :C, :C].set(w_hwio)
        return wp.astype(jnp.bfloat16)

    s1, o1 = fold_bn(bn1)
    s2, o2 = fold_bn(bn2)
    w1t = prep_w(w1_oihw)
    w2t = prep_w(w2_oihw)

    # NHWC, spatial zero-halo of 1, channels zero-padded to Cp, bf16.
    x_nhwc = jnp.transpose(x_nchw, (0, 2, 3, 1))
    xp = jnp.zeros((B, H + 2, W + 2, Cp), jnp.bfloat16)
    xp = xp.at[:, 1:H + 1, 1:W + 1, :C].set(x_nhwc.astype(jnp.bfloat16))

    out = pl.pallas_call(
        _resblock_kernel,
        out_shape=jax.ShapeDtypeStruct((B, H, W, Cp), jnp.float32),
        grid_spec=pltpu.PrefetchScalarGridSpec(
            num_scalar_prefetch=0,
            grid=(B,),
            in_specs=[
                pl.BlockSpec((1, H + 2, W + 2, Cp), lambda b: (b, 0, 0, 0)),
                pl.BlockSpec((9, Cp, Cp), lambda b: (0, 0, 0)),  # resident
                pl.BlockSpec((1, Cp), lambda b: (0, 0)),
                pl.BlockSpec((1, Cp), lambda b: (0, 0)),
                pl.BlockSpec((9, Cp, Cp), lambda b: (0, 0, 0)),  # resident
                pl.BlockSpec((1, Cp), lambda b: (0, 0)),
                pl.BlockSpec((1, Cp), lambda b: (0, 0)),
            ],
            out_specs=pl.BlockSpec((1, H, W, Cp), lambda b: (b, 0, 0, 0)),
            scratch_shapes=[pltpu.VMEM((H + 2, W + 2, Cp), jnp.bfloat16)],
        ),
        compiler_params=pltpu.CompilerParams(
            dimension_semantics=("parallel",),   # v7x: split batch over 2 TCs
        ),
    )(xp, w1t, s1, o1, w2t, s2, o2)

    return jnp.transpose(out[:, :, :, :C], (0, 3, 1, 2))


def _reference(x_nchw, w1_oihw, bn1, w2_oihw, bn2, *, eps=1e-5):
    """Pure-JAX reference mirroring the kernel's bf16 matmul operands."""
    def fold(p):
        g, b, m, v = p
        s = g / jnp.sqrt(v + eps)
        return s, b - m * s

    def q(a):
        return a.astype(jnp.bfloat16).astype(jnp.float32)

    def conv(h, w):
        return jax.lax.conv_general_dilated(
            h, w, window_strides=(1, 1), padding="SAME",
            dimension_numbers=("NCHW", "OIHW", "NCHW"))

    def bcast(v):
        return v[None, :, None, None]

    s1, o1 = fold(bn1)
    s2, o2 = fold(bn2)
    xq = q(x_nchw)
    h = jnp.maximum(conv(xq, q(w1_oihw)) * bcast(s1) + bcast(o1), 0.0)
    h = conv(q(h), q(w2_oihw)) * bcast(s2) + bcast(o2)
    return jnp.maximum(h + xq, 0.0)


if __name__ == "__main__":
    B, C, H, W = 2, 4, 16, 16
    eps = 1e-5

    key = jax.random.PRNGKey(0)
    ks = jax.random.split(key, 11)

    x = jax.random.normal(ks[0], (B, C, H, W), jnp.float32)
    w1 = jax.random.normal(ks[1], (C, C, 3, 3), jnp.float32) * 0.1  # OIHW
    w2 = jax.random.normal(ks[2], (C, C, 3, 3), jnp.float32) * 0.1

    bn1 = (jax.random.uniform(ks[3], (C,), jnp.float32, 0.5, 1.5),   # gamma
           jax.random.normal(ks[4], (C,), jnp.float32) * 0.1,        # beta
           jax.random.normal(ks[5], (C,), jnp.float32) * 0.1,        # mean
           jax.random.uniform(ks[6], (C,), jnp.float32, 0.5, 1.5))   # var
    bn2 = (jax.random.uniform(ks[7], (C,), jnp.float32, 0.5, 1.5),
           jax.random.normal(ks[8], (C,), jnp.float32) * 0.1,
           jax.random.normal(ks[9], (C,), jnp.float32) * 0.1,
           jax.random.uniform(ks[10], (C,), jnp.float32, 0.5, 1.5))

    out = resblock_forward(x, w1, bn1, w2, bn2, eps=eps)
    jax.block_until_ready(out)

    ref = _reference(x, w1, bn1, w2, bn2, eps=eps)
    assert out.shape == (B, C, H, W)
    assert bool(jnp.all(out >= 0.0))
    assert jnp.allclose(out, ref, atol=2e-2, rtol=2e-2), (
        float(jnp.max(jnp.abs(out - ref))))

    print("KERNEL_OK")
</pallas_src>

<mosaic_0001>
module attributes {stable_mosaic.version = 11 : i64} {
  func.func @_resblock_kernel(%arg0: i32, %arg1: memref<1x18x18x128xbf16, #tpu.memory_space<vmem>>, %arg2: memref<9x128x128xbf16, #tpu.memory_space<vmem>>, %arg3: memref<1x128xf32, #tpu.memory_space<vmem>>, %arg4: memref<1x128xf32, #tpu.memory_space<vmem>>, %arg5: memref<9x128x128xbf16, #tpu.memory_space<vmem>>, %arg6: memref<1x128xf32, #tpu.memory_space<vmem>>, %arg7: memref<1x128xf32, #tpu.memory_space<vmem>>, %arg8: memref<1x16x16x128xf32, #tpu.memory_space<vmem>>, %arg9: memref<18x18x128xbf16, #tpu.memory_space<vmem>>) attributes {dimension_semantics = [#tpu.dimension_semantics<parallel>], iteration_bounds = array<i64: 2>, scalar_prefetch = 0 : i64, scratch_operands = 1 : i64, tpu.core_type = #tpu.core_type<tc>, window_params = [{transform_indices = @transform_0, window_bounds = array<i64: 1, 18, 18, 128>}, {pipeline_mode = #tpu.pipeline_mode<synchronous>, transform_indices = @transform_1, window_bounds = array<i64: 9, 128, 128>}, {pipeline_mode = #tpu.pipeline_mode<synchronous>, transform_indices = @transform_2, window_bounds = array<i64: 1, 128>}, {pipeline_mode = #tpu.pipeline_mode<synchronous>, transform_indices = @transform_3, window_bounds = array<i64: 1, 128>}, {pipeline_mode = #tpu.pipeline_mode<synchronous>, transform_indices = @transform_4, window_bounds = array<i64: 9, 128, 128>}, {pipeline_mode = #tpu.pipeline_mode<synchronous>, transform_indices = @transform_5, window_bounds = array<i64: 1, 128>}, {pipeline_mode = #tpu.pipeline_mode<synchronous>, transform_indices = @transform_6, window_bounds = array<i64: 1, 128>}, {transform_indices = @transform_7, window_bounds = array<i64: 1, 16, 16, 128>}]} {
    %cst = arith.constant 0.000000e+00 : f32
    %0 = vector.broadcast %cst : f32 to vector<256x128xf32>
    %c0 = arith.constant 0 : index
    %c0_0 = arith.constant 0 : index
    %c0_1 = arith.constant 0 : index
    %c0_2 = arith.constant 0 : index
    %1 = vector.load %arg1[%c0, %c0_0, %c0_1, %c0_2] : memref<1x18x18x128xbf16, #tpu.memory_space<vmem>>, vector<1x16x16x128xbf16>
    %2 = vector.shape_cast %1 : vector<1x16x16x128xbf16> to vector<16x16x128xbf16>
    %3 = vector.shape_cast %2 : vector<16x16x128xbf16> to vector<256x128xbf16>
    %c0_3 = arith.constant 0 : index
    %c0_4 = arith.constant 0 : index
    %c0_5 = arith.constant 0 : index
    %4 = vector.load %arg2[%c0_3, %c0_4, %c0_5] : memref<9x128x128xbf16, #tpu.memory_space<vmem>>, vector<1x128x128xbf16>
    %5 = vector.shape_cast %4 : vector<1x128x128xbf16> to vector<128x128xbf16>
    %cst_6 = arith.constant dense<0.000000e+00> : vector<256x128xf32>
    %6 = tpu.matmul %3, %5, %cst_6 {dimension_numbers = #tpu.dot_dimension_numbers<[1], [0], [0], [1], [0, 0, 1, 1], [], []>} : vector<256x128xbf16>, vector<128x128xbf16>, vector<256x128xf32> -> vector<256x128xf32>
    %7 = arith.addf %0, %6 : vector<256x128xf32>
    %c0_7 = arith.constant 0 : index
    %c0_8 = arith.constant 0 : index
    %c1 = arith.constant 1 : index
    %c0_9 = arith.constant 0 : index
    %8 = vector.load %arg1[%c0_7, %c0_8, %c1, %c0_9] : memref<1x18x18x128xbf16, #tpu.memory_space<vmem>>, vector<1x16x16x128xbf16>
    %9 = vector.shape_cast %8 : vector<1x16x16x128xbf16> to vector<16x16x128xbf16>
    %10 = vector.shape_cast %9 : vector<16x16x128xbf16> to vector<256x128xbf16>
    %c1_10 = arith.constant 1 : index
    %c0_11 = arith.constant 0 : index
    %c0_12 = arith.constant 0 : index
    %11 = vector.load %arg2[%c1_10, %c0_11, %c0_12] : memref<9x128x128xbf16, #tpu.memory_space<vmem>>, vector<1x128x128xbf16>
    %12 = vector.shape_cast %11 : vector<1x128x128xbf16> to vector<128x128xbf16>
    %cst_13 = arith.constant dense<0.000000e+00> : vector<256x128xf32>
    %13 = tpu.matmul %10, %12, %cst_13 {dimension_numbers = #tpu.dot_dimension_numbers<[1], [0], [0], [1], [0, 0, 1, 1], [], []>} : vector<256x128xbf16>, vector<128x128xbf16>, vector<256x128xf32> -> vector<256x128xf32>
    %14 = arith.addf %7, %13 : vector<256x128xf32>
    %c0_14 = arith.constant 0 : index
    %c0_15 = arith.constant 0 : index
    %c2 = arith.constant 2 : index
    %c0_16 = arith.constant 0 : index
    %15 = vector.load %arg1[%c0_14, %c0_15, %c2, %c0_16] : memref<1x18x18x128xbf16, #tpu.memory_space<vmem>>, vector<1x16x16x128xbf16>
    %16 = vector.shape_cast %15 : vector<1x16x16x128xbf16> to vector<16x16x128xbf16>
    %17 = vector.shape_cast %16 : vector<16x16x128xbf16> to vector<256x128xbf16>
    %c2_17 = arith.constant 2 : index
    %c0_18 = arith.constant 0 : index
    %c0_19 = arith.constant 0 : index
    %18 = vector.load %arg2[%c2_17, %c0_18, %c0_19] : memref<9x128x128xbf16, #tpu.memory_space<vmem>>, vector<1x128x128xbf16>
    %19 = vector.shape_cast %18 : vector<1x128x128xbf16> to vector<128x128xbf16>
    %cst_20 = arith.constant dense<0.000000e+00> : vector<256x128xf32>
    %20 = tpu.matmul %17, %19, %cst_20 {dimension_numbers = #tpu.dot_dimension_numbers<[1], [0], [0], [1], [0, 0, 1, 1], [], []>} : vector<256x128xbf16>, vector<128x128xbf16>, vector<256x128xf32> -> vector<256x128xf32>
    %21 = arith.addf %14, %20 : vector<256x128xf32>
    %c0_21 = arith.constant 0 : index
    %c1_22 = arith.constant 1 : index
    %c0_23 = arith.constant 0 : index
    %c0_24 = arith.constant 0 : index
    %22 = vector.load %arg1[%c0_21, %c1_22, %c0_23, %c0_24] : memref<1x18x18x128xbf16, #tpu.memory_space<vmem>>, vector<1x16x16x128xbf16>
    %23 = vector.shape_cast %22 : vector<1x16x16x128xbf16> to vector<16x16x128xbf16>
    %24 = vector.shape_cast %23 : vector<16x16x128xbf16> to vector<256x128xbf16>
    %c3 = arith.constant 3 : index
    %c0_25 = arith.constant 0 : index
    %c0_26 = arith.constant 0 : index
    %25 = vector.load %arg2[%c3, %c0_25, %c0_26] : memref<9x128x128xbf16, #tpu.memory_space<vmem>>, vector<1x128x128xbf16>
    %26 = vector.shape_cast %25 : vector<1x128x128xbf16> to vector<128x128xbf16>
    %cst_27 = arith.constant dense<0.000000e+00> : vector<256x128xf32>
    %27 = tpu.matmul %24, %26, %cst_27 {dimension_numbers = #tpu.dot_dimension_numbers<[1], [0], [0], [1], [0, 0, 1, 1], [], []>} : vector<256x128xbf16>, vector<128x128xbf16>, vector<256x128xf32> -> vector<256x128xf32>
    %28 = arith.addf %21, %27 : vector<256x128xf32>
    %c0_28 = arith.constant 0 : index
    %c1_29 = arith.constant 1 : index
    %c1_30 = arith.constant 1 : index
    %c0_31 = arith.constant 0 : index
    %29 = vector.load %arg1[%c0_28, %c1_29, %c1_30, %c0_31] : memref<1x18x18x128xbf16, #tpu.memory_space<vmem>>, vector<1x16x16x128xbf16>
    %30 = vector.shape_cast %29 : vector<1x16x16x128xbf16> to vector<16x16x128xbf16>
    %31 = vector.shape_cast %30 : vector<16x16x128xbf16> to vector<256x128xbf16>
    %c4 = arith.constant 4 : index
    %c0_32 = arith.constant 0 : index
    %c0_33 = arith.constant 0 : index
    %32 = vector.load %arg2[%c4, %c0_32, %c0_33] : memref<9x128x128xbf16, #tpu.memory_space<vmem>>, vector<1x128x128xbf16>
    %33 = vector.shape_cast %32 : vector<1x128x128xbf16> to vector<128x128xbf16>
    %cst_34 = arith.constant dense<0.000000e+00> : vector<256x128xf32>
    %34 = tpu.matmul %31, %33, %cst_34 {dimension_numbers = #tpu.dot_dimension_numbers<[1], [0], [0], [1], [0, 0, 1, 1], [], []>} : vector<256x128xbf16>, vector<128x128xbf16>, vector<256x128xf32> -> vector<256x128xf32>
    %35 = arith.addf %28, %34 : vector<256x128xf32>
    %c0_35 = arith.constant 0 : index
    %c1_36 = arith.constant 1 : index
    %c2_37 = arith.constant 2 : index
    %c0_38 = arith.constant 0 : index
    %36 = vector.load %arg1[%c0_35, %c1_36, %c2_37, %c0_38] : memref<1x18x18x128xbf16, #tpu.memory_space<vmem>>, vector<1x16x16x128xbf16>
    %37 = vector.shape_cast %36 : vector<1x16x16x128xbf16> to vector<16x16x128xbf16>
    %38 = vector.shape_cast %37 : vector<16x16x128xbf16> to vector<256x128xbf16>
    %c5 = arith.constant 5 : index
    %c0_39 = arith.constant 0 : index
    %c0_40 = arith.constant 0 : index
    %39 = vector.load %arg2[%c5, %c0_39, %c0_40] : memref<9x128x128xbf16, #tpu.memory_space<vmem>>, vector<1x128x128xbf16>
    %40 = vector.shape_cast %39 : vector<1x128x128xbf16> to vector<128x128xbf16>
    %cst_41 = arith.constant dense<0.000000e+00> : vector<256x128xf32>
    %41 = tpu.matmul %38, %40, %cst_41 {dimension_numbers = #tpu.dot_dimension_numbers<[1], [0], [0], [1], [0, 0, 1, 1], [], []>} : vector<256x128xbf16>, vector<128x128xbf16>, vector<256x128xf32> -> vector<256x128xf32>
    %42 = arith.addf %35, %41 : vector<256x128xf32>
    %c0_42 = arith.constant 0 : index
    %c2_43 = arith.constant 2 : index
    %c0_44 = arith.constant 0 : index
    %c0_45 = arith.constant 0 : index
    %43 = vector.load %arg1[%c0_42, %c2_43, %c0_44, %c0_45] : memref<1x18x18x128xbf16, #tpu.memory_space<vmem>>, vector<1x16x16x128xbf16>
    %44 = vector.shape_cast %43 : vector<1x16x16x128xbf16> to vector<16x16x128xbf16>
    %45 = vector.shape_cast %44 : vector<16x16x128xbf16> to vector<256x128xbf16>
    %c6 = arith.constant 6 : index
    %c0_46 = arith.constant 0 : index
    %c0_47 = arith.constant 0 : index
    %46 = vector.load %arg2[%c6, %c0_46, %c0_47] : memref<9x128x128xbf16, #tpu.memory_space<vmem>>, vector<1x128x128xbf16>
    %47 = vector.shape_cast %46 : vector<1x128x128xbf16> to vector<128x128xbf16>
    %cst_48 = arith.constant dense<0.000000e+00> : vector<256x128xf32>
    %48 = tpu.matmul %45, %47, %cst_48 {dimension_numbers = #tpu.dot_dimension_numbers<[1], [0], [0], [1], [0, 0, 1, 1], [], []>} : vector<256x128xbf16>, vector<128x128xbf16>, vector<256x128xf32> -> vector<256x128xf32>
    %49 = arith.addf %42, %48 : vector<256x128xf32>
    %c0_49 = arith.constant 0 : index
    %c2_50 = arith.constant 2 : index
    %c1_51 = arith.constant 1 : index
    %c0_52 = arith.constant 0 : index
    %50 = vector.load %arg1[%c0_49, %c2_50, %c1_51, %c0_52] : memref<1x18x18x128xbf16, #tpu.memory_space<vmem>>, vector<1x16x16x128xbf16>
    %51 = vector.shape_cast %50 : vector<1x16x16x128xbf16> to vector<16x16x128xbf16>
    %52 = vector.shape_cast %51 : vector<16x16x128xbf16> to vector<256x128xbf16>
    %c7 = arith.constant 7 : index
    %c0_53 = arith.constant 0 : index
    %c0_54 = arith.constant 0 : index
    %53 = vector.load %arg2[%c7, %c0_53, %c0_54] : memref<9x128x128xbf16, #tpu.memory_space<vmem>>, vector<1x128x128xbf16>
    %54 = vector.shape_cast %53 : vector<1x128x128xbf16> to vector<128x128xbf16>
    %cst_55 = arith.constant dense<0.000000e+00> : vector<256x128xf32>
    %55 = tpu.matmul %52, %54, %cst_55 {dimension_numbers = #tpu.dot_dimension_numbers<[1], [0], [0], [1], [0, 0, 1, 1], [], []>} : vector<256x128xbf16>, vector<128x128xbf16>, vector<256x128xf32> -> vector<256x128xf32>
    %56 = arith.addf %49, %55 : vector<256x128xf32>
    %c0_56 = arith.constant 0 : index
    %c2_57 = arith.constant 2 : index
    %c2_58 = arith.constant 2 : index
    %c0_59 = arith.constant 0 : index
    %57 = vector.load %arg1[%c0_56, %c2_57, %c2_58, %c0_59] : memref<1x18x18x128xbf16, #tpu.memory_space<vmem>>, vector<1x16x16x128xbf16>
    %58 = vector.shape_cast %57 : vector<1x16x16x128xbf16> to vector<16x16x128xbf16>
    %59 = vector.shape_cast %58 : vector<16x16x128xbf16> to vector<256x128xbf16>
    %c8 = arith.constant 8 : index
    %c0_60 = arith.constant 0 : index
    %c0_61 = arith.constant 0 : index
    %60 = vector.load %arg2[%c8, %c0_60, %c0_61] : memref<9x128x128xbf16, #tpu.memory_space<vmem>>, vector<1x128x128xbf16>
    %61 = vector.shape_cast %60 : vector<1x128x128xbf16> to vector<128x128xbf16>
    %cst_62 = arith.constant dense<0.000000e+00> : vector<256x128xf32>
    %62 = tpu.matmul %59, %61, %cst_62 {dimension_numbers = #tpu.dot_dimension_numbers<[1], [0], [0], [1], [0, 0, 1, 1], [], []>} : vector<256x128xbf16>, vector<128x128xbf16>, vector<256x128xf32> -> vector<256x128xf32>
    %63 = arith.addf %56, %62 : vector<256x128xf32>
    %c0_63 = arith.constant 0 : index
    %c0_64 = arith.constant 0 : index
    %64 = vector.load %arg3[%c0_63, %c0_64] : memref<1x128xf32, #tpu.memory_space<vmem>>, vector<1x128xf32>
    %65 = vector.broadcast %64 : vector<1x128xf32> to vector<256x128xf32>
    %66 = arith.mulf %63, %65 : vector<256x128xf32>
    %c0_65 = arith.constant 0 : index
    %c0_66 = arith.constant 0 : index
    %67 = vector.load %arg4[%c0_65, %c0_66] : memref<1x128xf32, #tpu.memory_space<vmem>>, vector<1x128xf32>
    %68 = vector.broadcast %67 : vector<1x128xf32> to vector<256x128xf32>
    %69 = arith.addf %66, %68 : vector<256x128xf32>
    %cst_67 = arith.constant 0.000000e+00 : f32
    %70 = vector.broadcast %cst_67 : f32 to vector<256x128xf32>
    %71 = arith.maximumf %69, %70 : vector<256x128xf32>
    %cst_68 = arith.constant 0.000000e+00 : bf16
    %72 = vector.broadcast %cst_68 : bf16 to vector<18x18x128xbf16>
    %c0_69 = arith.constant 0 : index
    %c0_70 = arith.constant 0 : index
    %c0_71 = arith.constant 0 : index
    %73 = vector.load %arg9[%c0_69, %c0_70, %c0_71] : memref<18x18x128xbf16, #tpu.memory_space<vmem>>, vector<18x18x128xbf16>
    tpu.vector_store %arg9[%c0_69, %c0_70, %c0_71], %72 {strides = array<i32>} : memref<18x18x128xbf16, #tpu.memory_space<vmem>>, vector<18x18x128xbf16>,
    %74 = vector.shape_cast %71 : vector<256x128xf32> to vector<16x16x128xf32>
    %75 = arith.truncf %74 : vector<16x16x128xf32> to vector<16x16x128xbf16>
    %c1_72 = arith.constant 1 : index
    %c1_73 = arith.constant 1 : index
    %c0_74 = arith.constant 0 : index
    %76 = vector.load %arg9[%c1_72, %c1_73, %c0_74] : memref<18x18x128xbf16, #tpu.memory_space<vmem>>, vector<16x16x128xbf16>
    tpu.vector_store %arg9[%c1_72, %c1_73, %c0_74], %75 {strides = array<i32>} : memref<18x18x128xbf16, #tpu.memory_space<vmem>>, vector<16x16x128xbf16>,
    %cst_75 = arith.constant 0.000000e+00 : f32
    %77 = vector.broadcast %cst_75 : f32 to vector<256x128xf32>
    %c0_76 = arith.constant 0 : index
    %c0_77 = arith.constant 0 : index
    %c0_78 = arith.constant 0 : index
    %78 = vector.load %arg9[%c0_76, %c0_77, %c0_78] : memref<18x18x128xbf16, #tpu.memory_space<vmem>>, vector<16x16x128xbf16>
    %79 = vector.shape_cast %78 : vector<16x16x128xbf16> to vector<256x128xbf16>
    %c0_79 = arith.constant 0 : index
    %c0_80 = arith.constant 0 : index
    %c0_81 = arith.constant 0 : index
    %80 = vector.load %arg5[%c0_79, %c0_80, %c0_81] : memref<9x128x128xbf16, #tpu.memory_space<vmem>>, vector<1x128x128xbf16>
    %81 = vector.shape_cast %80 : vector<1x128x128xbf16> to vector<128x128xbf16>
    %cst_82 = arith.constant dense<0.000000e+00> : vector<256x128xf32>
    %82 = tpu.matmul %79, %81, %cst_82 {dimension_numbers = #tpu.dot_dimension_numbers<[1], [0], [0], [1], [0, 0, 1, 1], [], []>} : vector<256x128xbf16>, vector<128x128xbf16>, vector<256x128xf32> -> vector<256x128xf32>
    %83 = arith.addf %77, %82 : vector<256x128xf32>
    %c0_83 = arith.constant 0 : index
    %c1_84 = arith.constant 1 : index
    %c0_85 = arith.constant 0 : index
    %84 = vector.load %arg9[%c0_83, %c1_84, %c0_85] : memref<18x18x128xbf16, #tpu.memory_space<vmem>>, vector<16x16x128xbf16>
    %85 = vector.shape_cast %84 : vector<16x16x128xbf16> to vector<256x128xbf16>
    %c1_86 = arith.constant 1 : index
    %c0_87 = arith.constant 0 : index
    %c0_88 = arith.constant 0 : index
    %86 = vector.load %arg5[%c1_86, %c0_87, %c0_88] : memref<9x128x128xbf16, #tpu.memory_space<vmem>>, vector<1x128x128xbf16>
    %87 = vector.shape_cast %86 : vector<1x128x128xbf16> to vector<128x128xbf16>
    %cst_89 = arith.constant dense<0.000000e+00> : vector<256x128xf32>
    %88 = tpu.matmul %85, %87, %cst_89 {dimension_numbers = #tpu.dot_dimension_numbers<[1], [0], [0], [1], [0, 0, 1, 1], [], []>} : vector<256x128xbf16>, vector<128x128xbf16>, vector<256x128xf32> -> vector<256x128xf32>
    %89 = arith.addf %83, %88 : vector<256x128xf32>
    %c0_90 = arith.constant 0 : index
    %c2_91 = arith.constant 2 : index
    %c0_92 = arith.constant 0 : index
    %90 = vector.load %arg9[%c0_90, %c2_91, %c0_92] : memref<18x18x128xbf16, #tpu.memory_space<vmem>>, vector<16x16x128xbf16>
    %91 = vector.shape_cast %90 : vector<16x16x128xbf16> to vector<256x128xbf16>
    %c2_93 = arith.constant 2 : index
    %c0_94 = arith.constant 0 : index
    %c0_95 = arith.constant 0 : index
    %92 = vector.load %arg5[%c2_93, %c0_94, %c0_95] : memref<9x128x128xbf16, #tpu.memory_space<vmem>>, vector<1x128x128xbf16>
    %93 = vector.shape_cast %92 : vector<1x128x128xbf16> to vector<128x128xbf16>
    %cst_96 = arith.constant dense<0.000000e+00> : vector<256x128xf32>
    %94 = tpu.matmul %91, %93, %cst_96 {dimension_numbers = #tpu.dot_dimension_numbers<[1], [0], [0], [1], [0, 0, 1, 1], [], []>} : vector<256x128xbf16>, vector<128x128xbf16>, vector<256x128xf32> -> vector<256x128xf32>
    %95 = arith.addf %89, %94 : vector<256x128xf32>
    %c1_97 = arith.constant 1 : index
    %c0_98 = arith.constant 0 : index
    %c0_99 = arith.constant 0 : index
    %96 = vector.load %arg9[%c1_97, %c0_98, %c0_99] : memref<18x18x128xbf16, #tpu.memory_space<vmem>>, vector<16x16x128xbf16>
    %97 = vector.shape_cast %96 : vector<16x16x128xbf16> to vector<256x128xbf16>
    %c3_100 = arith.constant 3 : index
    %c0_101 = arith.constant 0 : index
    %c0_102 = arith.constant 0 : index
    %98 = vector.load %arg5[%c3_100, %c0_101, %c0_102] : memref<9x128x128xbf16, #tpu.memory_space<vmem>>, vector<1x128x128xbf16>
    %99 = vector.shape_cast %98 : vector<1x128x128xbf16> to vector<128x128xbf16>
    %cst_103 = arith.constant dense<0.000000e+00> : vector<256x128xf32>
    %100 = tpu.matmul %97, %99, %cst_103 {dimension_numbers = #tpu.dot_dimension_numbers<[1], [0], [0], [1], [0, 0, 1, 1], [], []>} : vector<256x128xbf16>, vector<128x128xbf16>, vector<256x128xf32> -> vector<256x128xf32>
    %101 = arith.addf %95, %100 : vector<256x128xf32>
    %c1_104 = arith.constant 1 : index
    %c1_105 = arith.constant 1 : index
    %c0_106 = arith.constant 0 : index
    %102 = vector.load %arg9[%c1_104, %c1_105, %c0_106] : memref<18x18x128xbf16, #tpu.memory_space<vmem>>, vector<16x16x128xbf16>
    %103 = vector.shape_cast %102 : vector<16x16x128xbf16> to vector<256x128xbf16>
    %c4_107 = arith.constant 4 : index
    %c0_108 = arith.constant 0 : index
    %c0_109 = arith.constant 0 : index
    %104 = vector.load %arg5[%c4_107, %c0_108, %c0_109] : memref<9x128x128xbf16, #tpu.memory_space<vmem>>, vector<1x128x128xbf16>
    %105 = vector.shape_cast %104 : vector<1x128x128xbf16> to vector<128x128xbf16>
    %cst_110 = arith.constant dense<0.000000e+00> : vector<256x128xf32>
    %106 = tpu.matmul %103, %105, %cst_110 {dimension_numbers = #tpu.dot_dimension_numbers<[1], [0], [0], [1], [0, 0, 1, 1], [], []>} : vector<256x128xbf16>, vector<128x128xbf16>, vector<256x128xf32> -> vector<256x128xf32>
    %107 = arith.addf %101, %106 : vector<256x128xf32>
    %c1_111 = arith.constant 1 : index
    %c2_112 = arith.constant 2 : index
    %c0_113 = arith.constant 0 : index
    %108 = vector.load %arg9[%c1_111, %c2_112, %c0_113] : memref<18x18x128xbf16, #tpu.memory_space<vmem>>, vector<16x16x128xbf16>
    %109 = vector.shape_cast %108 : vector<16x16x128xbf16> to vector<256x128xbf16>
    %c5_114 = arith.constant 5 : index
    %c0_115 = arith.constant 0 : index
    %c0_116 = arith.constant 0 : index
    %110 = vector.load %arg5[%c5_114, %c0_115, %c0_116] : memref<9x128x128xbf16, #tpu.memory_space<vmem>>, vector<1x128x128xbf16>
    %111 = vector.shape_cast %110 : vector<1x128x128xbf16> to vector<128x128xbf16>
    %cst_117 = arith.constant dense<0.000000e+00> : vector<256x128xf32>
    %112 = tpu.matmul %109, %111, %cst_117 {dimension_numbers = #tpu.dot_dimension_numbers<[1], [0], [0], [1], [0, 0, 1, 1], [], []>} : vector<256x128xbf16>, vector<128x128xbf16>, vector<256x128xf32> -> vector<256x128xf32>
    %113 = arith.addf %107, %112 : vector<256x128xf32>
    %c2_118 = arith.constant 2 : index
    %c0_119 = arith.constant 0 : index
    %c0_120 = arith.constant 0 : index
    %114 = vector.load %arg9[%c2_118, %c0_119, %c0_120] : memref<18x18x128xbf16, #tpu.memory_space<vmem>>, vector<16x16x128xbf16>
    %115 = vector.shape_cast %114 : vector<16x16x128xbf16> to vector<256x128xbf16>
    %c6_121 = arith.constant 6 : index
    %c0_122 = arith.constant 0 : index
    %c0_123 = arith.constant 0 : index
    %116 = vector.load %arg5[%c6_121, %c0_122, %c0_123] : memref<9x128x128xbf16, #tpu.memory_space<vmem>>, vector<1x128x128xbf16>
    %117 = vector.shape_cast %116 : vector<1x128x128xbf16> to vector<128x128xbf16>
    %cst_124 = arith.constant dense<0.000000e+00> : vector<256x128xf32>
    %118 = tpu.matmul %115, %117, %cst_124 {dimension_numbers = #tpu.dot_dimension_numbers<[1], [0], [0], [1], [0, 0, 1, 1], [], []>} : vector<256x128xbf16>, vector<128x128xbf16>, vector<256x128xf32> -> vector<256x128xf32>
    %119 = arith.addf %113, %118 : vector<256x128xf32>
    %c2_125 = arith.constant 2 : index
    %c1_126 = arith.constant 1 : index
    %c0_127 = arith.constant 0 : index
    %120 = vector.load %arg9[%c2_125, %c1_126, %c0_127] : memref<18x18x128xbf16, #tpu.memory_space<vmem>>, vector<16x16x128xbf16>
    %121 = vector.shape_cast %120 : vector<16x16x128xbf16> to vector<256x128xbf16>
    %c7_128 = arith.constant 7 : index
    %c0_129 = arith.constant 0 : index
    %c0_130 = arith.constant 0 : index
    %122 = vector.load %arg5[%c7_128, %c0_129, %c0_130] : memref<9x128x128xbf16, #tpu.memory_space<vmem>>, vector<1x128x128xbf16>
    %123 = vector.shape_cast %122 : vector<1x128x128xbf16> to vector<128x128xbf16>
    %cst_131 = arith.constant dense<0.000000e+00> : vector<256x128xf32>
    %124 = tpu.matmul %121, %123, %cst_131 {dimension_numbers = #tpu.dot_dimension_numbers<[1], [0], [0], [1], [0, 0, 1, 1], [], []>} : vector<256x128xbf16>, vector<128x128xbf16>, vector<256x128xf32> -> vector<256x128xf32>
    %125 = arith.addf %119, %124 : vector<256x128xf32>
    %c2_132 = arith.constant 2 : index
    %c2_133 = arith.constant 2 : index
    %c0_134 = arith.constant 0 : index
    %126 = vector.load %arg9[%c2_132, %c2_133, %c0_134] : memref<18x18x128xbf16, #tpu.memory_space<vmem>>, vector<16x16x128xbf16>
    %127 = vector.shape_cast %126 : vector<16x16x128xbf16> to vector<256x128xbf16>
    %c8_135 = arith.constant 8 : index
    %c0_136 = arith.constant 0 : index
    %c0_137 = arith.constant 0 : index
    %128 = vector.load %arg5[%c8_135, %c0_136, %c0_137] : memref<9x128x128xbf16, #tpu.memory_space<vmem>>, vector<1x128x128xbf16>
    %129 = vector.shape_cast %128 : vector<1x128x128xbf16> to vector<128x128xbf16>
    %cst_138 = arith.constant dense<0.000000e+00> : vector<256x128xf32>
    %130 = tpu.matmul %127, %129, %cst_138 {dimension_numbers = #tpu.dot_dimension_numbers<[1], [0], [0], [1], [0, 0, 1, 1], [], []>} : vector<256x128xbf16>, vector<128x128xbf16>, vector<256x128xf32> -> vector<256x128xf32>
    %131 = arith.addf %125, %130 : vector<256x128xf32>
    %c0_139 = arith.constant 0 : index
    %c1_140 = arith.constant 1 : index
    %c1_141 = arith.constant 1 : index
    %c0_142 = arith.constant 0 : index
    %132 = vector.load %arg1[%c0_139, %c1_140, %c1_141, %c0_142] : memref<1x18x18x128xbf16, #tpu.memory_space<vmem>>, vector<1x16x16x128xbf16>
    %133 = vector.shape_cast %132 : vector<1x16x16x128xbf16> to vector<16x16x128xbf16>
    %134 = vector.shape_cast %133 : vector<16x16x128xbf16> to vector<256x128xbf16>
    %135 = arith.extf %134 : vector<256x128xbf16> to vector<256x128xf32>
    %c0_143 = arith.constant 0 : index
    %c0_144 = arith.constant 0 : index
    %136 = vector.load %arg6[%c0_143, %c0_144] : memref<1x128xf32, #tpu.memory_space<vmem>>, vector<1x128xf32>
    %137 = vector.broadcast %136 : vector<1x128xf32> to vector<256x128xf32>
    %138 = arith.mulf %131, %137 : vector<256x128xf32>
    %c0_145 = arith.constant 0 : index
    %c0_146 = arith.constant 0 : index
    %139 = vector.load %arg7[%c0_145, %c0_146] : memref<1x128xf32, #tpu.memory_space<vmem>>, vector<1x128xf32>
    %140 = vector.broadcast %139 : vector<1x128xf32> to vector<256x128xf32>
    %141 = arith.addf %138, %140 : vector<256x128xf32>
    %142 = arith.addf %141, %135 : vector<256x128xf32>
    %cst_147 = arith.constant 0.000000e+00 : f32
    %143 = vector.broadcast %cst_147 : f32 to vector<256x128xf32>
    %144 = arith.maximumf %142, %143 : vector<256x128xf32>
    %145 = vector.shape_cast %144 : vector<256x128xf32> to vector<1x16x16x128xf32>
    %c0_148 = arith.constant 0 : index
    %c0_149 = arith.constant 0 : index
    %c0_150 = arith.constant 0 : index
    %c0_151 = arith.constant 0 : index
    %146 = vector.load %arg8[%c0_148, %c0_149, %c0_150, %c0_151] : memref<1x16x16x128xf32, #tpu.memory_space<vmem>>, vector<1x16x16x128xf32>
    tpu.vector_store %arg8[%c0_148, %c0_149, %c0_150, %c0_151], %145 {strides = array<i32>} : memref<1x16x16x128xf32, #tpu.memory_space<vmem>>, vector<1x16x16x128xf32>,
    return
  }
  func.func @transform_0(%arg0: i32) -> (i32, i32, i32, i32) {
    %c0_i32 = arith.constant 0 : i32
    %c0_i32_0 = arith.constant 0 : i32
    %c0_i32_1 = arith.constant 0 : i32
    %c0_i32_2 = arith.constant 0 : i32
    return %arg0, %c0_i32, %c0_i32_0, %c0_i32_1 : i32, i32, i32, i32
  }
  func.func @transform_1(%arg0: i32) -> (i32, i32, i32) {
    %c0_i32 = arith.constant 0 : i32
    %c0_i32_0 = arith.constant 0 : i32
    %c0_i32_1 = arith.constant 0 : i32
    %c0_i32_2 = arith.constant 0 : i32
    return %c0_i32, %c0_i32_0, %c0_i32_1 : i32, i32, i32
  }
  func.func @transform_2(%arg0: i32) -> (i32, i32) {
    %c0_i32 = arith.constant 0 : i32
    %c0_i32_0 = arith.constant 0 : i32
    %c0_i32_1 = arith.constant 0 : i32
    return %c0_i32, %c0_i32_0 : i32, i32
  }
  func.func @transform_3(%arg0: i32) -> (i32, i32) {
    %c0_i32 = arith.constant 0 : i32
    %c0_i32_0 = arith.constant 0 : i32
    %c0_i32_1 = arith.constant 0 : i32
    return %c0_i32, %c0_i32_0 : i32, i32
  }
  func.func @transform_4(%arg0: i32) -> (i32, i32, i32) {
    %c0_i32 = arith.constant 0 : i32
    %c0_i32_0 = arith.constant 0 : i32
    %c0_i32_1 = arith.constant 0 : i32
    %c0_i32_2 = arith.constant 0 : i32
    return %c0_i32, %c0_i32_0, %c0_i32_1 : i32, i32, i32
  }
  func.func @transform_5(%arg0: i32) -> (i32, i32) {
    %c0_i32 = arith.constant 0 : i32
    %c0_i32_0 = arith.constant 0 : i32
    %c0_i32_1 = arith.constant 0 : i32
    return %c0_i32, %c0_i32_0 : i32, i32
  }
  func.func @transform_6(%arg0: i32) -> (i32, i32) {
    %c0_i32 = arith.constant 0 : i32
    %c0_i32_0 = arith.constant 0 : i32
    %c0_i32_1 = arith.constant 0 : i32
    return %c0_i32, %c0_i32_0 : i32, i32
  }
  func.func @transform_7(%arg0: i32) -> (i32, i32, i32, i32) {
    %c0_i32 = arith.constant 0 : i32
    %c0_i32_0 = arith.constant 0 : i32
    %c0_i32_1 = arith.constant 0 : i32
    %c0_i32_2 = arith.constant 0 : i32
    return %arg0, %c0_i32, %c0_i32_0, %c0_i32_1 : i32, i32, i32, i32
  }
}

</mosaic_0001>

<bundles_post_ra>
// kernel: tpu_custom_call.1
= control target key start
LH: loop header
LB: loop body
LE: loop exit
PB: predicated region body
PF: predicated region fallthrough
CT: control target
= control target key end

     0   :  { %12 = vsyncpa [#allocation4], 0  ;;  %s18603_s0 = inlined_call_operand.vmem [shape: bf16[2,18,18,128], index: 0, kind: input, shape index: {}]   ;;  %s18604_s1 = inlined_call_operand.vmem [shape: bf16[9,128,128], index: 1, kind: input, shape index: {}]   ;;  %s18605_s2 = inlined_call_operand.vmem [shape: f32[1,128], index: 2, kind: input, shape index: {}]   ;;  %s18606_s3 = inlined_call_operand.vmem [shape: f32[1,128], index: 3, kind: input, shape index: {}]   ;;  %s18607_s4 = inlined_call_operand.hbm [shape: bf16[9,128,128], index: 4, kind: input, shape index: {}]   ;;  %s18608_s5 = inlined_call_operand.vmem [shape: f32[1,128], index: 5, kind: input, shape index: {}]   ;;  %s18609_s6 = inlined_call_operand.vmem [shape: f32[1,128], index: 6, kind: input, shape index: {}]   ;;  %s18610_s7 = inlined_call_operand.hbm [shape: f32[2,16,16,128], index: 7, kind: output, shape index: {}]  }
   0x1   :  { %13 = vsyncpa [#allocation5], 0 }
   0x2   :  { %15 = vsyncpa [#allocation5 + $0x1], 0  ;;  %s14644_s24 = smov 0   ;;  %s14646_s25 = smov 0  }
   0x3   :  { %s14648_s26 = smov 0   ;;  %s14650_s27 = smov 0  }
   0x4 LB: > { %s14665_s28 = sadd.s32 4294967295, %s14595_s27   ;;  %s11363_s29 = sadd.s32 4294967294, %s14595_s27   ;;  %s14595_s27 = sphi %s14650_s27, %s19042_s27   ;;  %s14591_s26 = sphi %s14648_s26, %s19041_s26   ;;  %s14587_s25 = sphi %s14646_s25, %s19040_s25   ;;  %s14583_s24 = sphi %s14644_s24, %s19039_s24  }
   0x5   : > { %s14669_s30 = sadd.s32 1, %s14595_s27   ;;  %s180_s8 = sadd.s32 1, %s14591_s26 }
   0x6   : > { %s177_s9 = ssub.s32 %s14595_s27, %s14669_s30  ;;  %p190_p0 = scmp.ne.s32.totalorder %s14591_s26, %s14587_s25 }
   0x7   : > { %p178_p1 = scmp.eq.s32.totalorder %s177_s9, 0  ;;  %p191_p2 = scmp.eq.s32.totalorder %s14665_s28, 1 }
   0x8   : > { %p196_p3 = scmp.ne.s32.totalorder %s14587_s25, %s14583_s24  ;;  %p197_p4 = scmp.eq.s32.totalorder %s11363_s29, 1 }
   0x9   : > { %s14680_s10 = scalar_select %p178_p1, %s14591_s26, %s180_s8  }
   0xa   : > { %p14682_p5 = por %p191_p2, %p190_p0  ;;  %p14686_p6 = por %p197_p4, %p196_p3 }
   0xb   : > { %p11364_p7 = scmp.ge.s32.totalorder %s14595_s27, 1  ;;  %p204_p8 = scmp.lt.s32.totalorder %s14595_s27, 3 }
   0xc   : > { %s18725_s11 = scalar_select %p14682_p5, 1, 0 }
   0xd   : > { %s18726_s12 = scalar_select %p14686_p6, 1, 0 }
   0xe   : > { %p18611_p9 = scmp.eq.s32.totalorder %s14665_s28, 0  ;;  %p14693_p10 = pnand %p11364_p7, %p204_p8 }
   0xf   : > { %s14597_s14 = smov [#allocation3]   ;;  %s14501_s19 = scalar_lea.hbm %s18607_s4, 9216 }
  0x10   : > { %s18727_s13 = scalar_select %p14693_p10, 1, 0 }
  0x11   : > { %s225_s15 = sshll.u32 %s14597_s14, 4  ;;  %p14156_p11 = pneg %p14693_p10  ;;  %s226_s15 = int_to_ptr.vmem [resolvable:$true] %s225_s15 }
  0x12   : > { %p14502_p13 = scmp.ne.s32.totalorder %s18607_s4, %s14501_s19  ;;  %p14508_p3 = scmp.lt.u32.totalorder %s14501_s19, %s18607_s4 }
  0x13   : > { %p14701_p12 = pnand %p18611_p9, %p14156_p11 }
  0x15   : > { %p14503_p0 = pneg %p14701_p12 }
  0x17   : > { %p14504_p1 = pnand %p14503_p0, %p14502_p13 }
  0x19   : > { %p14505_p2 = pneg %p14504_p1 }
  0x1b   : > { %p14510_p4 = pnand %p14508_p3, %p14505_p2 }
  0x1d   : > { %14513 = shalt.err (!%p14510_p4)
}
  0x1e   : > { %s14514_s29 = scalar_lea.vmem %s226_s15, 9216  ;;  %p14522_p9 = scmp.lt.s32.totalorder %s226_s15, %s226_s15 }
  0x1f   : > { %p14515_p7 = scmp.ne.s32.totalorder %s226_s15, %s14514_s29  ;;  %p14523_p6 = scmp.lt.s32.totalorder %s14514_s29, %s14514_s29 }
  0x21   : > { %p14517_p8 = pnand %p14515_p7, %p14503_p0  ;;  %p14524_p5 = por %p14523_p6, %p14522_p9 }
  0x23   : > { %p14518_p11 = pneg %p14517_p8 }
  0x25   : > { %p14525_p10 = pnand %p14524_p5, %p14518_p11 }
  0x27   : > { %14528 = shalt.err (!%p14525_p10)
}
  0x28   : > { %s14598_s8 = smov 64   ;;  %s14599_s9 = smov 4  }
  0x29   : > { %14159 = dma.hbm_to_vmem [thread:$0]  (!%p14701_p12), %s18607_s4, 9216, %s226_s15, [#allocation4], %s14598_s8, %s14598_s8, %s14599_s9  }
  0x2a   : > { %p18729_p13 = scmp.ne.s32.totalorder %s18727_s13, 0 }
  0x2c   : > { %255 = sbr.rel (%p18729_p13) target bundleno = 1721 (0x6b9), region = 48 }
  0x33   : > { %p18730_p1 = scmp.eq.s32.totalorder %s14665_s28, 0 }
  0x35   : > { %14574 = dma.done.wait (%p18730_p1), [#allocation4], 9216   ;;  %p18731_p0 = pmov %p18730_p1 }
  0x36   : > { %p287_p5 = scmp.lt.s32.totalorder %s14665_s28, 1  ;;  %v14205_v0 = vld [vmem:[%s18604_s1 + $0x40] sm:$0xff]   ;;  %v14206_v1 = vld [vmem:[%s18604_s1 + $0x48] sm:$0xff]   ;;  %v14207_v2 = vld [vmem:[%s18604_s1 + $0x50] sm:$0xff]   ;;  %vm357_vm0 = vsmask.f32 3328 }
  0x37   : > { %14576 = vsyncadd (%p18731_p0), [#allocation4], 4294958080  ;;  %12773 = vmatprep.subr.bf16.mxu0 %v14205_v0  ;;  %vm358_vm1 = vsmask.f32 7440  ;;  %v14208_v3 = vld [vmem:[%s18604_s1 + $0x58] sm:$0xff]   ;;  %v14209_v12 = vld [vmem:[%s18604_s1 + $0x60] sm:$0xff]  }
  0x38   : > { %s288_s18 = scalar_select %p287_p5, %s14665_s28, 1  ;;  %12774 = vmatpush3.bf16.msra.mxu0 %v14205_v0  ;;  %vm14776_vm2 = vmor %vm357_vm0, %vm358_vm1  ;;  %v18732_v29 = vmov 0  ;;  %v14210_v38 = vld [vmem:[%s18604_s1 + $0x68] sm:$0xff]   ;;  %v14211_v58 = vld [vmem:[%s18604_s1 + $0x70] sm:$0xff]   ;;  %vm1387_vm3 = vcmask 1042432   ;;  %vm1388_vm4 = vcmask 1046532  }
  0x39   : > { %12775 = vmatprep.subr.bf16.mxu0 %v14206_v1  ;;  %v18733_v29 = vsel %vm14776_vm2, 4294967295, %v18732_v29  ;;  %vm15106_vm5 = vmor %vm1387_vm3, %vm1388_vm4  ;;  %vm5686_vm6 = vcmask 1043456   ;;  %vm5687_vm7 = vsmask.f32 7938  ;;  %vm5362_vm8 = vsmask.f32 256 }
  0x3a   : > { %s14149_s13 = smul.u32 216, %s288_s18  ;;  %18734 = vst [vmem:[#allocation9_spill] sm:$0xff] %v18733_v29  ;;  %vm5363_vm9 = vsmask.f32 4368  ;;  %vm5693_vm10 = vcmask 1040384   ;;  %vm16651_vm11 = vmand %vm5686_vm6, %vm5687_vm7  ;;  %s284_s20 = sand.u32 1, %s14587_s25  }
  0x3b   : > { %vm16658_vm12 = vmor %vm5362_vm8, %vm5363_vm9  ;;  %p19037_p9 = scmp.ne.s32.totalorder %s18725_s11, 0  ;;  %s14601_s17 = smov [#allocation6]  }
  0x3c   : > { %s14741_s8 = scalar_lea.vmem %s18603_s0, %s14149_s13  ;;  %12776 = vmatpush3.bf16.msra.mxu0 %v14206_v1  ;;  %vm16664_vm13 = vmand %vm5693_vm10, %vm5362_vm8  ;;  %s11369_s13 = sshll.u32 %s284_s20, 8 }
  0x3d   : > { %12777 = vmatprep.subr.bf16.mxu0 %v14207_v2  ;;  %v14747_v4 = vld [vmem:[%s14741_s8] sm:$0xf]  ;;  %v14750_v5 = vld [vmem:[%s14741_s8 + $0x4] sm:$0xf]  ;;  %v341_v6 = vld [vmem:[%s14741_s8 + $0x8] sm:$0x1] }
  0x3e   : > { %v361_v7 = vshrl.u32 %v14747_v4, 16  ;;  %v364_v8 = vshll.u32 %v14747_v4, 16  ;;  %v370_v9 = vshll.u32 %v14750_v5, 16  ;;  %v374_v10 = vshrl.u32 %v14750_v5, 16  ;;  %v14758_v11 = vld [vmem:[%s14741_s8 + $0xc] sm:$0xf] }
  0x3f   : > { %v380_v13 = vshll.u32 %v341_v6, 16  ;;  %v14764_v14 = vld [vmem:[%s14741_s8 + $0x10] sm:$0xf]  ;;  %v342_v15 = vld [vmem:[%s14741_s8 + $0x14] sm:$0x1]  ;;  %v385_v21 = vshrl.u32 %v14758_v11, 16 }
  0x40   : > { %12778 = vmatpush3.bf16.msra.mxu0 %v14207_v2  ;;  %v363_v16 = vrot.slane %v361_v7, 4  ;;  %v366_v17 = vrot.slane %v364_v8, 5  ;;  %v372_v18 = vrot.slane %v370_v9, 5  ;;  %v376_v19 = vrot.slane %v374_v10, 4  ;;  %v14772_v28 = vld [vmem:[%s14741_s8 + $0x18] sm:$0xf] }
  0x41   : > { %12779 = vmatprep.subr.bf16.mxu0 %v14208_v3  ;;  %v382_v20 = vrot.slane %v380_v13, 5  ;;  %v388_v22 = vshll.u32 %v14758_v11, 16  ;;  %v394_v23 = vshll.u32 %v14764_v14, 16  ;;  %v398_v26 = vshrl.u32 %v14764_v14, 16  ;;  %v14781_v33 = vld [vmem:[%s14741_s8 + $0x1c] sm:$0xf] }
  0x42   : > { %v367_v24 = vor.u32 %v366_v17, %v363_v16  ;;  %v377_v25 = vor.u32 %v376_v19, %v372_v18  ;;  %v404_v27 = vshll.u32 %v342_v15, 16  ;;  %v387_v30 = vrot.slane %v385_v21, 4  ;;  %v343_v40 = vld [vmem:[%s14741_s8 + $0x20] sm:$0x1]  ;;  %v14796_v48 = vld [vmem:[%s14741_s8 + $0x24] sm:$0xf] }
  0x43   : > { %v390_v31 = vrot.slane %v388_v22, 5  ;;  %v396_v32 = vrot.slane %v394_v23, 5  ;;  %v400_v36 = vrot.slane %v398_v26, 4  ;;  %v409_v41 = vshrl.u32 %v14772_v28, 16  ;;  %v14799_v49 = vld [vmem:[%s14741_s8 + $0x28] sm:$0xf] }
  0x44   : > { %12780 = vmatpush3.bf16.msra.mxu0 %v14208_v3  ;;  %v368_v34 = vrot.slane %v367_v24, 4  ;;  %v378_v35 = vrot.slane %v377_v25, 4  ;;  %v406_v37 = vrot.slane %v404_v27, 5  ;;  %v412_v42 = vshll.u32 %v14772_v28, 16  ;;  %v14807_v61 = vld [vmem:[%s14741_s8 + $0x2c] sm:$0x1] }
  0x45   : > { %12781 = vmatprep.subr.bf16.mxu0 %v14209_v12  ;;  %v391_v39 = vor.u32 %v390_v31, %v387_v30  ;;  %v418_v43 = vshll.u32 %v14781_v33, 16  ;;  %v401_v46 = vor.u32 %v400_v36, %v396_v32  ;;  %v422_v47 = vshrl.u32 %v14781_v33, 16  ;;  %v14815_v6 = vld [vmem:[%s14741_s8 + $0x30] sm:$0xf]  ;;  %v14212_v7 = vld [vmem:[%s18604_s1 + $0x78] sm:$0xff]   ;;  %s18357_s15 = scalar_lea.vmem [#allocation6], %s11369_s13 }
  0x46   : > { %v373_v44 = vsel %vm14776_vm2, %v368_v34, %v372_v18  ;;  %v383_v45 = vsel %vm14776_vm2, %v378_v35, %v382_v20  ;;  %v411_v52 = vrot.slane %v409_v41, 4  ;;  %v414_v53 = vrot.slane %v412_v42, 5  ;;  %v14823_v13 = vld [vmem:[%s14741_s8 + $0x34] sm:$0xf]  ;;  %v14828_v19 = vld [vmem:[%s14741_s8 + $0x38] sm:$0x1] }
  0x47   : > { %v11387_v50 = vcombine.low %v373_v44, %v383_v45  ;;  %v392_v51 = vrot.slane %v391_v39, 4  ;;  %v402_v54 = vrot.slane %v401_v46, 4  ;;  %v420_v55 = vrot.slane %v418_v43, 5  ;;  %v14838_v30 = vld [vmem:[%s14741_s8 + $0x3c] sm:$0xf]  ;;  %v14213_v41 = vld [vmem:[%s18604_s1] sm:$0xff]  }
  0x48   : > { %12782 = vmatpush3.bf16.msra.mxu0 %v14209_v12  ;;  %v424_v56 = vrot.slane %v422_v47, 4  ;;  %v428_v57 = vshll.u32 %v343_v40, 16  ;;  %v415_v60 = vor.u32 %v414_v53, %v411_v52  ;;  %v433_v62 = vshrl.u32 %v14796_v48, 16  ;;  %v14841_v36 = vld [vmem:[%s14741_s8 + $0x40] sm:$0xf]  ;;  %s11289_s22 = sshll.u32 %s18357_s15, 4  ;;  %s18555_s22 = int_to_ptr.vmem [resolvable:$true] %s11289_s22 }
  0x49   : > { %12783 = vmatprep.subr.bf16.mxu0 %v14210_v38  ;;  %12789 = vmatprep.mubr.bf16.mxu0 %v11387_v50  ;;  %v397_v59 = vsel %vm14776_vm2, %v392_v51, %v396_v32  ;;  %v436_v63 = vshll.u32 %v14796_v48, 16  ;;  %v407_v0 = vsel %vm14776_vm2, %v402_v54, %v406_v37  ;;  %v442_v3 = vshll.u32 %v14799_v49, 16  ;;  %v14851_v44 = vld [vmem:[%s14741_s8 + $0x44] sm:$0x1]  ;;  %v14857_v53 = vld [vmem:[%s14741_s8 + $0x48] sm:$0xf] }
  0x4a   : > { %v425_v1 = vor.u32 %v424_v56, %v420_v55  ;;  %v430_v2 = vrot.slane %v428_v57, 5  ;;  %v14820_v8 = vcombine.low %v397_v59, %v407_v0  ;;  %v416_v9 = vrot.slane %v415_v60, 4  ;;  %s14529_s14 = scalar_lea.vmem %s18555_s22, 4096  ;;  %s14533_s18 = sshll.u32 %s14601_s17, 4  ;;  %s14534_s18 = int_to_ptr.vmem [resolvable:$false] %s14533_s18 }
  0x4b   : > { %v435_v10 = vrot.slane %v433_v62, 4  ;;  %v438_v12 = vrot.slane %v436_v63, 5  ;;  %v444_v16 = vrot.slane %v442_v3, 5  ;;  %v446_v17 = vshrl.u32 %v14799_v49, 16  ;;  %v14864_v63 = vld [vmem:[%s14741_s8 + $0x4c] sm:$0xf]  ;;  %p14530_p6 = scmp.ne.s32.totalorder %s18555_s22, %s14529_s14  ;;  %p14536_p2 = scmp.lt.s32.totalorder %s18555_s22, %s14534_s18 }
  0x4c   : > { %12784 = vmatpush3.bf16.msra.mxu0 %v14210_v38  ;;  %v426_v15 = vrot.slane %v425_v1, 4  ;;  %v452_v18 = vshll.u32 %v14807_v61, 16  ;;  %v421_v20 = vsel %vm14776_vm2, %v416_v9, %v420_v55  ;;  %v457_v22 = vshrl.u32 %v14815_v6, 16  ;;  %v14214_v1 = vld [vmem:[%s18604_s1 + $0x8] sm:$0xff]   ;;  %v14872_v9 = vld [vmem:[%s14741_s8 + $0x50] sm:$0x1] }
  0x4d   : > { %12785 = vmatprep.subr.bf16.mxu0 %v14211_v58  ;;  %v439_v21 = vor.u32 %v438_v12, %v435_v10  ;;  %v460_v23 = vshll.u32 %v14815_v6, 16  ;;  %v448_v25 = vrot.slane %v446_v17, 4  ;;  %v466_v27 = vshll.u32 %v14823_v13, 16  ;;  %p14531_p10 = pnand %p14530_p6, %p19037_p9  ;;  %s14535_s19 = scalar_lea.vmem %s14534_s18, 8192 }
  0x4e   : > { %v431_v24 = vsel %vm14776_vm2, %v426_v15, %v430_v2  ;;  %v454_v26 = vrot.slane %v452_v18, 5  ;;  %v459_v34 = vrot.slane %v457_v22, 4  ;;  %v470_v39 = vshrl.u32 %v14823_v13, 16  ;;  %v14880_v22 = vld [vmem:[%s14741_s8 + $0x54] sm:$0xf]  ;;  %p14537_p3 = scmp.lt.s32.totalorder %s14535_s19, %s14529_s14 }
  0x4f   : > { %v11389_v31 = vcombine.low %v421_v20, %v431_v24  ;;  %v440_v32 = vrot.slane %v439_v21, 4  ;;  %v462_v35 = vrot.slane %v460_v23, 5  ;;  %v449_v37 = vor.u32 %v448_v25, %v444_v16  ;;  %v14215_v24 = vld [vmem:[%s18604_s1 + $0x10] sm:$0xff]   ;;  %p14532_p12 = pneg %p14531_p10 }
  0x50   : > { %12786 = vmatpush3.bf16.msra.mxu0 %v14211_v58  ;;  %v468_v38 = vrot.slane %v466_v27, 5  ;;  %v476_v40 = vshll.u32 %v14828_v19, 16  ;;  %v481_v45 = vshrl.u32 %v14838_v30, 16  ;;  %v484_v46 = vshll.u32 %v14838_v30, 16  ;;  %v14889_v27 = vld [vmem:[%s14741_s8 + $0x58] sm:$0xf]  ;;  %p14538_p4 = por %p14537_p3, %p14536_p2 }
  0x51   : > { %12787 = vmatprep.subr.bf16.mxu0 %v14212_v7  ;;  %v445_v42 = vsel %vm14776_vm2, %v440_v32, %v444_v16  ;;  %v463_v43 = vor.u32 %v462_v35, %v459_v34  ;;  %v450_v47 = vrot.slane %v449_v37, 4  ;;  %v472_v50 = vrot.slane %v470_v39, 4 }
  0x52   : > { %v478_v51 = vrot.slane %v476_v40, 5  ;;  %v490_v52 = vshll.u32 %v14841_v36, 16  ;;  %v483_v55 = vrot.slane %v481_v45, 4  ;;  %v486_v56 = vrot.slane %v484_v46, 5  ;;  %v14894_v40 = vld [vmem:[%s14741_s8 + $0x5c] sm:$0x1]  ;;  %p14539_p7 = pnand %p14538_p4, %p14532_p12 }
  0x53   : > { %v464_v54 = vrot.slane %v463_v43, 4  ;;  %v494_v57 = vshrl.u32 %v14841_v36, 16  ;;  %v455_v58 = vsel %vm14776_vm2, %v450_v47, %v454_v26  ;;  %v473_v59 = vor.u32 %v472_v50, %v468_v38  ;;  %v14903_v47 = vld [vmem:[%s14741_s8 + $0x60] sm:$0xf] }
  0x54   : > { %12788 = vmatpush3.bf16.msra.mxu0 %v14212_v7  ;;  %v492_v60 = vrot.slane %v490_v52, 5  ;;  %v500_v62 = vshll.u32 %v14851_v44, 16  ;;  %v11390_v0 = vcombine.low %v445_v42, %v455_v58  ;;  %v487_v3 = vor.u32 %v486_v56, %v483_v55  ;;  %v14216_v55 = vld [vmem:[%s18604_s1 + $0x18] sm:$0xff]   ;;  %v14909_v56 = vld [vmem:[%s14741_s8 + $0x64] sm:$0xf] }
  0x55   : > { %12821 = vmatprep.subr.bf16.mxu0 %v14213_v41  ;;  %v469_v2 = vsel %vm14776_vm2, %v464_v54, %v468_v38  ;;  %v496_v7 = vrot.slane %v494_v57, 4  ;;  %v474_v10 = vrot.slane %v473_v59, 4  ;;  %v505_v15 = vshrl.u32 %v14857_v53, 16 }
  0x56   : > { %v502_v12 = vrot.slane %v500_v62, 5  ;;  %v508_v16 = vshll.u32 %v14857_v53, 16  ;;  %v488_v17 = vrot.slane %v487_v3, 4  ;;  %v514_v20 = vshll.u32 %v14864_v63, 16  ;;  %v14913_v62 = vld [vmem:[%s14741_s8 + $0x68] sm:$0x1] }
  0x57   : > { %12790 = vmatmul.mubr.bf16.vlgmr.msra.gmra.mrb[0].mxu0 %v14820_v8  ;;  %v497_v18 = vor.u32 %v496_v7, %v492_v60  ;;  %v518_v21 = vshrl.u32 %v14864_v63, 16  ;;  %v479_v23 = vsel %vm14776_vm2, %v474_v10, %v478_v51  ;;  %v507_v25 = vrot.slane %v505_v15, 4  ;;  %18735 = vst [vmem:[#allocation10_spill] sm:$0xff] %v14913_v62  ;;  %v14920_v10 = vld [vmem:[%s14741_s8 + $0x6c] sm:$0xf] }
  0x58   : > { %12822 = vmatpush3.bf16.msra.mxu0 %v14213_v41  ;;  %12793 = vmatprep.mubr.bf16.mxu0 %v11389_v31  ;;  %v510_v8 = vrot.slane %v508_v16, 5  ;;  %v524_v26 = vshll.u32 %v14872_v9, 16  ;;  %v11391_v32 = vcombine.low %v469_v2, %v479_v23  ;;  %v493_v34 = vsel %vm14776_vm2, %v488_v17, %v492_v60 }
  0x59   : > { %12823 = vmatprep.subr.bf16.mxu0 %v14214_v1  ;;  %v498_v31 = vrot.slane %v497_v18, 4  ;;  %v516_v35 = vrot.slane %v514_v20, 5  ;;  %v520_v38 = vrot.slane %v518_v21, 4  ;;  %v529_v41 = vshrl.u32 %v14880_v22, 16 }
  0x5a   : > { %v511_v37 = vor.u32 %v510_v8, %v507_v25  ;;  %v526_v39 = vrot.slane %v524_v26, 5  ;;  %v532_v43 = vshll.u32 %v14880_v22, 16  ;;  %v538_v45 = vshll.u32 %v14889_v27, 16  ;;  %v14927_v25 = vld [vmem:[%s14741_s8 + $0x70] sm:$0xf] }
  0x5b   : > { %v503_v42 = vsel %vm14776_vm2, %v498_v31, %v502_v12  ;;  %v542_v46 = vshrl.u32 %v14889_v27, 16  ;;  %v521_v52 = vor.u32 %v520_v38, %v516_v35  ;;  %v531_v54 = vrot.slane %v529_v41, 4  ;;  %v14939_v41 = vld [vmem:[%s14741_s8 + $0x74] sm:$0x1] }
  0x5c   : > { %12824 = vmatpush3.bf16.msra.mxu0 %v14214_v1  ;;  %v11392_v50 = vcombine.low %v493_v34, %v503_v42  ;;  %v512_v51 = vrot.slane %v511_v37, 4  ;;  %v534_v57 = vrot.slane %v532_v43, 5  ;;  %v540_v58 = vrot.slane %v538_v45, 5  ;;  %18736 = vst [vmem:[#allocation11_spill] sm:$0xff] %v14939_v41  ;;  %v14944_v45 = vld [vmem:[%s14741_s8 + $0x78] sm:$0xf] }
  0x5d   : > { %12825 = vmatprep.subr.bf16.mxu0 %v14215_v24  ;;  %v544_v59 = vrot.slane %v542_v46, 4  ;;  %v548_v60 = vshll.u32 %v14894_v40, 16  ;;  %v522_v2 = vrot.slane %v521_v52, 4  ;;  %v553_v3 = vshrl.u32 %v14903_v47, 16  ;;  %v14218_v46 = vld [vmem:[%s18604_s1 + $0x28] sm:$0xff]  }
  0x5e   : > { %v517_v1 = vsel %vm14776_vm2, %v512_v51, %v516_v35  ;;  %v556_v7 = vshll.u32 %v14903_v47, 16  ;;  %v535_v12 = vor.u32 %v534_v57, %v531_v54  ;;  %v562_v17 = vshll.u32 %v14909_v56, 16 }
  0x5f   : > { %12794 = vmatmul.mubr.bf16.gmra.mrb[4].mxu0 %v11390_v0  ;;  %v545_v15 = vor.u32 %v544_v59, %v540_v58  ;;  %v550_v16 = vrot.slane %v548_v60, 5  ;;  %v527_v18 = vsel %vm14776_vm2, %v522_v2, %v526_v39  ;;  %v555_v20 = vrot.slane %v553_v3, 4 }
  0x60   : > { %12797 = vmatprep.mubr.bf16.mxu0 %v11391_v32  ;;  %12826 = vmatpush3.bf16.msra.mxu0 %v14215_v24  ;;  %v558_v21 = vrot.slane %v556_v7, 5  ;;  %v566_v23 = vshrl.u32 %v14909_v56, 16  ;;  %v11393_v8 = vcombine.low %v517_v1, %v527_v18  ;;  %v536_v0 = vrot.slane %v535_v12, 4  ;;  %v14217_v24 = vld [vmem:[%s18604_s1 + $0x20] sm:$0xff]  }
  0x61   : > { %v546_v26 = vrot.slane %v545_v15, 4  ;;  %12827 = vmatprep.subr.bf16.mxu0 %v14216_v55  ;;  %v564_v34 = vrot.slane %v562_v17, 5  ;;  %v572_v35 = vshll.u32 %v14913_v62, 16  ;;  %v577_v37 = vshrl.u32 %v14920_v10, 16  ;;  %v14957_v15 = vld [vmem:[%s14741_s8 + $0x80] sm:$0x1] }
  0x62   : > { %v559_v32 = vor.u32 %v558_v21, %v555_v20  ;;  %v568_v31 = vrot.slane %v566_v23, 4  ;;  %v541_v38 = vsel %vm14776_vm2, %v536_v0, %v540_v58  ;;  %v580_v42 = vshll.u32 %v14920_v10, 16  ;;  %v14950_v58 = vld [vmem:[%s14741_s8 + $0x7c] sm:$0xf]  ;;  %18737 = vst [vmem:[#allocation12_spill] sm:$0xff] %v14957_v15 }
  0x63   : > { %v551_v39 = vsel %vm14776_vm2, %v546_v26, %v550_v16  ;;  %v586_v43 = vshll.u32 %v14927_v25, 16  ;;  %v574_v57 = vrot.slane %v572_v35, 5  ;;  %v579_v59 = vrot.slane %v577_v37, 4  ;;  %v14963_v21 = vld [vmem:[%s14741_s8 + $0x84] sm:$0xf] }
  0x64   : > { %v11394_v51 = vcombine.low %v541_v38, %v551_v39  ;;  %12828 = vmatpush3.bf16.msra.mxu0 %v14216_v55  ;;  %v560_v52 = vrot.slane %v559_v32, 4  ;;  %v569_v54 = vor.u32 %v568_v31, %v564_v34  ;;  %v582_v60 = vrot.slane %v580_v42, 5  ;;  %v14972_v38 = vld [vmem:[%s14741_s8 + $0x88] sm:$0xf] }
  0x65   : > { %v588_v1 = vrot.slane %v586_v43, 5  ;;  %v590_v2 = vshrl.u32 %v14927_v25, 16  ;;  %12829 = vmatprep.subr.bf16.mxu0 %v14217_v24  ;;  %v596_v12 = vshll.u32 %v14939_v41, 16  ;;  %v601_v55 = vshrl.u32 %v14944_v45, 16 }
  0x66   : > { %v565_v3 = vsel %vm14776_vm2, %v560_v52, %v564_v34  ;;  %v570_v7 = vrot.slane %v569_v54, 4  ;;  %v583_v16 = vor.u32 %v582_v60, %v579_v59  ;;  %v604_v18 = vshll.u32 %v14944_v45, 16  ;;  %v14219_v34 = vld [vmem:[%s18604_s1 + $0x30] sm:$0xff]  }
  0x67   : > { %12798 = vmatmul.mubr.bf16.gmra.mrb[8].mxu0 %v11392_v50  ;;  %v592_v17 = vrot.slane %v590_v2, 4  ;;  %v610_v20 = vshll.u32 %v14950_v58, 16  ;;  %v598_v0 = vrot.slane %v596_v12, 5  ;;  %v603_v26 = vrot.slane %v601_v55, 4  ;;  %v14980_v52 = vld [vmem:[%s14741_s8 + $0x90] sm:$0xf] }
  0x68   : > { %12801 = vmatprep.mubr.bf16.mxu0 %v11393_v8  ;;  %v575_v23 = vsel %vm14776_vm2, %v570_v7, %v574_v57  ;;  %12830 = vmatpush3.bf16.msra.mxu0 %v14217_v24  ;;  %v614_v50 = vshrl.u32 %v14950_v58, 16  ;;  %v584_v31 = vrot.slane %v583_v16, 4  ;;  %v606_v37 = vrot.slane %v604_v18, 5  ;;  %v14975_v8 = vld [vmem:[%s14741_s8 + $0x8c] sm:$0x1] }
  0x69   : > { %v11395_v32 = vcombine.low %v565_v3, %v575_v23  ;;  %v593_v35 = vor.u32 %v592_v17, %v588_v1  ;;  %18738 = vst [vmem:[#allocation13_spill] sm:$0xff] %v14975_v8  ;;  %12831 = vmatprep.subr.bf16.mxu0 %v14218_v46  ;;  %v612_v39 = vrot.slane %v610_v20, 5  ;;  %v620_v24 = vshll.u32 %v14957_v15, 16  ;;  %v14986_v2 = vld [vmem:[%s14741_s8 + $0x94] sm:$0xf]  ;;  %v14220_v23 = vld [vmem:[%s18604_s1 + $0x38] sm:$0xff]  }
  0x6a   : > { %v616_v42 = vrot.slane %v614_v50, 4  ;;  %v625_v43 = vshrl.u32 %v14963_v21, 16  ;;  %v589_v54 = vsel %vm14776_vm2, %v584_v31, %v588_v1  ;;  %v607_v59 = vor.u32 %v606_v37, %v603_v26  ;;  %v14993_v20 = vld [vmem:[%s14741_s8 + $0x98] sm:$0x1] }
  0x6b   : > { %v594_v57 = vrot.slane %v593_v35, 4  ;;  %v628_v60 = vshll.u32 %v14963_v21, 16  ;;  %v622_v7 = vrot.slane %v620_v24, 5  ;;  %v634_v55 = vshll.u32 %v14972_v38, 16  ;;  %18739 = vst [vmem:[#allocation14_spill] sm:$0xff] %v14993_v20 }
  0x6c   : > { %v617_v3 = vor.u32 %v616_v42, %v612_v39  ;;  %v627_v12 = vrot.slane %v625_v43, 4  ;;  %12832 = vmatpush3.bf16.msra.mxu0 %v14218_v46  ;;  %v608_v17 = vrot.slane %v607_v59, 4  ;;  %v638_v1 = vshrl.u32 %v14972_v38, 16  ;;  %v15000_v35 = vld [vmem:[%s14741_s8 + $0x9c] sm:$0xf] }
  0x6d   : > { %v599_v16 = vsel %vm14776_vm2, %v594_v57, %v598_v0  ;;  %v630_v18 = vrot.slane %v628_v60, 5  ;;  %12833 = vmatprep.subr.bf16.mxu0 %v14219_v34  ;;  %v636_v31 = vrot.slane %v634_v55, 5  ;;  %v644_v46 = vshll.u32 %v14975_v8, 16  ;;  %v15006_v43 = vld [vmem:[%s14741_s8 + $0xa0] sm:$0xf] }
  0x6e   : > { %v11396_v26 = vcombine.low %v589_v54, %v599_v16  ;;  %v618_v50 = vrot.slane %v617_v3, 4  ;;  %v613_v0 = vsel %vm14776_vm2, %v608_v17, %v612_v39  ;;  %v640_v42 = vrot.slane %v638_v1, 4  ;;  %v15015_v39 = vld [vmem:[%s18604_s1 + $0x80] sm:$0xff]  }
  0x6f   : > { %12802 = vmatmul.mubr.bf16.gmra.mrb[12].mxu0 %v11394_v51  ;;  %v631_v37 = vor.u32 %v630_v18, %v627_v12  ;;  %v649_v24 = vshrl.u32 %v14980_v52, 16  ;;  %v646_v57 = vrot.slane %v644_v46, 5  ;;  %v652_v59 = vshll.u32 %v14980_v52, 16  ;;  %18740 = vst [vmem:[#allocation15_spill] sm:$0xff] %v15015_v39  ;;  %v15020_v18 = vld [vmem:[%s14741_s8 + $0xa4] sm:$0x1] }
  0x70   : > { %12805 = vmatprep.mubr.bf16.mxu0 %v11395_v32  ;;  %v623_v54 = vsel %vm14776_vm2, %v618_v50, %v622_v7  ;;  %v658_v51 = vshll.u32 %v14986_v2, 16  ;;  %12834 = vmatpush3.bf16.msra.mxu0 %v14219_v34  ;;  %v641_v32 = vor.u32 %v640_v42, %v636_v31  ;;  %v662_v16 = vshrl.u32 %v14986_v2, 16  ;;  %18741 = vst [vmem:[#allocation16_spill] sm:$0xff] %v15020_v18  ;;  %v15023_v34 = vld [vmem:[%s14741_s8 + $0xa8] sm:$0xf] }
  0x71   : > { %v11397_v60 = vcombine.low %v613_v0, %v623_v54  ;;  %v632_v3 = vrot.slane %v631_v37, 4  ;;  %v651_v12 = vrot.slane %v649_v24, 4  ;;  %12835 = vmatprep.subr.bf16.mxu0 %v14220_v23  ;;  %v654_v55 = vrot.slane %v652_v59, 5  ;;  %v15030_v37 = vld [vmem:[%s14741_s8 + $0xac] sm:$0xf] }
  0x72   : > { %v660_v7 = vrot.slane %v658_v51, 5  ;;  %v668_v17 = vshll.u32 %v14993_v20, 16  ;;  %v642_v50 = vrot.slane %v641_v32, 4  ;;  %v673_v46 = vshrl.u32 %v15000_v35, 16 }
  0x73   : > { %v637_v1 = vsel %vm14776_vm2, %v632_v3, %v636_v31  ;;  %v676_v0 = vshll.u32 %v15000_v35, 16  ;;  %v655_v42 = vor.u32 %v654_v55, %v651_v12  ;;  %v664_v24 = vrot.slane %v662_v16, 4  ;;  %v15038_v12 = vld [vmem:[%s14741_s8 + $0xb0] sm:$0x1] }
  0x74   : > { %v670_v54 = vrot.slane %v668_v17, 5  ;;  %v682_v59 = vshll.u32 %v15006_v43, 16  ;;  %12836 = vmatpush3.bf16.msra.mxu0 %v14220_v23  ;;  %v647_v51 = vsel %vm14776_vm2, %v642_v50, %v646_v57  ;;  %v675_v20 = vrot.slane %v673_v46, 4  ;;  %18742 = vst [vmem:[#allocation17_spill] sm:$0xff] %v15038_v12 }
  0x75   : > { %v678_v8 = vrot.slane %v676_v0, 5  ;;  %v686_v31 = vshrl.u32 %v15006_v43, 16  ;;  %12869 = vmatprep.subr.bf16.mxu0 %v15015_v39  ;;  %v11398_v3 = vcombine.low %v637_v1, %v647_v51  ;;  %v656_v32 = vrot.slane %v655_v42, 4 }
  0x76   : > { %v665_v15 = vor.u32 %v664_v24, %v660_v7  ;;  %v684_v41 = vrot.slane %v682_v59, 5  ;;  %v692_v23 = vshll.u32 %v15020_v18, 16  ;;  %v697_v57 = vshrl.u32 %v15023_v34, 16 }
  0x77   : > { %12806 = vmatmul.mubr.bf16.gmra.mrb[16].mxu0 %v11396_v26  ;;  %v679_v55 = vor.u32 %v678_v8, %v675_v20  ;;  %v688_v16 = vrot.slane %v686_v31, 4  ;;  %v661_v17 = vsel %vm14776_vm2, %v656_v32, %v660_v7  ;;  %v700_v1 = vshll.u32 %v15023_v34, 16  ;;  %v15047_v20 = vld [vmem:[%s14741_s8 + $0xb4] sm:$0xf]  ;;  %v15053_v7 = vld [vmem:[%s14741_s8 + $0xb8] sm:$0xf] }
  0x78   : > { %12809 = vmatprep.mubr.bf16.mxu0 %v11397_v60  ;;  %v666_v50 = vrot.slane %v665_v15, 4  ;;  %v706_v46 = vshll.u32 %v15030_v37, 16  ;;  %v694_v26 = vrot.slane %v692_v23, 5  ;;  %v699_v8 = vrot.slane %v697_v57, 4  ;;  %v15059_v57 = vld [vmem:[%s14741_s8 + $0xbc] sm:$0x1] }
  0x79   : > { %v680_v0 = vrot.slane %v679_v55, 4  ;;  %v689_v42 = vor.u32 %v688_v16, %v684_v41  ;;  %v702_v59 = vrot.slane %v700_v1, 5  ;;  %v710_v51 = vshrl.u32 %v15030_v37, 16  ;;  %v18753_v29 = vld [vmem:[#allocation16_spill] sm:$0xff] }
  0x7a   : > { %v671_v24 = vsel %vm14776_vm2, %v666_v50, %v670_v54  ;;  %v708_v60 = vrot.slane %v706_v46, 5  ;;  %v716_v55 = vshll.u32 %v15038_v12, 16  ;;  %v721_v18 = vshrl.u32 %v15047_v20, 16 }
  0x7b   : > { %v11399_v15 = vcombine.low %v661_v17, %v671_v24  ;;  %v685_v31 = vsel %vm14776_vm2, %v680_v0, %v684_v41  ;;  %v690_v32 = vrot.slane %v689_v42, 4  ;;  %v703_v16 = vor.u32 %v702_v59, %v699_v8 }
  0x7c   : > { %v712_v23 = vrot.slane %v710_v51, 4  ;;  %v724_v54 = vshll.u32 %v15047_v20, 16  ;;  %v718_v1 = vrot.slane %v716_v55, 5  ;;  %v730_v17 = vshll.u32 %v15053_v7, 16 }
  0x7d   : > { %v695_v50 = vsel %vm14776_vm2, %v690_v32, %v694_v26  ;;  %v734_v46 = vshrl.u32 %v15053_v7, 16  ;;  %v704_v41 = vrot.slane %v703_v16, 4  ;;  %v723_v42 = vrot.slane %v721_v18, 4  ;;  %v1354_v16 = vld [vmem:[%s14741_s8 + $0xb4] sm:$0xe] }
  0x7e   : > { %v713_v0 = vor.u32 %v712_v23, %v708_v60  ;;  %v726_v8 = vrot.slane %v724_v54, 5  ;;  %v732_v24 = vrot.slane %v730_v17, 5  ;;  %v740_v51 = vshll.u32 %v15059_v57, 16  ;;  %v1351_v17 = vld [vmem:[%s14741_s8 + $0x90] sm:$0xe] }
  0x7f   : > { %12810 = vmatmul.mubr.bf16.gmra.mrb[20].mxu0 %v11398_v3  ;;  %v736_v59 = vrot.slane %v734_v46, 4  ;;  %v11400_v12 = vcombine.low %v685_v31, %v695_v50  ;;  %v709_v39 = vsel %vm14776_vm2, %v704_v41, %v708_v60  ;;  %v11413_v41 = vcombine.low %v14772_v28, %v14781_v33  ;;  %v18746_v46 = vld [vmem:[#allocation11_spill] sm:$0xff]  ;;  %v18747_v50 = vld [vmem:[#allocation12_spill] sm:$0xff] }
  0x80   : > { %12813 = vmatprep.mubr.bf16.mxu0 %v11399_v15  ;;  %v714_v26 = vrot.slane %v713_v0, 4  ;;  %v727_v32 = vor.u32 %v726_v8, %v723_v42  ;;  %v742_v62 = vrot.slane %v740_v51, 5  ;;  %v1344_v42 = vld [vmem:[%s14741_s8 + $0x3c] sm:$0xe]  ;;  %v1430_v28 = vrot.slane %v14851_v44, 5  ;;  %v18748_v15 = vld [vmem:[#allocation15_spill] sm:$0xff] }
  0x81   : > { %v737_v55 = vor.u32 %v736_v59, %v732_v24  ;;  %v1342_v59 = vld [vmem:[%s14741_s8 + $0x24] sm:$0xe]  ;;  %v1441_v44 = vrot.slane %v14889_v27, 5  ;;  %v1465_v60 = vrot.slane %v18747_v50, 5  ;;  %v11447_v3 = vrot.slane %v1351_v17, 9 }
  0x82   : > { %v719_v18 = vsel %vm14776_vm2, %v714_v26, %v718_v1  ;;  %v728_v23 = vrot.slane %v727_v32, 4  ;;  %v11438_v32 = vrot.slane %v1342_v59, 9  ;;  %v1346_v59 = vld [vmem:[%s14741_s8 + $0x54] sm:$0xe]  ;;  %v1458_v1 = vrot.slane %v18746_v46, 5 }
  0x83   : > { %v11401_v31 = vcombine.low %v709_v39, %v719_v18  ;;  %v738_v54 = vrot.slane %v737_v55, 4  ;;  %v1413_v55 = vrot.slane %v14799_v49, 5  ;;  %v1343_v18 = vld [vmem:[%s14741_s8 + $0x30] sm:$0xe]  ;;  %v11412_v39 = vcombine.low %v14758_v11, %v14764_v14 }
  0x84   : > { %v733_v51 = vsel %vm14776_vm2, %v728_v23, %v732_v24  ;;  %v1416_v23 = vrot.slane %v14807_v61, 5  ;;  %v1462_v46 = vrot.slane %v14950_v58, 5 }
  0x85   : > { %v743_v26 = vsel %vm14776_vm2, %v738_v54, %v742_v62  ;;  %v1415_v24 = vrot.slane %v1413_v55, 4  ;;  %v11411_v62 = vcombine.low %v14747_v4, %v14750_v5  ;;  %v11439_v54 = vrot.slane %v1343_v18, 9  ;;  %v1348_v18 = vld [vmem:[%s14741_s8 + $0x6c] sm:$0xe] }
  0x86   : > { %v11402_v8 = vcombine.low %v733_v51, %v743_v26  ;;  %v1420_v26 = vrot.slane %v14823_v13, 5  ;;  %v1423_v4 = vrot.slane %v14828_v19, 5  ;;  %v11440_v5 = vrot.slane %v1344_v42, 9 }
  0x87   : > { %12814 = vmatmul.mubr.bf16.gmra.mrb[24].mxu0 %v11400_v12  ;;  %v1345_v12 = vld [vmem:[%s14741_s8 + $0x48] sm:$0xe]  ;;  %v15125_v51 = vsel %vm15106_vm5, %v1415_v24, %v1416_v23  ;;  %v1434_v42 = vrot.slane %v14864_v63, 5  ;;  %v11444_v61 = vrot.slane %v1348_v18, 9 }
  0x88   : > { %12817 = vmatprep.mubr.bf16.mxu0 %v11401_v31  ;;  %v15113_v31 = vsel %vm15106_vm5, %v11438_v32, %v1413_v55  ;;  %v1427_v32 = vrot.slane %v14841_v36, 5  ;;  %v1347_v55 = vld [vmem:[%s14741_s8 + $0x60] sm:$0xe]  ;;  %v15135_v11 = vsel %vm15106_vm5, %v11439_v54, %v1420_v26  ;;  %v1422_v14 = vrot.slane %v1420_v26, 4  ;;  %v1350_v26 = vld [vmem:[%s14741_s8 + $0x84] sm:$0xe] }
  0x89   : > { %v11441_v33 = vrot.slane %v1345_v12, 9  ;;  %v11442_v54 = vrot.slane %v1346_v59, 9  ;;  %v1444_v12 = vrot.slane %v14894_v40, 5 }
  0x8a   : > { %v15141_v24 = vsel %vm15106_vm5, %v11440_v5, %v1427_v32  ;;  %v1429_v19 = vrot.slane %v1427_v32, 4  ;;  %v15147_v23 = vsel %vm15106_vm5, %v1422_v14, %v1423_v4  ;;  %v1436_v4 = vrot.slane %v1434_v42, 4 }
  0x8b   : > { %v15166_v40 = vsel %vm15106_vm5, %v11442_v54, %v1441_v44  ;;  %v1443_v32 = vrot.slane %v1441_v44, 4  ;;  %v11443_v14 = vrot.slane %v1347_v55, 9  ;;  %v1455_v44 = vrot.slane %v14927_v25, 5  ;;  %v1352_v54 = vld [vmem:[%s14741_s8 + $0x9c] sm:$0xe] }
  0x8c   : > { %v15156_v5 = vsel %vm15106_vm5, %v1429_v19, %v1430_v28  ;;  %v14226_v28 = vld [vmem:[%s18604_s1 + $0x88] sm:$0xff]   ;;  %v1448_v19 = vrot.slane %v14909_v56, 5 }
  0x8d   : > { %v15182_v55 = vsel %vm15106_vm5, %v1443_v32, %v1444_v12  ;;  %v15196_v12 = vsel %vm15106_vm5, %v11444_v61, %v1455_v44  ;;  %v1457_v32 = vrot.slane %v1455_v44, 4  ;;  %v1353_v61 = vld [vmem:[%s14741_s8 + $0xa8] sm:$0xe]  ;;  %v14229_v44 = vld [vmem:[%s18604_s1 + $0x90] sm:$0xff]  }
  0x8e   : > { %v1450_v18 = vrot.slane %v1448_v19, 4 }
  0x8f   : > { %12818 = vmatmul.mubr.bf16.gmra.mrb[28].mxu0 %v11402_v8  ;;  %v1437_v8 = vrot.slane %v14872_v9, 5  ;;  %v15160_v9 = vsel %vm15106_vm5, %v11441_v33, %v1434_v42  ;;  %v18745_v42 = vld [vmem:[#allocation10_spill] sm:$0xff]  ;;  %v15215_v50 = vsel %vm15106_vm5, %v1457_v32, %v1458_v1  ;;  %v14232_v1 = vld [vmem:[%s18604_s1 + $0x98] sm:$0xff]  }
  0x90   : > { %12837 = vmatprep.mubr.bf16.mxu0 %v11411_v62  ;;  %v1349_v62 = vld [vmem:[%s14741_s8 + $0x78] sm:$0xe]  ;;  %v1451_v59 = vrot.slane %v18745_v42, 5  ;;  %18750 = vst [vmem:[#allocation10_spill] sm:$0xff] %v15215_v50  ;;  %v1486_v50 = vrot.slane %v18753_v29, 5  ;;  %v18755_v29 = vcombine.low %v14796_v48, %v14799_v49 }
  0x91   : > { %v15174_v33 = vsel %vm15106_vm5, %v1436_v4, %v1437_v8  ;;  %v15191_v4 = vsel %vm15106_vm5, %v11443_v14, %v1448_v19  ;;  %v11445_v42 = vrot.slane %v1349_v62, 9  ;;  %v11446_v62 = vrot.slane %v1350_v26, 9  ;;  %v18749_v19 = vld [vmem:[#allocation13_spill] sm:$0xff] }
  0x92   : > { %v15203_v14 = vsel %vm15106_vm5, %v1450_v18, %v1451_v59  ;;  %v1472_v8 = vrot.slane %v18749_v19, 5  ;;  %v1464_v26 = vrot.slane %v1462_v46, 4  ;;  %v11448_v59 = vrot.slane %v1352_v54, 9 }
  0x93   : > { %v11449_v54 = vrot.slane %v1353_v61, 9  ;;  %v1497_v61 = vrot.slane %v15053_v7, 5 }
  0x94   : > { %v15233_v32 = vsel %vm15106_vm5, %v1464_v26, %v1465_v60 }
  0x95   : > { %18751 = vst [vmem:[#allocation11_spill] sm:$0xff] %v15233_v32 }
  0x97   : > { %12838 = vmatmul.mubr.bf16.vlgmr.msra.gmra.mrb[0].mxu0 %v11412_v39  ;;  %v1469_v39 = vrot.slane %v14972_v38, 5 }
  0x98   : > { %12870 = vmatpush3.bf16.msra.mxu0 %v18748_v15  ;;  %12841 = vmatprep.mubr.bf16.mxu0 %v11413_v41  ;;  %v15219_v41 = vsel %vm15106_vm5, %v11445_v42, %v1462_v46  ;;  %v1476_v42 = vrot.slane %v14986_v2, 5  ;;  %v18752_v46 = vld [vmem:[#allocation14_spill] sm:$0xff] }
  0x99   : > { %12871 = vmatprep.subr.bf16.mxu0 %v14226_v28  ;;  %v15225_v18 = vsel %vm15106_vm5, %v11446_v62, %v1469_v39  ;;  %v1471_v19 = vrot.slane %v1469_v39, 4  ;;  %v1479_v15 = vrot.slane %v18752_v46, 5  ;;  %v1483_v39 = vrot.slane %v15006_v43, 5  ;;  %v18754_v62 = vld [vmem:[#allocation17_spill] sm:$0xff] }
  0x9a   : > { %v15249_v26 = vsel %vm15106_vm5, %v11447_v3, %v1476_v42  ;;  %v1493_v32 = vrot.slane %v18754_v62, 5  ;;  %v11450_v3 = vrot.slane %v1354_v16, 9 }
  0x9b   : > { %v15241_v17 = vsel %vm15106_vm5, %v1471_v19, %v1472_v8  ;;  %v15253_v46 = vsel %vm15106_vm5, %v11448_v59, %v1483_v39  ;;  %v1485_v8 = vrot.slane %v1483_v39, 4  ;;  %v1490_v19 = vrot.slane %v15030_v37, 5 }
  0x9c   : > { %12872 = vmatpush3.bf16.msra.mxu0 %v14226_v28  ;;  %v1478_v28 = vrot.slane %v1476_v42, 4  ;;  %v1500_v42 = vrot.slane %v15059_v57, 5  ;;  %v18756_v59 = vcombine.low %v14815_v6, %v14823_v13  ;;  %v14235_v57 = vld [vmem:[%s18604_s1 + $0xa0] sm:$0xff]   ;;  %v15286_v13 = vsel %vm15106_vm5, %v11450_v3, %v1497_v61 }
  0x9d   : > { %12873 = vmatprep.subr.bf16.mxu0 %v14229_v44  ;;  %v15273_v48 = vsel %vm15106_vm5, %v1485_v8, %v1486_v50  ;;  %v15277_v49 = vsel %vm15106_vm5, %v11449_v54, %v1490_v19  ;;  %v1492_v16 = vrot.slane %v1490_v19, 4  ;;  %v14238_v50 = vld [vmem:[%s18604_s1 + $0xa8] sm:$0xff]   ;;  %v18758_v8 = vcombine.low %v14857_v53, %v14864_v63  ;;  %v14241_v19 = vld [vmem:[%s18604_s1 + $0xb0] sm:$0xff]   ;;  %v14245_v53 = vld [vmem:[%s18604_s1 + $0xc0] sm:$0xff]  }
  0x9e   : > { %v15262_v60 = vsel %vm15106_vm5, %v1478_v28, %v1479_v15  ;;  %v11480_v6 = vcombine.low %v15253_v46, %v15273_v48  ;;  %v18761_v63 = vcombine.low %v14920_v10, %v14927_v25  ;;  %v18764_v10 = vcombine.low %v14980_v52, %v14986_v2 }
  0x9f   : > { %12842 = vmatmul.mubr.bf16.gmra.mrb[4].mxu0 %v18755_v29  ;;  %v11479_v62 = vcombine.low %v15249_v26, %v15262_v60  ;;  %v15290_v15 = vsel %vm15106_vm5, %v1492_v16, %v1493_v32  ;;  %v18757_v32 = vcombine.low %v14838_v30, %v14841_v36  ;;  %v18759_v30 = vcombine.low %v14880_v22, %v14889_v27  ;;  %v14445_v27 = vld [vmem:[%s14741_s8 + $0x4] sm:$0xf]  ;;  %v14446_v29 = vld [vmem:[%s14741_s8 + $0x8] sm:$0x1]  ;;  %v14447_v16 = vld [vmem:[%s14741_s8 + $0x10] sm:$0xf] }
  0xa0   : > { %12845 = vmatprep.mubr.bf16.mxu0 %v18756_v59  ;;  %12874 = vmatpush3.bf16.msra.mxu0 %v14229_v44  ;;  %v1499_v44 = vrot.slane %v1497_v61, 4  ;;  %v11481_v39 = vcombine.low %v15277_v49, %v15290_v15  ;;  %v18760_v36 = vcombine.low %v14903_v47, %v14909_v56  ;;  %v18762_v22 = vcombine.low %v14944_v45, %v14950_v58  ;;  %v1339_v56 = vld [vmem:[%s14741_s8] sm:$0xe]  ;;  %v1340_v58 = vld [vmem:[%s14741_s8 + $0xc] sm:$0xe] }
  0xa1   : > { %12875 = vmatprep.subr.bf16.mxu0 %v14232_v1  ;;  %v1392_v47 = vrot.slane %v14445_v27, 5  ;;  %v1395_v3 = vrot.slane %v14446_v29, 5  ;;  %v18763_v61 = vcombine.low %v14963_v21, %v14972_v38  ;;  %v11435_v25 = vrot.slane %v1339_v56, 9  ;;  %v14448_v21 = vld [vmem:[%s14741_s8 + $0x1c] sm:$0xf]  ;;  %v14253_v60 = vld [vmem:[%s14741_s8 + $0xc] sm:$0xff]  }
  0xa2   : > { %v15299_v28 = vsel %vm15106_vm5, %v1499_v44, %v1500_v42  ;;  %v18765_v45 = vcombine.low %v15000_v35, %v15006_v43  ;;  %v18766_v59 = vcombine.low %v15023_v34, %v15030_v37  ;;  %v1406_v38 = vrot.slane %v14448_v21, 5  ;;  %v1341_v44 = vld [vmem:[%s14741_s8 + $0x18] sm:$0xe]  ;;  %v14450_v37 = vld [vmem:[%s14741_s8 + $0x20] sm:$0x1] }
  0xa3   : > { %v11482_v54 = vcombine.low %v15286_v13, %v15299_v28  ;;  %v1394_v42 = vrot.slane %v1392_v47, 4  ;;  %v1393_v52 = vsel %vm15106_vm5, %v11435_v25, %v1392_v47  ;;  %v14248_v29 = vld [vmem:[%s18604_s1 + $0xd8] sm:$0xff]   ;;  %v11565_v49 = vld [vmem:[%s14741_s8 + $0x14] sm:$0x1]  ;;  %v14258_v13 = vld [vmem:[%s18604_s1 + $0x108] sm:$0xff]  }
  0xa4   : > { %12876 = vmatpush3.bf16.msra.mxu0 %v14232_v1  ;;  %v14244_v1 = vld [vmem:[%s18604_s1 + $0xb8] sm:$0xff]   ;;  %v1408_v34 = vrot.slane %v1406_v38, 4 }
  0xa5   : > { %12877 = vmatprep.subr.bf16.mxu0 %v14235_v57  ;;  %v1396_v2 = vsel %vm15106_vm5, %v1394_v42, %v1395_v3  ;;  %v18768_v3 = vcombine.low %v15113_v31, %v15125_v51  ;;  %v18770_v31 = vcombine.low %v15141_v24, %v15156_v5  ;;  %v18771_v51 = vcombine.low %v15160_v9, %v15174_v33  ;;  %v14255_v9 = vld [vmem:[%s18604_s1 + $0x100] sm:$0xff]  }
  0xa6   : > { %v11467_v43 = vcombine.low %v1393_v52, %v1396_v2  ;;  %v18772_v24 = vcombine.low %v15166_v40, %v15182_v55  ;;  %v18773_v5 = vcombine.low %v15191_v4, %v15203_v14  ;;  %v18774_v33 = vld [vmem:[#allocation10_spill] sm:$0xff]  ;;  %v18776_v40 = vld [vmem:[#allocation11_spill] sm:$0xff]  ;;  %v18778_v4 = vcombine.low %v15225_v18, %v15241_v17  ;;  %v11567_v18 = vld [vmem:[%s14741_s8 + $0x1c] sm:$0xf] }
  0xa7   : > { %12846 = vmatmul.mubr.bf16.gmra.mrb[8].mxu0 %v18757_v32  ;;  %v11436_v32 = vrot.slane %v1340_v58, 9  ;;  %v18775_v25 = vcombine.low %v15196_v12, %v18774_v33  ;;  %v18777_v55 = vcombine.low %v15219_v41, %v18776_v40  ;;  %v11563_v14 = vld [vmem:[%s14741_s8 + $0xc] sm:$0xf]  ;;  %v11564_v12 = vld [vmem:[%s14741_s8 + $0x10] sm:$0xf]  ;;  %v2293_v46 = vshll.u32 %v11567_v18, 16 }
  0xa8   : > { %12849 = vmatprep.mubr.bf16.mxu0 %v18758_v8  ;;  %12878 = vmatpush3.bf16.msra.mxu0 %v14235_v57  ;;  %v1399_v57 = vrot.slane %v14447_v16, 5  ;;  %v2260_v41 = vshrl.u32 %v11563_v14, 16  ;;  %v2263_v42 = vshll.u32 %v11563_v14, 16  ;;  %v2269_v17 = vshll.u32 %v11564_v12, 16  ;;  %v11568_v16 = vld [vmem:[%s14741_s8 + $0x20] sm:$0x1] }
  0xa9   : > { %12879 = vmatprep.subr.bf16.mxu0 %v14238_v50  ;;  %v2273_v58 = vshrl.u32 %v11564_v12, 16  ;;  %v2297_v48 = vshrl.u32 %v11567_v18, 16  ;;  %v14254_v52 = vld [vmem:[%s14741_s8 + $0x18] sm:$0xff]   ;;  %v15440_v2 = vrot.slane %v2293_v46, 5  ;;  %v2303_v28 = vshll.u32 %v11568_v16, 16  ;;  %v14270_v18 = vld [vmem:[%s18604_s1 + $0x128] sm:$0xff]  }
  0xaa   : > { %v1401_v8 = vrot.slane %v1399_v57, 4  ;;  %v2265_v15 = vrot.slane %v2263_v42, 5  ;;  %v11656_v33 = vld [vmem:[%s14741_s8 + $0x48] sm:$0xe]  ;;  %v14262_v12 = vld [vmem:[%s14741_s8 + $0x54] sm:$0xff]  }
  0xab   : > { %v11672_v14 = vrot.slane %v11656_v33, 9  ;;  %v11658_v16 = vld [vmem:[%s14741_s8 + $0x60] sm:$0xe]  ;;  %v15578_v33 = vld [vmem:[%s14741_s8 + $0x88] sm:$0xf] }
  0xac   : > { %12880 = vmatpush3.bf16.msra.mxu0 %v14238_v50  ;;  %v14449_v50 = vld [vmem:[%s14741_s8 + $0x14] sm:$0x1] }
  0xad   : > { %12881 = vmatprep.subr.bf16.mxu0 %v14241_v19  ;;  %v1402_v35 = vrot.slane %v14449_v50, 5  ;;  %v14256_v50 = vld [vmem:[%s14741_s8 + $0x24] sm:$0xff]  }
  0xaf   : > { %12850 = vmatmul.mubr.bf16.gmra.mrb[12].mxu0 %v18759_v30  ;;  %v18767_v30 = vcombine.low %v15047_v20, %v15053_v7  ;;  %v14246_v20 = vld [vmem:[%s18604_s1 + $0xc8] sm:$0xff]   ;;  %v14247_v7 = vld [vmem:[%s18604_s1 + $0xd0] sm:$0xff]  }
  0xb0   : > { %12853 = vmatprep.mubr.bf16.mxu0 %v18760_v36  ;;  %12882 = vmatpush3.bf16.msra.mxu0 %v14241_v19  ;;  %v11437_v19 = vrot.slane %v1341_v44, 9  ;;  %v1400_v36 = vsel %vm15106_vm5, %v11436_v32, %v1399_v57  ;;  %v2299_v44 = vrot.slane %v2297_v48, 4 }
  0xb1   : > { %12883 = vmatprep.subr.bf16.mxu0 %v14244_v1 }
  0xb4   : > { %12884 = vmatpush3.bf16.msra.mxu0 %v14244_v1  ;;  %v1409_v1 = vrot.slane %v14450_v37, 5  ;;  %v14261_v37 = vld [vmem:[%s18604_s1 + $0x110] sm:$0xff]  }
  0xb5   : > { %12917 = vmatprep.subr.bf16.mxu0 %v14245_v53 }
  0xb6   : > { %v1410_v27 = vsel %vm15106_vm5, %v1408_v34, %v1409_v1  ;;  %v2300_v34 = vor.u32 %v2299_v44, %v15440_v2  ;;  %v11674_v44 = vrot.slane %v11658_v16, 9  ;;  %v11662_v16 = vld [vmem:[%s14741_s8 + $0x90] sm:$0xe] }
  0xb7   : > { %12854 = vmatmul.mubr.bf16.gmra.mrb[16].mxu0 %v18761_v63  ;;  %v1403_v63 = vsel %vm15106_vm5, %v1401_v8, %v1402_v35  ;;  %v2279_v35 = vshll.u32 %v11565_v49, 16  ;;  %v15515_v49 = vld [vmem:[%s14741_s8 + $0x64] sm:$0xf] }
  0xb8   : > { %12857 = vmatprep.mubr.bf16.mxu0 %v18762_v22  ;;  %v1407_v22 = vsel %vm15106_vm5, %v11437_v19, %v1406_v38  ;;  %v11468_v47 = vcombine.low %v1400_v36, %v1403_v63  ;;  %v11569_v38 = vld [vmem:[%s14741_s8 + $0x24] sm:$0xf]  ;;  %v11570_v19 = vld [vmem:[%s14741_s8 + $0x28] sm:$0xf] }
  0xb9   : > { %v11469_v56 = vcombine.low %v1407_v22, %v1410_v27  ;;  %v15456_v36 = vrot.slane %v2279_v35, 5  ;;  %v14257_v22 = vld [vmem:[%s14741_s8 + $0x30] sm:$0xff]   ;;  %v15461_v27 = vrot.slane %v2300_v34, 4  ;;  %v15554_v34 = vld [vmem:[%s14741_s8 + $0x3c] sm:$0xf] }
  0xbf   : > { %12858 = vmatmul.mubr.bf16.gmra.mrb[20].mxu0 %v18763_v61  ;;  %v18769_v61 = vcombine.low %v15135_v11, %v15147_v23  ;;  %v14251_v11 = vld [vmem:[%s18604_s1 + $0xf0] sm:$0xff]   ;;  %v14252_v23 = vld [vmem:[%s18604_s1 + $0xf8] sm:$0xff]  }
  0xc0   : > { %12861 = vmatprep.mubr.bf16.mxu0 %v18764_v10  ;;  %v14250_v10 = vld [vmem:[%s18604_s1 + $0xe8] sm:$0xff]  }
  0xc7   : > { %12862 = vmatmul.mubr.bf16.gmra.mrb[24].mxu0 %v18765_v45  ;;  %v11566_v45 = vld [vmem:[%s14741_s8 + $0x18] sm:$0xf] }
  0xc8   : > { %12865 = vmatprep.mubr.bf16.mxu0 %v18766_v59  ;;  %v2284_v26 = vshrl.u32 %v11566_v45, 16  ;;  %v2275_v59 = vrot.slane %v2273_v58, 4 }
  0xca   : > { %v2286_v57 = vrot.slane %v2284_v26, 4 }
  0xcf   : > { %12866 = vmatmul.mubr.bf16.gmra.mrb[28].mxu0 %v18767_v30 }
  0xd0   : > { %12885 = vmatprep.mubr.bf16.mxu0 %v11467_v43 }
  0xd7   : > { %12886 = vmatmul.mubr.bf16.vlgmr.msra.gmra.mrb[0].mxu0 %v11468_v47  ;;  %v15463_v47 = vrot.slane %v2303_v28, 5  ;;  %v14276_v28 = vld [vmem:[%s18604_s1 + $0x138] sm:$0xff]  }
  0xd8   : > { %12918 = vmatpush3.bf16.msra.mxu0 %v14245_v53  ;;  %12889 = vmatprep.mubr.bf16.mxu0 %v11469_v56  ;;  %v14249_v53 = vld [vmem:[%s18604_s1 + $0xe0] sm:$0xff]   ;;  %v2311_v56 = vshll.u32 %v11569_v38, 16 }
  0xd9   : > { %12919 = vmatprep.subr.bf16.mxu0 %v14246_v20 }
  0xdc   : > { %12920 = vmatpush3.bf16.msra.mxu0 %v14246_v20  ;;  %v2317_v20 = vshll.u32 %v11570_v19, 16 }
  0xdd   : > { %12921 = vmatprep.subr.bf16.mxu0 %v14247_v7 }
  0xdf   : > { %12890 = vmatmul.mubr.bf16.gmra.mrb[4].mxu0 %v18768_v3  ;;  %v2321_v3 = vshrl.u32 %v11570_v19, 16  ;;  %v15551_v19 = vld [vmem:[%s18604_s1 + $0x140] sm:$0xff]  }
  0xe0   : > { %12893 = vmatprep.mubr.bf16.mxu0 %v18769_v61  ;;  %12922 = vmatpush3.bf16.msra.mxu0 %v14247_v7  ;;  %v14259_v7 = vld [vmem:[%s14741_s8 + $0x3c] sm:$0xff]   ;;  %v11572_v61 = vld [vmem:[%s14741_s8 + $0x30] sm:$0xf] }
  0xe1   : > { %12923 = vmatprep.subr.bf16.mxu0 %v14248_v29  ;;  %v15493_v42 = vrot.slane %v2321_v3, 4 }
  0xe4   : > { %12924 = vmatpush3.bf16.msra.mxu0 %v14248_v29 }
  0xe5   : > { %12925 = vmatprep.subr.bf16.mxu0 %v14249_v53 }
  0xe7   : > { %12894 = vmatmul.mubr.bf16.gmra.mrb[8].mxu0 %v18770_v31  ;;  %v14267_v31 = vld [vmem:[%s18604_s1 + $0x120] sm:$0xff]  }
  0xe8   : > { %12897 = vmatprep.mubr.bf16.mxu0 %v18771_v51  ;;  %12926 = vmatpush3.bf16.msra.mxu0 %v14249_v53  ;;  %v14264_v53 = vld [vmem:[%s18604_s1 + $0x118] sm:$0xff]   ;;  %v2313_v51 = vrot.slane %v2311_v56, 5 }
  0xe9   : > { %12927 = vmatprep.subr.bf16.mxu0 %v14250_v10 }
  0xec   : > { %12928 = vmatpush3.bf16.msra.mxu0 %v14250_v10  ;;  %v15471_v10 = vld [vmem:[%s14741_s8 + $0x34] sm:$0xf] }
  0xed   : > { %12929 = vmatprep.subr.bf16.mxu0 %v14251_v11 }
  0xef   : > { %12898 = vmatmul.mubr.bf16.gmra.mrb[12].mxu0 %v18772_v24  ;;  %v15480_v24 = vld [vmem:[%s14741_s8 + $0x50] sm:$0x1] }
  0xf0   : > { %12901 = vmatprep.mubr.bf16.mxu0 %v18773_v5  ;;  %12930 = vmatpush3.bf16.msra.mxu0 %v14251_v11  ;;  %v2332_v11 = vshrl.u32 %v11572_v61, 16  ;;  %v15482_v5 = vrot.slane %v2317_v20, 5  ;;  %v3069_v40 = vrot.slane %v15480_v24, 5 }
  0xf1   : > { %12931 = vmatprep.subr.bf16.mxu0 %v14252_v23 }
  0xf2   : > { %v15512_v48 = vrot.slane %v2332_v11, 4 }
  0xf4   : > { %12932 = vmatpush3.bf16.msra.mxu0 %v14252_v23  ;;  %v15477_v23 = vld [vmem:[%s14741_s8 + $0x4c] sm:$0xf] }
  0xf5   : > { %12965 = vmatprep.subr.bf16.mxu0 %v14255_v9 }
  0xf7   : > { %12902 = vmatmul.mubr.bf16.gmra.mrb[16].mxu0 %v18775_v25  ;;  %v3066_v25 = vrot.slane %v15477_v23, 5 }
  0xf8   : > { %12905 = vmatprep.mubr.bf16.mxu0 %v18777_v55  ;;  %v14260_v55 = vld [vmem:[%s14741_s8 + $0x48] sm:$0xff]  }
  0xff   : > { %12906 = vmatmul.mubr.bf16.gmra.mrb[20].mxu0 %v18778_v4  ;;  %v2341_v4 = vshll.u32 %v15471_v10, 16 }
 0x100   : > { %12909 = vmatprep.mubr.bf16.mxu0 %v11479_v62  ;;  %v2287_v62 = vshll.u32 %v11566_v45, 16  ;;  %v3068_v45 = vrot.slane %v3066_v25, 4 }
 0x102   : > { %v2289_v21 = vrot.slane %v2287_v62, 5  ;;  %v15504_v58 = vsel %vm15106_vm5, %v3068_v45, %v3069_v40  ;;  %v14273_v62 = vld [vmem:[%s18604_s1 + $0x130] sm:$0xff]   ;;  %v11661_v45 = vld [vmem:[%s14741_s8 + $0x84] sm:$0xe] }
 0x104   : > { %v2290_v8 = vor.u32 %v2289_v21, %v2286_v57  ;;  %v3080_v57 = vrot.slane %v15515_v49, 5 }
 0x106   : > { %v15458_v63 = vrot.slane %v2290_v8, 4 }
 0x107   : > { %12910 = vmatmul.mubr.bf16.gmra.mrb[24].mxu0 %v11480_v6  ;;  %v2262_v6 = vrot.slane %v2260_v41, 4  ;;  %v15491_v41 = vld [vmem:[%s14741_s8 + $0x2c] sm:$0x1] }
 0x108   : > { %12913 = vmatprep.mubr.bf16.mxu0 %v11481_v39  ;;  %v15435_v39 = vrot.slane %v2269_v17, 5  ;;  %v15500_v17 = vsel %vm15106_vm5, %v11672_v14, %v3066_v25  ;;  %v2327_v46 = vshll.u32 %v15491_v41, 16  ;;  %v15581_v25 = vld [vmem:[%s14741_s8 + $0x8c] sm:$0x1]  ;;  %v14274_v14 = vld [vmem:[%s14741_s8 + $0xb4] sm:$0xff]  }
 0x109   : > { %v2266_v43 = vor.u32 %v2265_v15, %v2262_v6  ;;  %v15518_v6 = vld [vmem:[%s14741_s8 + $0x68] sm:$0x1] }
 0x10a   : > { %v2276_v32 = vor.u32 %v2275_v59, %v15435_v39  ;;  %v15522_v59 = vrot.slane %v2341_v4, 5  ;;  %v3083_v21 = vrot.slane %v15518_v6, 5  ;;  %v15562_v56 = vrot.slane %v2327_v46, 5  ;;  %v15592_v4 = vld [vmem:[%s14741_s8 + $0x94] sm:$0xf] }
 0x10b   : > { %v15452_v1 = vrot.slane %v2266_v43, 4  ;;  %v15540_v43 = vsel %vm15106_vm5, %v11674_v44, %v3080_v57  ;;  %v11677_v46 = vrot.slane %v11661_v45, 9  ;;  %v11678_v44 = vrot.slane %v11662_v16, 9 }
 0x10c   : > { %v15454_v30 = vrot.slane %v2276_v32, 4 }
 0x10d   : > { %v2272_v20 = vsel %vm14776_vm2, %v15452_v1, %v15435_v39 }
 0x10f   : > { %12914 = vmatmul.mubr.bf16.gmra.mrb[28].mxu0 %v11482_v54  ;;  %v2308_v54 = vshrl.u32 %v11569_v38, 16  ;;  %v14263_v38 = vld [vmem:[%s14741_s8 + $0x60] sm:$0xff]  }
 0x110   : > { %12933 = vmatprep.mubr.bf16.mxu0 %v14253_v60 }
 0x111   : > { %v2310_v29 = vrot.slane %v2308_v54, 4  ;;  %v15536_v54 = vld [vmem:[%s14741_s8 + $0x38] sm:$0x1] }
 0x113   : > { %v2314_v26 = vor.u32 %v2313_v51, %v2310_v29  ;;  %v2356_v51 = vshrl.u32 %v15554_v34, 16 }
 0x115   : > { %v15530_v35 = vrot.slane %v2314_v26, 4  ;;  %v3104_v26 = vrot.slane %v15581_v25, 5  ;;  %v2358_v1 = vrot.slane %v2356_v51, 4  ;;  %v2296_v51 = vsel %vm14776_vm2, %v15458_v63, %v15440_v2 }
 0x117   : > { %12934 = vmatmul.mubr.bf16.vlgmr.msra.gmra.mrb[0].mxu0 %v14254_v52  ;;  %v2345_v52 = vshrl.u32 %v15471_v10, 16  ;;  %v2320_v2 = vsel %vm14776_vm2, %v15530_v35, %v15482_v5 }
 0x118   : > { %12966 = vmatpush3.bf16.msra.mxu0 %v14255_v9  ;;  %12937 = vmatprep.mubr.bf16.mxu0 %v14256_v50  ;;  %v2335_v9 = vshll.u32 %v11572_v61, 16  ;;  %v14265_v50 = vld [vmem:[%s14741_s8 + $0x6c] sm:$0xff]   ;;  %v14266_v61 = vld [vmem:[%s14741_s8 + $0x78] sm:$0xff]  }
 0x119   : > { %12967 = vmatprep.subr.bf16.mxu0 %v14258_v13 }
 0x11a   : > { %v15520_v15 = vrot.slane %v2335_v9, 5 }
 0x11c   : > { %12968 = vmatpush3.bf16.msra.mxu0 %v14258_v13  ;;  %v3082_v13 = vrot.slane %v3080_v57, 4  ;;  %v3108_v57 = vrot.slane %v15592_v4, 5 }
 0x11d   : > { %12969 = vmatprep.subr.bf16.mxu0 %v14261_v37 }
 0x11e   : > { %v15544_v32 = vsel %vm15106_vm5, %v3082_v13, %v3083_v21 }
 0x11f   : > { %12938 = vmatmul.mubr.bf16.gmra.mrb[4].mxu0 %v14257_v22  ;;  %18779 = vst [vmem:[#allocation12_spill] sm:$0xff] %v15544_v32  ;;  %v15560_v22 = vld [vmem:[%s14741_s8 + $0x80] sm:$0x1] }
 0x120   : > { %12941 = vmatprep.mubr.bf16.mxu0 %v14259_v7  ;;  %12970 = vmatpush3.bf16.msra.mxu0 %v14261_v37  ;;  %v15557_v37 = vld [vmem:[%s14741_s8 + $0x7c] sm:$0xf]  ;;  %v11660_v7 = vld [vmem:[%s14741_s8 + $0x78] sm:$0xe]  ;;  %v3097_v3 = vrot.slane %v15560_v22, 5 }
 0x121   : > { %12971 = vmatprep.subr.bf16.mxu0 %v14264_v53  ;;  %v3094_v29 = vrot.slane %v15557_v37, 5  ;;  %v11676_v10 = vrot.slane %v11660_v7, 9 }
 0x123   : > { %v3096_v11 = vrot.slane %v3094_v29, 4  ;;  %v15575_v9 = vsel %vm15106_vm5, %v11676_v10, %v3094_v29  ;;  %v15619_v29 = vsel %vm15106_vm5, %v11678_v44, %v3108_v57  ;;  %v11664_v44 = vld [vmem:[%s14741_s8 + $0xa8] sm:$0xe] }
 0x124   : > { %12972 = vmatpush3.bf16.msra.mxu0 %v14264_v53  ;;  %v15569_v53 = vrot.slane %v2345_v52, 4  ;;  %18780 = vst [vmem:[#allocation15_spill] sm:$0xff] %v15575_v9  ;;  %18784 = vst [vmem:[#allocation17_spill] sm:$0xff] %v15619_v29  ;;  %v14272_v10 = vld [vmem:[%s14741_s8 + $0xa8] sm:$0xff]  }
 0x125   : > { %12973 = vmatprep.subr.bf16.mxu0 %v14267_v31  ;;  %v15585_v40 = vsel %vm15106_vm5, %v3096_v11, %v3097_v3  ;;  %v15622_v3 = vld [vmem:[%s14741_s8 + $0xa0] sm:$0xf]  ;;  %v15634_v11 = vld [vmem:[%s14741_s8 + $0xac] sm:$0xf]  ;;  %v11578_v29 = vld [vmem:[%s14741_s8 + $0x48] sm:$0xf] }
 0x126   : > { %18781 = vst [vmem:[#allocation13_spill] sm:$0xff] %v15585_v40  ;;  %v3115_v16 = vrot.slane %v15622_v3, 5  ;;  %v2348_v63 = vor.u32 %v15569_v53, %v15522_v59  ;;  %v2389_v40 = vshll.u32 %v15477_v23, 16 }
 0x127   : > { %12942 = vmatmul.mubr.bf16.gmra.mrb[8].mxu0 %v14260_v55  ;;  %v15589_v55 = vld [vmem:[%s14741_s8 + $0x40] sm:$0xf] }
 0x128   : > { %12945 = vmatprep.mubr.bf16.mxu0 %v14262_v12  ;;  %12974 = vmatpush3.bf16.msra.mxu0 %v14267_v31  ;;  %v14268_v31 = vld [vmem:[%s14741_s8 + $0x84] sm:$0xff]   ;;  %v15597_v12 = vld [vmem:[%s14741_s8 + $0x98] sm:$0x1]  ;;  %v2365_v13 = vshll.u32 %v15589_v55, 16 }
 0x129   : > { %12975 = vmatprep.subr.bf16.mxu0 %v14270_v18  ;;  %v3111_v21 = vrot.slane %v15597_v12, 5 }
 0x12c   : > { %12976 = vmatpush3.bf16.msra.mxu0 %v14270_v18  ;;  %v3101_v18 = vrot.slane %v15578_v33, 5 }
 0x12d   : > { %12977 = vmatprep.subr.bf16.mxu0 %v14273_v62 }
 0x12e   : > { %v3103_v52 = vrot.slane %v3101_v18, 4 }
 0x12f   : > { %12946 = vmatmul.mubr.bf16.gmra.mrb[12].mxu0 %v14263_v38  ;;  %v14269_v38 = vld [vmem:[%s14741_s8 + $0x90] sm:$0xff]  }
 0x130   : > { %12949 = vmatprep.mubr.bf16.mxu0 %v14265_v50  ;;  %12978 = vmatpush3.bf16.msra.mxu0 %v14273_v62  ;;  %v2359_v62 = vshll.u32 %v15554_v34, 16  ;;  %v14271_v50 = vld [vmem:[%s14741_s8 + $0x9c] sm:$0xff]   ;;  %v3110_v34 = vrot.slane %v3108_v57, 4  ;;  %v15615_v7 = vsel %vm15106_vm5, %v3103_v52, %v3104_v26  ;;  %v15641_v26 = vld [vmem:[%s14741_s8 + $0xb0] sm:$0x1] }
 0x131   : > { %12979 = vmatprep.subr.bf16.mxu0 %v14276_v28  ;;  %18783 = vst [vmem:[#allocation16_spill] sm:$0xff] %v15615_v7  ;;  %v3125_v45 = vrot.slane %v15641_v26, 5  ;;  %v15730_v7 = vld [vmem:[%s14741_s8 + $0x58] sm:$0xf] }
 0x134   : > { %12980 = vmatpush3.bf16.msra.mxu0 %v14276_v28  ;;  %v15611_v28 = vsel %vm15106_vm5, %v11677_v46, %v3101_v18  ;;  %v2324_v18 = vor.u32 %v15493_v42, %v15482_v5  ;;  %v11663_v46 = vld [vmem:[%s14741_s8 + $0x9c] sm:$0xe]  ;;  %v3117_v42 = vrot.slane %v3115_v16, 4 }
 0x135   : > { %13013 = vmatprep.subr.bf16.mxu0 %v15551_v19  ;;  %18782 = vst [vmem:[#allocation14_spill] sm:$0xff] %v15611_v28  ;;  %v11679_v52 = vrot.slane %v11663_v46, 9  ;;  %v14275_v28 = vld [vmem:[%s14741_s8 + $0xc0] sm:$0xff]  }
 0x136   : > { %v15652_v8 = vrot.slane %v2324_v18, 4 }
 0x137   : > { %12950 = vmatmul.mubr.bf16.gmra.mrb[16].mxu0 %v14266_v61  ;;  %v15625_v61 = vld [vmem:[%s14741_s8 + $0xa4] sm:$0x1]  ;;  %v15656_v60 = vsel %vm15106_vm5, %v11679_v52, %v3115_v16  ;;  %v18790_v52 = vshll.u32 %v15536_v54, 16 }
 0x138   : > { %12953 = vmatprep.mubr.bf16.mxu0 %v14268_v31  ;;  %v15631_v31 = vsel %vm15106_vm5, %v3110_v34, %v3111_v21  ;;  %v3118_v57 = vrot.slane %v15625_v61, 5  ;;  %v2369_v21 = vshrl.u32 %v15589_v55, 16  ;;  %v3122_v34 = vrot.slane %v15634_v11, 5  ;;  %18786 = vst [vmem:[#allocation11_spill] sm:$0xff] %v15656_v60 }
 0x139   : > { %18785 = vst [vmem:[#allocation10_spill] sm:$0xff] %v15631_v31  ;;  %v2282_v31 = vsel %vm14776_vm2, %v15454_v30, %v15456_v36  ;;  %v15677_v39 = vrot.slane %v18790_v52, 5  ;;  %v11581_v30 = vld [vmem:[%s14741_s8 + $0x54] sm:$0xf]  ;;  %v2383_v60 = vshll.u32 %v11578_v29, 16 }
 0x13a   : > { %v15669_v18 = vsel %vm15106_vm5, %v3117_v42, %v3118_v57  ;;  %v15686_v57 = vld [vmem:[%s14741_s8 + $0x44] sm:$0x1]  ;;  %v2371_v42 = vrot.slane %v2369_v21, 4  ;;  %v11627_v52 = vcombine.low %v2272_v20, %v2282_v31  ;;  %v15706_v21 = vld [vmem:[%s14741_s8 + $0xbc] sm:$0x1]  ;;  %v2380_v20 = vshrl.u32 %v11578_v29, 16 }
 0x13b   : > { %18788 = vst [vmem:[#allocation9_spill] sm:$0xff] %v15669_v18  ;;  %v11666_v31 = vld [vmem:[%s14741_s8 + $0xc0] sm:$0xe]  ;;  %v2375_v53 = vshll.u32 %v15686_v57, 16 }
 0x13f   : > { %12954 = vmatmul.mubr.bf16.gmra.mrb[20].mxu0 %v14269_v38  ;;  %v11680_v38 = vrot.slane %v11664_v44, 9  ;;  %v2361_v44 = vrot.slane %v2359_v62, 5  ;;  %v2338_v62 = vor.u32 %v15520_v15, %v15512_v48  ;;  %v3132_v15 = vrot.slane %v15706_v21, 5 }
 0x140   : > { %12957 = vmatprep.mubr.bf16.mxu0 %v14271_v50  ;;  %v3124_v50 = vrot.slane %v3122_v34, 4 }
 0x141   : > { %v15673_v16 = vsel %vm15106_vm5, %v11680_v38, %v3122_v34  ;;  %v15688_v34 = vrot.slane %v2365_v13, 5  ;;  %v15703_v13 = vld [vmem:[%s14741_s8 + $0xb8] sm:$0xf]  ;;  %v2362_v35 = vor.u32 %v2361_v44, %v2358_v1  ;;  %v2393_v1 = vshrl.u32 %v15477_v23, 16 }
 0x142   : > { %18789 = vst [vmem:[#allocation18_spill] sm:$0xff] %v15673_v16  ;;  %v15683_v36 = vsel %vm15106_vm5, %v3124_v50, %v3125_v45  ;;  %v2306_v45 = vsel %vm14776_vm2, %v15461_v27, %v15463_v47  ;;  %v15709_v50 = vld [vmem:[%s14741_s8 + $0xc4] sm:$0xf]  ;;  %v15718_v27 = vld [vmem:[%s14741_s8 + $0xc8] sm:$0x1]  ;;  %v3129_v48 = vrot.slane %v15703_v13, 5  ;;  %v2330_v23 = vsel %vm14776_vm2, %v15652_v8, %v15562_v56 }
 0x143   : > { %18791 = vst [vmem:[#allocation19_spill] sm:$0xff] %v15683_v36  ;;  %v11665_v47 = vld [vmem:[%s14741_s8 + $0xb4] sm:$0xe]  ;;  %v3136_v38 = vrot.slane %v15709_v50, 5  ;;  %v3139_v5 = vrot.slane %v15718_v27, 5  ;;  %v11682_v16 = vrot.slane %v11666_v31, 9  ;;  %v2372_v18 = vor.u32 %v2371_v42, %v15688_v34 }
 0x144   : > { %v3131_v36 = vrot.slane %v3129_v48, 4  ;;  %v2404_v42 = vshrl.u32 %v11581_v30, 16  ;;  %v2407_v31 = vshll.u32 %v11581_v30, 16  ;;  %v15762_v30 = vrot.slane %v2348_v63, 4 }
 0x145   : > { %v15745_v29 = vsel %vm15106_vm5, %v11682_v16, %v3136_v38  ;;  %v2385_v8 = vrot.slane %v2383_v60, 5  ;;  %v15768_v56 = vrot.slane %v2389_v40, 5  ;;  %v2399_v16 = vshll.u32 %v15480_v24, 16 }
 0x146   : > { %v15741_v44 = vsel %vm15106_vm5, %v3131_v36, %v3132_v15  ;;  %18794 = vst [vmem:[#allocation22_spill] sm:$0xff] %v15745_v29  ;;  %v15757_v36 = vrot.slane %v2338_v62, 4  ;;  %v2413_v15 = vshll.u32 %v15730_v7, 16  ;;  %v2395_v62 = vrot.slane %v2393_v1, 4 }
 0x147   : > { %12958 = vmatmul.mubr.bf16.gmra.mrb[24].mxu0 %v14272_v10  ;;  %v11681_v10 = vrot.slane %v11665_v47, 9  ;;  %v3138_v47 = vrot.slane %v3136_v38, 4  ;;  %18793 = vst [vmem:[#allocation21_spill] sm:$0xff] %v15741_v44  ;;  %v15764_v38 = vrot.slane %v2375_v53, 5  ;;  %v2363_v44 = vrot.slane %v2362_v35, 4 }
 0x148   : > { %12961 = vmatprep.mubr.bf16.mxu0 %v14274_v14  ;;  %v2406_v63 = vrot.slane %v2404_v42, 4  ;;  %v11628_v53 = vcombine.low %v2296_v51, %v2306_v45  ;;  %v11629_v29 = vcombine.low %v2320_v2, %v2330_v23  ;;  %v15774_v9 = vrot.slane %v2413_v15, 5  ;;  %v15790_v42 = vld [vmem:[%s14741_s8 + $0x70] sm:$0xf] }
 0x149   : > { %v15734_v14 = vsel %vm15106_vm5, %v11681_v10, %v3129_v48  ;;  %v15751_v10 = vsel %vm15106_vm5, %v3138_v47, %v3139_v5  ;;  %v2382_v48 = vrot.slane %v2380_v20, 4  ;;  %v2417_v5 = vshrl.u32 %v15730_v7, 16  ;;  %v11584_v47 = vld [vmem:[%s14741_s8 + $0x60] sm:$0xf]  ;;  %v15772_v20 = vld [vmem:[%s14741_s8 + $0x5c] sm:$0x1] }
 0x14a   : > { %18792 = vst [vmem:[#allocation20_spill] sm:$0xff] %v15734_v14  ;;  %18795 = vst [vmem:[#allocation23_spill] sm:$0xff] %v15751_v10  ;;  %v2373_v14 = vrot.slane %v2372_v18, 4  ;;  %v2409_v10 = vrot.slane %v2407_v31, 5  ;;  %v2428_v32 = vshrl.u32 %v11584_v47, 16  ;;  %v2431_v60 = vshll.u32 %v11584_v47, 16 }
 0x14b   : > { %v2419_v35 = vrot.slane %v2417_v5, 4  ;;  %v2437_v40 = vshll.u32 %v15515_v49, 16  ;;  %v2344_v24 = vsel %vm14776_vm2, %v15757_v36, %v15522_v59  ;;  %v2354_v18 = vsel %vm14776_vm2, %v15762_v30, %v15677_v39  ;;  %v14278_v59 = vld [vmem:[%s18604_s1 + $0x148] sm:$0xff]   ;;  %v11590_v47 = vld [vmem:[%s14741_s8 + $0x78] sm:$0xf] }
 0x14c   : > { %v2386_v51 = vor.u32 %v2385_v8, %v2382_v48  ;;  %v2396_v45 = vor.u32 %v2395_v62, %v15768_v56  ;;  %v2410_v2 = vor.u32 %v2409_v10, %v2406_v63  ;;  %v2423_v1 = vshll.u32 %v15772_v20, 16 }
 0x14d   : > { %v2368_v23 = vsel %vm14776_vm2, %v2363_v44, %v15688_v34  ;;  %v2378_v39 = vsel %vm14776_vm2, %v2373_v14, %v15764_v38  ;;  %v15801_v48 = vrot.slane %v2399_v16, 5  ;;  %v2430_v10 = vrot.slane %v2428_v32, 4  ;;  %v14279_v38 = vld [vmem:[%s18604_s1 + $0x150] sm:$0xff]  }
 0x14e   : > { %v2420_v36 = vor.u32 %v2419_v35, %v15774_v9  ;;  %v2433_v15 = vrot.slane %v2431_v60, 5  ;;  %v15804_v30 = vrot.slane %v2437_v40, 5  ;;  %v2387_v8 = vrot.slane %v2386_v51, 4 }
 0x14f   : > { %12962 = vmatmul.mubr.bf16.gmra.mrb[28].mxu0 %v14275_v28  ;;  %v11587_v28 = vld [vmem:[%s14741_s8 + $0x6c] sm:$0xf]  ;;  %v2397_v62 = vrot.slane %v2396_v45, 4  ;;  %v2461_v63 = vshll.u32 %v15790_v42, 16  ;;  %v2465_v34 = vshrl.u32 %v15790_v42, 16  ;;  %v2411_v14 = vrot.slane %v2410_v2, 4 }
 0x150   : > { %12981 = vmatprep.mubr.bf16.mxu0 %v11627_v52  ;;  %v2441_v52 = vshrl.u32 %v15515_v49, 16  ;;  %v2452_v49 = vshrl.u32 %v11587_v28, 16  ;;  %v2455_v31 = vshll.u32 %v11587_v28, 16  ;;  %v2425_v44 = vrot.slane %v2423_v1, 5 }
 0x151   : > { %v2476_v28 = vshrl.u32 %v11590_v47, 16  ;;  %v2485_v35 = vshll.u32 %v15557_v37, 16  ;;  %v2489_v60 = vshrl.u32 %v15557_v37, 16  ;;  %v2421_v40 = vrot.slane %v2420_v36, 4 }
 0x152   : > { %v2443_v5 = vrot.slane %v2441_v52, 4  ;;  %v2454_v32 = vrot.slane %v2452_v49, 4  ;;  %v2457_v16 = vrot.slane %v2455_v31, 5  ;;  %v2447_v52 = vshll.u32 %v15518_v6, 16 }
 0x153   : > { %v11630_v51 = vcombine.low %v2344_v24, %v2354_v18  ;;  %v11631_v45 = vcombine.low %v2368_v23, %v2378_v39  ;;  %v15817_v2 = vrot.slane %v2461_v63, 5  ;;  %v2467_v1 = vrot.slane %v2465_v34, 4  ;;  %v11593_v24 = vld [vmem:[%s14741_s8 + $0x84] sm:$0xf]  ;;  %v14280_v18 = vld [vmem:[%s18604_s1 + $0x158] sm:$0xff]  }
 0x154   : > { %v2392_v49 = vsel %vm14776_vm2, %v2387_v8, %v15768_v56  ;;  %v2402_v37 = vsel %vm14776_vm2, %v2397_v62, %v15801_v48  ;;  %v2416_v31 = vsel %vm14776_vm2, %v2411_v14, %v15774_v9  ;;  %v2458_v6 = vor.u32 %v2457_v16, %v2454_v32 }
 0x155   : > { %v15835_v56 = vrot.slane %v2485_v35, 5  ;;  %v2491_v39 = vrot.slane %v2489_v60, 4  ;;  %v2426_v48 = vsel %vm14776_vm2, %v2421_v40, %v2425_v44  ;;  %v2449_v9 = vrot.slane %v2447_v52, 5 }
 0x156   : > { %v2500_v8 = vshrl.u32 %v11593_v24, 16  ;;  %v2503_v62 = vshll.u32 %v11593_v24, 16  ;;  %v2509_v63 = vshll.u32 %v15578_v33, 16  ;;  %v2513_v34 = vshrl.u32 %v15578_v33, 16  ;;  %v14282_v24 = vld [vmem:[%s18604_s1 + $0x168] sm:$0xff]  }
 0x157   : > { %12982 = vmatmul.mubr.bf16.vlgmr.msra.gmra.mrb[0].mxu0 %v11628_v53  ;;  %v2479_v53 = vshll.u32 %v11590_v47, 16  ;;  %v2459_v14 = vrot.slane %v2458_v6, 4  ;;  %v2492_v32 = vor.u32 %v2491_v39, %v15835_v56  ;;  %v2495_v16 = vshll.u32 %v15560_v22, 16 }
 0x158   : > { %13014 = vmatpush3.bf16.msra.mxu0 %v15551_v19  ;;  %12985 = vmatprep.mubr.bf16.mxu0 %v11629_v29  ;;  %v2434_v19 = vor.u32 %v2433_v15, %v2430_v10  ;;  %v2444_v29 = vor.u32 %v2443_v5, %v15804_v30  ;;  %v15829_v10 = vld [vmem:[%s14741_s8 + $0x74] sm:$0x1]  ;;  %v2468_v5 = vor.u32 %v2467_v1, %v15817_v2  ;;  %v2505_v52 = vrot.slane %v2503_v62, 5 }
 0x159   : > { %13015 = vmatprep.subr.bf16.mxu0 %v14278_v59  ;;  %v2481_v23 = vrot.slane %v2479_v53, 5  ;;  %v2471_v47 = vshll.u32 %v15829_v10, 16  ;;  %v11596_v53 = vld [vmem:[%s14741_s8 + $0x90] sm:$0xf]  ;;  %v11632_v35 = vcombine.low %v2392_v49, %v2402_v37  ;;  %v11633_v60 = vcombine.low %v2416_v31, %v2426_v48 }
 0x15a   : > { %v2435_v36 = vrot.slane %v2434_v19, 4  ;;  %v2445_v15 = vrot.slane %v2444_v29, 4  ;;  %v2469_v40 = vrot.slane %v2468_v5, 4  ;;  %v2502_v29 = vrot.slane %v2500_v8, 4 }
 0x15b   : > { %v2473_v19 = vrot.slane %v2471_v47, 5  ;;  %v15855_v22 = vrot.slane %v2509_v63, 5  ;;  %v2524_v1 = vshrl.u32 %v11596_v53, 16  ;;  %v2527_v6 = vshll.u32 %v11596_v53, 16 }
 0x15c   : > { %13016 = vmatpush3.bf16.msra.mxu0 %v14278_v59  ;;  %v2478_v59 = vrot.slane %v2476_v28, 4  ;;  %v14281_v28 = vld [vmem:[%s18604_s1 + $0x160] sm:$0xff]   ;;  %v2450_v33 = vsel %vm14776_vm2, %v2445_v15, %v2449_v9  ;;  %v2464_v49 = vsel %vm14776_vm2, %v2459_v14, %v15817_v2  ;;  %v2497_v31 = vrot.slane %v2495_v16, 5 }
 0x15d   : > { %13017 = vmatprep.subr.bf16.mxu0 %v14279_v38  ;;  %v2474_v48 = vsel %vm14776_vm2, %v2469_v40, %v2473_v19  ;;  %v2519_v2 = vshll.u32 %v15581_v25, 16  ;;  %v2561_v15 = vshrl.u32 %v15622_v3, 16  ;;  %v2506_v9 = vor.u32 %v2505_v52, %v2502_v29  ;;  %v14284_v19 = vld [vmem:[%s18604_s1 + $0x178] sm:$0xff]  }
 0x15e   : > { %v2482_v44 = vor.u32 %v2481_v23, %v2478_v59  ;;  %v2533_v59 = vshll.u32 %v15592_v4, 16  ;;  %v2526_v47 = vrot.slane %v2524_v1, 4  ;;  %v11605_v1 = vld [vmem:[%s14741_s8 + $0xb4] sm:$0xf] }
 0x15f   : > { %12986 = vmatmul.mubr.bf16.gmra.mrb[4].mxu0 %v11630_v51  ;;  %v11599_v51 = vld [vmem:[%s14741_s8 + $0x9c] sm:$0xf]  ;;  %v2521_v16 = vrot.slane %v2519_v2, 5  ;;  %v2563_v53 = vrot.slane %v2561_v15, 4 }
 0x160   : > { %12989 = vmatprep.mubr.bf16.mxu0 %v11631_v45  ;;  %13018 = vmatpush3.bf16.msra.mxu0 %v14279_v38  ;;  %v2440_v38 = vsel %vm14776_vm2, %v2435_v36, %v15804_v30  ;;  %v2515_v45 = vrot.slane %v2513_v34, 4  ;;  %v2483_v37 = vrot.slane %v2482_v44, 4  ;;  %v2493_v30 = vrot.slane %v2492_v32, 4 }
 0x161   : > { %13019 = vmatprep.subr.bf16.mxu0 %v14280_v18  ;;  %v2548_v23 = vshrl.u32 %v11599_v51, 16  ;;  %v2551_v39 = vshll.u32 %v11599_v51, 16  ;;  %v2557_v36 = vshll.u32 %v15622_v3, 16  ;;  %v11634_v8 = vcombine.low %v2440_v38, %v2450_v33  ;;  %v14283_v3 = vld [vmem:[%s18604_s1 + $0x170] sm:$0xff]  }
 0x162   : > { %v2516_v5 = vor.u32 %v2515_v45, %v15855_v22  ;;  %v2488_v62 = vsel %vm14776_vm2, %v2483_v37, %v15835_v56  ;;  %v2498_v25 = vsel %vm14776_vm2, %v2493_v30, %v2497_v31  ;;  %v15879_v63 = vrot.slane %v2533_v59, 5  ;;  %v11602_v56 = vld [vmem:[%s14741_s8 + $0xa8] sm:$0xf] }
 0x163   : > { %v2550_v14 = vrot.slane %v2548_v23, 4  ;;  %v2553_v44 = vrot.slane %v2551_v39, 5  ;;  %v11635_v32 = vcombine.low %v2464_v49, %v2474_v48  ;;  %v2543_v33 = vshll.u32 %v15597_v12, 16 }
 0x164   : > { %13020 = vmatpush3.bf16.msra.mxu0 %v14280_v18  ;;  %v2537_v18 = vshrl.u32 %v15592_v4, 16  ;;  %v2529_v4 = vrot.slane %v2527_v6, 5  ;;  %v11636_v40 = vcombine.low %v2488_v62, %v2498_v25  ;;  %v2567_v51 = vshll.u32 %v15625_v61, 16 }
 0x165   : > { %13021 = vmatprep.subr.bf16.mxu0 %v14281_v28  ;;  %v2554_v52 = vor.u32 %v2553_v44, %v2550_v14  ;;  %v2572_v45 = vshrl.u32 %v11602_v56, 16  ;;  %v2575_v49 = vshll.u32 %v11602_v56, 16  ;;  %v2581_v12 = vshll.u32 %v15634_v11, 16 }
 0x166   : > { %v2539_v34 = vrot.slane %v2537_v18, 4  ;;  %v2530_v38 = vor.u32 %v2529_v4, %v2526_v47  ;;  %v2585_v37 = vshrl.u32 %v15634_v11, 16  ;;  %v2545_v61 = vrot.slane %v2543_v33, 5  ;;  %v15904_v11 = vld [vmem:[%s18604_s1 + $0x180] sm:$0xff]  }
 0x167   : > { %12990 = vmatmul.mubr.bf16.gmra.mrb[8].mxu0 %v11632_v35  ;;  %v2507_v35 = vrot.slane %v2506_v9, 4  ;;  %v2596_v59 = vshrl.u32 %v11605_v1, 16  ;;  %v2599_v18 = vshll.u32 %v11605_v1, 16  ;;  %v2605_v23 = vshll.u32 %v15703_v13, 16 }
 0x168   : > { %12993 = vmatprep.mubr.bf16.mxu0 %v11633_v60  ;;  %13022 = vmatpush3.bf16.msra.mxu0 %v14281_v28  ;;  %v15881_v28 = vrot.slane %v2557_v36, 5  ;;  %v2517_v60 = vrot.slane %v2516_v5, 4  ;;  %v2540_v29 = vor.u32 %v2539_v34, %v15879_v63  ;;  %v2609_v39 = vshrl.u32 %v15703_v13, 16 }
 0x169   : > { %13023 = vmatprep.subr.bf16.mxu0 %v14282_v24  ;;  %v2512_v30 = vsel %vm14776_vm2, %v2507_v35, %v15855_v22  ;;  %v2555_v48 = vrot.slane %v2554_v52, 4  ;;  %v2569_v2 = vrot.slane %v2567_v51, 5  ;;  %v2574_v36 = vrot.slane %v2572_v45, 4 }
 0x16a   : > { %v2564_v6 = vor.u32 %v2563_v53, %v15881_v28  ;;  %v2522_v31 = vsel %vm14776_vm2, %v2517_v60, %v2521_v16  ;;  %v2541_v22 = vrot.slane %v2540_v29, 4  ;;  %v2577_v9 = vrot.slane %v2575_v49, 5 }
 0x16b   : > { %v2583_v5 = vrot.slane %v2581_v12, 5  ;;  %v2587_v47 = vrot.slane %v2585_v37, 4  ;;  %v11637_v4 = vcombine.low %v2512_v30, %v2522_v31  ;;  %v2601_v62 = vrot.slane %v2599_v18, 5 }
 0x16c   : > { %13024 = vmatpush3.bf16.msra.mxu0 %v14282_v24  ;;  %v2531_v24 = vrot.slane %v2530_v38, 4  ;;  %v2565_v15 = vrot.slane %v2564_v6, 4  ;;  %v2607_v13 = vrot.slane %v2605_v23, 5  ;;  %v2611_v25 = vrot.slane %v2609_v39, 4  ;;  %v14451_v23 = vld [vmem:[%s14741_s8 + $0x10] sm:$0xf] }
 0x16d   : > { %13025 = vmatprep.subr.bf16.mxu0 %v14283_v3  ;;  %v2546_v14 = vsel %vm14776_vm2, %v2541_v22, %v2545_v61  ;;  %v2591_v44 = vshll.u32 %v15641_v26, 16  ;;  %v2578_v53 = vor.u32 %v2577_v9, %v2574_v36  ;;  %v2588_v56 = vor.u32 %v2587_v47, %v2583_v5  ;;  %v11651_v22 = vld [vmem:[%s14741_s8 + $0xc] sm:$0xe]  ;;  %v14452_v47 = vld [vmem:[%s14741_s8 + $0x14] sm:$0x1] }
 0x16e   : > { %v2536_v34 = vsel %vm14776_vm2, %v2531_v24, %v15879_v63  ;;  %v2570_v16 = vsel %vm14776_vm2, %v2565_v15, %v2569_v2  ;;  %v2629_v63 = vshll.u32 %v15709_v50, 16  ;;  %v2633_v38 = vshrl.u32 %v15709_v50, 16 }
 0x16f   : > { %12994 = vmatmul.mubr.bf16.gmra.mrb[12].mxu0 %v11634_v8  ;;  %v2598_v8 = vrot.slane %v2596_v59, 4  ;;  %v2615_v26 = vshll.u32 %v15706_v21, 16  ;;  %v2579_v52 = vrot.slane %v2578_v53, 4  ;;  %v2593_v51 = vrot.slane %v2591_v44, 5  ;;  %v14454_v44 = vld [vmem:[%s14741_s8 + $0x28] sm:$0xf] }
 0x170   : > { %12997 = vmatprep.mubr.bf16.mxu0 %v11635_v32  ;;  %13026 = vmatpush3.bf16.msra.mxu0 %v14283_v3  ;;  %v11608_v3 = vld [vmem:[%s14741_s8 + $0xc0] sm:$0xf]  ;;  %v2560_v32 = vsel %vm14776_vm2, %v2555_v48, %v15881_v28  ;;  %v2589_v28 = vrot.slane %v2588_v56, 4  ;;  %v2631_v6 = vrot.slane %v2629_v63, 5  ;;  %v2635_v49 = vrot.slane %v2633_v38, 4 }
 0x171   : > { %13027 = vmatprep.subr.bf16.mxu0 %v14284_v19  ;;  %v2620_v35 = vshrl.u32 %v11608_v3, 16  ;;  %v2623_v60 = vshll.u32 %v11608_v3, 16  ;;  %v2602_v33 = vor.u32 %v2601_v62, %v2598_v8  ;;  %v11639_v29 = vcombine.low %v2560_v32, %v2570_v16  ;;  %v11653_v16 = vld [vmem:[%s14741_s8 + $0x24] sm:$0xe]  ;;  %v14455_v63 = vld [vmem:[%s14741_s8 + $0x20] sm:$0x1] }
 0x172   : > { %v2617_v30 = vrot.slane %v2615_v26, 5  ;;  %v2584_v50 = vsel %vm14776_vm2, %v2579_v52, %v2583_v5  ;;  %v2594_v21 = vsel %vm14776_vm2, %v2589_v28, %v2593_v51  ;;  %v2636_v24 = vor.u32 %v2635_v49, %v2631_v6  ;;  %v14456_v52 = vld [vmem:[%s14741_s8 + $0x34] sm:$0xf] }
 0x173   : > { %v2622_v45 = vrot.slane %v2620_v35, 4  ;;  %v2625_v1 = vrot.slane %v2623_v60, 5  ;;  %v2603_v12 = vrot.slane %v2602_v33, 4  ;;  %v2639_v61 = vshll.u32 %v15718_v27, 16 }
 0x174   : > { %13028 = vmatpush3.bf16.msra.mxu0 %v14284_v19  ;;  %v2612_v19 = vor.u32 %v2611_v25, %v2607_v13  ;;  %v3031_v39 = vrot.slane %v14451_v23, 5  ;;  %v11640_v48 = vcombine.low %v2584_v50, %v2594_v21  ;;  %v2637_v15 = vrot.slane %v2636_v24, 4  ;;  %v14286_v21 = vld [vmem:[%s18604_s1 + $0x188] sm:$0xff]   ;;  %v11657_v23 = vld [vmem:[%s14741_s8 + $0x54] sm:$0xe] }
 0x175   : > { %13061 = vmatprep.subr.bf16.mxu0 %v15904_v11  ;;  %v2626_v31 = vor.u32 %v2625_v1, %v2622_v45  ;;  %v2608_v59 = vsel %vm14776_vm2, %v2603_v12, %v2607_v13  ;;  %v2641_v9 = vrot.slane %v2639_v61, 5  ;;  %v11667_v5 = vrot.slane %v11651_v22, 9  ;;  %v14453_v13 = vld [vmem:[%s14741_s8 + $0x1c] sm:$0xf]  ;;  %v11654_v1 = vld [vmem:[%s14741_s8 + $0x30] sm:$0xe] }
 0x176   : > { %v2613_v37 = vrot.slane %v2612_v19, 4  ;;  %v3033_v27 = vrot.slane %v3031_v39, 4  ;;  %v3038_v25 = vrot.slane %v14453_v13, 5  ;;  %v3045_v32 = vrot.slane %v14454_v44, 5  ;;  %v14290_v13 = vld [vmem:[%s18604_s1 + $0x1a8] sm:$0xff]   ;;  %v14295_v44 = vld [vmem:[%s18604_s1 + $0x1c0] sm:$0xff]  }
 0x177   : > { %12998 = vmatmul.mubr.bf16.gmra.mrb[16].mxu0 %v11636_v40  ;;  %v11638_v40 = vcombine.low %v2536_v34, %v2546_v14  ;;  %v2627_v36 = vrot.slane %v2626_v31, 4  ;;  %v2642_v62 = vsel %vm14776_vm2, %v2637_v15, %v2641_v9  ;;  %v3032_v3 = vsel %vm15106_vm5, %v11667_v5, %v3031_v39  ;;  %v11652_v14 = vld [vmem:[%s14741_s8 + $0x18] sm:$0xe] }
 0x178   : > { %13001 = vmatprep.mubr.bf16.mxu0 %v11637_v4  ;;  %v2618_v18 = vsel %vm14776_vm2, %v2613_v37, %v2617_v30  ;;  %v3034_v4 = vrot.slane %v14452_v47, 5  ;;  %v11668_v35 = vrot.slane %v11652_v14, 9  ;;  %v3040_v60 = vrot.slane %v3038_v25, 4  ;;  %v14288_v15 = vld [vmem:[%s18604_s1 + $0x198] sm:$0xff]  }
 0x179   : > { %v11641_v2 = vcombine.low %v2608_v59, %v2618_v18  ;;  %v2632_v8 = vsel %vm14776_vm2, %v2627_v36, %v2631_v6  ;;  %v3041_v38 = vrot.slane %v14455_v63, 5  ;;  %v11669_v33 = vrot.slane %v11653_v16, 9  ;;  %v18800_v16 = vld [vmem:[#allocation13_spill] sm:$0xff]  ;;  %v18806_v63 = vld [vmem:[#allocation10_spill] sm:$0xff] }
 0x17a   : > { %v3035_v34 = vsel %vm15106_vm5, %v3033_v27, %v3034_v4  ;;  %v11642_v53 = vcombine.low %v2632_v8, %v2642_v62  ;;  %v3047_v19 = vrot.slane %v3045_v32, 4  ;;  %v3048_v26 = vrot.slane %v15491_v41, 5  ;;  %v11655_v41 = vld [vmem:[%s14741_s8 + $0x3c] sm:$0xe]  ;;  %v11659_v27 = vld [vmem:[%s14741_s8 + $0x6c] sm:$0xe] }
 0x17b   : > { %v11699_v56 = vcombine.low %v3032_v3, %v3035_v34  ;;  %v3052_v28 = vrot.slane %v14456_v52, 5  ;;  %v3046_v51 = vsel %vm15106_vm5, %v11669_v33, %v3045_v32  ;;  %v3059_v6 = vrot.slane %v15589_v55, 5  ;;  %v18799_v32 = vld [vmem:[#allocation15_spill] sm:$0xff] }
 0x17c   : > { %v3049_v45 = vsel %vm15106_vm5, %v3047_v19, %v3048_v26  ;;  %v11670_v37 = vrot.slane %v11654_v1, 9  ;;  %v3055_v50 = vrot.slane %v15536_v54, 5  ;;  %v11671_v31 = vrot.slane %v11655_v41, 9  ;;  %v18808_v33 = vld [vmem:[#allocation11_spill] sm:$0xff]  ;;  %v18809_v19 = vld [vmem:[#allocation9_spill] sm:$0xff] }
 0x17d   : > { %v11701_v12 = vcombine.low %v3046_v51, %v3049_v45  ;;  %v3054_v30 = vrot.slane %v3052_v28, 4  ;;  %v3061_v24 = vrot.slane %v3059_v6, 4  ;;  %v3062_v61 = vrot.slane %v15686_v57, 5  ;;  %v14287_v57 = vld [vmem:[%s18604_s1 + $0x190] sm:$0xff]   ;;  %v18815_v51 = vld [vmem:[#allocation21_spill] sm:$0xff]  ;;  %v18818_v41 = vld [vmem:[#allocation23_spill] sm:$0xff] }
 0x17e   : > { %v3053_v55 = vsel %vm15106_vm5, %v11670_v37, %v3052_v28  ;;  %v3060_v54 = vsel %vm15106_vm5, %v11671_v31, %v3059_v6  ;;  %v3076_v36 = vrot.slane %v15772_v20, 5  ;;  %v3087_v5 = vrot.slane %v15790_v42, 5  ;;  %v14289_v20 = vld [vmem:[%s18604_s1 + $0x1a0] sm:$0xff]   ;;  %v18814_v28 = vld [vmem:[#allocation20_spill] sm:$0xff]  ;;  %v14293_v1 = vld [vmem:[%s14741_s8 + $0x18] sm:$0xff]  }
 0x17f   : > { %13002 = vmatmul.mubr.bf16.gmra.mrb[20].mxu0 %v11638_v40  ;;  %v3039_v40 = vsel %vm15106_vm5, %v11668_v35, %v3038_v25  ;;  %v3056_v59 = vsel %vm15106_vm5, %v3054_v30, %v3055_v50  ;;  %v3063_v18 = vsel %vm15106_vm5, %v3061_v24, %v3062_v61  ;;  %v11675_v4 = vrot.slane %v11659_v27, 9  ;;  %v18803_v35 = vld [vmem:[#allocation16_spill] sm:$0xff]  ;;  %v18817_v6 = vld [vmem:[#allocation22_spill] sm:$0xff]  ;;  %v14298_v30 = vld [vmem:[%s18604_s1 + $0x1c8] sm:$0xff]  }
 0x180   : > { %13005 = vmatprep.mubr.bf16.mxu0 %v11639_v29  ;;  %v3042_v29 = vsel %vm15106_vm5, %v3040_v60, %v3041_v38  ;;  %v11702_v39 = vcombine.low %v3053_v55, %v3056_v59  ;;  %v11703_v22 = vcombine.low %v3060_v54, %v3063_v18  ;;  %v3089_v8 = vrot.slane %v3087_v5, 4  ;;  %v14296_v37 = vld [vmem:[%s14741_s8 + $0x30] sm:$0xff]   ;;  %v14299_v31 = vld [vmem:[%s14741_s8 + $0x48] sm:$0xff]   ;;  %v14304_v24 = vld [vmem:[%s18604_s1 + $0x1d8] sm:$0xff]  }
 0x181   : > { %v11700_v49 = vcombine.low %v3039_v40, %v3042_v29  ;;  %v3090_v62 = vrot.slane %v15829_v10, 5  ;;  %v18796_v25 = vcombine.low %v15500_v17, %v15504_v58  ;;  %v3088_v42 = vsel %vm15106_vm5, %v11675_v4, %v3087_v5  ;;  %v14291_v10 = vld [vmem:[%s18604_s1 + $0x1b0] sm:$0xff]   ;;  %v14292_v17 = vld [vmem:[%s18604_s1 + $0x1b8] sm:$0xff]   ;;  %v18811_v40 = vld [vmem:[#allocation18_spill] sm:$0xff] }
 0x182   : > { %v18797_v58 = vld [vmem:[#allocation12_spill] sm:$0xff]  ;;  %v18810_v26 = vcombine.low %v18808_v33, %v18809_v19  ;;  %v18812_v29 = vld [vmem:[#allocation19_spill] sm:$0xff]  ;;  %v18816_v45 = vcombine.low %v18814_v28, %v18815_v51  ;;  %v16051_v61 = vld [vmem:[%s14741_s8 + $0x58] sm:$0xf] }
 0x183   : > { %v3091_v3 = vsel %vm15106_vm5, %v3089_v8, %v3090_v62  ;;  %v18798_v14 = vcombine.low %v15540_v43, %v18797_v58  ;;  %v18805_v43 = vld [vmem:[#allocation17_spill] sm:$0xff]  ;;  %v18813_v52 = vcombine.low %v18811_v40, %v18812_v29  ;;  %v14301_v50 = vld [vmem:[%s18604_s1 + $0x1d0] sm:$0xff]   ;;  %v4705_v54 = vrot.slane %v16051_v61, 5 }
 0x184   : > { %v11707_v34 = vcombine.low %v3088_v42, %v3091_v3  ;;  %v18807_v38 = vcombine.low %v18805_v43, %v18806_v63  ;;  %v16054_v55 = vld [vmem:[%s14741_s8 + $0x5c] sm:$0x1]  ;;  %v11888_v59 = vld [vmem:[%s14741_s8 + $0x54] sm:$0xe]  ;;  %v16091_v42 = vld [vmem:[%s14741_s8 + $0x74] sm:$0x1] }
 0x185   : > { %v4708_v18 = vrot.slane %v16054_v55, 5  ;;  %v4722_v58 = vrot.slane %v16091_v42, 5  ;;  %v16105_v43 = vld [vmem:[%s14741_s8 + $0x20] sm:$0x1]  ;;  %v14305_v19 = vld [vmem:[%s14741_s8 + $0x78] sm:$0xff]  }
 0x186   : > { %v14316_v28 = vld [vmem:[%s18604_s1 + $0x1f8] sm:$0xff]   ;;  %v11801_v51 = vld [vmem:[%s14741_s8 + $0x30] sm:$0xf]  ;;  %v11896_v27 = vld [vmem:[%s14741_s8 + $0xb4] sm:$0xe] }
 0x187   : > { %13006 = vmatmul.mubr.bf16.gmra.mrb[24].mxu0 %v11640_v48  ;;  %v11673_v48 = vrot.slane %v11657_v23, 9  ;;  %v11795_v23 = vld [vmem:[%s14741_s8 + $0x18] sm:$0xf] }
 0x188   : > { %13009 = vmatprep.mubr.bf16.mxu0 %v11641_v2  ;;  %v3899_v5 = vshrl.u32 %v11795_v23, 16 }
 0x18f   : > { %13010 = vmatmul.mubr.bf16.gmra.mrb[28].mxu0 %v11642_v53  ;;  %v18801_v53 = vcombine.low %v18799_v32, %v18800_v16 }
 0x190   : > { %13029 = vmatprep.mubr.bf16.mxu0 %v11699_v56  ;;  %v18802_v56 = vld [vmem:[#allocation14_spill] sm:$0xff] }
 0x191   : > { %v18804_v60 = vcombine.low %v18802_v56, %v18803_v35 }
 0x197   : > { %13030 = vmatmul.mubr.bf16.vlgmr.msra.gmra.mrb[0].mxu0 %v11700_v49  ;;  %v18819_v49 = vcombine.low %v18817_v6, %v18818_v41  ;;  %v3918_v41 = vshll.u32 %v16105_v43, 16 }
 0x198   : > { %13062 = vmatpush3.bf16.msra.mxu0 %v15904_v11  ;;  %13033 = vmatprep.mubr.bf16.mxu0 %v11701_v12  ;;  %v3073_v11 = vrot.slane %v15730_v7, 5  ;;  %v14294_v12 = vld [vmem:[%s14741_s8 + $0x24] sm:$0xff]  }
 0x199   : > { %13063 = vmatprep.subr.bf16.mxu0 %v14286_v21 }
 0x19a   : > { %v3075_v2 = vrot.slane %v3073_v11, 4  ;;  %v3074_v7 = vsel %vm15106_vm5, %v11673_v48, %v3073_v11  ;;  %v11904_v11 = vrot.slane %v11888_v59, 9  ;;  %v16065_v48 = vld [vmem:[%s14741_s8 + $0x1c] sm:$0xf] }
 0x19b   : > { %v3908_v4 = vshll.u32 %v16065_v48, 16  ;;  %v3912_v8 = vshrl.u32 %v16065_v48, 16 }
 0x19c   : > { %13064 = vmatpush3.bf16.msra.mxu0 %v14286_v21  ;;  %v3077_v9 = vsel %vm15106_vm5, %v3075_v2, %v3076_v36  ;;  %v14297_v21 = vld [vmem:[%s14741_s8 + $0x3c] sm:$0xff]   ;;  %v16069_v2 = vsel %vm15106_vm5, %v11904_v11, %v4705_v54 }
 0x19d   : > { %13065 = vmatprep.subr.bf16.mxu0 %v14287_v57  ;;  %v11705_v47 = vcombine.low %v3074_v7, %v3077_v9  ;;  %18820 = vst [vmem:[#allocation12_spill] sm:$0xff] %v16069_v2  ;;  %v14302_v36 = vld [vmem:[%s14741_s8 + $0x60] sm:$0xff]   ;;  %v14310_v9 = vld [vmem:[%s18604_s1 + $0x1e8] sm:$0xff]   ;;  %v3914_v56 = vrot.slane %v3912_v8, 4  ;;  %v14308_v8 = vld [vmem:[%s14741_s8 + $0x90] sm:$0xff]  }
 0x19e   : > { %v14315_v2 = vld [vmem:[%s14741_s8 + $0xcc] sm:$0xff]  }
 0x19f   : > { %13034 = vmatmul.mubr.bf16.gmra.mrb[4].mxu0 %v11702_v39  ;;  %v4707_v39 = vrot.slane %v4705_v54, 4  ;;  %v16143_v54 = vld [vmem:[%s18604_s1 + $0x200] sm:$0xff]  }
 0x1a0   : > { %13037 = vmatprep.mubr.bf16.mxu0 %v11703_v22  ;;  %13066 = vmatpush3.bf16.msra.mxu0 %v14287_v57  ;;  %v14307_v57 = vld [vmem:[%s18604_s1 + $0x1e0] sm:$0xff]   ;;  %v14300_v22 = vld [vmem:[%s14741_s8 + $0x54] sm:$0xff]  }
 0x1a1   : > { %13067 = vmatprep.subr.bf16.mxu0 %v14288_v15  ;;  %v16075_v7 = vsel %vm15106_vm5, %v4707_v39, %v4708_v18  ;;  %v16146_v18 = vld [vmem:[%s14741_s8 + $0x34] sm:$0xf]  ;;  %v16152_v39 = vrot.slane %v3918_v41, 5 }
 0x1a2   : > { %18821 = vst [vmem:[#allocation15_spill] sm:$0xff] %v16075_v7  ;;  %v16346_v7 = vld [vmem:[%s14741_s8 + $0x64] sm:$0xf] }
 0x1a3   : > { %18836 = vst [vmem:[#allocation25_spill] sm:$0xff] %v16346_v7 }
 0x1a4   : > { %13068 = vmatpush3.bf16.msra.mxu0 %v14288_v15  ;;  %v11798_v15 = vld [vmem:[%s14741_s8 + $0x24] sm:$0xf] }
 0x1a5   : > { %13069 = vmatprep.subr.bf16.mxu0 %v14289_v20  ;;  %v3923_v62 = vshrl.u32 %v11798_v15, 16 }
 0x1a7   : > { %13038 = vmatmul.mubr.bf16.gmra.mrb[8].mxu0 %v18796_v25  ;;  %v16088_v25 = vld [vmem:[%s14741_s8 + $0x70] sm:$0xf]  ;;  %v3925_v63 = vrot.slane %v3923_v62, 4 }
 0x1a8   : > { %13041 = vmatprep.mubr.bf16.mxu0 %v11705_v47  ;;  %13070 = vmatpush3.bf16.msra.mxu0 %v14289_v20  ;;  %v16081_v20 = vld [vmem:[%s14741_s8 + $0x28] sm:$0xf]  ;;  %v3902_v47 = vshll.u32 %v11795_v23, 16 }
 0x1a9   : > { %13071 = vmatprep.subr.bf16.mxu0 %v14290_v13  ;;  %v3932_v3 = vshll.u32 %v16081_v20, 16 }
 0x1aa   : > { %v3904_v16 = vrot.slane %v3902_v47, 5  ;;  %v3950_v47 = vshll.u32 %v11801_v51, 16 }
 0x1ab   : > { %v16115_v40 = vrot.slane %v3932_v3, 5  ;;  %v3956_v3 = vshll.u32 %v16146_v18, 16 }
 0x1ac   : > { %13072 = vmatpush3.bf16.msra.mxu0 %v14290_v13  ;;  %v3926_v13 = vshll.u32 %v11798_v15, 16  ;;  %v14306_v15 = vld [vmem:[%s14741_s8 + $0x84] sm:$0xff]   ;;  %v3952_v41 = vrot.slane %v3950_v47, 5 }
 0x1ad   : > { %13073 = vmatprep.subr.bf16.mxu0 %v14291_v10 }
 0x1af   : > { %13042 = vmatmul.mubr.bf16.gmra.mrb[12].mxu0 %v18798_v14  ;;  %v14313_v14 = vld [vmem:[%s18604_s1 + $0x1f0] sm:$0xff]  }
 0x1b0   : > { %13045 = vmatprep.mubr.bf16.mxu0 %v11707_v34  ;;  %13074 = vmatpush3.bf16.msra.mxu0 %v14291_v10  ;;  %v3936_v10 = vshrl.u32 %v16081_v20, 16  ;;  %v11890_v34 = vld [vmem:[%s14741_s8 + $0x6c] sm:$0xe] }
 0x1b1   : > { %13075 = vmatprep.subr.bf16.mxu0 %v14292_v17  ;;  %v11906_v32 = vrot.slane %v11890_v34, 9  ;;  %v3960_v34 = vshrl.u32 %v16146_v18, 16 }
 0x1b2   : > { %v3938_v29 = vrot.slane %v3936_v10, 4 }
 0x1b4   : > { %13076 = vmatpush3.bf16.msra.mxu0 %v14292_v17  ;;  %v4719_v17 = vrot.slane %v16088_v25, 5 }
 0x1b5   : > { %13109 = vmatprep.subr.bf16.mxu0 %v14295_v44 }
 0x1b6   : > { %v4721_v35 = vrot.slane %v4719_v17, 4  ;;  %v16109_v33 = vsel %vm15106_vm5, %v11906_v32, %v4719_v17  ;;  %v16177_v17 = vld [vmem:[%s14741_s8 + $0x40] sm:$0xf]  ;;  %v16182_v32 = vld [vmem:[%s14741_s8 + $0x38] sm:$0x1] }
 0x1b7   : > { %13046 = vmatmul.mubr.bf16.gmra.mrb[16].mxu0 %v18801_v53  ;;  %v16101_v53 = vrot.slane %v3908_v4, 5  ;;  %18822 = vst [vmem:[#allocation13_spill] sm:$0xff] %v16109_v33 }
 0x1b8   : > { %13049 = vmatprep.mubr.bf16.mxu0 %v18804_v60  ;;  %v14303_v60 = vld [vmem:[%s14741_s8 + $0x6c] sm:$0xff]  }
 0x1b9   : > { %v3915_v6 = vor.u32 %v3914_v56, %v16101_v53  ;;  %v16188_v56 = vld [vmem:[%s14741_s8 + $0x98] sm:$0x1] }
 0x1bb   : > { %v16150_v23 = vrot.slane %v3915_v6, 4 }
 0x1bf   : > { %13050 = vmatmul.mubr.bf16.gmra.mrb[20].mxu0 %v18807_v38  ;;  %v3928_v38 = vrot.slane %v3926_v13, 5 }
 0x1c0   : > { %13053 = vmatprep.mubr.bf16.mxu0 %v18810_v26  ;;  %v16113_v26 = vld [vmem:[%s14741_s8 + $0x2c] sm:$0x1] }
 0x1c7   : > { %13054 = vmatmul.mubr.bf16.gmra.mrb[24].mxu0 %v18813_v52  ;;  %v16119_v52 = vsel %vm15106_vm5, %v4721_v35, %v4722_v58  ;;  %v16191_v35 = vld [vmem:[%s14741_s8 + $0xa0] sm:$0xf] }
 0x1c8   : > { %13057 = vmatprep.mubr.bf16.mxu0 %v18816_v45  ;;  %18823 = vst [vmem:[#allocation14_spill] sm:$0xff] %v16119_v52  ;;  %v11895_v45 = vld [vmem:[%s14741_s8 + $0xa8] sm:$0xe] }
 0x1cf   : > { %13058 = vmatmul.mubr.bf16.gmra.mrb[28].mxu0 %v18819_v49  ;;  %v3929_v49 = vor.u32 %v3928_v38, %v3925_v63  ;;  %v11893_v63 = vld [vmem:[%s14741_s8 + $0x90] sm:$0xe] }
 0x1d0   : > { %13077 = vmatprep.mubr.bf16.mxu0 %v14293_v1 }
 0x1d7   : > { %13078 = vmatmul.mubr.bf16.vlgmr.msra.gmra.mrb[0].mxu0 %v14294_v12  ;;  %v3942_v12 = vshll.u32 %v16113_v26, 16 }
 0x1d8   : > { %13110 = vmatpush3.bf16.msra.mxu0 %v14295_v44  ;;  %13081 = vmatprep.mubr.bf16.mxu0 %v14296_v37  ;;  %v3901_v44 = vrot.slane %v3899_v5, 4  ;;  %v16131_v37 = vld [vmem:[%s14741_s8 + $0x88] sm:$0xf] }
 0x1d9   : > { %13111 = vmatprep.subr.bf16.mxu0 %v14298_v30  ;;  %v16158_v5 = vrot.slane %v3942_v12, 5 }
 0x1da   : > { %v3905_v1 = vor.u32 %v3904_v16, %v3901_v44  ;;  %v16185_v16 = vld [vmem:[%s14741_s8 + $0x94] sm:$0xf]  ;;  %v16263_v44 = vld [vmem:[%s14741_s8 + $0xbc] sm:$0x1] }
 0x1db   : > { %v4740_v38 = vrot.slane %v16185_v16, 5 }
 0x1dc   : > { %13112 = vmatpush3.bf16.msra.mxu0 %v14298_v30  ;;  %v16134_v30 = vld [vmem:[%s14741_s8 + $0x8c] sm:$0x1]  ;;  %v16148_v11 = vrot.slane %v3905_v1, 4  ;;  %v4747_v1 = vrot.slane %v16191_v35, 5 }
 0x1dd   : > { %13113 = vmatprep.subr.bf16.mxu0 %v14301_v50  ;;  %v4736_v59 = vrot.slane %v16134_v30, 5  ;;  %v4742_v12 = vrot.slane %v4740_v38, 4 }
 0x1df   : > { %13082 = vmatmul.mubr.bf16.gmra.mrb[4].mxu0 %v14297_v21  ;;  %v3947_v21 = vshrl.u32 %v11801_v51, 16  ;;  %v11894_v51 = vld [vmem:[%s14741_s8 + $0x9c] sm:$0xe] }
 0x1e0   : > { %13085 = vmatprep.mubr.bf16.mxu0 %v14299_v31  ;;  %13114 = vmatpush3.bf16.msra.mxu0 %v14301_v50  ;;  %v3939_v50 = vor.u32 %v3938_v29, %v16115_v40  ;;  %v11892_v31 = vld [vmem:[%s14741_s8 + $0x84] sm:$0xe]  ;;  %v3980_v29 = vshll.u32 %v16177_v17, 16 }
 0x1e1   : > { %13115 = vmatprep.subr.bf16.mxu0 %v14304_v24  ;;  %v16167_v13 = vrot.slane %v3947_v21, 4  ;;  %v3962_v21 = vrot.slane %v3960_v34, 4 }
 0x1e2   : > { %v16165_v62 = vrot.slane %v3939_v50, 4  ;;  %v11910_v50 = vrot.slane %v11894_v51, 9  ;;  %v16239_v51 = vld [vmem:[%s14741_s8 + $0x4c] sm:$0xf] }
 0x1e4   : > { %13116 = vmatpush3.bf16.msra.mxu0 %v14304_v24  ;;  %v4733_v24 = vrot.slane %v16131_v37, 5 }
 0x1e5   : > { %13117 = vmatprep.subr.bf16.mxu0 %v14307_v57 }
 0x1e7   : > { %13086 = vmatmul.mubr.bf16.gmra.mrb[8].mxu0 %v14300_v22  ;;  %v11804_v22 = vld [vmem:[%s14741_s8 + $0x3c] sm:$0xf] }
 0x1e8   : > { %13089 = vmatprep.mubr.bf16.mxu0 %v14302_v36  ;;  %13118 = vmatpush3.bf16.msra.mxu0 %v14307_v57  ;;  %v11908_v57 = vrot.slane %v11892_v31, 9  ;;  %v4735_v36 = vrot.slane %v4733_v24, 4  ;;  %v3971_v58 = vshrl.u32 %v11804_v22, 16  ;;  %v16206_v31 = vld [vmem:[%s14741_s8 + $0x44] sm:$0x1] }
 0x1e9   : > { %13119 = vmatprep.subr.bf16.mxu0 %v14310_v9  ;;  %18826 = vst [vmem:[#allocation10_spill] sm:$0xff] %v16206_v31 }
 0x1ea   : > { %v16162_v4 = vsel %vm15106_vm5, %v11908_v57, %v4733_v24  ;;  %v16172_v10 = vsel %vm15106_vm5, %v4735_v36, %v4736_v59  ;;  %v11807_v24 = vld [vmem:[%s14741_s8 + $0x48] sm:$0xf]  ;;  %v4749_v57 = vrot.slane %v4747_v1, 4  ;;  %v3966_v36 = vshll.u32 %v16182_v32, 16 }
 0x1eb   : > { %18824 = vst [vmem:[#allocation16_spill] sm:$0xff] %v16162_v4  ;;  %18825 = vst [vmem:[#allocation17_spill] sm:$0xff] %v16172_v10 }
 0x1ec   : > { %13120 = vmatpush3.bf16.msra.mxu0 %v14310_v9  ;;  %v16156_v9 = vrot.slane %v3929_v49, 4  ;;  %v16203_v49 = vrot.slane %v3956_v3, 5  ;;  %v14311_v3 = vld [vmem:[%s14741_s8 + $0xa8] sm:$0xff]  }
 0x1ed   : > { %13121 = vmatprep.subr.bf16.mxu0 %v14313_v14 }
 0x1ef   : > { %13090 = vmatmul.mubr.bf16.gmra.mrb[12].mxu0 %v14303_v60  ;;  %v16194_v60 = vld [vmem:[%s14741_s8 + $0xa4] sm:$0x1] }
 0x1f0   : > { %13093 = vmatprep.mubr.bf16.mxu0 %v14305_v19  ;;  %13122 = vmatpush3.bf16.msra.mxu0 %v14313_v14  ;;  %v3974_v14 = vshll.u32 %v11804_v22, 16  ;;  %v4743_v19 = vrot.slane %v16188_v56, 5  ;;  %v4750_v6 = vrot.slane %v16194_v60, 5  ;;  %v14309_v22 = vld [vmem:[%s14741_s8 + $0x9c] sm:$0xff]  }
 0x1f1   : > { %13123 = vmatprep.subr.bf16.mxu0 %v14316_v28 }
 0x1f2   : > { %v16219_v47 = vsel %vm15106_vm5, %v4742_v12, %v4743_v19  ;;  %v16226_v34 = vrot.slane %v3974_v14, 5  ;;  %v3984_v19 = vshrl.u32 %v16177_v17, 16  ;;  %v3953_v12 = vor.u32 %v3952_v41, %v16167_v13 }
 0x1f3   : > { %18828 = vst [vmem:[#allocation9_spill] sm:$0xff] %v16219_v47  ;;  %v3921_v14 = vsel %vm14776_vm2, %v16150_v23, %v16152_v39  ;;  %v3998_v13 = vshll.u32 %v11807_v24, 16  ;;  %v11911_v41 = vrot.slane %v11895_v45, 9  ;;  %v4004_v23 = vshll.u32 %v16239_v51, 16 }
 0x1f4   : > { %13124 = vmatpush3.bf16.msra.mxu0 %v14316_v28  ;;  %v11909_v28 = vrot.slane %v11893_v63, 9  ;;  %v16228_v63 = vrot.slane %v3980_v29, 5  ;;  %v3911_v29 = vsel %vm14776_vm2, %v16148_v11, %v16101_v53  ;;  %v4008_v39 = vshrl.u32 %v16239_v51, 16 }
 0x1f5   : > { %13157 = vmatprep.subr.bf16.mxu0 %v16143_v54  ;;  %v16273_v47 = vrot.slane %v3953_v12, 4  ;;  %v3986_v4 = vrot.slane %v3984_v19, 4 }
 0x1f6   : > { %v16211_v59 = vsel %vm15106_vm5, %v11909_v28, %v4740_v38  ;;  %v16234_v38 = vsel %vm15106_vm5, %v4749_v57, %v4750_v6  ;;  %v3990_v28 = vshll.u32 %v16206_v31, 16  ;;  %v16249_v6 = vld [vmem:[%s14741_s8 + $0xac] sm:$0xf]  ;;  %v16255_v57 = vld [vmem:[%s14741_s8 + $0xb8] sm:$0xf]  ;;  %v4028_v31 = vshll.u32 %v16051_v61, 16 }
 0x1f7   : > { %13094 = vmatmul.mubr.bf16.gmra.mrb[16].mxu0 %v14306_v15  ;;  %18827 = vst [vmem:[#allocation11_spill] sm:$0xff] %v16211_v59  ;;  %v16215_v15 = vrot.slane %v3971_v58, 4  ;;  %18830 = vst [vmem:[#allocation19_spill] sm:$0xff] %v16234_v38  ;;  %v3963_v58 = vor.u32 %v3962_v21, %v16203_v49  ;;  %v4754_v53 = vrot.slane %v16249_v6, 5  ;;  %v4764_v38 = vrot.slane %v16263_v44, 5 }
 0x1f8   : > { %13097 = vmatprep.mubr.bf16.mxu0 %v14308_v8  ;;  %v16223_v8 = vsel %vm15106_vm5, %v11910_v50, %v4747_v1  ;;  %v3995_v1 = vshrl.u32 %v11807_v24, 16  ;;  %v16252_v50 = vld [vmem:[%s14741_s8 + $0xb0] sm:$0x1]  ;;  %v16275_v59 = vrot.slane %v3966_v36, 5  ;;  %v14314_v36 = vld [vmem:[%s14741_s8 + $0xc0] sm:$0xff]   ;;  %v16293_v12 = vrot.slane %v3990_v28, 5 }
 0x1f9   : > { %18829 = vst [vmem:[#allocation18_spill] sm:$0xff] %v16223_v8  ;;  %v4757_v11 = vrot.slane %v16252_v50, 5  ;;  %v4756_v21 = vrot.slane %v4754_v53, 4  ;;  %v11912_v8 = vrot.slane %v11896_v27, 9  ;;  %v16279_v45 = vsel %vm15106_vm5, %v11911_v41, %v4754_v53  ;;  %v11810_v41 = vld [vmem:[%s14741_s8 + $0x54] sm:$0xf] }
 0x1fa   : > { %18831 = vst [vmem:[#allocation20_spill] sm:$0xff] %v16279_v45  ;;  %v16282_v10 = vrot.slane %v3963_v58, 4  ;;  %v3997_v53 = vrot.slane %v3995_v1, 4  ;;  %v11859_v1 = vcombine.low %v3911_v29, %v3921_v14  ;;  %v3935_v58 = vsel %vm14776_vm2, %v16156_v9, %v16115_v40  ;;  %v16334_v14 = vld [vmem:[%s14741_s8 + $0xd4] sm:$0x1] }
 0x1fb   : > { %v16286_v52 = vsel %vm15106_vm5, %v4756_v21, %v4757_v11  ;;  %v16303_v11 = vld [vmem:[%s14741_s8 + $0x50] sm:$0x1]  ;;  %v4010_v21 = vrot.slane %v4008_v39, 4  ;;  %v16323_v39 = vld [vmem:[%s14741_s8 + $0xc8] sm:$0x1]  ;;  %v3959_v40 = vsel %vm14776_vm2, %v16273_v47, %v16203_v49  ;;  %v3987_v9 = vor.u32 %v3986_v4, %v16228_v63 }
 0x1fc   : > { %18832 = vst [vmem:[#allocation21_spill] sm:$0xff] %v16286_v52  ;;  %18835 = vst [vmem:[#allocation24_spill] sm:$0xff] %v16303_v11  ;;  %v4014_v4 = vshll.u32 %v16303_v11, 16  ;;  %v11813_v47 = vld [vmem:[%s14741_s8 + $0x60] sm:$0xf]  ;;  %v4022_v33 = vshll.u32 %v11810_v41, 16 }
 0x1ff   : > { %13098 = vmatmul.mubr.bf16.gmra.mrb[20].mxu0 %v14309_v22  ;;  %v4761_v22 = vrot.slane %v16255_v57, 5 }
 0x200   : > { %13101 = vmatprep.mubr.bf16.mxu0 %v14311_v3  ;;  %v14312_v3 = vld [vmem:[%s14741_s8 + $0xb4] sm:$0xff]  }
 0x201   : > { %v4763_v24 = vrot.slane %v4761_v22, 4  ;;  %v16290_v27 = vsel %vm15106_vm5, %v11912_v8, %v4761_v22  ;;  %v4000_v8 = vrot.slane %v3998_v13, 5  ;;  %v16305_v22 = vrot.slane %v4004_v23, 5  ;;  %v16320_v23 = vld [vmem:[%s14741_s8 + $0xc4] sm:$0xf] }
 0x202   : > { %18833 = vst [vmem:[#allocation22_spill] sm:$0xff] %v16290_v27  ;;  %v3977_v13 = vor.u32 %v16226_v34, %v16215_v15  ;;  %v4771_v15 = vrot.slane %v16323_v39, 5  ;;  %v4019_v34 = vshrl.u32 %v11810_v41, 16 }
 0x203   : > { %v16300_v19 = vsel %vm15106_vm5, %v4763_v24, %v4764_v38  ;;  %v3945_v38 = vsel %vm14776_vm2, %v16165_v62, %v16158_v5  ;;  %v16326_v24 = vld [vmem:[%s14741_s8 + $0xd0] sm:$0xf]  ;;  %v11897_v5 = vld [vmem:[%s14741_s8 + $0xc0] sm:$0xe]  ;;  %v4768_v62 = vrot.slane %v16320_v23, 5  ;;  %v4001_v49 = vor.u32 %v4000_v8, %v3997_v53 }
 0x204   : > { %18834 = vst [vmem:[#allocation23_spill] sm:$0xff] %v16300_v19  ;;  %v11913_v29 = vrot.slane %v11897_v5, 9  ;;  %v4775_v28 = vrot.slane %v16326_v24, 5  ;;  %v4778_v19 = vrot.slane %v16334_v14, 5  ;;  %v4011_v45 = vor.u32 %v4010_v21, %v16305_v22 }
 0x205   : > { %v4770_v27 = vrot.slane %v4768_v62, 4  ;;  %v4032_v53 = vshrl.u32 %v16051_v61, 16  ;;  %v4043_v21 = vshrl.u32 %v11813_v47, 16  ;;  %v3969_v61 = vsel %vm14776_vm2, %v16282_v10, %v16275_v59 }
 0x206   : > { %v4777_v5 = vrot.slane %v4775_v28, 4  ;;  %v4024_v10 = vrot.slane %v4022_v33, 5  ;;  %v16384_v59 = vrot.slane %v4028_v31, 5  ;;  %v4076_v31 = vshll.u32 %v16088_v25, 16 }
 0x207   : > { %13102 = vmatmul.mubr.bf16.gmra.mrb[24].mxu0 %v14312_v3  ;;  %v11898_v3 = vld [vmem:[%s14741_s8 + $0xcc] sm:$0xe]  ;;  %v16357_v8 = vsel %vm15106_vm5, %v4770_v27, %v4771_v15  ;;  %v16373_v27 = vrot.slane %v3977_v13, 4  ;;  %v4052_v15 = vshll.u32 %v16346_v7, 16  ;;  %v4034_v13 = vrot.slane %v4032_v53, 4 }
 0x208   : > { %13105 = vmatprep.mubr.bf16.mxu0 %v14314_v36  ;;  %v11914_v52 = vrot.slane %v11898_v3, 9  ;;  %v16350_v36 = vsel %vm15106_vm5, %v11913_v29, %v4768_v62  ;;  %18838 = vst [vmem:[#allocation27_spill] sm:$0xff] %v16357_v8  ;;  %v4046_v3 = vshll.u32 %v11813_v47, 16  ;;  %v16367_v29 = vsel %vm15106_vm5, %v4777_v5, %v4778_v19  ;;  %v11816_v5 = vld [vmem:[%s14741_s8 + $0x6c] sm:$0xf] }
 0x209   : > { %18837 = vst [vmem:[#allocation26_spill] sm:$0xff] %v16350_v36  ;;  %18840 = vst [vmem:[#allocation29_spill] sm:$0xff] %v16367_v29  ;;  %v16380_v47 = vrot.slane %v4014_v4, 5  ;;  %v4021_v62 = vrot.slane %v4019_v34, 4  ;;  %v4056_v19 = vshrl.u32 %v16346_v7, 16  ;;  %v4002_v8 = vrot.slane %v4001_v49, 4 }
 0x20a   : > { %v16361_v41 = vsel %vm15106_vm5, %v11914_v52, %v4775_v28  ;;  %v16378_v28 = vrot.slane %v3987_v9, 4  ;;  %v4012_v36 = vrot.slane %v4011_v45, 4  ;;  %v4038_v52 = vshll.u32 %v16054_v55, 16  ;;  %v16388_v34 = vld [vmem:[%s14741_s8 + $0x68] sm:$0x1] }
 0x20b   : > { %18839 = vst [vmem:[#allocation28_spill] sm:$0xff] %v16361_v41  ;;  %v4045_v9 = vrot.slane %v4043_v21, 4  ;;  %v4048_v29 = vrot.slane %v4046_v3, 5  ;;  %v11860_v4 = vcombine.low %v3935_v58, %v3945_v38  ;;  %v11861_v41 = vcombine.low %v3959_v40, %v3969_v61  ;;  %v16406_v21 = vld [vmem:[%s14741_s8 + $0x7c] sm:$0xf] }
 0x20c   : > { %v16390_v7 = vrot.slane %v4052_v15, 5  ;;  %v4067_v11 = vshrl.u32 %v11816_v5, 16  ;;  %v4058_v49 = vrot.slane %v4056_v19, 4  ;;  %v4070_v33 = vshll.u32 %v11816_v5, 16  ;;  %v11822_v5 = vld [vmem:[%s14741_s8 + $0x84] sm:$0xf] }
 0x20d   : > { %v3983_v55 = vsel %vm14776_vm2, %v16373_v27, %v16228_v63  ;;  %v3993_v45 = vsel %vm14776_vm2, %v16378_v28, %v16293_v12  ;;  %v4025_v58 = vor.u32 %v4024_v10, %v4021_v62  ;;  %v4035_v38 = vor.u32 %v4034_v13, %v16384_v59  ;;  %v14318_v63 = vld [vmem:[%s18604_s1 + $0x208] sm:$0xff]  }
 0x20e   : > { %v4049_v40 = vor.u32 %v4048_v29, %v4045_v9  ;;  %v4062_v53 = vshll.u32 %v16388_v34, 16  ;;  %v4007_v61 = vsel %vm14776_vm2, %v4002_v8, %v16305_v22  ;;  %v4017_v12 = vsel %vm14776_vm2, %v4012_v36, %v16380_v47  ;;  %v14319_v47 = vld [vmem:[%s18604_s1 + $0x210] sm:$0xff]  }
 0x20f   : > { %13106 = vmatmul.mubr.bf16.gmra.mrb[28].mxu0 %v14315_v2  ;;  %v11819_v2 = vld [vmem:[%s14741_s8 + $0x78] sm:$0xf]  ;;  %v16417_v62 = vrot.slane %v4038_v52, 5  ;;  %v4069_v29 = vrot.slane %v4067_v11, 4  ;;  %v4059_v27 = vor.u32 %v4058_v49, %v16390_v7  ;;  %v4072_v15 = vrot.slane %v4070_v33, 5 }
 0x210   : > { %13125 = vmatprep.mubr.bf16.mxu0 %v11859_v1  ;;  %v4080_v1 = vshrl.u32 %v16088_v25, 16  ;;  %v4091_v25 = vshrl.u32 %v11819_v2, 16  ;;  %v4094_v3 = vshll.u32 %v11819_v2, 16  ;;  %v16420_v28 = vrot.slane %v4076_v31, 5 }
 0x211   : > { %v4026_v10 = vrot.slane %v4025_v58, 4  ;;  %v4036_v13 = vrot.slane %v4035_v38, 4  ;;  %v4100_v9 = vshll.u32 %v16406_v21, 16  ;;  %v4104_v22 = vshrl.u32 %v16406_v21, 16 }
 0x212   : > { %v4082_v19 = vrot.slane %v4080_v1, 4  ;;  %v4050_v36 = vrot.slane %v4049_v40, 4  ;;  %v4064_v8 = vrot.slane %v4062_v53, 5  ;;  %v4093_v11 = vrot.slane %v4091_v25, 4 }
 0x213   : > { %v4096_v52 = vrot.slane %v4094_v3, 5  ;;  %v4115_v2 = vshrl.u32 %v11822_v5, 16  ;;  %v4124_v49 = vshll.u32 %v16131_v37, 16  ;;  %v4128_v33 = vshrl.u32 %v16131_v37, 16 }
 0x214   : > { %v4060_v31 = vrot.slane %v4059_v27, 4  ;;  %v4086_v1 = vshll.u32 %v16091_v42, 16  ;;  %v11862_v58 = vcombine.low %v3983_v55, %v3993_v45  ;;  %v11863_v38 = vcombine.low %v4007_v61, %v4017_v12  ;;  %v11825_v55 = vld [vmem:[%s14741_s8 + $0x90] sm:$0xf]  ;;  %v14320_v45 = vld [vmem:[%s18604_s1 + $0x218] sm:$0xff]  }
 0x215   : > { %v16433_v40 = vrot.slane %v4100_v9, 5  ;;  %v4106_v53 = vrot.slane %v4104_v22, 4  ;;  %v4031_v25 = vsel %vm14776_vm2, %v4026_v10, %v16384_v59  ;;  %v4041_v37 = vsel %vm14776_vm2, %v4036_v13, %v16417_v62 }
 0x216   : > { %v4055_v3 = vsel %vm14776_vm2, %v4050_v36, %v16390_v7  ;;  %v4097_v42 = vor.u32 %v4096_v52, %v4093_v11  ;;  %v16451_v59 = vrot.slane %v4124_v49, 5  ;;  %v4130_v12 = vrot.slane %v4128_v33, 4 }
 0x217   : > { %13126 = vmatmul.mubr.bf16.vlgmr.msra.gmra.mrb[0].mxu0 %v11860_v4  ;;  %v4118_v4 = vshll.u32 %v11822_v5, 16  ;;  %v4065_v62 = vsel %vm14776_vm2, %v4060_v31, %v4064_v8  ;;  %v4088_v7 = vrot.slane %v4086_v1, 5  ;;  %v4139_v10 = vshrl.u32 %v11825_v55, 16 }
 0x218   : > { %13158 = vmatpush3.bf16.msra.mxu0 %v16143_v54  ;;  %13129 = vmatprep.mubr.bf16.mxu0 %v11861_v41  ;;  %v4073_v54 = vor.u32 %v4072_v15, %v4069_v29  ;;  %v4083_v41 = vor.u32 %v4082_v19, %v16420_v28  ;;  %v16445_v29 = vld [vmem:[%s14741_s8 + $0x80] sm:$0x1]  ;;  %v4107_v19 = vor.u32 %v4106_v53, %v16433_v40  ;;  %v4142_v13 = vshll.u32 %v11825_v55, 16  ;;  %v14322_v55 = vld [vmem:[%s18604_s1 + $0x228] sm:$0xff]  }
 0x219   : > { %13159 = vmatprep.subr.bf16.mxu0 %v14318_v63  ;;  %v4120_v61 = vrot.slane %v4118_v4, 5  ;;  %v4110_v5 = vshll.u32 %v16445_v29, 16  ;;  %v4148_v9 = vshll.u32 %v16185_v16, 16  ;;  %v4152_v22 = vshrl.u32 %v16185_v16, 16  ;;  %v11828_v4 = vld [vmem:[%s14741_s8 + $0x9c] sm:$0xf] }
 0x21a   : > { %v4074_v27 = vrot.slane %v4073_v54, 4  ;;  %v4084_v15 = vrot.slane %v4083_v41, 4  ;;  %v4098_v36 = vrot.slane %v4097_v42, 4  ;;  %v4131_v11 = vor.u32 %v4130_v12, %v16451_v59 }
 0x21b   : > { %v4134_v52 = vshll.u32 %v16134_v30, 16  ;;  %v11864_v49 = vcombine.low %v4031_v25, %v4041_v37  ;;  %v11865_v33 = vcombine.low %v4055_v3, %v4065_v62  ;;  %v4108_v31 = vrot.slane %v4107_v19, 4 }
 0x21c   : > { %13160 = vmatpush3.bf16.msra.mxu0 %v14318_v63  ;;  %v4117_v63 = vrot.slane %v4115_v2, 4  ;;  %v14321_v2 = vld [vmem:[%s18604_s1 + $0x220] sm:$0xff]   ;;  %v4089_v16 = vsel %vm14776_vm2, %v4084_v15, %v4088_v7  ;;  %v4112_v54 = vrot.slane %v4110_v5, 5  ;;  %v4141_v41 = vrot.slane %v4139_v10, 4 }
 0x21d   : > { %13161 = vmatprep.subr.bf16.mxu0 %v14319_v47  ;;  %v4144_v1 = vrot.slane %v4142_v13, 5  ;;  %v16471_v30 = vrot.slane %v4148_v9, 5  ;;  %v4163_v53 = vshrl.u32 %v11828_v4, 16  ;;  %v4166_v42 = vshll.u32 %v11828_v4, 16 }
 0x21e   : > { %v4121_v8 = vor.u32 %v4120_v61, %v4117_v63  ;;  %v4103_v25 = vsel %vm14776_vm2, %v4098_v36, %v16433_v40  ;;  %v4136_v3 = vrot.slane %v4134_v52, 5  ;;  %v4172_v63 = vshll.u32 %v16191_v35, 16 }
 0x21f   : > { %13130 = vmatmul.mubr.bf16.gmra.mrb[4].mxu0 %v11862_v58  ;;  %v11831_v58 = vld [vmem:[%s14741_s8 + $0xa8] sm:$0xf]  ;;  %v4113_v62 = vsel %vm14776_vm2, %v4108_v31, %v4112_v54  ;;  %v4158_v40 = vshll.u32 %v16188_v56, 16  ;;  %v4200_v15 = vshrl.u32 %v16249_v6, 16  ;;  %v4145_v7 = vor.u32 %v4144_v1, %v4141_v41  ;;  %v14324_v54 = vld [vmem:[%s18604_s1 + $0x238] sm:$0xff]  }
 0x220   : > { %13133 = vmatprep.mubr.bf16.mxu0 %v11863_v38  ;;  %13162 = vmatpush3.bf16.msra.mxu0 %v14319_v47  ;;  %v4079_v47 = vsel %vm14776_vm2, %v4074_v27, %v16420_v28  ;;  %v4154_v38 = vrot.slane %v4152_v22, 4  ;;  %v4122_v37 = vrot.slane %v4121_v8, 4  ;;  %v4132_v28 = vrot.slane %v4131_v11, 4 }
 0x221   : > { %13163 = vmatprep.subr.bf16.mxu0 %v14320_v45  ;;  %v4187_v61 = vshrl.u32 %v11831_v58, 16  ;;  %v4190_v12 = vshll.u32 %v11831_v58, 16  ;;  %v4196_v27 = vshll.u32 %v16249_v6, 16  ;;  %v4165_v5 = vrot.slane %v4163_v53, 4  ;;  %v14323_v6 = vld [vmem:[%s18604_s1 + $0x230] sm:$0xff]  }
 0x222   : > { %v4155_v19 = vor.u32 %v4154_v38, %v16471_v30  ;;  %v11866_v10 = vcombine.low %v4079_v47, %v4089_v16  ;;  %v4127_v13 = vsel %vm14776_vm2, %v4122_v37, %v16451_v59  ;;  %v4137_v56 = vsel %vm14776_vm2, %v4132_v28, %v4136_v3  ;;  %v11834_v59 = vld [vmem:[%s14741_s8 + $0xb4] sm:$0xf]  ;;  %v11837_v53 = vld [vmem:[%s14741_s8 + $0xc0] sm:$0xf] }
 0x223   : > { %v16495_v9 = vrot.slane %v4172_v63, 5  ;;  %v4189_v36 = vrot.slane %v4187_v61, 4  ;;  %v4192_v8 = vrot.slane %v4190_v12, 5  ;;  %v11867_v11 = vcombine.low %v4103_v25, %v4113_v62 }
 0x224   : > { %13164 = vmatpush3.bf16.msra.mxu0 %v14320_v45  ;;  %v4176_v45 = vshrl.u32 %v16191_v35, 16  ;;  %v4168_v35 = vrot.slane %v4166_v42, 5  ;;  %v4160_v52 = vrot.slane %v4158_v40, 5  ;;  %v4202_v4 = vrot.slane %v4200_v15, 4 }
 0x225   : > { %13165 = vmatprep.subr.bf16.mxu0 %v14321_v2  ;;  %v4182_v16 = vshll.u32 %v16194_v60, 16  ;;  %v11868_v31 = vcombine.low %v4127_v13, %v4137_v56  ;;  %v4193_v1 = vor.u32 %v4192_v8, %v4189_v36  ;;  %v4206_v58 = vshll.u32 %v16252_v50, 16 }
 0x226   : > { %v4178_v22 = vrot.slane %v4176_v45, 4  ;;  %v4169_v47 = vor.u32 %v4168_v35, %v4165_v5  ;;  %v4211_v38 = vshrl.u32 %v11834_v59, 16  ;;  %v4214_v25 = vshll.u32 %v11834_v59, 16 }
 0x227   : > { %13134 = vmatmul.mubr.bf16.gmra.mrb[8].mxu0 %v11864_v49  ;;  %v4146_v49 = vrot.slane %v4145_v7, 4  ;;  %v4220_v60 = vshll.u32 %v16255_v57, 16  ;;  %v4224_v37 = vshrl.u32 %v16255_v57, 16  ;;  %v4184_v50 = vrot.slane %v4182_v16, 5 }
 0x228   : > { %13137 = vmatprep.mubr.bf16.mxu0 %v11865_v33  ;;  %13166 = vmatpush3.bf16.msra.mxu0 %v14321_v2  ;;  %v16497_v2 = vrot.slane %v4196_v27, 5  ;;  %v4156_v33 = vrot.slane %v4155_v19, 4  ;;  %v4179_v41 = vor.u32 %v4178_v22, %v16495_v9  ;;  %v4235_v63 = vshrl.u32 %v11837_v53, 16 }
 0x229   : > { %13167 = vmatprep.subr.bf16.mxu0 %v14322_v55  ;;  %v4151_v28 = vsel %vm14776_vm2, %v4146_v49, %v16471_v30  ;;  %v4238_v45 = vshll.u32 %v11837_v53, 16  ;;  %v4244_v61 = vshll.u32 %v16320_v23, 16  ;;  %v4248_v12 = vshrl.u32 %v16320_v23, 16 }
 0x22a   : > { %v4203_v42 = vor.u32 %v4202_v4, %v16497_v2  ;;  %v4161_v3 = vsel %vm14776_vm2, %v4156_v33, %v4160_v52  ;;  %v4180_v57 = vrot.slane %v4179_v41, 4  ;;  %v4194_v62 = vrot.slane %v4193_v1, 4 }
 0x22b   : > { %v4208_v40 = vrot.slane %v4206_v58, 5  ;;  %v4213_v27 = vrot.slane %v4211_v38, 4  ;;  %v4216_v30 = vrot.slane %v4214_v25, 5  ;;  %v4222_v7 = vrot.slane %v4220_v60, 5 }
 0x22c   : > { %13168 = vmatpush3.bf16.msra.mxu0 %v14322_v55  ;;  %v4170_v55 = vrot.slane %v4169_v47, 4  ;;  %v4204_v15 = vrot.slane %v4203_v42, 4  ;;  %v4226_v19 = vrot.slane %v4224_v37, 4  ;;  %v11869_v5 = vcombine.low %v4151_v28, %v4161_v3 }
 0x22d   : > { %13169 = vmatprep.subr.bf16.mxu0 %v14323_v6  ;;  %v4237_v35 = vrot.slane %v4235_v63, 4  ;;  %v4246_v13 = vrot.slane %v4244_v61, 5  ;;  %v4250_v56 = vrot.slane %v4248_v12, 4  ;;  %v4185_v22 = vsel %vm14776_vm2, %v4180_v57, %v4184_v50  ;;  %v11883_v61 = vld [vmem:[%s14741_s8 + $0x18] sm:$0xe] }
 0x22e   : > { %v4175_v23 = vsel %vm14776_vm2, %v4170_v55, %v16495_v9  ;;  %v4230_v36 = vshll.u32 %v16263_v44, 16  ;;  %v4199_v8 = vsel %vm14776_vm2, %v4194_v62, %v16497_v2  ;;  %v4217_v52 = vor.u32 %v4216_v30, %v4213_v27 }
 0x22f   : > { %13138 = vmatmul.mubr.bf16.gmra.mrb[12].mxu0 %v11866_v10  ;;  %v4240_v10 = vrot.slane %v4238_v45, 5  ;;  %v4227_v4 = vor.u32 %v4226_v19, %v4222_v7  ;;  %v4268_v9 = vshll.u32 %v16326_v24, 16  ;;  %v4272_v33 = vshrl.u32 %v16326_v24, 16 }
 0x230   : > { %13141 = vmatprep.mubr.bf16.mxu0 %v11867_v11  ;;  %13170 = vmatpush3.bf16.msra.mxu0 %v14323_v6  ;;  %v11840_v6 = vld [vmem:[%s14741_s8 + $0xcc] sm:$0xf]  ;;  %v4209_v11 = vsel %vm14776_vm2, %v4204_v15, %v4208_v40  ;;  %v4251_v16 = vor.u32 %v4250_v56, %v4246_v13  ;;  %v4254_v44 = vshll.u32 %v16323_v39, 16  ;;  %v4218_v41 = vrot.slane %v4217_v52, 4 }
 0x231   : > { %13171 = vmatprep.subr.bf16.mxu0 %v14324_v54  ;;  %v4259_v59 = vshrl.u32 %v11840_v6, 16  ;;  %v4262_v49 = vshll.u32 %v11840_v6, 16  ;;  %v4241_v47 = vor.u32 %v4240_v10, %v4237_v35  ;;  %v4228_v2 = vrot.slane %v4227_v4, 4  ;;  %v11884_v10 = vld [vmem:[%s14741_s8 + $0x24] sm:$0xe] }
 0x232   : > { %v4232_v1 = vrot.slane %v4230_v36, 5  ;;  %v4270_v53 = vrot.slane %v4268_v9, 5  ;;  %v4274_v42 = vrot.slane %v4272_v33, 4  ;;  %v4252_v60 = vrot.slane %v4251_v16, 4 }
 0x233   : > { %v4261_v58 = vrot.slane %v4259_v59, 4  ;;  %v4264_v38 = vrot.slane %v4262_v49, 5  ;;  %v4242_v25 = vrot.slane %v4241_v47, 4  ;;  %v4256_v37 = vrot.slane %v4254_v44, 5  ;;  %v11886_v49 = vld [vmem:[%s14741_s8 + $0x3c] sm:$0xe] }
 0x234   : > { %13172 = vmatpush3.bf16.msra.mxu0 %v14324_v54  ;;  %v11871_v54 = vcombine.low %v4199_v8, %v4209_v11  ;;  %v4223_v24 = vsel %vm14776_vm2, %v4218_v41, %v4222_v7  ;;  %v4233_v39 = vsel %vm14776_vm2, %v4228_v2, %v4232_v1  ;;  %v4275_v3 = vor.u32 %v4274_v42, %v4270_v53  ;;  %v18843_v42 = vld [vmem:[#allocation25_spill] sm:$0xff] }
 0x235   : > { %v4265_v28 = vor.u32 %v4264_v38, %v4261_v58  ;;  %v4278_v55 = vshll.u32 %v16334_v14, 16  ;;  %v4247_v50 = vsel %vm14776_vm2, %v4242_v25, %v4246_v13  ;;  %v4257_v63 = vsel %vm14776_vm2, %v4252_v60, %v4256_v37  ;;  %v11889_v60 = vld [vmem:[%s14741_s8 + $0x60] sm:$0xe] }
 0x236   : > { %v4670_v45 = vrot.slane %v16065_v48, 5  ;;  %v11872_v12 = vcombine.low %v4223_v24, %v4233_v39  ;;  %v11873_v57 = vcombine.low %v4247_v50, %v4257_v63  ;;  %v4276_v40 = vrot.slane %v4275_v3, 4 }
 0x237   : > { %13142 = vmatmul.mubr.bf16.gmra.mrb[16].mxu0 %v11868_v31  ;;  %v11870_v31 = vcombine.low %v4175_v23, %v4185_v22  ;;  %v4266_v62 = vrot.slane %v4265_v28, 4  ;;  %v4280_v27 = vrot.slane %v4278_v55, 5  ;;  %v11899_v15 = vrot.slane %v11883_v61, 9 }
 0x238   : > { %13145 = vmatprep.mubr.bf16.mxu0 %v11869_v5  ;;  %v4672_v30 = vrot.slane %v4670_v45, 4  ;;  %v4673_v14 = vrot.slane %v16105_v43, 5  ;;  %v4677_v19 = vrot.slane %v16081_v20, 5  ;;  %v4684_v13 = vrot.slane %v16146_v18, 5  ;;  %v11885_v43 = vld [vmem:[%s14741_s8 + $0x30] sm:$0xe] }
 0x239   : > { %v4271_v7 = vsel %vm14776_vm2, %v4266_v62, %v4270_v53  ;;  %v4281_v48 = vsel %vm14776_vm2, %v4276_v40, %v4280_v27  ;;  %v4671_v5 = vsel %vm15106_vm5, %v11899_v15, %v4670_v45  ;;  %v11900_v23 = vrot.slane %v11884_v10, 9  ;;  %v11891_v45 = vld [vmem:[%s14741_s8 + $0x78] sm:$0xe]  ;;  %v18844_v40 = vld [vmem:[#allocation12_spill] sm:$0xff]  ;;  %v18845_v27 = vld [vmem:[#allocation15_spill] sm:$0xff] }
 0x23a   : > { %v4674_v35 = vsel %vm15106_vm5, %v4672_v30, %v4673_v14  ;;  %v11874_v56 = vcombine.low %v4271_v7, %v4281_v48  ;;  %v4679_v22 = vrot.slane %v4677_v19, 4  ;;  %v4680_v36 = vrot.slane %v16113_v26, 5  ;;  %v18847_v7 = vld [vmem:[#allocation13_spill] sm:$0xff] }
 0x23b   : > { %v11931_v6 = vcombine.low %v4671_v5, %v4674_v35  ;;  %v11901_v8 = vrot.slane %v11885_v43, 9  ;;  %v4686_v20 = vrot.slane %v4684_v13, 4  ;;  %v4687_v11 = vrot.slane %v16182_v32, 5  ;;  %v11887_v32 = vld [vmem:[%s14741_s8 + $0x48] sm:$0xe]  ;;  %v18851_v5 = vld [vmem:[#allocation17_spill] sm:$0xff] }
 0x23c   : > { %v4678_v52 = vsel %vm15106_vm5, %v11900_v23, %v4677_v19  ;;  %v4681_v18 = vsel %vm15106_vm5, %v4679_v22, %v4680_v36  ;;  %v4691_v4 = vrot.slane %v16177_v17, 5  ;;  %v4698_v9 = vrot.slane %v16239_v51, 5  ;;  %v18842_v17 = vld [vmem:[#allocation24_spill] sm:$0xff]  ;;  %v18853_v35 = vld [vmem:[#allocation11_spill] sm:$0xff]  ;;  %v18854_v10 = vld [vmem:[#allocation9_spill] sm:$0xff] }
 0x23d   : > { %v4685_v59 = vsel %vm15106_vm5, %v11901_v8, %v4684_v13  ;;  %v4688_v26 = vsel %vm15106_vm5, %v4686_v20, %v4687_v11  ;;  %v11932_v33 = vcombine.low %v4678_v52, %v4681_v18  ;;  %v11902_v16 = vrot.slane %v11886_v49, 9  ;;  %v18850_v19 = vld [vmem:[#allocation16_spill] sm:$0xff]  ;;  %v18856_v43 = vld [vmem:[#allocation18_spill] sm:$0xff]  ;;  %v18860_v22 = vld [vmem:[#allocation21_spill] sm:$0xff] }
 0x23e   : > { %v11933_v47 = vcombine.low %v4685_v59, %v4688_v26  ;;  %v4693_v44 = vrot.slane %v4691_v4, 4  ;;  %v11903_v41 = vrot.slane %v11887_v32, 9  ;;  %v4700_v2 = vrot.slane %v4698_v9, 4  ;;  %v18859_v23 = vld [vmem:[#allocation20_spill] sm:$0xff]  ;;  %v18862_v8 = vld [vmem:[#allocation22_spill] sm:$0xff]  ;;  %v18863_v20 = vld [vmem:[#allocation23_spill] sm:$0xff] }
 0x23f   : > { %13146 = vmatmul.mubr.bf16.gmra.mrb[20].mxu0 %v11870_v31  ;;  %v18841_v31 = vld [vmem:[#allocation10_spill] sm:$0xff]  ;;  %v4701_v1 = vrot.slane %v18842_v17, 5  ;;  %v4692_v58 = vsel %vm15106_vm5, %v11902_v16, %v4691_v4  ;;  %v4712_v25 = vrot.slane %v18843_v42, 5  ;;  %v11905_v39 = vrot.slane %v11889_v60, 9  ;;  %v18866_v18 = vld [vmem:[#allocation27_spill] sm:$0xff]  ;;  %v18868_v59 = vld [vmem:[#allocation28_spill] sm:$0xff] }
 0x240   : > { %13149 = vmatprep.mubr.bf16.mxu0 %v11871_v54  ;;  %v4694_v54 = vrot.slane %v18841_v31, 5  ;;  %v4699_v38 = vsel %vm15106_vm5, %v11903_v41, %v4698_v9  ;;  %v4715_v3 = vrot.slane %v16388_v34, 5  ;;  %v4726_v63 = vrot.slane %v16406_v21, 5  ;;  %v18848_v21 = vld [vmem:[#allocation14_spill] sm:$0xff]  ;;  %v18869_v26 = vld [vmem:[#allocation29_spill] sm:$0xff]  ;;  %v14328_v16 = vld [vmem:[#allocation3 + $0x58] sm:$0xff]  }
 0x241   : > { %v4702_v53 = vsel %vm15106_vm5, %v4700_v2, %v4701_v1  ;;  %v4714_v28 = vrot.slane %v4712_v25, 4  ;;  %v4713_v55 = vsel %vm15106_vm5, %v11905_v39, %v4712_v25  ;;  %v4729_v62 = vrot.slane %v16445_v29, 5  ;;  %v18865_v52 = vld [vmem:[#allocation26_spill] sm:$0xff]  ;;  %v14325_v9 = vld [vmem:[#allocation3 + $0x40] sm:$0xff]  }
 0x242   : > { %v4695_v51 = vsel %vm15106_vm5, %v4693_v44, %v4694_v54  ;;  %v11935_v24 = vcombine.low %v4699_v38, %v4702_v53  ;;  %v18846_v15 = vcombine.low %v18844_v40, %v18845_v27  ;;  %v18849_v48 = vcombine.low %v18847_v7, %v18848_v21  ;;  %13205 = vmatprep.subr.bf16.mxu1 %v14325_v9  ;;  %v14329_v44 = vld [vmem:[#allocation3 + $0x60] sm:$0xff]   ;;  %v14330_v31 = vld [vmem:[#allocation3 + $0x68] sm:$0xff]   ;;  %v14331_v54 = vld [vmem:[#allocation3 + $0x70] sm:$0xff]  }
 0x243   : > { %v11934_v37 = vcombine.low %v4692_v58, %v4695_v51  ;;  %v4716_v50 = vsel %vm15106_vm5, %v4714_v28, %v4715_v3  ;;  %v18852_v29 = vcombine.low %v18850_v19, %v18851_v5  ;;  %v18855_v13 = vcombine.low %v18853_v35, %v18854_v10  ;;  %13206 = vmatpush3.bf16.msra.mxu1 %v14325_v9  ;;  %v14332_v28 = vld [vmem:[#allocation3 + $0x78] sm:$0xff]   ;;  %v16636_v40 = vld [vmem:[%s18606_s3] ss:$0 sm:$0xff] }
 0x244   : > { %v11937_v61 = vcombine.low %v4713_v55, %v4716_v50  ;;  %v18861_v36 = vcombine.low %v18859_v23, %v18860_v22  ;;  %v18864_v11 = vcombine.low %v18862_v8, %v18863_v20  ;;  %v18867_v4 = vcombine.low %v18865_v52, %v18866_v18 }
 0x245   : > { %v18870_v49 = vcombine.low %v18868_v59, %v18869_v26  ;;  %v14600_v32 = vmov 0  }
 0x246   : > { %5218 = vst [vmem:[#allocation2 + $0x18] sm:$0xf] %v14600_v32  ;;  %5212 = vst [vmem:[#allocation2] sm:$0xf] %v14600_v32 }
 0x247   : > { %13150 = vmatmul.mubr.bf16.gmra.mrb[24].mxu0 %v11872_v12  ;;  %v11907_v12 = vrot.slane %v11891_v45, 9  ;;  %5213 = vst [vmem:[#allocation2 + $0x4] sm:$0xf] %v14600_v32  ;;  %5214 = vst [vmem:[#allocation2 + $0x8] sm:$0x1] %v14600_v32 }
 0x248   : > { %13153 = vmatprep.mubr.bf16.mxu0 %v11873_v57  ;;  %v4728_v57 = vrot.slane %v4726_v63, 4  ;;  %5215 = vst [vmem:[#allocation2 + $0xc] sm:$0xf] %v14600_v32  ;;  %5216 = vst [vmem:[#allocation2 + $0x10] sm:$0xf] %v14600_v32 }
 0x249   : > { %v4727_v34 = vsel %vm15106_vm5, %v11907_v12, %v4726_v63  ;;  %5217 = vst [vmem:[#allocation2 + $0x14] sm:$0x1] %v14600_v32  ;;  %5219 = vst [vmem:[#allocation2 + $0x1c] sm:$0xf] %v14600_v32  ;;  %v16625_v12 = vld [vmem:[#allocation3] sm:$0xff]  }
 0x24a   : > { %v4730_v30 = vsel %vm15106_vm5, %v4728_v57, %v4729_v62  ;;  %5220 = vst [vmem:[#allocation2 + $0x20] sm:$0x1] %v14600_v32  ;;  %5221 = vst [vmem:[#allocation2 + $0x24] sm:$0xf] %v14600_v32  ;;  %v16631_v57 = vld [vmem:[%s18605_s2] ss:$0 sm:$0xff] }
 0x24b   : > { %v11939_v14 = vcombine.low %v4727_v34, %v4730_v30  ;;  %5222 = vst [vmem:[#allocation2 + $0x28] sm:$0xf] %v14600_v32  ;;  %5223 = vst [vmem:[#allocation2 + $0x2c] sm:$0x1] %v14600_v32 }
 0x24c   : > { %5224 = vst [vmem:[#allocation2 + $0x30] sm:$0xf] %v14600_v32  ;;  %5225 = vst [vmem:[#allocation2 + $0x34] sm:$0xf] %v14600_v32 }
 0x24d   : > { %5226 = vst [vmem:[#allocation2 + $0x38] sm:$0x1] %v14600_v32  ;;  %5227 = vst [vmem:[#allocation2 + $0x3c] sm:$0xf] %v14600_v32  ;;  %v5803_v41 = vld [vmem:[#allocation2] sm:$0xf] }
 0x24e   : > { %5228 = vst [vmem:[#allocation2 + $0x40] sm:$0xf] %v14600_v32  ;;  %5229 = vst [vmem:[#allocation2 + $0x44] sm:$0x1] %v14600_v32  ;;  %v5804_v2 = vld [vmem:[#allocation2 + $0x4] sm:$0xf] }
 0x24f   : > { %13154 = vmatmul.mubr.bf16.gmra.mrb[28].mxu0 %v11874_v56  ;;  %v18857_v56 = vld [vmem:[#allocation19_spill] sm:$0xff]  ;;  %5230 = vst [vmem:[#allocation2 + $0x48] sm:$0xf] %v14600_v32  ;;  %5231 = vst [vmem:[#allocation2 + $0x4c] sm:$0xf] %v14600_v32  ;;  %v5868_v17 = vshrl.u32 %v5803_v41, 16 }
 0x250   : > { %13173 = vmatprep.mubr.bf16.mxu0 %v11931_v6  ;;  %v18858_v6 = vcombine.low %v18856_v43, %v18857_v56  ;;  %5232 = vst [vmem:[#allocation2 + $0x50] sm:$0x1] %v14600_v32  ;;  %5233 = vst [vmem:[#allocation2 + $0x54] sm:$0xf] %v14600_v32  ;;  %v5871_v1 = vshll.u32 %v5803_v41, 16  ;;  %v5877_v58 = vshll.u32 %v5804_v2, 16 }
 0x251   : > { %5234 = vst [vmem:[#allocation2 + $0x58] sm:$0xf] %v14600_v32  ;;  %5235 = vst [vmem:[#allocation2 + $0x5c] sm:$0x1] %v14600_v32  ;;  %v5881_v51 = vshrl.u32 %v5804_v2, 16  ;;  %v5870_v38 = vrot.slane %v5868_v17, 4 }
 0x252   : > { %5236 = vst [vmem:[#allocation2 + $0x60] sm:$0xf] %v14600_v32  ;;  %5237 = vst [vmem:[#allocation2 + $0x64] sm:$0xf] %v14600_v32  ;;  %v5873_v53 = vrot.slane %v5871_v1, 5  ;;  %v5879_v42 = vrot.slane %v5877_v58, 5 }
 0x253   : > { %5238 = vst [vmem:[#allocation2 + $0x68] sm:$0x1] %v14600_v32  ;;  %5239 = vst [vmem:[#allocation2 + $0x6c] sm:$0xf] %v14600_v32  ;;  %v5883_v25 = vrot.slane %v5881_v51, 4 }
 0x254   : > { %5240 = vst [vmem:[#allocation2 + $0x70] sm:$0xf] %v14600_v32  ;;  %5241 = vst [vmem:[#allocation2 + $0x74] sm:$0x1] %v14600_v32  ;;  %v5851_v60 = vld [vmem:[#allocation2 + $0x8] sm:$0x1] }
 0x255   : > { %5242 = vst [vmem:[#allocation2 + $0x78] sm:$0xf] %v14600_v32  ;;  %5243 = vst [vmem:[#allocation2 + $0x7c] sm:$0xf] %v14600_v32  ;;  %v5887_v39 = vshll.u32 %v5851_v60, 16 }
 0x256   : > { %5244 = vst [vmem:[#allocation2 + $0x80] sm:$0x1] %v14600_v32  ;;  %5245 = vst [vmem:[#allocation2 + $0x84] sm:$0xf] %v14600_v32  ;;  %v5689_v58 = vld [vmem:[#allocation2 + $0xc] sm:$0xf] }
 0x257   : > { %13174 = vmatmul.mubr.bf16.vlgmr.msra.gmra.mrb[0].mxu0 %v11932_v33  ;;  %5246 = vst [vmem:[#allocation2 + $0x88] sm:$0xf] %v14600_v32  ;;  %5247 = vst [vmem:[#allocation2 + $0x8c] sm:$0x1] %v14600_v32  ;;  %v14326_v33 = vld [vmem:[#allocation3 + $0x48] sm:$0xff]   ;;  %v5889_v50 = vrot.slane %v5887_v39, 5 }
 0x258   : > { %13177 = vmatprep.mubr.bf16.mxu0 %v11933_v47  ;;  %5248 = vst [vmem:[#allocation2 + $0x90] sm:$0xf] %v14600_v32  ;;  %5249 = vst [vmem:[#allocation2 + $0x94] sm:$0xf] %v14600_v32  ;;  %13207 = vmatprep.subr.bf16.mxu1 %v14326_v33  ;;  %v14327_v47 = vld [vmem:[#allocation3 + $0x50] sm:$0xff]  }
 0x259   : > { %5250 = vst [vmem:[#allocation2 + $0x98] sm:$0x1] %v14600_v32  ;;  %5251 = vst [vmem:[#allocation2 + $0x9c] sm:$0xf] %v14600_v32  ;;  %13208 = vmatpush3.bf16.msra.mxu1 %v14326_v33 }
 0x25a   : > { %5252 = vst [vmem:[#allocation2 + $0xa0] sm:$0xf] %v14600_v32  ;;  %5253 = vst [vmem:[#allocation2 + $0xa4] sm:$0x1] %v14600_v32  ;;  %13209 = vmatprep.subr.bf16.mxu1 %v14327_v47 }
 0x25b   : > { %5254 = vst [vmem:[#allocation2 + $0xa8] sm:$0xf] %v14600_v32  ;;  %5255 = vst [vmem:[#allocation2 + $0xac] sm:$0xf] %v14600_v32 }
 0x25c   : > { %5256 = vst [vmem:[#allocation2 + $0xb0] sm:$0x1] %v14600_v32  ;;  %5257 = vst [vmem:[#allocation2 + $0xb4] sm:$0xf] %v14600_v32 }
 0x25d   : > { %5258 = vst [vmem:[#allocation2 + $0xb8] sm:$0xf] %v14600_v32  ;;  %5259 = vst [vmem:[#allocation2 + $0xbc] sm:$0x1] %v14600_v32  ;;  %13210 = vmatpush3.bf16.msra.mxu1 %v14327_v47 }
 0x25e   : > { %5260 = vst [vmem:[#allocation2 + $0xc0] sm:$0xf] %v14600_v32  ;;  %5261 = vst [vmem:[#allocation2 + $0xc4] sm:$0xf] %v14600_v32  ;;  %13211 = vmatprep.subr.bf16.mxu1 %v14328_v16 }
 0x25f   : > { %13178 = vmatmul.mubr.bf16.gmra.mrb[4].mxu0 %v11934_v37  ;;  %5262 = vst [vmem:[#allocation2 + $0xc8] sm:$0x1] %v14600_v32  ;;  %5263 = vst [vmem:[#allocation2 + $0xcc] sm:$0xf] %v14600_v32  ;;  %v5874_v37 = vor.u32 %v5873_v53, %v5870_v38 }
 0x260   : > { %13181 = vmatprep.mubr.bf16.mxu0 %v11935_v24  ;;  %5264 = vst [vmem:[#allocation2 + $0xd0] sm:$0xf] %v14600_v32  ;;  %5265 = vst [vmem:[#allocation2 + $0xd4] sm:$0x1] %v14600_v32  ;;  %v5884_v24 = vor.u32 %v5883_v25, %v5879_v42 }
 0x261   : > { %13212 = vmatpush3.bf16.msra.mxu1 %v14328_v16  ;;  %v5875_v3 = vrot.slane %v5874_v37, 4  ;;  %v5702_v37 = vld [vmem:[#allocation2 + $0x20] sm:$0x1] }
 0x262   : > { %13213 = vmatprep.subr.bf16.mxu1 %v14329_v44  ;;  %v5885_v55 = vrot.slane %v5884_v24, 4 }
 0x263   : > { %v5880_v63 = vsel %vm14776_vm2, %v5875_v3, %v5879_v42 }
 0x264   : > { %v5890_v45 = vsel %vm14776_vm2, %v5885_v55, %v5889_v50  ;;  %v5695_v50 = vld [vmem:[#allocation2 + $0x14] sm:$0x1] }
 0x265   : > { %13214 = vmatpush3.bf16.msra.mxu1 %v14329_v44  ;;  %v5698_v44 = vld [vmem:[#allocation2 + $0x18] sm:$0xf] }
 0x266   : > { %13215 = vmatprep.subr.bf16.mxu1 %v14330_v31 }
 0x267   : > { %13182 = vmatmul.mubr.bf16.gmra.mrb[8].mxu0 %v18846_v15 }
 0x268   : > { %13185 = vmatprep.mubr.bf16.mxu0 %v11937_v61  ;;  %v11989_v61 = vcombine.low %v5880_v63, %v5890_v45 }
 0x269   : > { %13216 = vmatpush3.bf16.msra.mxu1 %v14330_v31 }
 0x26a   : > { %13217 = vmatprep.subr.bf16.mxu1 %v14331_v54  ;;  %13221 = vmatprep.mubr.bf16.mxu1 %v11989_v61 }
 0x26d   : > { %13218 = vmatpush3.bf16.msra.mxu1 %v14331_v54 }
 0x26e   : > { %13219 = vmatprep.subr.bf16.mxu1 %v14332_v28 }
 0x26f   : > { %13186 = vmatmul.mubr.bf16.gmra.mrb[12].mxu0 %v18849_v48 }
 0x270   : > { %13189 = vmatprep.mubr.bf16.mxu0 %v11939_v14 }
 0x271   : > { %13220 = vmatpush3.bf16.msra.mxu1 %v14332_v28 }
 0x272   : > { %13253 = vmatprep.subr.bf16.mxu1 %v16625_v12 }
 0x277   : > { %13190 = vmatmul.mubr.bf16.gmra.mrb[16].mxu0 %v18852_v29 }
 0x278   : > { %13193 = vmatprep.mubr.bf16.mxu0 %v18855_v13 }
 0x27f   : > { %13194 = vmatmul.mubr.bf16.gmra.mrb[20].mxu0 %v18858_v6 }
 0x280   : > { %13197 = vmatprep.mubr.bf16.mxu0 %v18861_v36 }
 0x287   : > { %13198 = vmatmul.mubr.bf16.gmra.mrb[24].mxu0 %v18864_v11 }
 0x288   : > { %13201 = vmatprep.mubr.bf16.mxu0 %v18867_v4 }
 0x28f   : > { %13202 = vmatmul.mubr.bf16.gmra.mrb[28].mxu0 %v18870_v49 }
 0x32a   : > { %v13175_v62 = vpop.f32.mrb[0].mxu0 }
 0x32b   : > { %v5111_v27 = vmul.f32 %v13175_v62, %v16631_v57  ;;  %v4943_v15 = vpop.f32.mrb[1].mxu0 }
 0x32c   : > { %v5109_v34 = vmul.f32 %v16631_v57, %v4943_v15  ;;  %v13176_v30 = vpop.f32.mrb[2].mxu0 }
 0x32d   : > { %v5150_v14 = vadd.f32 %v16636_v40, %v5111_v27  ;;  %v5112_v7 = vmul.f32 %v13176_v30, %v16631_v57  ;;  %v4946_v21 = vpop.f32.mrb[3].mxu0 }
 0x32e   : > { %v5148_v48 = vadd.f32 %v16636_v40, %v5109_v34  ;;  %v5110_v19 = vmul.f32 %v16631_v57, %v4946_v21 }
 0x32f   : > { %v5182_v5 = vmax.f32 %v5150_v14, 0.0  ;;  %v5151_v29 = vadd.f32 %v16636_v40, %v5112_v7 }
 0x330   : > { %v5180_v35 = vmax.f32 %v5148_v48, 0.0  ;;  %v5149_v10 = vadd.f32 %v16636_v40, %v5110_v19 }
 0x331   : > { %v12310_v13 = vpack.c.bf16 %v5182_v5, %v5182_v5  ;;  %v5183_v43 = vmax.f32 %v5151_v29, 0.0 }
 0x332   : > { %v12308_v56 = vpack.c.bf16 %v5180_v35, %v5180_v35  ;;  %v5181_v6 = vmax.f32 %v5149_v10, 0.0  ;;  %v13179_v23 = vpop.f32.mrb[4].mxu0 }
 0x333   : > { %v5383_v22 = vshrl.u32 %v12310_v13, 16  ;;  %v5386_v36 = vshll.u32 %v12310_v13, 16  ;;  %v12311_v8 = vpack.c.bf16 %v5183_v43, %v5183_v43  ;;  %v5115_v20 = vmul.f32 %v13179_v23, %v16631_v57  ;;  %v4959_v11 = vpop.f32.mrb[5].mxu0  ;;  %v5712_v23 = vld [vmem:[#allocation2 + $0x30] sm:$0xf] }
 0x334   : > { %v5366_v52 = vshrl.u32 %v12308_v56, 16  ;;  %v5369_v18 = vshll.u32 %v12308_v56, 16  ;;  %v12309_v4 = vpack.c.bf16 %v5181_v6, %v5181_v6  ;;  %v5113_v59 = vmul.f32 %v16631_v57, %v4959_v11  ;;  %v13180_v26 = vpop.f32.mrb[6].mxu0 }
 0x335   : > { %v5385_v49 = vrot.slane %v5383_v22, 7  ;;  %v5391_v9 = vshrl.u32 %v12311_v8, 16  ;;  %v5394_v32 = vshll.u32 %v12311_v8, 16  ;;  %v5154_v33 = vadd.f32 %v16636_v40, %v5115_v20  ;;  %v4962_v47 = vpop.f32.mrb[7].mxu0 }
 0x336   : > { %v5368_v31 = vrot.slane %v5366_v52, 7  ;;  %v5374_v54 = vshrl.u32 %v12309_v4, 16  ;;  %v5377_v41 = vshll.u32 %v12309_v4, 16  ;;  %v5152_v2 = vadd.f32 %v16636_v40, %v5113_v59 }
 0x337   : > { %v5388_v17 = vor.u32 %v5386_v36, %v5385_v49  ;;  %v5389_v1 = vrot.slane %v5385_v49, 4  ;;  %v5393_v38 = vrot.slane %v5391_v9, 7  ;;  %v5186_v53 = vmax.f32 %v5154_v33, 0.0 }
 0x338   : > { %v5371_v42 = vor.u32 %v5369_v18, %v5368_v31  ;;  %v5372_v25 = vrot.slane %v5368_v31, 4  ;;  %v5376_v24 = vrot.slane %v5374_v54, 7  ;;  %v5184_v39 = vmax.f32 %v5152_v2, 0.0  ;;  %v5705_v18 = vld [vmem:[#allocation2 + $0x24] sm:$0xf] }
 0x339   : > { %v5699_v28 = vsel %vm16651_vm11, %v5388_v17, %v5698_v44  ;;  %v5396_v3 = vor.u32 %v5394_v32, %v5393_v38  ;;  %v5398_v55 = vrot.slane %v5393_v38, 4  ;;  %v12314_v63 = vpack.c.bf16 %v5186_v53, %v5186_v53 }
 0x33a   : > { %5700 = vst [vmem:[#allocation2 + $0x18] sm:$0xf] %v5699_v28  ;;  %v5690_v45 = vsel %vm16651_vm11, %v5371_v42, %v5689_v58  ;;  %v5379_v61 = vor.u32 %v5377_v41, %v5376_v24  ;;  %v5381_v62 = vrot.slane %v5376_v24, 4  ;;  %v12312_v27 = vpack.c.bf16 %v5184_v39, %v5184_v39  ;;  %v13183_v15 = vpop.f32.mrb[8].mxu0 }
 0x33b   : > { %5691 = vst [vmem:[#allocation2 + $0xc] sm:$0xf] %v5690_v45  ;;  %v5397_v34 = vsel %vm16658_vm12, %v5389_v1, %v5396_v3  ;;  %v5703_v30 = vsel %vm16664_vm13, %v5398_v55, %v5702_v37  ;;  %v5417_v14 = vshrl.u32 %v12314_v63, 16  ;;  %v5420_v7 = vshll.u32 %v12314_v63, 16  ;;  %v4975_v21 = vpop.f32.mrb[9].mxu0 }
 0x33c   : > { %5701 = vst [vmem:[#allocation2 + $0x1c] sm:$0xf] %v5397_v34  ;;  %5704 = vst [vmem:[#allocation2 + $0x20] sm:$0x1] %v5703_v30  ;;  %v5380_v48 = vsel %vm16658_vm12, %v5372_v25, %v5379_v61  ;;  %v5696_v19 = vsel %vm16664_vm13, %v5381_v62, %v5695_v50  ;;  %v5400_v5 = vshrl.u32 %v12312_v27, 16  ;;  %v5403_v29 = vshll.u32 %v12312_v27, 16 }
 0x33d   : > { %v13184_v35 = vpop.f32.mrb[10].mxu0  ;;  %5692 = vst [vmem:[#allocation2 + $0x10] sm:$0xf] %v5380_v48  ;;  %5697 = vst [vmem:[#allocation2 + $0x14] sm:$0x1] %v5696_v19  ;;  %v16680_v10 = vrot.slane %v5417_v14, 7  ;;  %v5116_v13 = vmul.f32 %v13180_v26, %v16631_v57  ;;  %v5114_v43 = vmul.f32 %v16631_v57, %v4962_v47  ;;  %v5119_v56 = vmul.f32 %v13183_v15, %v16631_v57 }
 0x33e   : > { %v4978_v6 = vpop.f32.mrb[11].mxu0  ;;  %v16685_v22 = vrot.slane %v5400_v5, 7  ;;  %v5117_v36 = vmul.f32 %v16631_v57, %v4975_v21  ;;  %v5120_v8 = vmul.f32 %v13184_v35, %v16631_v57  ;;  %v5716_v62 = vld [vmem:[#allocation2 + $0x38] sm:$0x1]  ;;  %v5709_v21 = vld [vmem:[#allocation2 + $0x2c] sm:$0x1] }
 0x33f   : > { %v5118_v20 = vmul.f32 %v16631_v57, %v4978_v6  ;;  %v5422_v11 = vor.u32 %v5420_v7, %v16680_v10  ;;  %v5423_v52 = vrot.slane %v16680_v10, 4  ;;  %v5155_v4 = vadd.f32 %v16636_v40, %v5116_v13 }
 0x340   : > { %v5153_v59 = vadd.f32 %v16636_v40, %v5114_v43  ;;  %v5405_v26 = vor.u32 %v5403_v29, %v16685_v22  ;;  %v5406_v49 = vrot.slane %v16685_v22, 4  ;;  %v5158_v9 = vadd.f32 %v16636_v40, %v5119_v56  ;;  %v5719_v22 = vld [vmem:[#allocation2 + $0x3c] sm:$0xf] }
 0x341   : > { %v5156_v32 = vadd.f32 %v16636_v40, %v5117_v36  ;;  %v5713_v33 = vsel %vm16651_vm11, %v5422_v11, %v5712_v23  ;;  %v5187_v47 = vmax.f32 %v5155_v4, 0.0  ;;  %v5159_v31 = vadd.f32 %v16636_v40, %v5120_v8  ;;  %v5726_v23 = vld [vmem:[#allocation2 + $0x48] sm:$0xf] }
 0x342   : > { %v5185_v44 = vmax.f32 %v5153_v59, 0.0  ;;  %5714 = vst [vmem:[#allocation2 + $0x30] sm:$0xf] %v5713_v33  ;;  %v5706_v54 = vsel %vm16651_vm11, %v5405_v26, %v5705_v18  ;;  %v5190_v41 = vmax.f32 %v5158_v9, 0.0  ;;  %v5157_v17 = vadd.f32 %v16636_v40, %v5118_v20  ;;  %v13187_v1 = vpop.f32.mrb[12].mxu0 }
 0x343   : > { %v5188_v2 = vmax.f32 %v5156_v32, 0.0  ;;  %5707 = vst [vmem:[#allocation2 + $0x24] sm:$0xf] %v5706_v54  ;;  %v12315_v58 = vpack.c.bf16 %v5187_v47, %v5187_v47  ;;  %v5191_v53 = vmax.f32 %v5159_v31, 0.0  ;;  %v5123_v42 = vmul.f32 %v13187_v1, %v16631_v57  ;;  %v4991_v25 = vpop.f32.mrb[13].mxu0 }
 0x344   : > { %v12313_v38 = vpack.c.bf16 %v5185_v44, %v5185_v44  ;;  %v12318_v37 = vpack.c.bf16 %v5190_v41, %v5190_v41  ;;  %v5189_v39 = vmax.f32 %v5157_v17, 0.0  ;;  %v5121_v28 = vmul.f32 %v16631_v57, %v4991_v25  ;;  %v13188_v3 = vpop.f32.mrb[14].mxu0 }
 0x345   : > { %v12316_v24 = vpack.c.bf16 %v5188_v2, %v5188_v2  ;;  %v5425_v55 = vshrl.u32 %v12315_v58, 16  ;;  %v5428_v50 = vshll.u32 %v12315_v58, 16  ;;  %v4994_v61 = vpop.f32.mrb[15].mxu0  ;;  %v12319_v48 = vpack.c.bf16 %v5191_v53, %v5191_v53 }
 0x346   : > { %v5408_v63 = vshrl.u32 %v12313_v38, 16  ;;  %v5411_v45 = vshll.u32 %v12313_v38, 16  ;;  %v5451_v27 = vshrl.u32 %v12318_v37, 16  ;;  %v5454_v15 = vshll.u32 %v12318_v37, 16 }
 0x347   : > { %v5434_v34 = vshrl.u32 %v12316_v24, 16  ;;  %v5437_v30 = vshll.u32 %v12316_v24, 16  ;;  %v5427_v14 = vrot.slane %v5425_v55, 7  ;;  %v12317_v19 = vpack.c.bf16 %v5189_v39, %v5189_v39 }
 0x348   : > { %v5410_v7 = vrot.slane %v5408_v63, 7  ;;  %v5453_v5 = vrot.slane %v5451_v27, 7  ;;  %v5162_v35 = vadd.f32 %v16636_v40, %v5123_v42  ;;  %v5160_v10 = vadd.f32 %v16636_v40, %v5121_v28  ;;  %v5730_v42 = vld [vmem:[#allocation2 + $0x50] sm:$0x1] }
 0x349   : > { %v5436_v29 = vrot.slane %v5434_v34, 7  ;;  %v5430_v13 = vor.u32 %v5428_v50, %v5427_v14  ;;  %v5432_v43 = vrot.slane %v5427_v14, 4  ;;  %v5459_v47 = vshrl.u32 %v12319_v48, 16  ;;  %v5723_v50 = vld [vmem:[#allocation2 + $0x44] sm:$0x1] }
 0x34a   : > { %v5413_v56 = vor.u32 %v5411_v45, %v5410_v7  ;;  %v5415_v6 = vrot.slane %v5410_v7, 4  ;;  %v5456_v36 = vor.u32 %v5454_v15, %v5453_v5  ;;  %v5457_v8 = vrot.slane %v5453_v5, 4  ;;  %v13191_v18 = vpop.f32.mrb[16].mxu0 }
 0x34b   : > { %v5439_v20 = vor.u32 %v5437_v30, %v5436_v29  ;;  %v5440_v11 = vrot.slane %v5436_v29, 4  ;;  %v5431_v4 = vsel %vm16658_vm12, %v5423_v52, %v5430_v13  ;;  %v5717_v59 = vsel %vm16664_vm13, %v5432_v43, %v5716_v62  ;;  %v5007_v32 = vpop.f32.mrb[17].mxu0 }
 0x34c   : > { %v5414_v26 = vsel %vm16658_vm12, %v5406_v49, %v5413_v56  ;;  %v5710_v9 = vsel %vm16664_vm13, %v5415_v6, %v5709_v21  ;;  %5715 = vst [vmem:[#allocation2 + $0x34] sm:$0xf] %v5431_v4  ;;  %5718 = vst [vmem:[#allocation2 + $0x38] sm:$0x1] %v5717_v59  ;;  %v5727_v33 = vsel %vm16651_vm11, %v5456_v36, %v5726_v23  ;;  %v5462_v44 = vshll.u32 %v12319_v48, 16  ;;  %v13192_v31 = vpop.f32.mrb[18].mxu0 }
 0x34d   : > { %5708 = vst [vmem:[#allocation2 + $0x28] sm:$0xf] %v5414_v26  ;;  %5711 = vst [vmem:[#allocation2 + $0x2c] sm:$0x1] %v5710_v9  ;;  %v5720_v52 = vsel %vm16651_vm11, %v5439_v20, %v5719_v22  ;;  %v5442_v49 = vshrl.u32 %v12317_v19, 16  ;;  %v5445_v54 = vshll.u32 %v12317_v19, 16  ;;  %v5124_v58 = vmul.f32 %v13188_v3, %v16631_v57 }
 0x34e   : > { %5728 = vst [vmem:[#allocation2 + $0x48] sm:$0xf] %v5727_v33  ;;  %5721 = vst [vmem:[#allocation2 + $0x3c] sm:$0xf] %v5720_v52  ;;  %v5194_v41 = vmax.f32 %v5162_v35, 0.0  ;;  %v5192_v2 = vmax.f32 %v5160_v10, 0.0  ;;  %v5122_v38 = vmul.f32 %v16631_v57, %v4994_v61  ;;  %v5127_v53 = vmul.f32 %v13191_v18, %v16631_v57 }
 0x34f   : > { %v16720_v17 = vpop.f32.mrb[19].mxu0  ;;  %v5461_v1 = vrot.slane %v5459_v47, 7  ;;  %v5444_v25 = vrot.slane %v5442_v49, 7  ;;  %v5125_v39 = vmul.f32 %v16631_v57, %v5007_v32  ;;  %v5163_v63 = vadd.f32 %v16636_v40, %v5124_v58  ;;  %v5740_v35 = vld [vmem:[#allocation2 + $0x60] sm:$0xf] }
 0x350   : > { %v12322_v37 = vpack.c.bf16 %v5194_v41, %v5194_v41  ;;  %v12320_v24 = vpack.c.bf16 %v5192_v2, %v5192_v2  ;;  %v5161_v45 = vadd.f32 %v16636_v40, %v5122_v38  ;;  %v5166_v43 = vadd.f32 %v16636_v40, %v5127_v53  ;;  %v5733_v36 = vld [vmem:[#allocation2 + $0x54] sm:$0xf]  ;;  %v5805_v47 = vld [vmem:[#allocation2 + $0xc] sm:$0xf]  ;;  %v5744_v49 = vld [vmem:[#allocation2 + $0x68] sm:$0x1] }
 0x351   : > { %v5464_v28 = vor.u32 %v5462_v44, %v5461_v1  ;;  %v5466_v55 = vrot.slane %v5461_v1, 4  ;;  %v5447_v62 = vor.u32 %v5445_v54, %v5444_v25  ;;  %v5449_v27 = vrot.slane %v5444_v25, 4 }
 0x352   : > { %v5485_v3 = vshrl.u32 %v12322_v37, 16  ;;  %v5488_v15 = vshll.u32 %v12322_v37, 16  ;;  %v5468_v30 = vshrl.u32 %v12320_v24, 16  ;;  %v5471_v14 = vshll.u32 %v12320_v24, 16  ;;  %v16732_v7 = vpop.f32.mrb[20].mxu0 }
 0x353   : > { %v5465_v61 = vsel %vm16658_vm12, %v5457_v8, %v5464_v28  ;;  %v5731_v34 = vsel %vm16664_vm13, %v5466_v55, %v5730_v42  ;;  %v5448_v21 = vsel %vm16658_vm12, %v5440_v11, %v5447_v62  ;;  %v5724_v48 = vsel %vm16664_vm13, %v5449_v27, %v5723_v50  ;;  %v16738_v29 = vpop.f32.mrb[21].mxu0  ;;  %v5737_v55 = vld [vmem:[#allocation2 + $0x5c] sm:$0x1] }
 0x354   : > { %5729 = vst [vmem:[#allocation2 + $0x4c] sm:$0xf] %v5465_v61  ;;  %5732 = vst [vmem:[#allocation2 + $0x50] sm:$0x1] %v5731_v34  ;;  %v5487_v19 = vrot.slane %v5485_v3, 7  ;;  %v5195_v5 = vmax.f32 %v5163_v63, 0.0  ;;  %v5164_v56 = vadd.f32 %v16636_v40, %v5125_v39  ;;  %v5128_v20 = vmul.f32 %v13192_v31, %v16631_v57 }
 0x355   : > { %5722 = vst [vmem:[#allocation2 + $0x40] sm:$0xf] %v5448_v21  ;;  %5725 = vst [vmem:[#allocation2 + $0x44] sm:$0x1] %v5724_v48  ;;  %v5470_v10 = vrot.slane %v5468_v30, 7  ;;  %v5193_v13 = vmax.f32 %v5161_v45, 0.0  ;;  %v5126_v38 = vmul.f32 %v16631_v57, %v16720_v17 }
 0x356   : > { %v16742_v6 = vpop.f32.mrb[22].mxu0  ;;  %v5490_v23 = vor.u32 %v5488_v15, %v5487_v19  ;;  %v5491_v22 = vrot.slane %v5487_v19, 4  ;;  %v12323_v8 = vpack.c.bf16 %v5195_v5, %v5195_v5  ;;  %v5198_v26 = vmax.f32 %v5166_v43, 0.0  ;;  %v5754_v30 = vld [vmem:[#allocation2 + $0x78] sm:$0xf] }
 0x357   : > { %v16745_v11 = vpop.f32.mrb[23].mxu0  ;;  %v5473_v18 = vor.u32 %v5471_v14, %v5470_v10  ;;  %v5474_v4 = vrot.slane %v5470_v10, 4  ;;  %v12321_v59 = vpack.c.bf16 %v5193_v13, %v5193_v13  ;;  %v5196_v52 = vmax.f32 %v5164_v56, 0.0  ;;  %v5806_v48 = vld [vmem:[#allocation2 + $0x10] sm:$0xf] }
 0x358   : > { %v5741_v9 = vsel %vm16651_vm11, %v5490_v23, %v5740_v35  ;;  %v5493_v32 = vshrl.u32 %v12323_v8, 16  ;;  %v5496_v33 = vshll.u32 %v12323_v8, 16  ;;  %v12326_v41 = vpack.c.bf16 %v5198_v26, %v5198_v26  ;;  %v5747_v13 = vld [vmem:[#allocation2 + $0x6c] sm:$0xf] }
 0x359   : > { %5742 = vst [vmem:[#allocation2 + $0x60] sm:$0xf] %v5741_v9  ;;  %v5734_v44 = vsel %vm16651_vm11, %v5473_v18, %v5733_v36  ;;  %v5476_v54 = vshrl.u32 %v12321_v59, 16  ;;  %v5479_v31 = vshll.u32 %v12321_v59, 16  ;;  %v12324_v1 = vpack.c.bf16 %v5196_v52, %v5196_v52  ;;  %v5852_v36 = vld [vmem:[#allocation2 + $0x14] sm:$0x1] }
 0x35a   : > { %5735 = vst [vmem:[#allocation2 + $0x54] sm:$0xf] %v5734_v44  ;;  %v5495_v2 = vrot.slane %v5493_v32, 7  ;;  %v5167_v58 = vadd.f32 %v16636_v40, %v5128_v20  ;;  %v5519_v42 = vshrl.u32 %v12326_v41, 16  ;;  %v5522_v25 = vshll.u32 %v12326_v41, 16  ;;  %v16754_v24 = vpop.f32.mrb[24].mxu0 }
 0x35b   : > { %v5478_v53 = vrot.slane %v5476_v54, 7  ;;  %v5892_v37 = vshrl.u32 %v5805_v47, 16  ;;  %v5502_v50 = vshrl.u32 %v12324_v1, 16  ;;  %v5505_v63 = vshll.u32 %v12324_v1, 16  ;;  %v16756_v45 = vpop.f32.mrb[25].mxu0 }
 0x35c   : > { %v5498_v39 = vor.u32 %v5496_v33, %v5495_v2  ;;  %v5500_v28 = vrot.slane %v5495_v2, 4  ;;  %v16758_v3 = vrot.slane %v5519_v42, 7  ;;  %v5199_v15 = vmax.f32 %v5167_v58, 0.0  ;;  %v16760_v61 = vpop.f32.mrb[26].mxu0  ;;  %v5807_v59 = vld [vmem:[#allocation2 + $0x18] sm:$0xf] }
 0x35d   : > { %v5481_v62 = vor.u32 %v5479_v31, %v5478_v53  ;;  %v5483_v27 = vrot.slane %v5478_v53, 4  ;;  %v16766_v14 = vrot.slane %v5502_v50, 7  ;;  %v5165_v21 = vadd.f32 %v16636_v40, %v5126_v38  ;;  %v16769_v19 = vpop.f32.mrb[27].mxu0  ;;  %v5808_v52 = vld [vmem:[#allocation2 + $0x1c] sm:$0xf] }
 0x35e   : > { %v5499_v17 = vsel %vm16658_vm12, %v5491_v22, %v5498_v39  ;;  %v5745_v34 = vsel %vm16664_vm13, %v5500_v28, %v5744_v49  ;;  %v5524_v10 = vor.u32 %v5522_v25, %v16758_v3  ;;  %v5525_v43 = vrot.slane %v16758_v3, 4  ;;  %v5758_v44 = vld [vmem:[#allocation2 + $0x80] sm:$0x1] }
 0x35f   : > { %5743 = vst [vmem:[#allocation2 + $0x64] sm:$0xf] %v5499_v17  ;;  %5746 = vst [vmem:[#allocation2 + $0x68] sm:$0x1] %v5745_v34  ;;  %v5482_v5 = vsel %vm16658_vm12, %v5474_v4, %v5481_v62  ;;  %v5738_v35 = vsel %vm16664_vm13, %v5483_v27, %v5737_v55  ;;  %v5507_v56 = vor.u32 %v5505_v63, %v16766_v14  ;;  %v5197_v22 = vmax.f32 %v5165_v21, 0.0 }
 0x360   : > { %5736 = vst [vmem:[#allocation2 + $0x58] sm:$0xf] %v5482_v5  ;;  %5739 = vst [vmem:[#allocation2 + $0x5c] sm:$0x1] %v5738_v35  ;;  %v12327_v23 = vpack.c.bf16 %v5199_v15, %v5199_v15  ;;  %v5755_v8 = vsel %vm16651_vm11, %v5524_v10, %v5754_v30  ;;  %v5894_v20 = vrot.slane %v5892_v37, 4  ;;  %v5895_v18 = vshll.u32 %v5805_v47, 16 }
 0x361   : > { %v5901_v4 = vshll.u32 %v5806_v48, 16  ;;  %5756 = vst [vmem:[#allocation2 + $0x78] sm:$0xf] %v5755_v8  ;;  %v5508_v26 = vrot.slane %v16766_v14, 4  ;;  %v5748_v9 = vsel %vm16651_vm11, %v5507_v56, %v5747_v13  ;;  %v12325_v33 = vpack.c.bf16 %v5197_v22, %v5197_v22  ;;  %v5751_v62 = vld [vmem:[#allocation2 + $0x74] sm:$0x1] }
 0x362   : > { %v5527_v32 = vshrl.u32 %v12327_v23, 16  ;;  %5749 = vst [vmem:[#allocation2 + $0x6c] sm:$0xf] %v5748_v9  ;;  %v5897_v49 = vrot.slane %v5895_v18, 5  ;;  %v5905_v31 = vshrl.u32 %v5806_v48, 16  ;;  %v5911_v41 = vshll.u32 %v5852_v36, 16 }
 0x363   : > { %v5903_v54 = vrot.slane %v5901_v4, 5  ;;  %v16783_v2 = vpop.f32.mrb[28].mxu0  ;;  %v5530_v1 = vshll.u32 %v12327_v23, 16  ;;  %v5510_v58 = vshrl.u32 %v12325_v33, 16  ;;  %v5513_v38 = vshll.u32 %v12325_v33, 16 }
 0x364   : > { %v5529_v47 = vrot.slane %v5527_v32, 7  ;;  %v16785_v53 = vpop.f32.mrb[29].mxu0  ;;  %v5898_v42 = vor.u32 %v5897_v49, %v5894_v20  ;;  %v5907_v25 = vrot.slane %v5905_v31, 4  ;;  %v5913_v37 = vrot.slane %v5911_v41, 5  ;;  %v5853_v34 = vld [vmem:[#allocation2 + $0x20] sm:$0x1] }
 0x365   : > { %v5916_v39 = vshrl.u32 %v5807_v59, 16  ;;  %v16787_v28 = vpop.f32.mrb[30].mxu0  ;;  %v5512_v63 = vrot.slane %v5510_v58, 7  ;;  %v5919_v27 = vshll.u32 %v5807_v59, 16  ;;  %v5925_v14 = vshll.u32 %v5808_v52, 16  ;;  %v14334_v32 = vld [vmem:[#allocation3 + $0x8] sm:$0xff]  }
 0x366   : > { %v5532_v55 = vor.u32 %v5530_v1, %v5529_v47  ;;  %v5534_v50 = vrot.slane %v5529_v47, 4  ;;  %v16789_v3 = vpop.f32.mrb[31].mxu0  ;;  %v5899_v15 = vrot.slane %v5898_v42, 4  ;;  %v5908_v17 = vor.u32 %v5907_v25, %v5903_v54  ;;  %v5809_v9 = vld [vmem:[#allocation2 + $0x24] sm:$0xf] }
 0x367   : > { %v5918_v30 = vrot.slane %v5916_v39, 4  ;;  %v5515_v5 = vor.u32 %v5513_v38, %v5512_v63  ;;  %v5517_v35 = vrot.slane %v5512_v63, 4  ;;  %v5921_v56 = vrot.slane %v5919_v27, 5  ;;  %v5810_v47 = vld [vmem:[#allocation2 + $0x28] sm:$0xf] }
 0x368   : > { %v5533_v21 = vsel %vm16658_vm12, %v5525_v43, %v5532_v55  ;;  %v5759_v48 = vsel %vm16664_vm13, %v5534_v50, %v5758_v44  ;;  %v5904_v10 = vsel %vm14776_vm2, %v5899_v15, %v5903_v54  ;;  %v5909_v13 = vrot.slane %v5908_v17, 4  ;;  %v14335_v50 = vld [vmem:[#allocation3 + $0x10] sm:$0xff]  }
 0x369   : > { %5757 = vst [vmem:[#allocation2 + $0x7c] sm:$0xf] %v5533_v21  ;;  %5760 = vst [vmem:[#allocation2 + $0x80] sm:$0x1] %v5759_v48  ;;  %v5927_v23 = vrot.slane %v5925_v14, 5  ;;  %v5516_v22 = vsel %vm16658_vm12, %v5508_v26, %v5515_v5  ;;  %v5752_v36 = vsel %vm16664_vm13, %v5517_v35, %v5751_v62  ;;  %v5929_v43 = vshrl.u32 %v5808_v52, 16 }
 0x36a   : > { %v5935_v8 = vshll.u32 %v5853_v34, 16  ;;  %5750 = vst [vmem:[#allocation2 + $0x70] sm:$0xf] %v5516_v22  ;;  %5753 = vst [vmem:[#allocation2 + $0x74] sm:$0x1] %v5752_v36  ;;  %v5914_v20 = vsel %vm14776_vm2, %v5909_v13, %v5913_v37  ;;  %v5922_v18 = vor.u32 %v5921_v56, %v5918_v30  ;;  %v5131_v4 = vmul.f32 %v16732_v7, %v16631_v57  ;;  %v14336_v22 = vld [vmem:[#allocation3 + $0x18] sm:$0xff]  }
 0x36b   : > { %v5129_v59 = vmul.f32 %v16631_v57, %v16738_v29  ;;  %v11990_v26 = vcombine.low %v5904_v10, %v5914_v20  ;;  %v5931_v33 = vrot.slane %v5929_v43, 4  ;;  %v5132_v52 = vmul.f32 %v16742_v6, %v16631_v57  ;;  %v5768_v35 = vld [vmem:[#allocation2 + $0x90] sm:$0xf] }
 0x36c   : > { %v5937_v44 = vrot.slane %v5935_v8, 5  ;;  %v5923_v49 = vrot.slane %v5922_v18, 4  ;;  %v5170_v54 = vadd.f32 %v16636_v40, %v5131_v4  ;;  %v5130_v41 = vmul.f32 %v16631_v57, %v16745_v11  ;;  %v5761_v8 = vld [vmem:[#allocation2 + $0x84] sm:$0xf] }
 0x36d   : > { %v5168_v31 = vadd.f32 %v16636_v40, %v5129_v59  ;;  %13222 = vmatmul.mubr.bf16.vlgmr.msra.gmra.mrb[0].mxu1 %v11990_v26  ;;  %v5932_v7 = vor.u32 %v5931_v33, %v5927_v23  ;;  %v5171_v29 = vadd.f32 %v16636_v40, %v5132_v52  ;;  %v5940_v1 = vshrl.u32 %v5809_v9, 16  ;;  %v5854_v26 = vld [vmem:[#allocation2 + $0x2c] sm:$0x1] }
 0x36e   : > { %v5943_v58 = vshll.u32 %v5809_v9, 16  ;;  %v5928_v38 = vsel %vm14776_vm2, %v5923_v49, %v5927_v23  ;;  %13254 = vmatpush3.bf16.msra.mxu1 %v16625_v12  ;;  %v5202_v6 = vmax.f32 %v5170_v54, 0.0  ;;  %v5169_v25 = vadd.f32 %v16636_v40, %v5130_v41  ;;  %v5772_v54 = vld [vmem:[#allocation2 + $0x98] sm:$0x1] }
 0x36f   : > { %v5200_v42 = vmax.f32 %v5168_v31, 0.0  ;;  %v5933_v37 = vrot.slane %v5932_v7, 4  ;;  %v5203_v39 = vmax.f32 %v5171_v29, 0.0  ;;  %v5942_v55 = vrot.slane %v5940_v1, 4  ;;  %13255 = vmatprep.subr.bf16.mxu1 %v14334_v32  ;;  %v14337_v1 = vld [vmem:[#allocation3 + $0x20] sm:$0xff]  }
 0x370   : > { %v5945_v11 = vrot.slane %v5943_v58, 5  ;;  %v12330_v63 = vpack.c.bf16 %v5202_v6, %v5202_v6  ;;  %v5201_v27 = vmax.f32 %v5169_v25, 0.0  ;;  %v5949_v15 = vshll.u32 %v5810_v47, 16  ;;  %v5765_v6 = vld [vmem:[#allocation2 + $0x8c] sm:$0x1] }
 0x371   : > { %v12328_v62 = vpack.c.bf16 %v5200_v42, %v5200_v42  ;;  %v5938_v17 = vsel %vm14776_vm2, %v5933_v37, %v5937_v44  ;;  %v12331_v34 = vpack.c.bf16 %v5203_v39, %v5203_v39  ;;  %v5953_v12 = vshrl.u32 %v5810_v47, 16  ;;  %v16822_v47 = vld [vmem:[#allocation2 + $0x30] sm:$0xf]  ;;  %v16828_v37 = vld [vmem:[#allocation2 + $0x34] sm:$0xf] }
 0x372   : > { %v5946_v30 = vor.u32 %v5945_v11, %v5942_v55  ;;  %v11991_v14 = vcombine.low %v5928_v38, %v5938_v17  ;;  %v5553_v21 = vshrl.u32 %v12330_v63, 16  ;;  %v5556_v48 = vshll.u32 %v12330_v63, 16  ;;  %13256 = vmatpush3.bf16.msra.mxu1 %v14334_v32  ;;  %v5855_v63 = vld [vmem:[#allocation2 + $0x38] sm:$0x1] }
 0x373   : > { %v5536_v5 = vshrl.u32 %v12328_v62, 16  ;;  %v5539_v10 = vshll.u32 %v12328_v62, 16  ;;  %v5561_v13 = vshrl.u32 %v12331_v34, 16  ;;  %v5564_v56 = vshll.u32 %v12331_v34, 16  ;;  %13257 = vmatprep.subr.bf16.mxu1 %v14335_v50  ;;  %v14338_v34 = vld [vmem:[#allocation3 + $0x28] sm:$0xff]  }
 0x374   : > { %v12329_v23 = vpack.c.bf16 %v5201_v27, %v5201_v27  ;;  %13225 = vmatprep.mubr.bf16.mxu1 %v11991_v14  ;;  %v5555_v36 = vrot.slane %v5553_v21, 7  ;;  %v5947_v20 = vrot.slane %v5946_v30, 4  ;;  %v5951_v18 = vrot.slane %v5949_v15, 5 }
 0x375   : > { %v5538_v43 = vrot.slane %v5536_v5, 7  ;;  %v5563_v4 = vrot.slane %v5561_v13, 7  ;;  %v5955_v33 = vrot.slane %v5953_v12, 4  ;;  %v5959_v25 = vshll.u32 %v5854_v26, 16 }
 0x376   : > { %v5544_v59 = vshrl.u32 %v12329_v23, 16  ;;  %v5547_v9 = vshll.u32 %v12329_v23, 16  ;;  %v5558_v44 = vor.u32 %v5556_v48, %v5555_v36  ;;  %v5559_v32 = vrot.slane %v5555_v36, 4  ;;  %13258 = vmatpush3.bf16.msra.mxu1 %v14335_v50  ;;  %v16842_v48 = vld [vmem:[#allocation2 + $0x3c] sm:$0xf] }
 0x377   : > { %v5541_v52 = vor.u32 %v5539_v10, %v5538_v43  ;;  %v5542_v49 = vrot.slane %v5538_v43, 4  ;;  %v5566_v31 = vor.u32 %v5564_v56, %v5563_v4  ;;  %v5568_v41 = vrot.slane %v5563_v4, 4  ;;  %13259 = vmatprep.subr.bf16.mxu1 %v14336_v22 }
 0x378   : > { %v5546_v7 = vrot.slane %v5544_v59, 7  ;;  %v5952_v29 = vsel %vm14776_vm2, %v5947_v20, %v5951_v18  ;;  %v5769_v58 = vsel %vm16651_vm11, %v5558_v44, %v5768_v35  ;;  %v5956_v42 = vor.u32 %v5955_v33, %v5951_v18 }
 0x379   : > { %v5762_v38 = vsel %vm16651_vm11, %v5541_v52, %v5761_v8  ;;  %5770 = vst [vmem:[#allocation2 + $0x90] sm:$0xf] %v5769_v58  ;;  %v5567_v39 = vsel %vm16658_vm12, %v5559_v32, %v5566_v31  ;;  %v5773_v55 = vsel %vm16664_vm13, %v5568_v41, %v5772_v54  ;;  %v5961_v27 = vrot.slane %v5959_v25, 5  ;;  %v16858_v32 = vld [vmem:[#allocation2 + $0x40] sm:$0xf] }
 0x37a   : > { %5763 = vst [vmem:[#allocation2 + $0x84] sm:$0xf] %v5762_v38  ;;  %v5549_v11 = vor.u32 %v5547_v9, %v5546_v7  ;;  %v5551_v50 = vrot.slane %v5546_v7, 4  ;;  %5771 = vst [vmem:[#allocation2 + $0x94] sm:$0xf] %v5567_v39  ;;  %v5957_v62 = vrot.slane %v5956_v42, 4  ;;  %13260 = vmatpush3.bf16.msra.mxu1 %v14336_v22  ;;  %v5135_v36 = vmul.f32 %v16754_v24, %v16631_v57 }
 0x37b   : > { %5774 = vst [vmem:[#allocation2 + $0x98] sm:$0x1] %v5773_v55  ;;  %v5964_v15 = vshrl.u32 %v16822_v47, 16  ;;  %v5967_v17 = vshll.u32 %v16822_v47, 16  ;;  %v5973_v14 = vshll.u32 %v16828_v37, 16  ;;  %v5977_v21 = vshrl.u32 %v16828_v37, 16  ;;  %13261 = vmatprep.subr.bf16.mxu1 %v14337_v1 }
 0x37c   : > { %v5550_v30 = vsel %vm16658_vm12, %v5542_v49, %v5549_v11  ;;  %v5766_v12 = vsel %vm16664_vm13, %v5551_v50, %v5765_v6  ;;  %v5962_v5 = vsel %vm14776_vm2, %v5957_v62, %v5961_v27  ;;  %v5983_v13 = vshll.u32 %v5855_v63, 16  ;;  %v14339_v24 = vld [vmem:[#allocation3 + $0x30] sm:$0xff]   ;;  %v14340_v6 = vld [vmem:[#allocation3 + $0x38] sm:$0xff]   ;;  %v5856_v39 = vld [vmem:[#allocation2 + $0x44] sm:$0x1] }
 0x37d   : > { %5764 = vst [vmem:[#allocation2 + $0x88] sm:$0xf] %v5550_v30  ;;  %5767 = vst [vmem:[#allocation2 + $0x8c] sm:$0x1] %v5766_v12  ;;  %v5966_v35 = vrot.slane %v5964_v15, 4  ;;  %v5969_v10 = vrot.slane %v5967_v17, 5  ;;  %v11992_v56 = vcombine.low %v5952_v29, %v5962_v5  ;;  %v5133_v20 = vmul.f32 %v16631_v57, %v16756_v45 }
 0x37e   : > { %v5975_v23 = vrot.slane %v5973_v14, 5  ;;  %v5979_v22 = vrot.slane %v5977_v21, 4  ;;  %v5985_v8 = vrot.slane %v5983_v13, 5  ;;  %v5136_v18 = vmul.f32 %v16760_v61, %v16631_v57  ;;  %13262 = vmatpush3.bf16.msra.mxu1 %v14337_v1  ;;  %v16869_v27 = vld [vmem:[#allocation3 + $0x80] sm:$0xff]  }
 0x37f   : > { %v5970_v43 = vor.u32 %v5969_v10, %v5966_v35  ;;  %13226 = vmatmul.mubr.bf16.gmra.mrb[4].mxu1 %v11992_v56  ;;  %v5174_v59 = vadd.f32 %v16636_v40, %v5135_v36  ;;  %v5134_v9 = vmul.f32 %v16631_v57, %v16769_v19  ;;  %v5988_v26 = vshrl.u32 %v16842_v48, 16  ;;  %13263 = vmatprep.subr.bf16.mxu1 %v14338_v34  ;;  %v5782_v35 = vld [vmem:[#allocation2 + $0xa8] sm:$0xf] }
 0x380   : > { %v5980_v4 = vor.u32 %v5979_v22, %v5975_v23  ;;  %v5172_v44 = vadd.f32 %v16636_v40, %v5133_v20  ;;  %v5175_v45 = vadd.f32 %v16636_v40, %v5136_v18  ;;  %v5991_v61 = vshll.u32 %v16842_v48, 16 }
 0x381   : > { %v5971_v33 = vrot.slane %v5970_v43, 4  ;;  %v5206_v49 = vmax.f32 %v5174_v59, 0.0  ;;  %v5173_v54 = vadd.f32 %v16636_v40, %v5134_v9  ;;  %v5990_v31 = vrot.slane %v5988_v26, 4  ;;  %v5775_v43 = vld [vmem:[#allocation2 + $0x9c] sm:$0xf] }
 0x382   : > { %v5981_v52 = vrot.slane %v5980_v4, 4  ;;  %v5204_v19 = vmax.f32 %v5172_v44, 0.0  ;;  %v5207_v41 = vmax.f32 %v5175_v45, 0.0  ;;  %v5993_v7 = vrot.slane %v5991_v61, 5  ;;  %13264 = vmatpush3.bf16.msra.mxu1 %v14338_v34 }
 0x383   : > { %v5976_v57 = vsel %vm14776_vm2, %v5971_v33, %v5975_v23  ;;  %v12334_v1 = vpack.c.bf16 %v5206_v49, %v5206_v49  ;;  %v5205_v58 = vmax.f32 %v5173_v54, 0.0  ;;  %v5997_v38 = vshll.u32 %v16858_v32, 16  ;;  %13265 = vmatprep.subr.bf16.mxu1 %v14339_v24  ;;  %v16875_v33 = vld [vmem:[#allocation2 + $0x48] sm:$0xf]  ;;  %v16879_v49 = vld [vmem:[#allocation2 + $0x4c] sm:$0xf] }
 0x384   : > { %v5986_v29 = vsel %vm14776_vm2, %v5981_v52, %v5985_v8  ;;  %v12332_v25 = vpack.c.bf16 %v5204_v19, %v5204_v19  ;;  %v12335_v40 = vpack.c.bf16 %v5207_v41, %v5207_v41  ;;  %v5994_v55 = vor.u32 %v5993_v7, %v5990_v31  ;;  %v5786_v8 = vld [vmem:[#allocation2 + $0xb0] sm:$0x1] }
 0x385   : > { %v11993_v42 = vcombine.low %v5976_v57, %v5986_v29  ;;  %v5587_v11 = vshrl.u32 %v12334_v1, 16  ;;  %v5590_v50 = vshll.u32 %v12334_v1, 16  ;;  %v12333_v63 = vpack.c.bf16 %v5205_v58, %v5205_v58  ;;  %v16881_v54 = vld [vmem:[#allocation2 + $0x50] sm:$0x1] }
 0x386   : > { %v16867_v62 = vrot.slane %v5997_v38, 5  ;;  %v5570_v15 = vshrl.u32 %v12332_v25, 16  ;;  %v5573_v17 = vshll.u32 %v12332_v25, 16  ;;  %v5595_v34 = vshrl.u32 %v12335_v40, 16  ;;  %13266 = vmatpush3.bf16.msra.mxu1 %v14339_v24  ;;  %v5779_v24 = vld [vmem:[#allocation2 + $0xa4] sm:$0x1] }
 0x387   : > { %13229 = vmatprep.mubr.bf16.mxu1 %v11993_v42  ;;  %v5598_v30 = vshll.u32 %v12335_v40, 16  ;;  %v5589_v12 = vrot.slane %v5587_v11, 7  ;;  %v5578_v14 = vshrl.u32 %v12333_v63, 16  ;;  %v5581_v21 = vshll.u32 %v12333_v63, 16  ;;  %13267 = vmatprep.subr.bf16.mxu1 %v14340_v6 }
 0x388   : > { %v5995_v5 = vrot.slane %v5994_v55, 4  ;;  %v5572_v10 = vrot.slane %v5570_v15, 7  ;;  %v5597_v13 = vrot.slane %v5595_v34, 7  ;;  %v6001_v56 = vshrl.u32 %v16858_v32, 16  ;;  %v14457_v55 = vld [vmem:[%s18605_s2] ss:$0 sm:$0xff] }
 0x389   : > { %v6007_v23 = vshll.u32 %v5856_v39, 16  ;;  %v5592_v22 = vor.u32 %v5590_v50, %v5589_v12  ;;  %v5593_v36 = vrot.slane %v5589_v12, 4  ;;  %v5580_v20 = vrot.slane %v5578_v14, 7  ;;  %v16905_v34 = vld [vmem:[#allocation2 + $0x54] sm:$0xf] }
 0x38a   : > { %v6000_v18 = vsel %vm14776_vm2, %v5995_v5, %v16867_v62  ;;  %v5575_v4 = vor.u32 %v5573_v17, %v5572_v10  ;;  %v5576_v59 = vrot.slane %v5572_v10, 4  ;;  %v5600_v9 = vor.u32 %v5598_v30, %v5597_v13  ;;  %13268 = vmatpush3.bf16.msra.mxu1 %v14340_v6  ;;  %v14458_v12 = vld [vmem:[%s18606_s3] ss:$0 sm:$0xff] }
 0x38b   : > { %v5602_v26 = vrot.slane %v5597_v13, 4  ;;  %v5783_v44 = vsel %vm16651_vm11, %v5592_v22, %v5782_v35  ;;  %v5583_v45 = vor.u32 %v5581_v21, %v5580_v20  ;;  %v5585_v61 = vrot.slane %v5580_v20, 4  ;;  %13301 = vmatprep.subr.bf16.mxu1 %v16869_v27 }
 0x38c   : > { %v6003_v52 = vrot.slane %v6001_v56, 4  ;;  %5784 = vst [vmem:[#allocation2 + $0xa8] sm:$0xf] %v5783_v44  ;;  %v5776_v31 = vsel %vm16651_vm11, %v5575_v4, %v5775_v43  ;;  %v5601_v57 = vsel %vm16658_vm12, %v5593_v36, %v5600_v9  ;;  %v6009_v41 = vrot.slane %v6007_v23, 5 }
 0x38d   : > { %v5787_v19 = vsel %vm16664_vm13, %v5602_v26, %v5786_v8  ;;  %5777 = vst [vmem:[#allocation2 + $0x9c] sm:$0xf] %v5776_v31  ;;  %5785 = vst [vmem:[#allocation2 + $0xac] sm:$0xf] %v5601_v57  ;;  %v5584_v7 = vsel %vm16658_vm12, %v5576_v59, %v5583_v45  ;;  %v5780_v29 = vsel %vm16664_vm13, %v5585_v61, %v5779_v24  ;;  %v6012_v58 = vshrl.u32 %v16875_v33, 16 }
 0x38e   : > { %5788 = vst [vmem:[#allocation2 + $0xb0] sm:$0x1] %v5787_v19  ;;  %v6004_v1 = vor.u32 %v6003_v52, %v16867_v62  ;;  %5778 = vst [vmem:[#allocation2 + $0xa0] sm:$0xf] %v5584_v7  ;;  %v6015_v38 = vshll.u32 %v16875_v33, 16  ;;  %v6021_v6 = vshll.u32 %v16879_v49, 16  ;;  %v5139_v11 = vmul.f32 %v14457_v55, %v16783_v2 }
 0x38f   : > { %5781 = vst [vmem:[#allocation2 + $0xa4] sm:$0x1] %v5780_v29  ;;  %v6025_v42 = vshrl.u32 %v16879_v49, 16  ;;  %v6031_v25 = vshll.u32 %v16881_v54, 16  ;;  %v6014_v39 = vrot.slane %v6012_v58, 4  ;;  %v5137_v50 = vmul.f32 %v14457_v55, %v16785_v53 }
 0x390   : > { %v6005_v40 = vrot.slane %v6004_v1, 4  ;;  %v6017_v63 = vrot.slane %v6015_v38, 5  ;;  %v6023_v62 = vrot.slane %v6021_v6, 5  ;;  %v5178_v14 = vadd.f32 %v14458_v12, %v5139_v11  ;;  %v16920_v24 = vld [vmem:[#allocation2 + $0x58] sm:$0xf] }
 0x391   : > { %v6027_v15 = vrot.slane %v6025_v42, 4  ;;  %v6033_v17 = vrot.slane %v6031_v25, 5  ;;  %v5176_v21 = vadd.f32 %v14458_v12, %v5137_v50  ;;  %v5140_v5 = vmul.f32 %v14457_v55, %v16787_v28  ;;  %v5796_v57 = vld [vmem:[#allocation2 + $0xc0] sm:$0xf]  ;;  %v16924_v11 = vld [vmem:[#allocation2 + $0x5c] sm:$0x1] }
 0x392   : > { %v6010_v30 = vsel %vm14776_vm2, %v6005_v40, %v6009_v41  ;;  %v6018_v35 = vor.u32 %v6017_v63, %v6014_v39  ;;  %v5138_v10 = vmul.f32 %v14457_v55, %v16789_v3  ;;  %v5210_v13 = vmax.f32 %v5178_v14, 0.0  ;;  %v5789_v41 = vld [vmem:[#allocation2 + $0xb4] sm:$0xf] }
 0x393   : > { %v11994_v2 = vcombine.low %v6000_v18, %v6010_v30  ;;  %v6028_v53 = vor.u32 %v6027_v15, %v6023_v62  ;;  %v5208_v56 = vmax.f32 %v5176_v21, 0.0  ;;  %v5179_v23 = vadd.f32 %v14458_v12, %v5140_v5  ;;  %v16926_v5 = vld [vmem:[#allocation2 + $0x60] sm:$0xf] }
 0x394   : > { %v6036_v22 = vshrl.u32 %v16905_v34, 16  ;;  %v6019_v36 = vrot.slane %v6018_v35, 4  ;;  %v5177_v8 = vadd.f32 %v14458_v12, %v5138_v10  ;;  %v6039_v20 = vshll.u32 %v16905_v34, 16 }
 0x395   : > { %13230 = vmatmul.mubr.bf16.gmra.mrb[8].mxu1 %v11994_v2  ;;  %v6029_v43 = vrot.slane %v6028_v53, 4  ;;  %v12338_v4 = vpack.c.bf16 %v5210_v13, %v5210_v13  ;;  %v12336_v59 = vpack.c.bf16 %v5208_v56, %v5208_v56  ;;  %v5211_v9 = vmax.f32 %v5179_v23, 0.0  ;;  %v5793_v53 = vld [vmem:[#allocation2 + $0xbc] sm:$0x1]  ;;  %v16933_v56 = vld [vmem:[#allocation2 + $0x64] sm:$0xf] }
 0x396   : > { %v6038_v28 = vrot.slane %v6036_v22, 4  ;;  %v6024_v18 = vsel %vm14776_vm2, %v6019_v36, %v6023_v62  ;;  %v5209_v26 = vmax.f32 %v5177_v8, 0.0  ;;  %v6041_v44 = vrot.slane %v6039_v20, 5  ;;  %v16935_v8 = vld [vmem:[#allocation2 + $0x68] sm:$0x1] }
 0x397   : > { %v6034_v3 = vsel %vm14776_vm2, %v6029_v43, %v6033_v17  ;;  %v5621_v61 = vshrl.u32 %v12338_v4, 16  ;;  %v5624_v52 = vshll.u32 %v12338_v4, 16  ;;  %v5604_v31 = vshrl.u32 %v12336_v59, 16  ;;  %v5800_v17 = vld [vmem:[#allocation2 + $0xc8] sm:$0x1] }
 0x398   : > { %v11995_v45 = vcombine.low %v6024_v18, %v6034_v3  ;;  %v5607_v19 = vshll.u32 %v12336_v59, 16  ;;  %v12339_v7 = vpack.c.bf16 %v5211_v9, %v5211_v9  ;;  %v12337_v29 = vpack.c.bf16 %v5209_v26, %v5209_v26  ;;  %v16937_v20 = vld [vmem:[#allocation2 + $0x6c] sm:$0xf] }
 0x399   : > { %v6042_v1 = vor.u32 %v6041_v44, %v6038_v28  ;;  %v5623_v58 = vrot.slane %v5621_v61, 7  ;;  %v5606_v38 = vrot.slane %v5604_v31, 7  ;;  %v6045_v6 = vshll.u32 %v16920_v24, 16  ;;  %v16942_v28 = vld [vmem:[#allocation2 + $0x70] sm:$0xf] }
 0x39a   : > { %13233 = vmatprep.mubr.bf16.mxu1 %v11995_v45  ;;  %v6049_v42 = vshrl.u32 %v16920_v24, 16  ;;  %v5629_v25 = vshrl.u32 %v12339_v7, 16  ;;  %v5632_v40 = vshll.u32 %v12339_v7, 16  ;;  %v5612_v39 = vshrl.u32 %v12337_v29, 16  ;;  %v16960_v7 = vld [vmem:[#allocation2 + $0x7c] sm:$0xf] }
 0x39b   : > { %v5615_v55 = vshll.u32 %v12337_v29, 16  ;;  %v5626_v50 = vor.u32 %v5624_v52, %v5623_v58  ;;  %v5627_v63 = vrot.slane %v5623_v58, 4  ;;  %v5609_v62 = vor.u32 %v5607_v19, %v5606_v38 }
 0x39c   : > { %v5610_v15 = vrot.slane %v5606_v38, 4  ;;  %v5631_v30 = vrot.slane %v5629_v25, 7  ;;  %v5614_v12 = vrot.slane %v5612_v39, 7  ;;  %v6043_v14 = vrot.slane %v6042_v1, 4  ;;  %v16964_v38 = vld [vmem:[#allocation2 + $0x74] sm:$0x1] }
 0x39d   : > { %v6047_v21 = vrot.slane %v6045_v6, 5  ;;  %v5797_v2 = vsel %vm16651_vm11, %v5626_v50, %v5796_v57  ;;  %v5790_v35 = vsel %vm16651_vm11, %v5609_v62, %v5789_v41  ;;  %v6051_v10 = vrot.slane %v6049_v42, 4  ;;  %v16954_v57 = vld [vmem:[#allocation2 + $0x78] sm:$0xf] }
 0x39e   : > { %v6055_v13 = vshll.u32 %v16924_v11, 16  ;;  %5798 = vst [vmem:[#allocation2 + $0xc0] sm:$0xf] %v5797_v2  ;;  %5791 = vst [vmem:[#allocation2 + $0xb4] sm:$0xf] %v5790_v35  ;;  %v5634_v23 = vor.u32 %v5632_v40, %v5631_v30  ;;  %v5636_v22 = vrot.slane %v5631_v30, 4  ;;  %v5617_v36 = vor.u32 %v5615_v55, %v5614_v12 }
 0x39f   : > { %v5619_v43 = vrot.slane %v5614_v12, 4  ;;  %v6048_v16 = vsel %vm14776_vm2, %v6043_v14, %v6047_v21  ;;  %v6052_v4 = vor.u32 %v6051_v10, %v6047_v21  ;;  %v6060_v9 = vshrl.u32 %v16926_v5, 16  ;;  %v16969_v30 = vld [vmem:[#allocation2 + $0x80] sm:$0x1] }
 0x3a0   : > { %v6057_v59 = vrot.slane %v6055_v13, 5  ;;  %v5635_v18 = vsel %vm16658_vm12, %v5627_v63, %v5634_v23  ;;  %v5801_v3 = vsel %vm16664_vm13, %v5636_v22, %v5800_v17  ;;  %v5618_v26 = vsel %vm16658_vm12, %v5610_v15, %v5617_v36  ;;  %v16974_v36 = vld [vmem:[#allocation2 + $0x84] sm:$0xf] }
 0x3a1   : > { %v5794_v44 = vsel %vm16664_vm13, %v5619_v43, %v5793_v53  ;;  %5799 = vst [vmem:[#allocation2 + $0xc4] sm:$0xf] %v5635_v18  ;;  %5802 = vst [vmem:[#allocation2 + $0xc8] sm:$0x1] %v5801_v3  ;;  %v6053_v45 = vrot.slane %v6052_v4, 4  ;;  %v6062_v61 = vrot.slane %v6060_v9, 4 }
 0x3a2   : > { %5792 = vst [vmem:[#allocation2 + $0xb8] sm:$0xf] %v5618_v26  ;;  %5795 = vst [vmem:[#allocation2 + $0xbc] sm:$0x1] %v5794_v44  ;;  %v6063_v52 = vshll.u32 %v16926_v5, 16  ;;  %v6069_v31 = vshll.u32 %v16933_v56, 16 }
 0x3a3   : > { %v6073_v19 = vshrl.u32 %v16933_v56, 16  ;;  %v6079_v51 = vshll.u32 %v16935_v8, 16  ;;  %v6084_v41 = vshrl.u32 %v16937_v20, 16  ;;  %v6087_v60 = vshll.u32 %v16937_v20, 16  ;;  %v16982_v44 = vld [vmem:[#allocation2 + $0x88] sm:$0xf] }
 0x3a4   : > { %v6058_v29 = vsel %vm14776_vm2, %v6053_v45, %v6057_v59  ;;  %v6065_v1 = vrot.slane %v6063_v52, 5  ;;  %v6071_v58 = vrot.slane %v6069_v31, 5  ;;  %v6093_v6 = vshll.u32 %v16942_v28, 16 }
 0x3a5   : > { %v11996_v42 = vcombine.low %v6048_v16, %v6058_v29  ;;  %v6075_v25 = vrot.slane %v6073_v19, 4  ;;  %v6081_v40 = vrot.slane %v6079_v51, 5  ;;  %v6086_v39 = vrot.slane %v6084_v41, 4  ;;  %v16987_v19 = vld [vmem:[#allocation2 + $0x90] sm:$0xf] }
 0x3a6   : > { %v6066_v55 = vor.u32 %v6065_v1, %v6062_v61  ;;  %v6089_v50 = vrot.slane %v6087_v60, 5  ;;  %v6095_v63 = vrot.slane %v6093_v6, 5  ;;  %v6097_v62 = vshrl.u32 %v16942_v28, 16  ;;  %v16989_v29 = vld [vmem:[#allocation2 + $0x8c] sm:$0x1] }
 0x3a7   : > { %13234 = vmatmul.mubr.bf16.gmra.mrb[12].mxu1 %v11996_v42  ;;  %v6076_v15 = vor.u32 %v6075_v25, %v6071_v58  ;;  %v6103_v17 = vshll.u32 %v16964_v38, 16  ;;  %v6108_v12 = vshrl.u32 %v16954_v57, 16  ;;  %v6111_v14 = vshll.u32 %v16954_v57, 16 }
 0x3a8   : > { %v6067_v21 = vrot.slane %v6066_v55, 4  ;;  %v6090_v2 = vor.u32 %v6089_v50, %v6086_v39  ;;  %v6099_v35 = vrot.slane %v6097_v62, 4  ;;  %v6117_v53 = vshll.u32 %v16960_v7, 16 }
 0x3a9   : > { %v6077_v10 = vrot.slane %v6076_v15, 4  ;;  %v6105_v13 = vrot.slane %v6103_v17, 5  ;;  %v6110_v23 = vrot.slane %v6108_v12, 4  ;;  %v6113_v22 = vrot.slane %v6111_v14, 5  ;;  %v17001_v12 = vld [vmem:[#allocation2 + $0x98] sm:$0x1] }
 0x3aa   : > { %v6072_v43 = vsel %vm14776_vm2, %v6067_v21, %v6071_v58  ;;  %v6091_v16 = vrot.slane %v6090_v2, 4  ;;  %v6100_v4 = vor.u32 %v6099_v35, %v6095_v63  ;;  %v6119_v59 = vrot.slane %v6117_v53, 5 }
 0x3ab   : > { %v6082_v9 = vsel %vm14776_vm2, %v6077_v10, %v6081_v40  ;;  %v6114_v18 = vor.u32 %v6113_v22, %v6110_v23  ;;  %v6121_v3 = vshrl.u32 %v16960_v7, 16  ;;  %v6127_v26 = vshll.u32 %v16969_v30, 16  ;;  %v16996_v40 = vld [vmem:[#allocation2 + $0x94] sm:$0xf]  ;;  %v17006_v10 = vld [vmem:[#allocation2 + $0x9c] sm:$0xf] }
 0x3ac   : > { %v11997_v45 = vcombine.low %v6072_v43, %v6082_v9  ;;  %v6096_v61 = vsel %vm14776_vm2, %v6091_v16, %v6095_v63  ;;  %v6101_v52 = vrot.slane %v6100_v4, 4  ;;  %v6132_v31 = vshrl.u32 %v16974_v36, 16  ;;  %v17009_v16 = vld [vmem:[#allocation2 + $0xa0] sm:$0xf] }
 0x3ad   : > { %v6115_v51 = vrot.slane %v6114_v18, 4  ;;  %v6123_v41 = vrot.slane %v6121_v3, 4  ;;  %v6129_v60 = vrot.slane %v6127_v26, 5  ;;  %v6135_v1 = vshll.u32 %v16974_v36, 16  ;;  %v17013_v3 = vld [vmem:[#allocation2 + $0xa4] sm:$0x1] }
 0x3ae   : > { %13237 = vmatprep.mubr.bf16.mxu1 %v11997_v45  ;;  %v6106_v58 = vsel %vm14776_vm2, %v6101_v52, %v6105_v13  ;;  %v6134_v6 = vrot.slane %v6132_v31, 4  ;;  %v6141_v42 = vshll.u32 %v16982_v44, 16  ;;  %v6145_v25 = vshrl.u32 %v16982_v44, 16  ;;  %v17016_v31 = vld [vmem:[#allocation2 + $0xa8] sm:$0xf] }
 0x3af   : > { %v11998_v39 = vcombine.low %v6096_v61, %v6106_v58  ;;  %v6120_v55 = vsel %vm14776_vm2, %v6115_v51, %v6119_v59  ;;  %v6124_v50 = vor.u32 %v6123_v41, %v6119_v59  ;;  %v6137_v63 = vrot.slane %v6135_v1, 5 }
 0x3b0   : > { %v6143_v62 = vrot.slane %v6141_v42, 5  ;;  %v6147_v15 = vrot.slane %v6145_v25, 4  ;;  %v6151_v17 = vshll.u32 %v16989_v29, 16  ;;  %v6156_v14 = vshrl.u32 %v16987_v19, 16 }
 0x3b1   : > { %13238 = vmatmul.mubr.bf16.gmra.mrb[16].mxu1 %v11998_v39  ;;  %v6125_v21 = vrot.slane %v6124_v50, 4  ;;  %v6138_v2 = vor.u32 %v6137_v63, %v6134_v6  ;;  %v6159_v35 = vshll.u32 %v16987_v19, 16  ;;  %v6165_v53 = vshll.u32 %v16996_v40, 16  ;;  %v17025_v39 = vld [vmem:[#allocation2 + $0xac] sm:$0xf] }
 0x3b2   : > { %v6148_v13 = vor.u32 %v6147_v15, %v6143_v62  ;;  %v6153_v23 = vrot.slane %v6151_v17, 5  ;;  %v6158_v22 = vrot.slane %v6156_v14, 4  ;;  %v6169_v43 = vshrl.u32 %v16996_v40, 16 }
 0x3b3   : > { %v6130_v4 = vsel %vm14776_vm2, %v6125_v21, %v6129_v60  ;;  %v6139_v59 = vrot.slane %v6138_v2, 4  ;;  %v6161_v9 = vrot.slane %v6159_v35, 5  ;;  %v6167_v18 = vrot.slane %v6165_v53, 5  ;;  %v17031_v35 = vld [vmem:[#allocation2 + $0xb4] sm:$0xf] }
 0x3b4   : > { %v11999_v26 = vcombine.low %v6120_v55, %v6130_v4  ;;  %v6149_v45 = vrot.slane %v6148_v13, 4  ;;  %v6171_v61 = vrot.slane %v6169_v43, 4  ;;  %v6175_v52 = vshll.u32 %v17001_v12, 16  ;;  %v17037_v43 = vld [vmem:[#allocation2 + $0xb8] sm:$0xf] }
 0x3b5   : > { %v6144_v51 = vsel %vm14776_vm2, %v6139_v59, %v6143_v62  ;;  %v6162_v41 = vor.u32 %v6161_v9, %v6158_v22  ;;  %v6180_v1 = vshrl.u32 %v17006_v10, 16  ;;  %v6183_v60 = vshll.u32 %v17006_v10, 16  ;;  %v17027_v62 = vld [vmem:[#allocation2 + $0xb0] sm:$0x1] }
 0x3b6   : > { %13241 = vmatprep.mubr.bf16.mxu1 %v11999_v26  ;;  %v6154_v58 = vsel %vm14776_vm2, %v6149_v45, %v6153_v23  ;;  %v6172_v6 = vor.u32 %v6171_v61, %v6167_v18  ;;  %v6177_v42 = vrot.slane %v6175_v52, 5  ;;  %v6189_v25 = vshll.u32 %v17009_v16, 16 }
 0x3b7   : > { %v12000_v55 = vcombine.low %v6144_v51, %v6154_v58  ;;  %v6163_v50 = vrot.slane %v6162_v41, 4  ;;  %v6182_v63 = vrot.slane %v6180_v1, 4  ;;  %v6185_v15 = vrot.slane %v6183_v60, 5  ;;  %v17042_v41 = vld [vmem:[#allocation2 + $0xbc] sm:$0x1] }
 0x3b8   : > { %v6173_v17 = vrot.slane %v6172_v6, 4  ;;  %v6191_v14 = vrot.slane %v6189_v25, 5  ;;  %v6193_v21 = vshrl.u32 %v17009_v16, 16  ;;  %v6199_v2 = vshll.u32 %v17013_v3, 16 }
 0x3b9   : > { %13242 = vmatmul.mubr.bf16.gmra.mrb[20].mxu1 %v12000_v55  ;;  %v6168_v53 = vsel %vm14776_vm2, %v6163_v50, %v6167_v18  ;;  %v6186_v13 = vor.u32 %v6185_v15, %v6182_v63  ;;  %v6204_v23 = vshrl.u32 %v17016_v31, 16  ;;  %v6207_v22 = vshll.u32 %v17016_v31, 16 }
 0x3ba   : > { %v6178_v4 = vsel %vm14776_vm2, %v6173_v17, %v6177_v42  ;;  %v6195_v59 = vrot.slane %v6193_v21, 4  ;;  %v6201_v9 = vrot.slane %v6199_v2, 5  ;;  %v6213_v26 = vshll.u32 %v17025_v39, 16 }
 0x3bb   : > { %v12001_v45 = vcombine.low %v6168_v53, %v6178_v4  ;;  %v6187_v61 = vrot.slane %v6186_v13, 4  ;;  %v6206_v52 = vrot.slane %v6204_v23, 4  ;;  %v6209_v51 = vrot.slane %v6207_v22, 5 }
 0x3bc   : > { %v6196_v18 = vor.u32 %v6195_v59, %v6191_v14  ;;  %v6215_v1 = vrot.slane %v6213_v26, 5  ;;  %v6217_v60 = vshrl.u32 %v17025_v39, 16  ;;  %v6223_v58 = vshll.u32 %v17027_v62, 16 }
 0x3bd   : > { %13245 = vmatprep.mubr.bf16.mxu1 %v12001_v45  ;;  %v6210_v6 = vor.u32 %v6209_v51, %v6206_v52  ;;  %v6228_v42 = vshrl.u32 %v17031_v35, 16  ;;  %v6231_v25 = vshll.u32 %v17031_v35, 16  ;;  %v6192_v55 = vsel %vm14776_vm2, %v6187_v61, %v6191_v14 }
 0x3be   : > { %v6197_v50 = vrot.slane %v6196_v18, 4  ;;  %v6219_v63 = vrot.slane %v6217_v60, 4  ;;  %v6237_v15 = vshll.u32 %v17037_v43, 16  ;;  %v6241_v53 = vshrl.u32 %v17037_v43, 16 }
 0x3bf   : > { %v6211_v17 = vrot.slane %v6210_v6, 4  ;;  %v6230_v21 = vrot.slane %v6228_v42, 4  ;;  %v6233_v2 = vrot.slane %v6231_v25, 5  ;;  %v6247_v4 = vshll.u32 %v17042_v41, 16 }
 0x3c0   : > { %v6202_v13 = vsel %vm14776_vm2, %v6197_v50, %v6201_v9  ;;  %v6220_v23 = vor.u32 %v6219_v63, %v6215_v1  ;;  %v6239_v22 = vrot.slane %v6237_v15, 5  ;;  %v6243_v45 = vrot.slane %v6241_v53, 4 }
 0x3c1   : > { %v12002_v59 = vcombine.low %v6192_v55, %v6202_v13  ;;  %v6234_v26 = vor.u32 %v6233_v2, %v6230_v21  ;;  %v6225_v61 = vrot.slane %v6223_v58, 5  ;;  %v6216_v18 = vsel %vm14776_vm2, %v6211_v17, %v6215_v1  ;;  %v14459_v13 = vld [vmem:[#allocation2] sm:$0xf]  ;;  %v6856_v2 = vld [vmem:[#allocation2 + $0x78] sm:$0xe] }
 0x3c2   : > { %v6221_v14 = vrot.slane %v6220_v23, 4  ;;  %v6244_v51 = vor.u32 %v6243_v45, %v6239_v22  ;;  %v6249_v6 = vrot.slane %v6247_v4, 5  ;;  %v12020_v55 = vcombine.low %v16905_v34, %v16920_v24  ;;  %v17079_v23 = vld [vmem:[#allocation2 + $0x4] sm:$0xf] }
 0x3c3   : > { %13246 = vmatmul.mubr.bf16.gmra.mrb[24].mxu1 %v12002_v59  ;;  %v6235_v52 = vrot.slane %v6234_v26, 4  ;;  %v12021_v58 = vcombine.low %v16926_v5, %v16933_v56  ;;  %v12022_v50 = vcombine.low %v16937_v20, %v16942_v28  ;;  %v12023_v1 = vcombine.low %v16954_v57, %v16960_v7  ;;  %v14461_v59 = vld [vmem:[#allocation2 + $0xc] sm:$0xf]  ;;  %v17084_v26 = vld [vmem:[#allocation2 + $0x10] sm:$0xf] }
 0x3c4   : > { %v6226_v60 = vsel %vm14776_vm2, %v6221_v14, %v6225_v61  ;;  %v6245_v25 = vrot.slane %v6244_v51, 4  ;;  %v12014_v45 = vcombine.low %v14461_v59, %v17084_v26  ;;  %v14346_v14 = vld [vmem:[#allocation3 + $0x88] sm:$0xff]   ;;  %v6853_v61 = vld [vmem:[#allocation2 + $0x54] sm:$0xe]  ;;  %v17087_v51 = vld [vmem:[#allocation2 + $0x1c] sm:$0xf]  ;;  %v18877_v34 = vcombine.low %v16974_v36, %v16982_v44 }
 0x3c5   : > { %v12003_v9 = vcombine.low %v6216_v18, %v6226_v60  ;;  %v6240_v42 = vsel %vm14776_vm2, %v6235_v52, %v6239_v22  ;;  %v12013_v22 = vcombine.low %v14459_v13, %v17079_v23  ;;  %v14463_v52 = vld [vmem:[#allocation2 + $0x18] sm:$0xf]  ;;  %v6854_v60 = vld [vmem:[#allocation2 + $0x60] sm:$0xe]  ;;  %v6955_v4 = vrot.slane %v16935_v8, 5 }
 0x3c6   : > { %v6250_v15 = vsel %vm14776_vm2, %v6245_v25, %v6249_v6  ;;  %v12015_v18 = vcombine.low %v14463_v52, %v17087_v51  ;;  %v6945_v6 = vrot.slane %v16920_v24, 5  ;;  %v6855_v25 = vld [vmem:[#allocation2 + $0x6c] sm:$0xe]  ;;  %v6948_v52 = vrot.slane %v16924_v11, 5 }
 0x3c7   : > { %13249 = vmatprep.mubr.bf16.mxu1 %v12003_v9  ;;  %v12004_v53 = vcombine.low %v6240_v42, %v6250_v15  ;;  %v12044_v9 = vrot.slane %v6853_v61, 9  ;;  %v6952_v42 = vrot.slane %v16933_v56, 5  ;;  %v14465_v15 = vld [vmem:[#allocation2 + $0x24] sm:$0xf]  ;;  %v12046_v11 = vrot.slane %v6855_v25, 9 }
 0x3c8   : > { %v6947_v59 = vrot.slane %v6945_v6, 4  ;;  %v18878_v24 = vcombine.low %v16987_v19, %v16996_v40  ;;  %v6896_v5 = vrot.slane %v17079_v23, 5  ;;  %v6846_v56 = vld [vmem:[#allocation2] sm:$0xe]  ;;  %v18880_v57 = vcombine.low %v17016_v31, %v17025_v39  ;;  %v14468_v31 = vld [vmem:[#allocation2 + $0x14] sm:$0x1] }
 0x3c9   : > { %v6954_v61 = vrot.slane %v6952_v42, 4  ;;  %v6910_v19 = vrot.slane %v17087_v51, 5  ;;  %v6848_v23 = vld [vmem:[#allocation2 + $0x18] sm:$0xe] }
 0x3ca   : > { %v6898_v20 = vrot.slane %v6896_v5, 4 }
 0x3cb   : > { %13250 = vmatmul.mubr.bf16.gmra.mrb[28].mxu1 %v12004_v53  ;;  %v17093_v53 = vld [vmem:[#allocation2 + $0x28] sm:$0xf]  ;;  %v17117_v8 = vsel %vm15106_vm5, %v6954_v61, %v6955_v4 }
 0x3cc   : > { %13269 = vmatprep.mubr.bf16.mxu1 %v12013_v22  ;;  %v12016_v13 = vcombine.low %v14465_v15, %v17093_v53  ;;  %v14349_v22 = vld [vmem:[#allocation3 + $0x90] sm:$0xff]   ;;  %v17106_v15 = vsel %vm15106_vm5, %v6947_v59, %v6948_v52  ;;  %v14352_v59 = vld [vmem:[#allocation3 + $0x98] sm:$0xff]   ;;  %v12047_v52 = vrot.slane %v6856_v2, 9  ;;  %v6980_v2 = vrot.slane %v16996_v40, 5 }
 0x3cd   : > { %v6917_v51 = vrot.slane %v17093_v53, 5  ;;  %v14471_v53 = vld [vmem:[#allocation2 + $0x2c] sm:$0x1] }
 0x3d3   : > { %13270 = vmatmul.mubr.bf16.vlgmr.msra.gmra.mrb[0].mxu1 %v12014_v45  ;;  %v12045_v45 = vrot.slane %v6854_v60, 9  ;;  %v6959_v60 = vrot.slane %v16942_v28, 5  ;;  %v18879_v28 = vcombine.low %v17006_v10, %v17009_v16  ;;  %v18881_v10 = vcombine.low %v17031_v35, %v17037_v43  ;;  %v14470_v35 = vld [vmem:[#allocation2 + $0x34] sm:$0xf] }
 0x3d4   : > { %13273 = vmatprep.mubr.bf16.mxu1 %v12015_v18  ;;  %13302 = vmatpush3.bf16.msra.mxu1 %v16869_v27  ;;  %v12017_v18 = vcombine.low %v16822_v47, %v16828_v37  ;;  %v17101_v27 = vsel %vm15106_vm5, %v12044_v9, %v6945_v6  ;;  %v6857_v47 = vld [vmem:[#allocation2 + $0x84] sm:$0xe]  ;;  %v6962_v6 = vrot.slane %v16964_v38, 5  ;;  %v6966_v9 = vrot.slane %v16960_v7, 5 }
 0x3d5   : > { %13303 = vmatprep.subr.bf16.mxu1 %v14346_v14  ;;  %v17110_v21 = vsel %vm15106_vm5, %v12045_v45, %v6952_v42  ;;  %v6961_v25 = vrot.slane %v6959_v60, 4  ;;  %v6858_v45 = vld [vmem:[#allocation2 + $0x90] sm:$0xe]  ;;  %v17126_v37 = vsel %vm15106_vm5, %v12046_v11, %v6959_v60  ;;  %v12048_v61 = vrot.slane %v6857_v47, 9 }
 0x3d6   : > { %v6968_v4 = vrot.slane %v6966_v9, 4  ;;  %v6973_v38 = vrot.slane %v16982_v44, 5  ;;  %v17135_v42 = vsel %vm15106_vm5, %v12047_v52, %v6966_v9  ;;  %v12049_v47 = vrot.slane %v6858_v45, 9  ;;  %v6860_v52 = vld [vmem:[#allocation2 + $0xa8] sm:$0xe]  ;;  %v14358_v45 = vld [vmem:[#allocation3 + $0xa8] sm:$0xff]  }
 0x3d7   : > { %v17131_v17 = vsel %vm15106_vm5, %v6961_v25, %v6962_v6  ;;  %v6859_v6 = vld [vmem:[#allocation2 + $0x9c] sm:$0xe]  ;;  %v12018_v9 = vcombine.low %v16842_v48, %v16858_v32  ;;  %v6987_v32 = vrot.slane %v17009_v16, 5  ;;  %v6903_v44 = vrot.slane %v17084_v26, 5  ;;  %v6847_v16 = vld [vmem:[#allocation2 + $0xc] sm:$0xe] }
 0x3d8   : > { %13304 = vmatpush3.bf16.msra.mxu1 %v14346_v14  ;;  %v6969_v14 = vrot.slane %v16969_v30, 5  ;;  %v6976_v30 = vrot.slane %v16989_v29, 5  ;;  %v6975_v60 = vrot.slane %v6973_v38, 4  ;;  %v14355_v25 = vld [vmem:[#allocation3 + $0xa0] sm:$0xff]   ;;  %v17152_v11 = vsel %vm15106_vm5, %v12048_v61, %v6973_v38  ;;  %v6861_v38 = vld [vmem:[#allocation2 + $0xb4] sm:$0xe] }
 0x3d9   : > { %13305 = vmatprep.subr.bf16.mxu1 %v14349_v22  ;;  %v17160_v48 = vsel %vm15106_vm5, %v12049_v47, %v6980_v2  ;;  %v6994_v61 = vrot.slane %v17025_v39, 5  ;;  %v12051_v47 = vrot.slane %v6860_v52, 9  ;;  %v12019_v29 = vcombine.low %v16875_v33, %v16879_v49 }
 0x3da   : > { %v12052_v33 = vrot.slane %v6861_v38, 9  ;;  %v6906_v39 = vrot.slane %v14468_v31, 5  ;;  %v6851_v31 = vld [vmem:[#allocation2 + $0x3c] sm:$0xe] }
 0x3db   : > { %13274 = vmatmul.mubr.bf16.gmra.mrb[4].mxu1 %v12016_v13  ;;  %v17143_v13 = vsel %vm15106_vm5, %v6968_v4, %v6969_v14  ;;  %v17156_v14 = vsel %vm15106_vm5, %v6975_v60, %v6976_v30  ;;  %v12050_v4 = vrot.slane %v6859_v6, 9  ;;  %v6989_v60 = vrot.slane %v6987_v32, 4 }
 0x3dc   : > { %13277 = vmatprep.mubr.bf16.mxu1 %v12017_v18  ;;  %13306 = vmatpush3.bf16.msra.mxu1 %v14349_v22  ;;  %v6982_v18 = vrot.slane %v6980_v2, 4  ;;  %v6983_v22 = vrot.slane %v17001_v12, 5  ;;  %v6990_v2 = vrot.slane %v17013_v3, 5  ;;  %v6996_v63 = vrot.slane %v6994_v61, 4 }
 0x3dd   : > { %13307 = vmatprep.subr.bf16.mxu1 %v14352_v59  ;;  %v7001_v6 = vrot.slane %v17037_v43, 5  ;;  %v17187_v3 = vsel %vm15106_vm5, %v12051_v47, %v6994_v61  ;;  %v14361_v61 = vld [vmem:[#allocation3 + $0xb0] sm:$0xff]   ;;  %v6924_v43 = vrot.slane %v14470_v35, 5 }
 0x3de   : > { %v17167_v12 = vsel %vm15106_vm5, %v6982_v18, %v6983_v22  ;;  %v6997_v18 = vrot.slane %v17027_v62, 5  ;;  %v17183_v22 = vsel %vm15106_vm5, %v6989_v60, %v6990_v2  ;;  %v12038_v60 = vrot.slane %v6847_v16, 9 }
 0x3df   : > { %v7003_v30 = vrot.slane %v7001_v6, 4  ;;  %v12039_v2 = vrot.slane %v6848_v23, 9  ;;  %v14474_v23 = vld [vmem:[#allocation2 + $0x44] sm:$0x1] }
 0x3e0   : > { %13308 = vmatpush3.bf16.msra.mxu1 %v14352_v59  ;;  %v17179_v59 = vsel %vm15106_vm5, %v12050_v4, %v6987_v32  ;;  %v17193_v62 = vsel %vm15106_vm5, %v6996_v63, %v6997_v18  ;;  %v7004_v32 = vrot.slane %v17042_v41, 5  ;;  %v14364_v41 = vld [vmem:[#allocation3 + $0xb8] sm:$0xff]   ;;  %v6904_v18 = vsel %vm15106_vm5, %v12038_v60, %v6903_v44  ;;  %v14369_v60 = vld [vmem:[#allocation3 + $0xe0] sm:$0xff]   ;;  %v7754_v4 = vld [vmem:[#allocation2 + $0xac] sm:$0xf] }
 0x3e1   : > { %13309 = vmatprep.subr.bf16.mxu1 %v14355_v25 }
 0x3e2   : > { %v17204_v38 = vsel %vm15106_vm5, %v7003_v30, %v7004_v32  ;;  %v14366_v32 = vld [vmem:[#allocation3 + $0xc8] sm:$0xff]  }
 0x3e3   : > { %13278 = vmatmul.mubr.bf16.gmra.mrb[8].mxu1 %v12018_v9  ;;  %v17200_v9 = vsel %vm15106_vm5, %v12052_v33, %v7001_v6  ;;  %v6911_v33 = vsel %vm15106_vm5, %v12039_v2, %v6910_v19 }
 0x3e4   : > { %13281 = vmatprep.mubr.bf16.mxu1 %v12019_v29  ;;  %13310 = vmatpush3.bf16.msra.mxu1 %v14355_v25  ;;  %v14365_v25 = vld [vmem:[#allocation3 + $0xc0] sm:$0xff]   ;;  %v12037_v29 = vrot.slane %v6846_v56, 9  ;;  %v6850_v56 = vld [vmem:[#allocation2 + $0x30] sm:$0xe] }
 0x3e5   : > { %13311 = vmatprep.subr.bf16.mxu1 %v14358_v45 }
 0x3e6   : > { %v6897_v7 = vsel %vm15106_vm5, %v12037_v29, %v6896_v5  ;;  %v6920_v5 = vrot.slane %v14471_v53, 5  ;;  %v14367_v29 = vld [vmem:[#allocation3 + $0xd0] sm:$0xff]   ;;  %v17275_v53 = vld [vmem:[#allocation2 + $0x38] sm:$0x1] }
 0x3e8   : > { %13312 = vmatpush3.bf16.msra.mxu1 %v14358_v45  ;;  %v14469_v45 = vld [vmem:[#allocation2 + $0x20] sm:$0x1] }
 0x3e9   : > { %13313 = vmatprep.subr.bf16.mxu1 %v14361_v61  ;;  %v6913_v30 = vrot.slane %v14469_v45, 5  ;;  %v6934_v45 = vrot.slane %v14474_v23, 5 }
 0x3eb   : > { %13282 = vmatmul.mubr.bf16.gmra.mrb[12].mxu1 %v12020_v55  ;;  %v14467_v55 = vld [vmem:[#allocation2 + $0x8] sm:$0x1] }
 0x3ec   : > { %13285 = vmatprep.mubr.bf16.mxu1 %v12021_v58  ;;  %13314 = vmatpush3.bf16.msra.mxu1 %v14361_v61  ;;  %v6899_v58 = vrot.slane %v14467_v55, 5  ;;  %v14472_v55 = vld [vmem:[#allocation2 + $0x38] sm:$0x1] }
 0x3ed   : > { %13315 = vmatprep.subr.bf16.mxu1 %v14364_v41 }
 0x3ee   : > { %v6900_v36 = vsel %vm15106_vm5, %v6898_v20, %v6899_v58  ;;  %v6927_v58 = vrot.slane %v14472_v55, 5  ;;  %v17280_v55 = vld [vmem:[#allocation2 + $0x44] sm:$0x1] }
 0x3ef   : > { %v12053_v40 = vcombine.low %v6897_v7, %v6900_v36  ;;  %v12041_v36 = vrot.slane %v6850_v56, 9 }
 0x3f0   : > { %13316 = vmatpush3.bf16.msra.mxu1 %v14364_v41  ;;  %v6919_v41 = vrot.slane %v6917_v51, 4 }
 0x3f1   : > { %13349 = vmatprep.subr.bf16.mxu1 %v14365_v25 }
 0x3f3   : > { %13286 = vmatmul.mubr.bf16.gmra.mrb[16].mxu1 %v12022_v50  ;;  %v6905_v50 = vrot.slane %v6903_v44, 4 }
 0x3f4   : > { %13289 = vmatprep.mubr.bf16.mxu1 %v12023_v1  ;;  %v6912_v1 = vrot.slane %v6910_v19, 4  ;;  %v6938_v19 = vrot.slane %v16879_v49, 5  ;;  %v6941_v49 = vrot.slane %v16881_v54, 5  ;;  %v14370_v54 = vld [vmem:[#allocation3 + $0xe8] sm:$0xff]  }
 0x3f5   : > { %v6907_v26 = vsel %vm15106_vm5, %v6905_v50, %v6906_v39  ;;  %v6925_v50 = vsel %vm15106_vm5, %v12041_v36, %v6924_v43 }
 0x3f6   : > { %v6914_v47 = vsel %vm15106_vm5, %v6912_v1, %v6913_v30  ;;  %v12054_v6 = vcombine.low %v6904_v18, %v6907_v26  ;;  %v6940_v39 = vrot.slane %v6938_v19, 4  ;;  %v6852_v30 = vld [vmem:[#allocation2 + $0x48] sm:$0xe]  ;;  %v12042_v26 = vrot.slane %v6851_v31, 9 }
 0x3f7   : > { %v12055_v61 = vcombine.low %v6911_v33, %v6914_v47  ;;  %v12043_v2 = vrot.slane %v6852_v30, 9  ;;  %v14371_v33 = vld [vmem:[#allocation3 + $0xf0] sm:$0xff]   ;;  %v17312_v30 = vld [vmem:[#allocation2 + $0x64] sm:$0xf] }
 0x3f8   : > { %v6942_v47 = vsel %vm15106_vm5, %v6940_v39, %v6941_v49 }
 0x3f9   : > { %v6939_v18 = vsel %vm15106_vm5, %v12043_v2, %v6938_v19  ;;  %v18883_v19 = vcombine.low %v17110_v21, %v17117_v8  ;;  %v8558_v8 = vrot.slane %v17275_v53, 5 }
 0x3fb   : > { %13290 = vmatmul.mubr.bf16.gmra.mrb[20].mxu1 %v18877_v34  ;;  %v6849_v34 = vld [vmem:[#allocation2 + $0x24] sm:$0xe] }
 0x3fc   : > { %13293 = vmatprep.mubr.bf16.mxu1 %v18878_v24  ;;  %v6926_v24 = vrot.slane %v6924_v43, 4  ;;  %v12040_v20 = vrot.slane %v6849_v34, 9  ;;  %v8470_v34 = vld [vmem:[#allocation2 + $0x24] sm:$0xe] }
 0x3fe   : > { %v6928_v44 = vsel %vm15106_vm5, %v6926_v24, %v6927_v58  ;;  %v14372_v24 = vld [vmem:[#allocation3 + $0xf8] sm:$0xff]   ;;  %v17282_v58 = vld [vmem:[#allocation2 + $0x4c] sm:$0xf] }
 0x3ff   : > { %v12057_v16 = vcombine.low %v6925_v50, %v6928_v44  ;;  %v8472_v44 = vld [vmem:[#allocation2 + $0x3c] sm:$0xe]  ;;  %v8473_v50 = vld [vmem:[#allocation2 + $0x48] sm:$0xe] }
 0x400   : > { %v12129_v39 = vrot.slane %v8472_v44, 9  ;;  %v18886_v44 = vcombine.low %v17126_v37, %v17131_v17  ;;  %v17363_v17 = vld [vmem:[#allocation2 + $0x80] sm:$0x1] }
 0x403   : > { %13294 = vmatmul.mubr.bf16.gmra.mrb[24].mxu1 %v18879_v28  ;;  %v6921_v28 = vsel %vm15106_vm5, %v6919_v41, %v6920_v5  ;;  %v17273_v41 = vld [vmem:[#allocation2 + $0x34] sm:$0xf]  ;;  %v17277_v5 = vld [vmem:[#allocation2 + $0x40] sm:$0xf] }
 0x404   : > { %13297 = vmatprep.mubr.bf16.mxu1 %v18880_v57  ;;  %v14473_v57 = vld [vmem:[#allocation2 + $0x40] sm:$0xf]  ;;  %v8562_v23 = vrot.slane %v17277_v5, 5 }
 0x405   : > { %v6931_v7 = vrot.slane %v14473_v57, 5  ;;  %v12127_v57 = vrot.slane %v8470_v34, 9 }
 0x407   : > { %v6933_v1 = vrot.slane %v6931_v7, 4  ;;  %v6932_v35 = vsel %vm15106_vm5, %v12042_v26, %v6931_v7  ;;  %v12130_v26 = vrot.slane %v8473_v50, 9 }
 0x40b   : > { %13298 = vmatmul.mubr.bf16.gmra.mrb[28].mxu1 %v18881_v10  ;;  %v14368_v10 = vld [vmem:[#allocation3 + $0xd8] sm:$0xff]  }
 0x40c   : > { %13317 = vmatprep.mubr.bf16.mxu1 %v12053_v40 }
 0x413   : > { %13318 = vmatmul.mubr.bf16.vlgmr.msra.gmra.mrb[0].mxu1 %v12054_v6  ;;  %v12059_v6 = vcombine.low %v6939_v18, %v6942_v47  ;;  %v17326_v47 = vsel %vm15106_vm5, %v12129_v39, %v8562_v23  ;;  %v8475_v18 = vld [vmem:[#allocation2 + $0x60] sm:$0xe]  ;;  %v18888_v39 = vcombine.low %v17135_v42, %v17143_v13 }
 0x414   : > { %13321 = vmatprep.mubr.bf16.mxu1 %v12055_v61  ;;  %13350 = vmatpush3.bf16.msra.mxu1 %v14365_v25  ;;  %v6918_v25 = vsel %vm15106_vm5, %v12040_v20, %v6917_v51  ;;  %v6935_v51 = vsel %vm15106_vm5, %v6933_v1, %v6934_v45  ;;  %v17271_v61 = vld [vmem:[#allocation2 + $0x2c] sm:$0x1]  ;;  %v18882_v20 = vcombine.low %v17101_v27, %v17106_v15  ;;  %v17296_v27 = vld [vmem:[#allocation3 + $0x100] sm:$0xff]   ;;  %v8474_v45 = vld [vmem:[#allocation2 + $0x54] sm:$0xe] }
 0x415   : > { %13351 = vmatprep.subr.bf16.mxu1 %v14366_v32  ;;  %v12056_v40 = vcombine.low %v6918_v25, %v6921_v28  ;;  %v12058_v43 = vcombine.low %v6932_v35, %v6935_v51  ;;  %v17287_v28 = vld [vmem:[#allocation2 + $0x50] sm:$0x1]  ;;  %v8551_v36 = vrot.slane %v17271_v61, 5  ;;  %v17293_v25 = vld [vmem:[#allocation2 + $0x58] sm:$0xf]  ;;  %v8569_v51 = vrot.slane %v17282_v58, 5 }
 0x416   : > { %v17298_v15 = vld [vmem:[#allocation2 + $0x5c] sm:$0x1]  ;;  %v8564_v35 = vrot.slane %v8562_v23, 4  ;;  %v12131_v34 = vrot.slane %v8474_v45, 9  ;;  %v17361_v23 = vld [vmem:[#allocation2 + $0x74] sm:$0x1] }
 0x417   : > { %v8593_v37 = vrot.slane %v17361_v23, 5 }
 0x418   : > { %13352 = vmatpush3.bf16.msra.mxu1 %v14366_v32  ;;  %v17269_v32 = vld [vmem:[#allocation2 + $0x28] sm:$0xf] }
 0x419   : > { %13353 = vmatprep.subr.bf16.mxu1 %v14367_v29  ;;  %v8548_v56 = vrot.slane %v17269_v32, 5 }
 0x41b   : > { %13322 = vmatmul.mubr.bf16.gmra.mrb[4].mxu1 %v12056_v40  ;;  %v8550_v7 = vrot.slane %v8548_v56, 4  ;;  %v8555_v40 = vrot.slane %v17273_v41, 5 }
 0x41c   : > { %13325 = vmatprep.mubr.bf16.mxu1 %v12057_v16  ;;  %13354 = vmatpush3.bf16.msra.mxu1 %v14367_v29  ;;  %v8471_v29 = vld [vmem:[#allocation2 + $0x30] sm:$0xe] }
 0x41d   : > { %13355 = vmatprep.subr.bf16.mxu1 %v14368_v10  ;;  %v17306_v16 = vsel %vm15106_vm5, %v8550_v7, %v8551_v36  ;;  %v12128_v21 = vrot.slane %v8471_v29, 9  ;;  %v8557_v31 = vrot.slane %v8555_v40, 4  ;;  %v8583_v7 = vrot.slane %v17312_v30, 5  ;;  %v8476_v36 = vld [vmem:[#allocation2 + $0x6c] sm:$0xe] }
 0x41f   : > { %v17316_v49 = vsel %vm15106_vm5, %v12128_v21, %v8555_v40  ;;  %v17322_v2 = vsel %vm15106_vm5, %v8557_v31, %v8558_v8  ;;  %v12132_v8 = vrot.slane %v8475_v18, 9  ;;  %v8477_v31 = vld [vmem:[#allocation2 + $0x78] sm:$0xe]  ;;  %v17401_v40 = vld [vmem:[#allocation2 + $0xa0] sm:$0xf] }
 0x420   : > { %13356 = vmatpush3.bf16.msra.mxu1 %v14368_v10  ;;  %v17302_v10 = vsel %vm15106_vm5, %v12127_v57, %v8548_v56  ;;  %v17335_v56 = vld [vmem:[#allocation2 + $0x70] sm:$0xf]  ;;  %v8579_v57 = vrot.slane %v17298_v15, 5 }
 0x421   : > { %13357 = vmatprep.subr.bf16.mxu1 %v14369_v60  ;;  %v17382_v13 = vsel %vm15106_vm5, %v12132_v8, %v8583_v7  ;;  %v8590_v18 = vrot.slane %v17335_v56, 5 }
 0x422   : > { %18891 = vst [vmem:[#allocation13_spill] sm:$0xff] %v17382_v13  ;;  %v8480_v13 = vld [vmem:[#allocation2 + $0x9c] sm:$0xe] }
 0x423   : > { %13326 = vmatmul.mubr.bf16.gmra.mrb[8].mxu1 %v12058_v43  ;;  %v8572_v43 = vrot.slane %v17287_v28, 5  ;;  %v8592_v8 = vrot.slane %v8590_v18, 4 }
 0x424   : > { %13329 = vmatprep.mubr.bf16.mxu1 %v12059_v6  ;;  %13358 = vmatpush3.bf16.msra.mxu1 %v14369_v60  ;;  %v8565_v60 = vrot.slane %v17280_v55, 5 }
 0x425   : > { %13359 = vmatprep.subr.bf16.mxu1 %v14370_v54 }
 0x426   : > { %v17339_v29 = vsel %vm15106_vm5, %v8564_v35, %v8565_v60  ;;  %v8585_v60 = vrot.slane %v8583_v7, 4  ;;  %v17374_v35 = vld [vmem:[#allocation2 + $0x94] sm:$0xf]  ;;  %v7752_v7 = vld [vmem:[#allocation2 + $0xa4] sm:$0x1] }
 0x427   : > { %18884 = vst [vmem:[#allocation10_spill] sm:$0xff] %v17339_v29  ;;  %v8611_v63 = vrot.slane %v17374_v35, 5  ;;  %v9376_v29 = vld [vmem:[#allocation2 + $0x74] sm:$0x1] }
 0x428   : > { %13360 = vmatpush3.bf16.msra.mxu1 %v14370_v54  ;;  %v17330_v54 = vld [vmem:[#allocation2 + $0x68] sm:$0x1] }
 0x429   : > { %13361 = vmatprep.subr.bf16.mxu1 %v14371_v33 }
 0x42b   : > { %13330 = vmatmul.mubr.bf16.gmra.mrb[12].mxu1 %v18882_v20  ;;  %v17343_v20 = vsel %vm15106_vm5, %v12130_v26, %v8569_v51  ;;  %v8586_v26 = vrot.slane %v17330_v54, 5 }
 0x42c   : > { %13333 = vmatprep.mubr.bf16.mxu1 %v18883_v19  ;;  %13362 = vmatpush3.bf16.msra.mxu1 %v14371_v33  ;;  %v8571_v33 = vrot.slane %v8569_v51, 4  ;;  %18885 = vst [vmem:[#allocation24_spill] sm:$0xff] %v17343_v20  ;;  %v17350_v19 = vld [vmem:[#allocation2 + $0x7c] sm:$0xf]  ;;  %v17372_v51 = vld [vmem:[#allocation2 + $0x88] sm:$0xf] }
 0x42d   : > { %13363 = vmatprep.subr.bf16.mxu1 %v14372_v24  ;;  %v8604_v6 = vrot.slane %v17372_v51, 5  ;;  %v10114_v20 = vld [vmem:[#allocation2 + $0x6c] sm:$0xe] }
 0x42e   : > { %v17356_v50 = vsel %vm15106_vm5, %v8571_v33, %v8572_v43  ;;  %v12133_v43 = vrot.slane %v8476_v36, 9  ;;  %v17385_v33 = vld [vmem:[#allocation2 + $0x8c] sm:$0x1] }
 0x42f   : > { %18887 = vst [vmem:[#allocation25_spill] sm:$0xff] %v17356_v50  ;;  %v8607_v1 = vrot.slane %v17385_v33, 5  ;;  %v8606_v52 = vrot.slane %v8604_v6, 4  ;;  %v8481_v50 = vld [vmem:[#allocation2 + $0xa8] sm:$0xe] }
 0x430   : > { %13364 = vmatpush3.bf16.msra.mxu1 %v14372_v24  ;;  %v8576_v24 = vrot.slane %v17293_v25, 5  ;;  %v17398_v36 = vsel %vm15106_vm5, %v12133_v43, %v8590_v18  ;;  %v17411_v43 = vsel %vm15106_vm5, %v8592_v8, %v8593_v37  ;;  %v18897_v37 = vcombine.low %v17152_v11, %v17156_v14  ;;  %v7761_v8 = vld [vmem:[#allocation2 + $0xc8] sm:$0x1] }
 0x431   : > { %13397 = vmatprep.subr.bf16.mxu1 %v17296_v27  ;;  %18893 = vst [vmem:[#allocation16_spill] sm:$0xff] %v17398_v36  ;;  %18895 = vst [vmem:[#allocation11_spill] sm:$0xff] %v17411_v43  ;;  %v17437_v11 = vsel %vm15106_vm5, %v8606_v52, %v8607_v1  ;;  %v14380_v52 = vld [vmem:[#allocation2 + $0x48] sm:$0xff]   ;;  %v14386_v43 = vld [vmem:[#allocation2 + $0x78] sm:$0xff]  }
 0x432   : > { %v8578_v21 = vrot.slane %v8576_v24, 4  ;;  %v17369_v45 = vsel %vm15106_vm5, %v12131_v34, %v8576_v24  ;;  %v17391_v24 = vsel %vm15106_vm5, %v8585_v60, %v8586_v26  ;;  %v8479_v34 = vld [vmem:[#allocation2 + $0x90] sm:$0xe]  ;;  %v8600_v26 = vrot.slane %v17363_v17, 5  ;;  %18900 = vst [vmem:[#allocation19_spill] sm:$0xff] %v17437_v11 }
 0x433   : > { %13334 = vmatmul.mubr.bf16.gmra.mrb[16].mxu1 %v18886_v44  ;;  %18889 = vst [vmem:[#allocation12_spill] sm:$0xff] %v17369_v45  ;;  %18892 = vst [vmem:[#allocation14_spill] sm:$0xff] %v17391_v24  ;;  %v12134_v44 = vrot.slane %v8477_v31, 9  ;;  %v12136_v24 = vrot.slane %v8479_v34, 9  ;;  %v17693_v36 = vld [vmem:[#allocation2 + $0x64] sm:$0xf] }
 0x434   : > { %13337 = vmatprep.mubr.bf16.mxu1 %v18888_v39  ;;  %v17378_v42 = vsel %vm15106_vm5, %v8578_v21, %v8579_v57  ;;  %v8597_v57 = vrot.slane %v17350_v19, 5  ;;  %v8478_v21 = vld [vmem:[#allocation2 + $0x84] sm:$0xe]  ;;  %v7749_v39 = vld [vmem:[#allocation2 + $0x98] sm:$0x1]  ;;  %18930 = vst [vmem:[#allocation48_spill] sm:$0xff] %v17693_v36 }
 0x435   : > { %18890 = vst [vmem:[#allocation15_spill] sm:$0xff] %v17378_v42  ;;  %v12135_v18 = vrot.slane %v8478_v21, 9  ;;  %v7755_v21 = vld [vmem:[#allocation2 + $0xb0] sm:$0x1]  ;;  %v8613_v42 = vrot.slane %v8611_v63, 4  ;;  %v8614_v45 = vrot.slane %v7749_v39, 5  ;;  %v17441_v14 = vsel %vm15106_vm5, %v12136_v24, %v8611_v63 }
 0x436   : > { %v17405_v31 = vsel %vm15106_vm5, %v12134_v44, %v8597_v57  ;;  %v8599_v60 = vrot.slane %v8597_v57, 4  ;;  %v18898_v44 = vcombine.low %v17160_v48, %v17167_v12  ;;  %18901 = vst [vmem:[#allocation20_spill] sm:$0xff] %v17441_v14  ;;  %v8618_v39 = vrot.slane %v17401_v40, 5 }
 0x437   : > { %18894 = vst [vmem:[#allocation17_spill] sm:$0xff] %v17405_v31  ;;  %v17433_v34 = vsel %vm15106_vm5, %v12135_v18, %v8604_v6  ;;  %v17448_v12 = vsel %vm15106_vm5, %v8613_v42, %v8614_v45  ;;  %v12137_v6 = vrot.slane %v8480_v13, 9  ;;  %v8625_v18 = vrot.slane %v7754_v4, 5  ;;  %v8483_v45 = vld [vmem:[#allocation2 + $0xc0] sm:$0xe] }
 0x438   : > { %v17419_v57 = vsel %vm15106_vm5, %v8599_v60, %v8600_v26  ;;  %v17429_v60 = vld [vmem:[#allocation2 + $0xb8] sm:$0xf]  ;;  %v7758_v26 = vld [vmem:[#allocation2 + $0xbc] sm:$0x1]  ;;  %18899 = vst [vmem:[#allocation18_spill] sm:$0xff] %v17433_v34  ;;  %18902 = vst [vmem:[#allocation21_spill] sm:$0xff] %v17448_v12 }
 0x439   : > { %18896 = vst [vmem:[#allocation9_spill] sm:$0xff] %v17419_v57  ;;  %v8620_v1 = vrot.slane %v8618_v39, 4  ;;  %v8621_v63 = vrot.slane %v7752_v7, 5  ;;  %v12138_v24 = vrot.slane %v8481_v50, 9  ;;  %v17454_v57 = vsel %vm15106_vm5, %v12137_v6, %v8618_v39  ;;  %v17505_v50 = vld [vmem:[#allocation2 + $0x14] sm:$0x1] }
 0x43a   : > { %18903 = vst [vmem:[#allocation22_spill] sm:$0xff] %v17454_v57  ;;  %v8627_v31 = vrot.slane %v8625_v18, 4  ;;  %v8628_v48 = vrot.slane %v7755_v21, 5  ;;  %v8632_v11 = vrot.slane %v17429_v60, 5  ;;  %v8635_v6 = vrot.slane %v7758_v26, 5 }
 0x43b   : > { %13338 = vmatmul.mubr.bf16.gmra.mrb[20].mxu1 %v18897_v37  ;;  %v7760_v37 = vld [vmem:[#allocation2 + $0xc4] sm:$0xf]  ;;  %v17459_v4 = vsel %vm15106_vm5, %v8620_v1, %v8621_v63  ;;  %v17463_v42 = vsel %vm15106_vm5, %v12138_v24, %v8625_v18  ;;  %v12140_v1 = vrot.slane %v8483_v45, 9  ;;  %v8642_v12 = vrot.slane %v7761_v8, 5  ;;  %v14381_v45 = vld [vmem:[#allocation3 + $0x110] sm:$0xff]  }
 0x43c   : > { %13341 = vmatprep.mubr.bf16.mxu1 %v18898_v44  ;;  %v8482_v44 = vld [vmem:[#allocation2 + $0xb4] sm:$0xe]  ;;  %18904 = vst [vmem:[#allocation23_spill] sm:$0xff] %v17459_v4  ;;  %18905 = vst [vmem:[#allocation26_spill] sm:$0xff] %v17463_v42  ;;  %v8639_v7 = vrot.slane %v7760_v37, 5  ;;  %v17469_v39 = vsel %vm15106_vm5, %v8627_v31, %v8628_v48  ;;  %v8634_v21 = vrot.slane %v8632_v11, 4  ;;  %v18907_v18 = vcombine.low %v17179_v59, %v17183_v22 }
 0x43d   : > { %v12139_v13 = vrot.slane %v8482_v44, 9  ;;  %18906 = vst [vmem:[#allocation27_spill] sm:$0xff] %v17469_v39  ;;  %v18910_v26 = vcombine.low %v17187_v3, %v17193_v62  ;;  %v18913_v44 = vcombine.low %v17200_v9, %v17204_v38  ;;  %v14374_v3 = vld [vmem:[#allocation2 + $0x18] sm:$0xff]   ;;  %v14378_v62 = vld [vmem:[#allocation3 + $0x108] sm:$0xff]   ;;  %v14384_v9 = vld [vmem:[#allocation3 + $0x118] sm:$0xff]   ;;  %v7848_v14 = vshrl.u32 %v17273_v41, 16 }
 0x43e   : > { %v8641_v63 = vrot.slane %v8639_v7, 4  ;;  %v17482_v31 = vsel %vm15106_vm5, %v8634_v21, %v8635_v6  ;;  %v17491_v8 = vsel %vm15106_vm5, %v12140_v1, %v8639_v7  ;;  %v14376_v24 = vld [vmem:[#allocation2 + $0x24] sm:$0xff]   ;;  %v14377_v6 = vld [vmem:[#allocation2 + $0x30] sm:$0xff]   ;;  %v14379_v1 = vld [vmem:[#allocation2 + $0x3c] sm:$0xff]  }
 0x43f   : > { %v17478_v37 = vsel %vm15106_vm5, %v12139_v13, %v8632_v11  ;;  %18909 = vst [vmem:[#allocation29_spill] sm:$0xff] %v17482_v31  ;;  %18911 = vst [vmem:[#allocation30_spill] sm:$0xff] %v17491_v8  ;;  %v14373_v11 = vld [vmem:[#allocation2 + $0xc] sm:$0xff]   ;;  %v7720_v8 = vld [vmem:[#allocation2 + $0x24] sm:$0xf] }
 0x440   : > { %18908 = vst [vmem:[#allocation28_spill] sm:$0xff] %v17478_v37  ;;  %v17495_v59 = vsel %vm15106_vm5, %v8641_v63, %v8642_v12  ;;  %v7714_v12 = vld [vmem:[#allocation2 + $0xc] sm:$0xf]  ;;  %v7715_v13 = vld [vmem:[#allocation2 + $0x10] sm:$0xf]  ;;  %v7811_v31 = vshrl.u32 %v7720_v8, 16 }
 0x441   : > { %18912 = vst [vmem:[#allocation31_spill] sm:$0xff] %v17495_v59  ;;  %v7763_v7 = vshrl.u32 %v7714_v12, 16  ;;  %v7766_v21 = vshll.u32 %v7714_v12, 16  ;;  %v7772_v38 = vshll.u32 %v7715_v13, 16  ;;  %v7776_v63 = vshrl.u32 %v7715_v13, 16  ;;  %v14382_v59 = vld [vmem:[#allocation2 + $0x54] sm:$0xff]  }
 0x442   : > { %v7726_v42 = vld [vmem:[#allocation2 + $0x3c] sm:$0xf] }
 0x443   : > { %13342 = vmatmul.mubr.bf16.gmra.mrb[24].mxu1 %v18907_v18  ;;  %v7717_v18 = vld [vmem:[#allocation2 + $0x18] sm:$0xf]  ;;  %v17503_v22 = vrot.slane %v7772_v38, 5  ;;  %v7778_v12 = vrot.slane %v7776_v63, 4  ;;  %v7820_v63 = vshll.u32 %v17269_v32, 16 }
 0x444   : > { %13345 = vmatprep.mubr.bf16.mxu1 %v18910_v26  ;;  %v7718_v26 = vld [vmem:[#allocation2 + $0x1c] sm:$0xf] }
 0x445   : > { %v7800_v48 = vshrl.u32 %v7718_v26, 16  ;;  %v17517_v39 = vrot.slane %v7820_v63, 5 }
 0x447   : > { %v7802_v38 = vrot.slane %v7800_v48, 4 }
 0x44b   : > { %13346 = vmatmul.mubr.bf16.gmra.mrb[28].mxu1 %v18913_v44  ;;  %v14387_v44 = vld [vmem:[#allocation3 + $0x120] sm:$0xff]  }
 0x44c   : > { %13365 = vmatprep.mubr.bf16.mxu1 %v14373_v11  ;;  %v7765_v11 = vrot.slane %v7763_v7, 4 }
 0x453   : > { %13366 = vmatmul.mubr.bf16.vlgmr.msra.gmra.mrb[0].mxu1 %v14374_v3  ;;  %v7787_v3 = vshrl.u32 %v7717_v18, 16 }
 0x454   : > { %13369 = vmatprep.mubr.bf16.mxu1 %v14376_v24  ;;  %13398 = vmatpush3.bf16.msra.mxu1 %v17296_v27  ;;  %v7768_v27 = vrot.slane %v7766_v21, 5  ;;  %v7790_v24 = vshll.u32 %v7717_v18, 16  ;;  %v7779_v18 = vor.u32 %v7778_v12, %v17503_v22  ;;  %v7814_v12 = vshll.u32 %v7720_v8, 16 }
 0x455   : > { %13399 = vmatprep.subr.bf16.mxu1 %v14378_v62 }
 0x456   : > { %v7769_v13 = vor.u32 %v7768_v27, %v7765_v11  ;;  %v7792_v7 = vrot.slane %v7790_v24, 5  ;;  %v7782_v11 = vshll.u32 %v17505_v50, 16  ;;  %v7723_v27 = vld [vmem:[#allocation2 + $0x30] sm:$0xf]  ;;  %v7780_v48 = vrot.slane %v7779_v18, 4 }
 0x457   : > { %v7813_v18 = vrot.slane %v7811_v31, 4  ;;  %v7816_v57 = vrot.slane %v7814_v12, 5  ;;  %v7859_v31 = vshrl.u32 %v7726_v42, 16  ;;  %v7872_v12 = vshrl.u32 %v17277_v5, 16 }
 0x458   : > { %13400 = vmatpush3.bf16.msra.mxu1 %v14378_v62  ;;  %v7796_v62 = vshll.u32 %v7718_v26, 16  ;;  %v7770_v26 = vrot.slane %v7769_v13, 4  ;;  %v7784_v13 = vrot.slane %v7782_v11, 5 }
 0x459   : > { %13401 = vmatprep.subr.bf16.mxu1 %v14381_v45 }
 0x45a   : > { %v17509_v21 = vrot.slane %v7796_v62, 5  ;;  %v7785_v63 = vsel %vm14776_vm2, %v7780_v48, %v7784_v13  ;;  %v7817_v13 = vor.u32 %v7816_v57, %v7813_v18  ;;  %v7861_v57 = vrot.slane %v7859_v31, 4 }
 0x45b   : > { %13370 = vmatmul.mubr.bf16.gmra.mrb[4].mxu1 %v14377_v6  ;;  %v14390_v6 = vld [vmem:[#allocation3 + $0x128] sm:$0xff]   ;;  %v7854_v31 = vshll.u32 %v17275_v53, 16 }
 0x45c   : > { %13373 = vmatprep.mubr.bf16.mxu1 %v14379_v1  ;;  %13402 = vmatpush3.bf16.msra.mxu1 %v14381_v45  ;;  %v17507_v1 = vld [vmem:[#allocation2 + $0x20] sm:$0x1]  ;;  %v7789_v45 = vrot.slane %v7787_v3, 4  ;;  %v14393_v3 = vld [vmem:[#allocation3 + $0x130] sm:$0xff]   ;;  %v7803_v37 = vor.u32 %v7802_v38, %v17509_v21 }
 0x45d   : > { %13403 = vmatprep.subr.bf16.mxu1 %v14384_v9  ;;  %v7806_v62 = vshll.u32 %v17507_v1, 16  ;;  %v14385_v38 = vld [vmem:[#allocation2 + $0x6c] sm:$0xff]  }
 0x45e   : > { %v7793_v24 = vor.u32 %v7792_v7, %v7789_v45  ;;  %v14383_v45 = vld [vmem:[#allocation2 + $0x60] sm:$0xff]   ;;  %v14396_v7 = vld [vmem:[#allocation3 + $0x138] sm:$0xff]  }
 0x45f   : > { %v7808_v8 = vrot.slane %v7806_v62, 5  ;;  %v7868_v62 = vshll.u32 %v17277_v5, 16 }
 0x460   : > { %13404 = vmatpush3.bf16.msra.mxu1 %v14384_v9  ;;  %v7824_v9 = vshrl.u32 %v17269_v32, 16  ;;  %v7794_v4 = vrot.slane %v7793_v24, 4  ;;  %v7862_v24 = vshll.u32 %v7726_v42, 16 }
 0x461   : > { %13405 = vmatprep.subr.bf16.mxu1 %v14387_v44  ;;  %v17543_v34 = vrot.slane %v7868_v62, 5 }
 0x462   : > { %v7826_v32 = vrot.slane %v7824_v9, 4  ;;  %v7804_v9 = vrot.slane %v7803_v37, 4  ;;  %v7729_v37 = vld [vmem:[#allocation2 + $0x48] sm:$0xf]  ;;  %v7864_v18 = vrot.slane %v7862_v24, 5 }
 0x463   : > { %13374 = vmatmul.mubr.bf16.gmra.mrb[8].mxu1 %v14380_v52  ;;  %v7835_v52 = vshrl.u32 %v7723_v27, 16 }
 0x464   : > { %13377 = vmatprep.mubr.bf16.mxu1 %v14382_v59  ;;  %13406 = vmatpush3.bf16.msra.mxu1 %v14387_v44  ;;  %v7838_v59 = vshll.u32 %v7723_v27, 16  ;;  %v7775_v44 = vsel %vm14776_vm2, %v7770_v26, %v17503_v22  ;;  %v7844_v27 = vshll.u32 %v17273_v41, 16  ;;  %v7830_v22 = vshll.u32 %v17271_v61, 16 }
 0x465   : > { %13407 = vmatprep.subr.bf16.mxu1 %v14390_v6  ;;  %v7837_v26 = vrot.slane %v7835_v52, 4  ;;  %v17530_v48 = vcombine.low %v7775_v44, %v7785_v63  ;;  %v7892_v61 = vshll.u32 %v17282_v58, 16  ;;  %v7896_v52 = vshrl.u32 %v17282_v58, 16 }
 0x466   : > { %v7840_v11 = vrot.slane %v7838_v59, 5  ;;  %v7799_v41 = vsel %vm14776_vm2, %v7794_v4, %v17509_v21  ;;  %v7809_v42 = vsel %vm14776_vm2, %v7804_v9, %v7808_v8  ;;  %v17541_v5 = vrot.slane %v7844_v27, 5  ;;  %v7732_v59 = vld [vmem:[#allocation2 + $0x54] sm:$0xf] }
 0x467   : > { %v7886_v63 = vshll.u32 %v7729_v37, 16  ;;  %v7874_v58 = vrot.slane %v7872_v12, 4  ;;  %v17546_v4 = vrot.slane %v7892_v61, 5  ;;  %v7898_v21 = vrot.slane %v7896_v52, 4 }
 0x468   : > { %13408 = vmatpush3.bf16.msra.mxu1 %v14390_v6  ;;  %v7827_v6 = vor.u32 %v7826_v32, %v17517_v39  ;;  %v17532_v32 = vld [vmem:[#allocation3 + $0x140] sm:$0xff]   ;;  %v7841_v44 = vor.u32 %v7840_v11, %v7837_v26  ;;  %v7907_v8 = vshrl.u32 %v7732_v59, 16  ;;  %v7910_v9 = vshll.u32 %v7732_v59, 16 }
 0x469   : > { %13409 = vmatprep.subr.bf16.mxu1 %v14393_v3  ;;  %v7818_v27 = vrot.slane %v7817_v13, 4  ;;  %v7832_v26 = vrot.slane %v7830_v22, 5  ;;  %v7888_v62 = vrot.slane %v7886_v63, 5  ;;  %v17552_v12 = vcombine.low %v7799_v41, %v7809_v42  ;;  %v7735_v42 = vld [vmem:[#allocation2 + $0x60] sm:$0xf] }
 0x46a   : > { %v7865_v61 = vor.u32 %v7864_v18, %v7861_v57  ;;  %v7875_v52 = vor.u32 %v7874_v58, %v17543_v34  ;;  %v7899_v13 = vor.u32 %v7898_v21, %v17546_v4  ;;  %v7878_v59 = vshll.u32 %v17280_v55, 16 }
 0x46b   : > { %13378 = vmatmul.mubr.bf16.gmra.mrb[12].mxu1 %v14383_v45  ;;  %v7850_v45 = vrot.slane %v7848_v14, 4  ;;  %v7916_v14 = vshll.u32 %v17293_v25, 16  ;;  %v7823_v53 = vsel %vm14776_vm2, %v7818_v27, %v17517_v39  ;;  %v7902_v57 = vshll.u32 %v17287_v28, 16  ;;  %v14389_v39 = vld [vmem:[#allocation2 + $0x90] sm:$0xff]   ;;  %v7738_v27 = vld [vmem:[#allocation2 + $0x6c] sm:$0xf] }
 0x46c   : > { %13381 = vmatprep.mubr.bf16.mxu1 %v14385_v38  ;;  %13410 = vmatpush3.bf16.msra.mxu1 %v14393_v3  ;;  %v7828_v3 = vrot.slane %v7827_v6, 4  ;;  %v7883_v38 = vshrl.u32 %v7729_v37, 16  ;;  %v14388_v6 = vld [vmem:[#allocation2 + $0x84] sm:$0xff]   ;;  %v7842_v37 = vrot.slane %v7841_v44, 4  ;;  %v7866_v58 = vrot.slane %v7865_v61, 4 }
 0x46d   : > { %13411 = vmatprep.subr.bf16.mxu1 %v14396_v7  ;;  %v7851_v11 = vor.u32 %v7850_v45, %v17541_v5  ;;  %v17562_v45 = vrot.slane %v7916_v14, 5  ;;  %v7876_v21 = vrot.slane %v7875_v52, 4  ;;  %v7880_v14 = vrot.slane %v7878_v59, 5 }
 0x46e   : > { %v7885_v24 = vrot.slane %v7883_v38, 4  ;;  %v7833_v22 = vsel %vm14776_vm2, %v7828_v3, %v7832_v26  ;;  %v7856_v38 = vrot.slane %v7854_v31, 5  ;;  %v7847_v18 = vsel %vm14776_vm2, %v7842_v37, %v17541_v5  ;;  %v14391_v26 = vld [vmem:[#allocation2 + $0x9c] sm:$0xff]  }
 0x46f   : > { %v7852_v44 = vrot.slane %v7851_v11, 4  ;;  %v17565_v3 = vcombine.low %v7823_v53, %v7833_v22  ;;  %v7940_v28 = vshll.u32 %v17312_v30, 16  ;;  %v7944_v11 = vshrl.u32 %v17312_v30, 16 }
 0x470   : > { %13412 = vmatpush3.bf16.msra.mxu1 %v14396_v7  ;;  %v7920_v7 = vshrl.u32 %v17293_v25, 16  ;;  %v7909_v25 = vrot.slane %v7907_v8, 4  ;;  %v7889_v63 = vor.u32 %v7888_v62, %v7885_v24  ;;  %v7900_v8 = vrot.slane %v7899_v13, 4 }
 0x471   : > { %13445 = vmatprep.subr.bf16.mxu1 %v17532_v32  ;;  %v7857_v5 = vsel %vm14776_vm2, %v7852_v44, %v7856_v38  ;;  %v7904_v24 = vrot.slane %v7902_v57, 5  ;;  %v7926_v62 = vshll.u32 %v17298_v15, 16  ;;  %v7871_v37 = vsel %vm14776_vm2, %v7866_v58, %v17543_v34  ;;  %v17589_v15 = vld [vmem:[#allocation2 + $0x78] sm:$0xf]  ;;  %v17609_v58 = vld [vmem:[#allocation2 + $0x20] sm:$0x1] }
 0x472   : > { %v7922_v41 = vrot.slane %v7920_v7, 4  ;;  %v7890_v31 = vrot.slane %v7889_v63, 4  ;;  %v7881_v61 = vsel %vm14776_vm2, %v7876_v21, %v7880_v14  ;;  %v7955_v52 = vshrl.u32 %v7738_v27, 16  ;;  %18915 = vst [vmem:[#allocation33_spill] sm:$0xff] %v17609_v58  ;;  %v10107_v21 = vld [vmem:[#allocation2 + $0x18] sm:$0xe] }
 0x473   : > { %13382 = vmatmul.mubr.bf16.gmra.mrb[16].mxu1 %v14386_v43  ;;  %v7912_v43 = vrot.slane %v7910_v9, 5  ;;  %v7931_v9 = vshrl.u32 %v7735_v42, 16  ;;  %v7958_v22 = vshll.u32 %v7738_v27, 16  ;;  %v7905_v30 = vsel %vm14776_vm2, %v7900_v8, %v7904_v24  ;;  %v14394_v27 = vld [vmem:[#allocation2 + $0xb4] sm:$0xff]   ;;  %v17637_v24 = vld [vmem:[#allocation2 + $0x2c] sm:$0x1] }
 0x474   : > { %13385 = vmatprep.mubr.bf16.mxu1 %v14388_v6  ;;  %v7934_v6 = vshll.u32 %v7735_v42, 16  ;;  %v7923_v7 = vor.u32 %v7922_v41, %v17562_v45  ;;  %v17593_v59 = vrot.slane %v7940_v28, 5  ;;  %v17595_v34 = vrot.slane %v7944_v11, 4  ;;  %v17598_v42 = vld [vmem:[#allocation2 + $0x1c] sm:$0xf]  ;;  %18917 = vst [vmem:[#allocation35_spill] sm:$0xff] %v17637_v24 }
 0x475   : > { %v7913_v55 = vor.u32 %v7912_v43, %v7909_v25  ;;  %v17585_v25 = vrot.slane %v7931_v9, 4  ;;  %v7964_v41 = vshll.u32 %v17335_v56, 16  ;;  %18914 = vst [vmem:[#allocation32_spill] sm:$0xff] %v17598_v42  ;;  %v17600_v44 = vcombine.low %v7847_v18, %v7857_v5  ;;  %v17618_v9 = vld [vmem:[#allocation2 + $0x28] sm:$0xf] }
 0x476   : > { %v17587_v43 = vrot.slane %v7934_v6, 5  ;;  %v17591_v53 = vrot.slane %v7923_v7, 4  ;;  %v17602_v38 = vcombine.low %v7871_v37, %v7881_v61  ;;  %v7895_v63 = vsel %vm14776_vm2, %v7890_v31, %v17546_v4  ;;  %18916 = vst [vmem:[#allocation34_spill] sm:$0xff] %v17618_v9  ;;  %v14392_v6 = vld [vmem:[#allocation2 + $0xa8] sm:$0xff]   ;;  %v10108_v28 = vld [vmem:[#allocation2 + $0x24] sm:$0xe] }
 0x477   : > { %v17583_v13 = vrot.slane %v7913_v55, 4  ;;  %v17607_v57 = vrot.slane %v7926_v62, 5  ;;  %v17613_v8 = vrot.slane %v7955_v52, 4  ;;  %v17615_v55 = vrot.slane %v7958_v22, 5  ;;  %v17639_v62 = vld [vmem:[#allocation2 + $0x34] sm:$0xf] }
 0x478   : > { %v7968_v18 = vshrl.u32 %v17335_v56, 16  ;;  %v10173_v7 = vrot.slane %v17598_v42, 5  ;;  %v17634_v5 = vrot.slane %v7964_v41, 5  ;;  %18918 = vst [vmem:[#allocation36_spill] sm:$0xff] %v17639_v62  ;;  %v17641_v37 = vld [vmem:[#allocation2 + $0x38] sm:$0x1] }
 0x479   : > { %18919 = vst [vmem:[#allocation37_spill] sm:$0xff] %v17641_v37  ;;  %v17643_v61 = vld [vmem:[#allocation2 + $0x40] sm:$0xf]  ;;  %v12213_v52 = vrot.slane %v10107_v21, 9  ;;  %v12214_v56 = vrot.slane %v10108_v28, 9 }
 0x47a   : > { %18920 = vst [vmem:[#allocation38_spill] sm:$0xff] %v17643_v61  ;;  %v10175_v22 = vrot.slane %v10173_v7, 4  ;;  %v17649_v14 = vrot.slane %v7968_v18, 4  ;;  %v17652_v11 = vld [vmem:[#allocation2 + $0x4c] sm:$0xf]  ;;  %v10194_v18 = vrot.slane %v17643_v61, 5 }
 0x47b   : > { %13386 = vmatmul.mubr.bf16.gmra.mrb[20].mxu1 %v14389_v39  ;;  %v17611_v39 = vcombine.low %v7895_v63, %v7905_v30  ;;  %v10176_v30 = vrot.slane %v17609_v58, 5  ;;  %v10180_v63 = vrot.slane %v17618_v9, 5  ;;  %18921 = vst [vmem:[#allocation39_spill] sm:$0xff] %v17652_v11  ;;  %v17656_v21 = vsel %vm15106_vm5, %v12213_v52, %v10173_v7  ;;  %v10110_v41 = vld [vmem:[#allocation2 + $0x3c] sm:$0xe]  ;;  %v14395_v9 = vld [vmem:[#allocation2 + $0xc0] sm:$0xff]  }
 0x47c   : > { %13389 = vmatprep.mubr.bf16.mxu1 %v14391_v26  ;;  %18922 = vst [vmem:[#allocation40_spill] sm:$0xff] %v17656_v21  ;;  %v10183_v26 = vrot.slane %v17637_v24, 5  ;;  %v17665_v28 = vld [vmem:[#allocation2 + $0x44] sm:$0x1]  ;;  %v10187_v7 = vrot.slane %v17639_v62, 5  ;;  %v10190_v21 = vrot.slane %v17641_v37, 5 }
 0x47d   : > { %v17660_v31 = vsel %vm15106_vm5, %v10175_v22, %v10176_v30  ;;  %18924 = vst [vmem:[#allocation42_spill] sm:$0xff] %v17665_v28  ;;  %v9367_v52 = vld [vmem:[#allocation2 + $0x50] sm:$0x1]  ;;  %v17672_v22 = vsel %vm15106_vm5, %v12214_v56, %v10180_v63  ;;  %v10111_v4 = vld [vmem:[#allocation2 + $0x48] sm:$0xe]  ;;  %v12216_v62 = vrot.slane %v10110_v41, 9 }
 0x47e   : > { %18923 = vst [vmem:[#allocation41_spill] sm:$0xff] %v17660_v31  ;;  %18925 = vst [vmem:[#allocation43_spill] sm:$0xff] %v17672_v22  ;;  %v17679_v42 = vld [vmem:[#allocation2 + $0x58] sm:$0xf]  ;;  %v10189_v31 = vrot.slane %v10187_v7, 4  ;;  %v12217_v56 = vrot.slane %v10111_v4, 9 }
 0x47f   : > { %18927 = vst [vmem:[#allocation45_spill] sm:$0xff] %v17679_v42  ;;  %v10112_v61 = vld [vmem:[#allocation2 + $0x54] sm:$0xe]  ;;  %v17701_v41 = vsel %vm15106_vm5, %v12216_v62, %v10194_v18  ;;  %v10113_v22 = vld [vmem:[#allocation2 + $0x60] sm:$0xe] }
 0x480   : > { %v17697_v58 = vsel %vm15106_vm5, %v10189_v31, %v10190_v21  ;;  %18932 = vst [vmem:[#allocation50_spill] sm:$0xff] %v17701_v41  ;;  %v10204_v31 = vrot.slane %v9367_v52, 5  ;;  %v10208_v21 = vrot.slane %v17679_v42, 5  ;;  %v9378_v4 = vld [vmem:[#allocation2 + $0x7c] sm:$0xf]  ;;  %v12219_v52 = vrot.slane %v10113_v22, 9 }
 0x481   : > { %18931 = vst [vmem:[#allocation49_spill] sm:$0xff] %v17697_v58  ;;  %v9379_v58 = vld [vmem:[#allocation2 + $0x80] sm:$0x1]  ;;  %v10115_v41 = vld [vmem:[#allocation2 + $0x78] sm:$0xe] }
 0x482   : > { %v14398_v42 = vld [vmem:[#allocation3 + $0x148] sm:$0xff]  }
 0x483   : > { %13390 = vmatmul.mubr.bf16.gmra.mrb[24].mxu1 %v14392_v6  ;;  %v10109_v6 = vld [vmem:[#allocation2 + $0x30] sm:$0xe] }
 0x484   : > { %13393 = vmatprep.mubr.bf16.mxu1 %v14394_v27  ;;  %v10182_v27 = vrot.slane %v10180_v63, 4  ;;  %v12215_v24 = vrot.slane %v10109_v6, 9  ;;  %v17686_v63 = vld [vmem:[#allocation2 + $0x5c] sm:$0x1]  ;;  %v10196_v6 = vrot.slane %v10194_v18, 4  ;;  %v12218_v18 = vrot.slane %v10112_v61, 9 }
 0x485   : > { %18928 = vst [vmem:[#allocation46_spill] sm:$0xff] %v17686_v63 }
 0x486   : > { %v17676_v30 = vsel %vm15106_vm5, %v10182_v27, %v10183_v26  ;;  %v17690_v26 = vsel %vm15106_vm5, %v12215_v24, %v10187_v7  ;;  %v10197_v27 = vrot.slane %v17665_v28, 5  ;;  %v9373_v24 = vld [vmem:[#allocation2 + $0x68] sm:$0x1]  ;;  %v17704_v7 = vld [vmem:[#allocation2 + $0x70] sm:$0xf]  ;;  %v17728_v61 = vsel %vm15106_vm5, %v12218_v18, %v10208_v21 }
 0x487   : > { %18926 = vst [vmem:[#allocation44_spill] sm:$0xff] %v17676_v30  ;;  %18929 = vst [vmem:[#allocation47_spill] sm:$0xff] %v17690_v26  ;;  %v10201_v30 = vrot.slane %v17652_v11, 5  ;;  %v10211_v11 = vrot.slane %v17686_v63, 5  ;;  %v10218_v62 = vrot.slane %v9373_v24, 5 }
 0x488   : > { %18933 = vst [vmem:[#allocation51_spill] sm:$0xff] %v17704_v7  ;;  %v17710_v37 = vsel %vm15106_vm5, %v10196_v6, %v10197_v27  ;;  %v10210_v6 = vrot.slane %v10208_v21, 4  ;;  %v10215_v27 = vrot.slane %v17693_v36, 5  ;;  %18936 = vst [vmem:[#allocation54_spill] sm:$0xff] %v17728_v61  ;;  %v9381_v26 = vld [vmem:[#allocation2 + $0x88] sm:$0xf] }
 0x489   : > { %18934 = vst [vmem:[#allocation52_spill] sm:$0xff] %v17710_v37  ;;  %v17719_v28 = vsel %vm15106_vm5, %v12217_v56, %v10201_v30  ;;  %v10222_v37 = vrot.slane %v17704_v7, 5  ;;  %v10225_v7 = vrot.slane %v9376_v29, 5  ;;  %v10116_v36 = vld [vmem:[#allocation2 + $0x84] sm:$0xe]  ;;  %v10236_v61 = vrot.slane %v9381_v26, 5 }
 0x48a   : > { %v17735_v56 = vsel %vm15106_vm5, %v10210_v6, %v10211_v11  ;;  %v10217_v63 = vrot.slane %v10215_v27, 4  ;;  %v17741_v24 = vsel %vm15106_vm5, %v12219_v52, %v10215_v27  ;;  %v10229_v6 = vrot.slane %v9378_v4, 5  ;;  %v9385_v21 = vld [vmem:[#allocation2 + $0x98] sm:$0x1]  ;;  %v9388_v52 = vld [vmem:[#allocation2 + $0xa4] sm:$0x1] }
 0x48b   : > { %13394 = vmatmul.mubr.bf16.gmra.mrb[28].mxu1 %v14395_v9  ;;  %v10203_v9 = vrot.slane %v10201_v30, 4  ;;  %v9384_v30 = vld [vmem:[#allocation2 + $0x94] sm:$0xf]  ;;  %18937 = vst [vmem:[#allocation55_spill] sm:$0xff] %v17735_v56  ;;  %v10224_v18 = vrot.slane %v10222_v37, 4  ;;  %v10232_v27 = vrot.slane %v9379_v58, 5 }
 0x48c   : > { %13413 = vmatprep.mubr.bf16.mxu1 %v17530_v48  ;;  %v17745_v22 = vsel %vm15106_vm5, %v10217_v63, %v10218_v62  ;;  %v9387_v56 = vld [vmem:[#allocation2 + $0xa0] sm:$0xf]  ;;  %v9390_v63 = vld [vmem:[#allocation2 + $0xac] sm:$0xf]  ;;  %v12222_v4 = vrot.slane %v10116_v36, 9  ;;  %v10238_v58 = vrot.slane %v10236_v61, 4 }
 0x48d   : > { %v17724_v48 = vsel %vm15106_vm5, %v10203_v9, %v10204_v31  ;;  %v12220_v31 = vrot.slane %v10114_v20, 9  ;;  %v9382_v9 = vld [vmem:[#allocation2 + $0x8c] sm:$0x1]  ;;  %18938 = vst [vmem:[#allocation56_spill] sm:$0xff] %v17745_v22  ;;  %v12221_v20 = vrot.slane %v10115_v41, 9  ;;  %v17755_v29 = vsel %vm15106_vm5, %v10224_v18, %v10225_v7 }
 0x48e   : > { %18935 = vst [vmem:[#allocation53_spill] sm:$0xff] %v17724_v48  ;;  %v10117_v48 = vld [vmem:[#allocation2 + $0x90] sm:$0xe]  ;;  %18940 = vst [vmem:[#allocation58_spill] sm:$0xff] %v17755_v29  ;;  %v10231_v41 = vrot.slane %v10229_v6, 4  ;;  %v10239_v62 = vrot.slane %v9382_v9, 5 }
 0x48f   : > { %v17749_v11 = vsel %vm15106_vm5, %v12220_v31, %v10222_v37  ;;  %v10118_v31 = vld [vmem:[#allocation2 + $0x9c] sm:$0xe]  ;;  %v17764_v7 = vsel %vm15106_vm5, %v12221_v20, %v10229_v6  ;;  %v12223_v26 = vrot.slane %v10117_v48, 9  ;;  %v14399_v18 = vld [vmem:[#allocation3 + $0x150] sm:$0xff]   ;;  %v9391_v22 = vld [vmem:[#allocation2 + $0xb0] sm:$0x1] }
 0x490   : > { %18939 = vst [vmem:[#allocation57_spill] sm:$0xff] %v17749_v11  ;;  %v17768_v36 = vsel %vm15106_vm5, %v10231_v41, %v10232_v27  ;;  %v10250_v9 = vrot.slane %v9387_v56, 5  ;;  %v9393_v37 = vld [vmem:[#allocation2 + $0xb8] sm:$0xf]  ;;  %v17778_v48 = vsel %vm15106_vm5, %v10238_v58, %v10239_v62  ;;  %v12224_v6 = vrot.slane %v10118_v31, 9 }
 0x491   : > { %18941 = vst [vmem:[#allocation59_spill] sm:$0xff] %v17768_v36  ;;  %18943 = vst [vmem:[#allocation61_spill] sm:$0xff] %v17778_v48  ;;  %v10119_v29 = vld [vmem:[#allocation2 + $0xa8] sm:$0xe]  ;;  %v18944_v27 = vshll.u32 %v17350_v19, 16  ;;  %v10253_v56 = vrot.slane %v9388_v52, 5 }
 0x492   : > { %v9394_v11 = vld [vmem:[#allocation2 + $0xbc] sm:$0x1]  ;;  %v9396_v20 = vld [vmem:[#allocation2 + $0xc4] sm:$0xf]  ;;  %v17796_v58 = vsel %vm15106_vm5, %v12224_v6, %v10250_v9  ;;  %v10121_v48 = vld [vmem:[#allocation2 + $0xc0] sm:$0xe] }
 0x493   : > { %13414 = vmatmul.mubr.bf16.vlgmr.msra.gmra.mrb[0].mxu1 %v17552_v12  ;;  %v10243_v12 = vrot.slane %v9384_v30, 5  ;;  %v17782_v41 = vrot.slane %v18944_v27, 5  ;;  %v10257_v27 = vrot.slane %v9390_v63, 5  ;;  %v18947_v63 = vshrl.u32 %v17350_v19, 16 }
 0x494   : > { %13417 = vmatprep.mubr.bf16.mxu1 %v17565_v3  ;;  %13446 = vmatpush3.bf16.msra.mxu1 %v17532_v32  ;;  %v17772_v3 = vsel %vm15106_vm5, %v12222_v4, %v10236_v61  ;;  %v10246_v32 = vrot.slane %v9385_v21, 5  ;;  %v10252_v21 = vrot.slane %v10250_v9, 4  ;;  %v10120_v4 = vld [vmem:[#allocation2 + $0xb4] sm:$0xe]  ;;  %v10260_v9 = vrot.slane %v9391_v22, 5  ;;  %v14401_v22 = vld [vmem:[#allocation3 + $0x160] sm:$0xff]  }
 0x495   : > { %13447 = vmatprep.subr.bf16.mxu1 %v14398_v42  ;;  %18942 = vst [vmem:[#allocation60_spill] sm:$0xff] %v17772_v3  ;;  %v10245_v30 = vrot.slane %v10243_v12, 4  ;;  %v17788_v62 = vsel %vm15106_vm5, %v12223_v26, %v10243_v12  ;;  %v14400_v61 = vld [vmem:[#allocation3 + $0x158] sm:$0xff]   ;;  %v12225_v26 = vrot.slane %v10119_v29, 9  ;;  %v10264_v12 = vrot.slane %v9393_v37, 5 }
 0x496   : > { %18945 = vst [vmem:[#allocation62_spill] sm:$0xff] %v17788_v62  ;;  %v17802_v52 = vsel %vm15106_vm5, %v10252_v21, %v10253_v56  ;;  %v9397_v3 = vld [vmem:[#allocation2 + $0xc8] sm:$0x1]  ;;  %v12226_v6 = vrot.slane %v10120_v4, 9  ;;  %v7994_v36 = vrot.slane %v18947_v63, 4  ;;  %v10271_v62 = vrot.slane %v9396_v20, 5 }
 0x497   : > { %v17792_v31 = vsel %vm15106_vm5, %v10245_v30, %v10246_v32  ;;  %v12240_v32 = vcombine.low %v17796_v58, %v17802_v52  ;;  %v10259_v30 = vrot.slane %v10257_v27, 4  ;;  %v17812_v29 = vsel %vm15106_vm5, %v12225_v26, %v10257_v27 }
 0x498   : > { %13448 = vmatpush3.bf16.msra.mxu1 %v14398_v42  ;;  %18946 = vst [vmem:[#allocation63_spill] sm:$0xff] %v17792_v31  ;;  %v10266_v42 = vrot.slane %v10264_v12, 4  ;;  %v10267_v31 = vrot.slane %v9394_v11, 5  ;;  %v12227_v19 = vrot.slane %v10121_v48, 9  ;;  %v7744_v11 = vld [vmem:[#allocation2 + $0x84] sm:$0xf]  ;;  %v18948_v56 = vor.u32 %v17587_v43, %v17585_v25 }
 0x499   : > { %13449 = vmatprep.subr.bf16.mxu1 %v14399_v18  ;;  %v17816_v37 = vsel %vm15106_vm5, %v10259_v30, %v10260_v9  ;;  %v10273_v20 = vrot.slane %v10271_v62, 4  ;;  %v10274_v21 = vrot.slane %v9397_v3, 5  ;;  %v7974_v27 = vshll.u32 %v17361_v23, 16 }
 0x49a   : > { %v7938_v4 = vrot.slane %v18948_v56, 4  ;;  %v18949_v48 = vshrl.u32 %v17589_v15, 16  ;;  %v8012_v30 = vshll.u32 %v17372_v51, 16  ;;  %v8016_v9 = vshrl.u32 %v17372_v51, 16 }
 0x49b   : > { %13418 = vmatmul.mubr.bf16.gmra.mrb[4].mxu1 %v17600_v44  ;;  %v17820_v44 = vsel %vm15106_vm5, %v12226_v6, %v10264_v12  ;;  %v17844_v25 = vsel %vm15106_vm5, %v10273_v20, %v10274_v21  ;;  %v18950_v23 = vshll.u32 %v17589_v15, 16  ;;  %v8003_v3 = vshrl.u32 %v7744_v11, 16  ;;  %v14402_v21 = vld [vmem:[#allocation3 + $0x168] sm:$0xff]  }
 0x49c   : > { %13421 = vmatprep.mubr.bf16.mxu1 %v17602_v38  ;;  %13450 = vmatpush3.bf16.msra.mxu1 %v14399_v18  ;;  %v12241_v38 = vcombine.low %v17812_v29, %v17816_v37  ;;  %v17826_v18 = vsel %vm15106_vm5, %v10266_v42, %v10267_v31  ;;  %v7981_v26 = vrot.slane %v18949_v48, 4  ;;  %v17840_v31 = vsel %vm15106_vm5, %v12227_v19, %v10271_v62  ;;  %v12253_v37 = vld [vmem:[%s14741_s8 + $0xc] sm:$0xf] }
 0x49d   : > { %13451 = vmatprep.subr.bf16.mxu1 %v14400_v61  ;;  %v12242_v12 = vcombine.low %v17820_v44, %v17826_v18  ;;  %v7984_v43 = vrot.slane %v18950_v23, 5  ;;  %v8006_v42 = vshll.u32 %v7744_v11, 16  ;;  %v12243_v6 = vcombine.low %v17840_v31, %v17844_v25  ;;  %v12254_v44 = vld [vmem:[%s14741_s8 + $0x10] sm:$0xf]  ;;  %v12259_v31 = vld [vmem:[%s14741_s8 + $0x24] sm:$0xf] }
 0x49e   : > { %v18951_v51 = vor.u32 %v17595_v34, %v17593_v59  ;;  %v18952_v62 = vor.u32 %v17615_v55, %v17613_v8  ;;  %v18953_v20 = vor.u32 %v17649_v14, %v17634_v5  ;;  %v7995_v15 = vor.u32 %v7994_v36, %v17782_v41 }
 0x49f   : > { %v18954_v11 = vsel %vm14776_vm2, %v17591_v53, %v17607_v57  ;;  %v18955_v34 = vsel %vm14776_vm2, %v17583_v13, %v17562_v45  ;;  %v18956_v55 = vshll.u32 %v17330_v54, 16  ;;  %v7976_v14 = vrot.slane %v7974_v27, 5 }
 0x4a0   : > { %13452 = vmatpush3.bf16.msra.mxu1 %v14400_v61  ;;  %v7948_v63 = vrot.slane %v18951_v51, 4  ;;  %v7962_v19 = vrot.slane %v18952_v62, 4  ;;  %v7972_v61 = vrot.slane %v18953_v20, 4  ;;  %v12107_v8 = vcombine.low %v18955_v34, %v18954_v11  ;;  %v7747_v51 = vld [vmem:[#allocation2 + $0x90] sm:$0xf] }
 0x4a1   : > { %13453 = vmatprep.subr.bf16.mxu1 %v14401_v22  ;;  %v7952_v56 = vrot.slane %v18956_v55, 5  ;;  %v7998_v36 = vshll.u32 %v17363_v17, 16  ;;  %v17874_v48 = vrot.slane %v8012_v30, 5  ;;  %v8018_v23 = vrot.slane %v8016_v9, 4  ;;  %v14403_v30 = vld [vmem:[#allocation3 + $0x170] sm:$0xff]   ;;  %v14404_v34 = vld [vmem:[#allocation3 + $0x178] sm:$0xff]  }
 0x4a2   : > { %v7943_v53 = vsel %vm14776_vm2, %v7938_v4, %v17593_v59  ;;  %v7985_v57 = vor.u32 %v7984_v43, %v7981_v26  ;;  %v8005_v45 = vrot.slane %v8003_v3, 4  ;;  %v8008_v13 = vrot.slane %v8006_v42, 5 }
 0x4a3   : > { %13422 = vmatmul.mubr.bf16.gmra.mrb[8].mxu1 %v17611_v39  ;;  %v7953_v54 = vsel %vm14776_vm2, %v7948_v63, %v7952_v56  ;;  %v7967_v17 = vsel %vm14776_vm2, %v7962_v19, %v17634_v5  ;;  %v7977_v39 = vsel %vm14776_vm2, %v7972_v61, %v7976_v14  ;;  %v7996_v27 = vrot.slane %v7995_v15, 4 }
 0x4a4   : > { %13425 = vmatprep.mubr.bf16.mxu1 %v12107_v8  ;;  %13454 = vmatpush3.bf16.msra.mxu1 %v14401_v22  ;;  %v8027_v9 = vshrl.u32 %v7747_v51, 16  ;;  %v8030_v62 = vshll.u32 %v7747_v51, 16  ;;  %v8036_v59 = vshll.u32 %v17374_v35, 16  ;;  %v8040_v4 = vshrl.u32 %v17374_v35, 16  ;;  %v7750_v22 = vld [vmem:[#allocation2 + $0x9c] sm:$0xf] }
 0x4a5   : > { %13455 = vmatprep.subr.bf16.mxu1 %v14402_v21  ;;  %v8000_v26 = vrot.slane %v7998_v36, 5  ;;  %v8019_v43 = vor.u32 %v8018_v23, %v17874_v48  ;;  %v8060_v3 = vshll.u32 %v17401_v40, 16  ;;  %v8064_v5 = vshrl.u32 %v17401_v40, 16 }
 0x4a6   : > { %v12108_v42 = vcombine.low %v7943_v53, %v7953_v54  ;;  %v12109_v63 = vcombine.low %v7967_v17, %v7977_v39  ;;  %v7986_v19 = vrot.slane %v7985_v57, 4  ;;  %v8009_v20 = vor.u32 %v8008_v13, %v8005_v45  ;;  %v7753_v13 = vld [vmem:[#allocation2 + $0xa8] sm:$0xf]  ;;  %v17901_v54 = vld [vmem:[#allocation3 + $0x180] sm:$0xff]  }
 0x4a7   : > { %v8001_v61 = vsel %vm14776_vm2, %v7996_v27, %v8000_v26  ;;  %v8022_v15 = vshll.u32 %v17385_v33, 16  ;;  %v8051_v11 = vshrl.u32 %v7750_v22, 16  ;;  %v8054_v35 = vshll.u32 %v7750_v22, 16  ;;  %v14475_v27 = vld [vmem:[#allocation2 + $0xac] sm:$0xf] }
 0x4a8   : > { %13456 = vmatpush3.bf16.msra.mxu1 %v14402_v21  ;;  %v8029_v8 = vrot.slane %v8027_v9, 4  ;;  %v8032_v55 = vrot.slane %v8030_v62, 5  ;;  %v17894_v56 = vrot.slane %v8036_v59, 5  ;;  %v8042_v14 = vrot.slane %v8040_v4, 4  ;;  %v7756_v59 = vld [vmem:[#allocation2 + $0xb4] sm:$0xf] }
 0x4a9   : > { %13457 = vmatprep.subr.bf16.mxu1 %v14403_v30  ;;  %v8020_v40 = vrot.slane %v8019_v43, 4  ;;  %v17896_v36 = vrot.slane %v8060_v3, 5  ;;  %v8066_v23 = vrot.slane %v8064_v5, 4  ;;  %v7991_v21 = vsel %vm14776_vm2, %v7986_v19, %v17782_v41  ;;  %v14476_v43 = vld [vmem:[#allocation2 + $0x98] sm:$0x1] }
 0x4aa   : > { %v8010_v33 = vrot.slane %v8009_v20, 4  ;;  %v12110_v51 = vcombine.low %v7991_v21, %v8001_v61  ;;  %v8024_v53 = vrot.slane %v8022_v15, 5  ;;  %v8053_v57 = vrot.slane %v8051_v11, 4  ;;  %v14477_v19 = vld [vmem:[#allocation2 + $0xa4] sm:$0x1] }
 0x4ab   : > { %13426 = vmatmul.mubr.bf16.gmra.mrb[12].mxu1 %v12108_v42  ;;  %v8056_v45 = vrot.slane %v8054_v35, 5  ;;  %v8033_v17 = vor.u32 %v8032_v55, %v8029_v8  ;;  %v8043_v39 = vor.u32 %v8042_v14, %v17894_v56  ;;  %v8084_v9 = vshll.u32 %v14475_v27, 16 }
 0x4ac   : > { %13429 = vmatprep.mubr.bf16.mxu1 %v12109_v63  ;;  %13458 = vmatpush3.bf16.msra.mxu1 %v14403_v30  ;;  %v8088_v62 = vshrl.u32 %v14475_v27, 16  ;;  %v8025_v41 = vsel %vm14776_vm2, %v8020_v40, %v8024_v53  ;;  %v8067_v30 = vor.u32 %v8066_v23, %v17896_v36  ;;  %v8108_v4 = vshll.u32 %v17429_v60, 16 }
 0x4ad   : > { %13459 = vmatprep.subr.bf16.mxu1 %v14404_v34  ;;  %v8112_v22 = vshrl.u32 %v17429_v60, 16  ;;  %v8015_v26 = vsel %vm14776_vm2, %v8010_v33, %v17874_v48  ;;  %v8046_v3 = vshll.u32 %v14476_v43, 16  ;;  %v8075_v5 = vshrl.u32 %v7753_v13, 16 }
 0x4ae   : > { %v8078_v42 = vshll.u32 %v7753_v13, 16  ;;  %v8057_v63 = vor.u32 %v8056_v45, %v8053_v57  ;;  %v8070_v20 = vshll.u32 %v14477_v19, 16  ;;  %v8099_v61 = vshrl.u32 %v7756_v59, 16  ;;  %v7759_v13 = vld [vmem:[#allocation2 + $0xc0] sm:$0xf] }
 0x4af   : > { %v8102_v15 = vshll.u32 %v7756_v59, 16  ;;  %v12111_v11 = vcombine.low %v8015_v26, %v8025_v41  ;;  %v8044_v35 = vrot.slane %v8043_v39, 4  ;;  %v8086_v8 = vrot.slane %v8084_v9, 5  ;;  %v14478_v9 = vld [vmem:[#allocation2 + $0xc4] sm:$0xf] }
 0x4b0   : > { %13460 = vmatpush3.bf16.msra.mxu1 %v14404_v34  ;;  %v8090_v60 = vrot.slane %v8088_v62, 4  ;;  %v8034_v55 = vrot.slane %v8033_v17, 4  ;;  %v8068_v14 = vrot.slane %v8067_v30, 4  ;;  %v8110_v48 = vrot.slane %v8108_v4, 5  ;;  %v14479_v4 = vld [vmem:[#allocation2 + $0xb0] sm:$0x1] }
 0x4b1   : > { %13493 = vmatprep.subr.bf16.mxu1 %v17901_v54  ;;  %v8114_v40 = vrot.slane %v8112_v22, 4  ;;  %v8048_v23 = vrot.slane %v8046_v3, 5  ;;  %v8077_v21 = vrot.slane %v8075_v5, 4  ;;  %v8080_v34 = vrot.slane %v8078_v42, 5 }
 0x4b2   : > { %v8058_v33 = vrot.slane %v8057_v63, 4  ;;  %v8072_v53 = vrot.slane %v8070_v20, 5  ;;  %v8101_v57 = vrot.slane %v8099_v61, 4  ;;  %v8104_v45 = vrot.slane %v8102_v15, 5  ;;  %v14480_v63 = vld [vmem:[#allocation2 + $0xbc] sm:$0x1] }
 0x4b3   : > { %13430 = vmatmul.mubr.bf16.gmra.mrb[16].mxu1 %v12110_v51  ;;  %v8049_v27 = vsel %vm14776_vm2, %v8044_v35, %v8048_v23  ;;  %v8091_v39 = vor.u32 %v8090_v60, %v8086_v8  ;;  %v8132_v62 = vshll.u32 %v14478_v9, 16  ;;  %v8136_v51 = vshrl.u32 %v14478_v9, 16 }
 0x4b4   : > { %13433 = vmatprep.mubr.bf16.mxu1 %v12111_v11  ;;  %v8039_v17 = vsel %vm14776_vm2, %v8034_v55, %v17894_v56  ;;  %v8073_v59 = vsel %vm14776_vm2, %v8068_v14, %v8072_v53  ;;  %v8115_v41 = vor.u32 %v8114_v40, %v8110_v48  ;;  %v8081_v30 = vor.u32 %v8080_v34, %v8077_v21 }
 0x4b5   : > { %v8094_v22 = vshll.u32 %v14479_v4, 16  ;;  %v8123_v26 = vshrl.u32 %v7759_v13, 16  ;;  %v8126_v43 = vshll.u32 %v7759_v13, 16  ;;  %v12112_v3 = vcombine.low %v8039_v17, %v8049_v27  ;;  %v14482_v13 = vld [vmem:[#allocation2 + $0xc8] sm:$0x1] }
 0x4b6   : > { %v8063_v5 = vsel %vm14776_vm2, %v8058_v33, %v17896_v36  ;;  %v8105_v42 = vor.u32 %v8104_v45, %v8101_v57  ;;  %v8118_v19 = vshll.u32 %v14480_v63, 16  ;;  %v8092_v61 = vrot.slane %v8091_v39, 4  ;;  %v14481_v33 = vld [vmem:[#allocation2 + $0x10] sm:$0xf] }
 0x4b7   : > { %v12113_v20 = vcombine.low %v8063_v5, %v8073_v59  ;;  %v8134_v56 = vrot.slane %v8132_v62, 5  ;;  %v8138_v15 = vrot.slane %v8136_v51, 4  ;;  %v8116_v11 = vrot.slane %v8115_v41, 4 }
 0x4b8   : > { %v8082_v35 = vrot.slane %v8081_v30, 4  ;;  %v8096_v60 = vrot.slane %v8094_v22, 5  ;;  %v8125_v55 = vrot.slane %v8123_v26, 4  ;;  %v8128_v14 = vrot.slane %v8126_v43, 5  ;;  %v8468_v30 = vld [vmem:[#allocation2 + $0xc] sm:$0xe] }
 0x4b9   : > { %v8106_v40 = vrot.slane %v8105_v42, 4  ;;  %v8120_v23 = vrot.slane %v8118_v19, 5  ;;  %v8139_v36 = vor.u32 %v8138_v15, %v8134_v56  ;;  %v8534_v53 = vrot.slane %v14481_v33, 5  ;;  %v14483_v22 = vld [vmem:[#allocation2 + $0x1c] sm:$0xf]  ;;  %v18965_v33 = vld [vmem:[#allocation15_spill] sm:$0xff] }
 0x4ba   : > { %v8097_v21 = vsel %vm14776_vm2, %v8092_v61, %v8096_v60  ;;  %v8087_v57 = vsel %vm14776_vm2, %v8082_v35, %v8086_v8  ;;  %v8129_v45 = vor.u32 %v8128_v14, %v8125_v55  ;;  %v8142_v27 = vshll.u32 %v14482_v13, 16  ;;  %v14407_v55 = vld [vmem:[#allocation3 + $0x190] sm:$0xff]   ;;  %v18970_v13 = vld [vmem:[#allocation16_spill] sm:$0xff] }
 0x4bb   : > { %13434 = vmatmul.mubr.bf16.gmra.mrb[20].mxu1 %v12112_v3  ;;  %v8121_v34 = vsel %vm14776_vm2, %v8116_v11, %v8120_v23  ;;  %v12114_v39 = vcombine.low %v8087_v57, %v8097_v21  ;;  %v8111_v9 = vsel %vm14776_vm2, %v8106_v40, %v8110_v48  ;;  %v8140_v51 = vrot.slane %v8139_v36, 4  ;;  %v18959_v40 = vld [vmem:[#allocation10_spill] sm:$0xff]  ;;  %v14409_v21 = vld [vmem:[#allocation3 + $0x1a0] sm:$0xff]  }
 0x4bc   : > { %13437 = vmatprep.mubr.bf16.mxu1 %v12113_v20  ;;  %v12115_v62 = vcombine.low %v8111_v9, %v8121_v34  ;;  %v8536_v17 = vrot.slane %v8534_v53, 4  ;;  %v8130_v59 = vrot.slane %v8129_v45, 4  ;;  %v8144_v41 = vrot.slane %v8142_v27, 5  ;;  %v18964_v34 = vld [vmem:[#allocation12_spill] sm:$0xff]  ;;  %v18968_v57 = vld [vmem:[#allocation14_spill] sm:$0xff]  ;;  %v18971_v27 = vld [vmem:[#allocation11_spill] sm:$0xff] }
 0x4bd   : > { %v8537_v4 = vrot.slane %v17505_v50, 5  ;;  %v8541_v26 = vrot.slane %v14483_v22, 5  ;;  %v12125_v43 = vrot.slane %v8468_v30, 9  ;;  %v8469_v50 = vld [vmem:[#allocation2 + $0x18] sm:$0xe]  ;;  %v8544_v20 = vrot.slane %v17507_v1, 5 }
 0x4be   : > { %v8145_v8 = vsel %vm14776_vm2, %v8140_v51, %v8144_v41  ;;  %v8135_v48 = vsel %vm14776_vm2, %v8130_v59, %v8134_v56  ;;  %v12126_v61 = vrot.slane %v8469_v50, 9  ;;  %v14406_v56 = vld [vmem:[#allocation3 + $0x188] sm:$0xff]   ;;  %v18957_v60 = vcombine.low %v17302_v10, %v17306_v16  ;;  %v14408_v1 = vld [vmem:[#allocation3 + $0x198] sm:$0xff]   ;;  %v14415_v9 = vld [vmem:[#allocation3 + $0x1c0] sm:$0xff]  }
 0x4bf   : > { %v8538_v3 = vsel %vm15106_vm5, %v8536_v17, %v8537_v4  ;;  %v12116_v5 = vcombine.low %v8135_v48, %v8145_v8  ;;  %v8535_v42 = vsel %vm15106_vm5, %v12125_v43, %v8534_v53  ;;  %v8543_v19 = vrot.slane %v8541_v26, 4  ;;  %v14410_v10 = vld [vmem:[#allocation3 + $0x1a8] sm:$0xff]   ;;  %v18961_v16 = vld [vmem:[#allocation24_spill] sm:$0xff]  ;;  %v18974_v51 = vld [vmem:[#allocation9_spill] sm:$0xff] }
 0x4c0   : > { %v12141_v63 = vcombine.low %v8535_v42, %v8538_v3  ;;  %v8542_v11 = vsel %vm15106_vm5, %v12126_v61, %v8541_v26  ;;  %v18958_v14 = vcombine.low %v17316_v49, %v17322_v2  ;;  %v18960_v23 = vcombine.low %v17326_v47, %v18959_v40  ;;  %v14411_v49 = vld [vmem:[#allocation3 + $0x1b0] sm:$0xff]   ;;  %v14412_v2 = vld [vmem:[#allocation3 + $0x1b8] sm:$0xff]   ;;  %v18967_v47 = vld [vmem:[#allocation13_spill] sm:$0xff] }
 0x4c1   : > { %v8545_v15 = vsel %vm15106_vm5, %v8543_v19, %v8544_v20  ;;  %v18966_v53 = vcombine.low %v18964_v34, %v18965_v33  ;;  %v18969_v45 = vcombine.low %v18967_v47, %v18968_v57  ;;  %v18976_v59 = vld [vmem:[#allocation18_spill] sm:$0xff]  ;;  %v18977_v41 = vld [vmem:[#allocation19_spill] sm:$0xff]  ;;  %v18979_v4 = vld [vmem:[#allocation20_spill] sm:$0xff]  ;;  %v10654_v25 = vshrl.u32 %v12253_v37, 16 }
 0x4c2   : > { %v12142_v35 = vcombine.low %v8542_v11, %v8545_v15  ;;  %v18978_v30 = vcombine.low %v18976_v59, %v18977_v41  ;;  %v18980_v8 = vld [vmem:[#allocation21_spill] sm:$0xff]  ;;  %v18982_v26 = vld [vmem:[#allocation22_spill] sm:$0xff]  ;;  %v18983_v43 = vld [vmem:[#allocation23_spill] sm:$0xff] }
 0x4c3   : > { %13438 = vmatmul.mubr.bf16.gmra.mrb[24].mxu1 %v12114_v39  ;;  %v18972_v39 = vcombine.low %v18970_v13, %v18971_v27  ;;  %v18981_v22 = vcombine.low %v18979_v4, %v18980_v8  ;;  %v18984_v3 = vcombine.low %v18982_v26, %v18983_v43  ;;  %v18985_v48 = vld [vmem:[#allocation26_spill] sm:$0xff]  ;;  %v18989_v19 = vld [vmem:[#allocation29_spill] sm:$0xff]  ;;  %v18992_v15 = vld [vmem:[#allocation31_spill] sm:$0xff] }
 0x4c4   : > { %13441 = vmatprep.mubr.bf16.mxu1 %v12115_v62  ;;  %v18973_v62 = vld [vmem:[#allocation17_spill] sm:$0xff]  ;;  %v18991_v61 = vld [vmem:[#allocation30_spill] sm:$0xff]  ;;  %v14419_v40 = vld [vmem:[#allocation2 + $0x48] sm:$0xff]  }
 0x4c5   : > { %v18975_v17 = vcombine.low %v18973_v62, %v18974_v51  ;;  %v14413_v20 = vld [vmem:[#allocation2 + $0x18] sm:$0xff]   ;;  %v18993_v11 = vcombine.low %v18991_v61, %v18992_v15  ;;  %v14436_v34 = vld [vmem:[#allocation3 + $0x1f8] sm:$0xff]   ;;  %v14426_v13 = vld [vmem:[#allocation2 + $0x84] sm:$0xff]  }
 0x4c6   : > { %v14425_v33 = vld [vmem:[#allocation2 + $0x78] sm:$0xff]   ;;  %v18995_v4 = vld [vmem:[#allocation34_spill] sm:$0xff] }
 0x4c7   : > { %v9435_v8 = vshll.u32 %v18995_v4, 16 }
 0x4cb   : > { %13442 = vmatmul.mubr.bf16.gmra.mrb[28].mxu1 %v12116_v5  ;;  %v18986_v5 = vld [vmem:[#allocation27_spill] sm:$0xff] }
 0x4cc   : > { %13461 = vmatprep.mubr.bf16.mxu1 %v12141_v63  ;;  %v18987_v42 = vcombine.low %v18985_v48, %v18986_v5  ;;  %v18988_v63 = vld [vmem:[#allocation28_spill] sm:$0xff]  ;;  %v14429_v5 = vld [vmem:[#allocation2 + $0x9c] sm:$0xff]  }
 0x4cd   : > { %v18990_v50 = vcombine.low %v18988_v63, %v18989_v19  ;;  %v9359_v48 = vld [vmem:[#allocation2 + $0x30] sm:$0xf]  ;;  %v18996_v63 = vld [vmem:[#allocation33_spill] sm:$0xff] }
 0x4ce   : > { %v9421_v19 = vshll.u32 %v18996_v63, 16  ;;  %v9450_v61 = vshrl.u32 %v9359_v48, 16  ;;  %v10122_v63 = vld [vmem:[#allocation2 + $0xcc] sm:$0xe] }
 0x4d3   : > { %13462 = vmatmul.mubr.bf16.vlgmr.msra.gmra.mrb[0].mxu1 %v12142_v35  ;;  %v14414_v35 = vld [vmem:[#allocation2 + $0x24] sm:$0xff]  }
 0x4d4   : > { %13465 = vmatprep.mubr.bf16.mxu1 %v18957_v60  ;;  %13494 = vmatpush3.bf16.msra.mxu1 %v17901_v54  ;;  %v18962_v54 = vld [vmem:[#allocation25_spill] sm:$0xff]  ;;  %v14416_v60 = vld [vmem:[#allocation2 + $0x30] sm:$0xff]  }
 0x4d5   : > { %13495 = vmatprep.subr.bf16.mxu1 %v14406_v56  ;;  %v18963_v36 = vcombine.low %v18961_v16, %v18962_v54  ;;  %v14422_v16 = vld [vmem:[#allocation2 + $0x60] sm:$0xff]   ;;  %v14433_v54 = vld [vmem:[#allocation3 + $0x1f0] sm:$0xff]  }
 0x4d8   : > { %13496 = vmatpush3.bf16.msra.mxu1 %v14406_v56  ;;  %v14418_v56 = vld [vmem:[#allocation3 + $0x1c8] sm:$0xff]  }
 0x4d9   : > { %13497 = vmatprep.subr.bf16.mxu1 %v14407_v55 }
 0x4db   : > { %13466 = vmatmul.mubr.bf16.gmra.mrb[4].mxu1 %v18958_v14  ;;  %v14424_v14 = vld [vmem:[#allocation3 + $0x1d8] sm:$0xff]  }
 0x4dc   : > { %13469 = vmatprep.mubr.bf16.mxu1 %v18960_v23  ;;  %13498 = vmatpush3.bf16.msra.mxu1 %v14407_v55  ;;  %v14421_v55 = vld [vmem:[#allocation3 + $0x1d0] sm:$0xff]   ;;  %v14427_v23 = vld [vmem:[#allocation3 + $0x1e0] sm:$0xff]  }
 0x4dd   : > { %13499 = vmatprep.subr.bf16.mxu1 %v14408_v1 }
 0x4e0   : > { %13500 = vmatpush3.bf16.msra.mxu1 %v14408_v1  ;;  %v14417_v1 = vld [vmem:[#allocation2 + $0x3c] sm:$0xff]  }
 0x4e1   : > { %13501 = vmatprep.subr.bf16.mxu1 %v14409_v21 }
 0x4e3   : > { %13470 = vmatmul.mubr.bf16.gmra.mrb[8].mxu1 %v18963_v36  ;;  %v14423_v36 = vld [vmem:[#allocation2 + $0x6c] sm:$0xff]  }
 0x4e4   : > { %13473 = vmatprep.mubr.bf16.mxu1 %v18966_v53  ;;  %13502 = vmatpush3.bf16.msra.mxu1 %v14409_v21  ;;  %v14420_v21 = vld [vmem:[#allocation2 + $0x54] sm:$0xff]  }
 0x4e5   : > { %13503 = vmatprep.subr.bf16.mxu1 %v14410_v10  ;;  %v17988_v53 = vld [vmem:[#allocation3 + $0x200] sm:$0xff]  }
 0x4e8   : > { %13504 = vmatpush3.bf16.msra.mxu1 %v14410_v10  ;;  %v14430_v10 = vld [vmem:[#allocation3 + $0x1e8] sm:$0xff]  }
 0x4e9   : > { %13505 = vmatprep.subr.bf16.mxu1 %v14411_v49 }
 0x4eb   : > { %13474 = vmatmul.mubr.bf16.gmra.mrb[12].mxu1 %v18969_v45  ;;  %v9356_v45 = vld [vmem:[#allocation2 + $0x24] sm:$0xf] }
 0x4ec   : > { %13477 = vmatprep.mubr.bf16.mxu1 %v18972_v39  ;;  %13506 = vmatpush3.bf16.msra.mxu1 %v14411_v49  ;;  %v9353_v49 = vld [vmem:[#allocation2 + $0x18] sm:$0xf]  ;;  %v9429_v59 = vshll.u32 %v9356_v45, 16 }
 0x4ed   : > { %13507 = vmatprep.subr.bf16.mxu1 %v14412_v2  ;;  %v9402_v27 = vshrl.u32 %v9353_v49, 16  ;;  %v9405_v39 = vshll.u32 %v9353_v49, 16 }
 0x4ee   : > { %v9431_v43 = vrot.slane %v9429_v59, 5  ;;  %v19000_v59 = vld [vmem:[#allocation38_spill] sm:$0xff] }
 0x4ef   : > { %v9404_v41 = vrot.slane %v9402_v27, 4 }
 0x4f0   : > { %13508 = vmatpush3.bf16.msra.mxu1 %v14412_v2  ;;  %v18994_v2 = vld [vmem:[#allocation32_spill] sm:$0xff] }
 0x4f1   : > { %13541 = vmatprep.subr.bf16.mxu1 %v14415_v9  ;;  %v9411_v47 = vshll.u32 %v18994_v2, 16  ;;  %v9415_v57 = vshrl.u32 %v18994_v2, 16 }
 0x4f3   : > { %13478 = vmatmul.mubr.bf16.gmra.mrb[16].mxu1 %v18975_v17  ;;  %v9413_v62 = vrot.slane %v9411_v47, 5  ;;  %v9417_v51 = vrot.slane %v9415_v57, 4  ;;  %v9426_v17 = vshrl.u32 %v9356_v45, 16  ;;  %v14432_v47 = vld [vmem:[#allocation2 + $0xb4] sm:$0xff]  }
 0x4f4   : > { %13481 = vmatprep.mubr.bf16.mxu1 %v18978_v30  ;;  %v9407_v30 = vrot.slane %v9405_v39, 5 }
 0x4f5   : > { %v9428_v26 = vrot.slane %v9426_v17, 4 }
 0x4fb   : > { %13482 = vmatmul.mubr.bf16.gmra.mrb[20].mxu1 %v18981_v22  ;;  %v9418_v22 = vor.u32 %v9417_v51, %v9413_v62 }
 0x4fc   : > { %13485 = vmatprep.mubr.bf16.mxu1 %v18984_v3  ;;  %v9439_v3 = vshrl.u32 %v18995_v4, 16  ;;  %v9365_v4 = vld [vmem:[#allocation2 + $0x48] sm:$0xf] }
 0x4fd   : > { %v9419_v15 = vrot.slane %v9418_v22, 4 }
 0x503   : > { %13486 = vmatmul.mubr.bf16.gmra.mrb[24].mxu1 %v18987_v42  ;;  %v9408_v42 = vor.u32 %v9407_v30, %v9404_v41  ;;  %v9483_v41 = vshll.u32 %v19000_v59, 16  ;;  %v9487_v30 = vshrl.u32 %v19000_v59, 16 }
 0x504   : > { %13489 = vmatprep.mubr.bf16.mxu1 %v18990_v50  ;;  %v14431_v50 = vld [vmem:[#allocation2 + $0xa8] sm:$0xff]  }
 0x50b   : > { %13490 = vmatmul.mubr.bf16.gmra.mrb[28].mxu1 %v18993_v11  ;;  %v9432_v11 = vor.u32 %v9431_v43, %v9428_v26  ;;  %v19001_v26 = vld [vmem:[#allocation39_spill] sm:$0xff] }
 0x50c   : > { %13509 = vmatprep.mubr.bf16.mxu1 %v14413_v20  ;;  %v17996_v20 = vrot.slane %v9435_v8, 5  ;;  %v9507_v43 = vshll.u32 %v19001_v26, 16 }
 0x513   : > { %13510 = vmatmul.mubr.bf16.vlgmr.msra.gmra.mrb[0].mxu1 %v14414_v35  ;;  %v9441_v35 = vrot.slane %v9439_v3, 4  ;;  %v18020_v3 = vld [vmem:[#allocation2 + $0xd0] sm:$0xf] }
 0x514   : > { %13513 = vmatprep.mubr.bf16.mxu1 %v14416_v60  ;;  %13542 = vmatpush3.bf16.msra.mxu1 %v14415_v9  ;;  %v14428_v9 = vld [vmem:[#allocation2 + $0x90] sm:$0xff]  }
 0x515   : > { %13543 = vmatprep.subr.bf16.mxu1 %v14418_v56  ;;  %v18997_v60 = vld [vmem:[#allocation36_spill] sm:$0xff] }
 0x518   : > { %13544 = vmatpush3.bf16.msra.mxu1 %v14418_v56  ;;  %v9453_v56 = vshll.u32 %v9359_v48, 16  ;;  %v18022_v48 = vld [vmem:[#allocation2 + $0xd4] sm:$0x1] }
 0x519   : > { %13545 = vmatprep.subr.bf16.mxu1 %v14421_v55 }
 0x51b   : > { %13514 = vmatmul.mubr.bf16.gmra.mrb[4].mxu1 %v14417_v1  ;;  %v9463_v1 = vshrl.u32 %v18997_v60, 16 }
 0x51c   : > { %13517 = vmatprep.mubr.bf16.mxu1 %v14419_v40  ;;  %13546 = vmatpush3.bf16.msra.mxu1 %v14421_v55  ;;  %v9459_v55 = vshll.u32 %v18997_v60, 16  ;;  %v9423_v40 = vrot.slane %v9421_v19, 5  ;;  %v10278_v19 = vrot.slane %v18020_v3, 5 }
 0x51d   : > { %13547 = vmatprep.subr.bf16.mxu1 %v14424_v14  ;;  %v9465_v2 = vrot.slane %v9463_v1, 4  ;;  %v9489_v1 = vrot.slane %v9487_v30, 4 }
 0x51e   : > { %v18006_v49 = vrot.slane %v9459_v55, 5  ;;  %v18030_v55 = vrot.slane %v9483_v41, 5  ;;  %v19003_v41 = vld [vmem:[#allocation42_spill] sm:$0xff] }
 0x51f   : > { %v9493_v30 = vshll.u32 %v19003_v41, 16 }
 0x520   : > { %13548 = vmatpush3.bf16.msra.mxu1 %v14424_v14  ;;  %v9409_v14 = vrot.slane %v9408_v42, 4  ;;  %v9511_v42 = vshrl.u32 %v19001_v26, 16 }
 0x521   : > { %13549 = vmatprep.subr.bf16.mxu1 %v14427_v23 }
 0x522   : > { %v9414_v57 = vsel %vm14776_vm2, %v9409_v14, %v9413_v62  ;;  %v10280_v14 = vrot.slane %v10278_v19, 4 }
 0x523   : > { %13518 = vmatmul.mubr.bf16.gmra.mrb[8].mxu1 %v14420_v21 }
 0x524   : > { %13521 = vmatprep.mubr.bf16.mxu1 %v14422_v16  ;;  %13550 = vmatpush3.bf16.msra.mxu1 %v14427_v23  ;;  %v18998_v23 = vld [vmem:[#allocation35_spill] sm:$0xff]  ;;  %v9362_v16 = vld [vmem:[#allocation2 + $0x3c] sm:$0xf] }
 0x525   : > { %13551 = vmatprep.subr.bf16.mxu1 %v14430_v10  ;;  %v9445_v21 = vshll.u32 %v18998_v23, 16  ;;  %v9474_v39 = vshrl.u32 %v9362_v16, 16  ;;  %v9477_v17 = vshll.u32 %v9362_v16, 16  ;;  %v9498_v23 = vshrl.u32 %v9365_v4, 16 }
 0x527   : > { %v18010_v45 = vrot.slane %v9445_v21, 5  ;;  %v9479_v60 = vrot.slane %v9477_v17, 5  ;;  %v9501_v21 = vshll.u32 %v9365_v4, 16  ;;  %v9490_v4 = vor.u32 %v9489_v1, %v18030_v55  ;;  %v19005_v1 = vld [vmem:[#allocation46_spill] sm:$0xff] }
 0x528   : > { %13552 = vmatpush3.bf16.msra.mxu1 %v14430_v10  ;;  %v9452_v10 = vrot.slane %v9450_v61, 4  ;;  %v9476_v61 = vrot.slane %v9474_v39, 4 }
 0x529   : > { %13553 = vmatprep.subr.bf16.mxu1 %v14433_v54  ;;  %v9503_v26 = vrot.slane %v9501_v21, 5 }
 0x52a   : > { %v9480_v0 = vor.u32 %v9479_v60, %v9476_v61  ;;  %v9495_v60 = vrot.slane %v9493_v30, 5 }
 0x52b   : > { %13522 = vmatmul.mubr.bf16.gmra.mrb[12].mxu1 %v14423_v36  ;;  %v18003_v36 = vrot.slane %v9432_v11, 4 }
 0x52c   : > { %13525 = vmatprep.mubr.bf16.mxu1 %v14425_v33  ;;  %13554 = vmatpush3.bf16.msra.mxu1 %v14433_v54  ;;  %v9424_v54 = vsel %vm14776_vm2, %v9419_v15, %v9423_v40  ;;  %v9455_v33 = vrot.slane %v9453_v56, 5  ;;  %v19002_v15 = vld [vmem:[#allocation45_spill] sm:$0xff]  ;;  %v12228_v56 = vrot.slane %v10122_v63, 9  ;;  %v14435_v40 = vld [vmem:[#allocation2 + $0xcc] sm:$0xff]  }
 0x52d   : > { %13555 = vmatprep.subr.bf16.mxu1 %v14436_v34  ;;  %v12189_v51 = vcombine.low %v9414_v57, %v9424_v54  ;;  %v9438_v8 = vsel %vm14776_vm2, %v18003_v36, %v17996_v20  ;;  %v9531_v11 = vshll.u32 %v19002_v15, 16  ;;  %v9513_v54 = vrot.slane %v9511_v42, 4 }
 0x52e   : > { %v9456_v22 = vor.u32 %v9455_v33, %v9452_v10  ;;  %v18032_v10 = vrot.slane %v9507_v43, 5  ;;  %v18036_v16 = vsel %vm15106_vm5, %v12228_v56, %v10278_v19  ;;  %v9491_v56 = vrot.slane %v9490_v4, 4 }
 0x530   : > { %13556 = vmatpush3.bf16.msra.mxu1 %v14436_v34  ;;  %v9442_v34 = vor.u32 %v9441_v35, %v17996_v20  ;;  %v9368_v20 = vld [vmem:[#allocation2 + $0x54] sm:$0xf]  ;;  %v9535_v35 = vshrl.u32 %v19002_v15, 16  ;;  %v9457_v17 = vrot.slane %v9456_v22, 4  ;;  %v9514_v43 = vor.u32 %v9513_v54, %v18032_v10  ;;  %v14484_v15 = vld [vmem:[#allocation2 + $0x50] sm:$0x1] }
 0x531   : > { %13589 = vmatprep.subr.bf16.mxu1 %v17988_v53  ;;  %v9522_v36 = vshrl.u32 %v9368_v20, 16 }
 0x532   : > { %v9443_v62 = vrot.slane %v9442_v34, 4  ;;  %v9525_v34 = vshll.u32 %v9368_v20, 16  ;;  %v9537_v57 = vrot.slane %v9535_v35, 4  ;;  %v9462_v61 = vsel %vm14776_vm2, %v9457_v17, %v18006_v49  ;;  %v19006_v17 = vld [vmem:[#allocation51_spill] sm:$0xff] }
 0x533   : > { %13526 = vmatmul.mubr.bf16.gmra.mrb[16].mxu1 %v14426_v13  ;;  %v18999_v13 = vld [vmem:[#allocation37_spill] sm:$0xff]  ;;  %v9524_v42 = vrot.slane %v9522_v36, 4  ;;  %v9481_v35 = vrot.slane %v9480_v0, 4  ;;  %v9374_v36 = vld [vmem:[#allocation2 + $0x6c] sm:$0xf]  ;;  %v9583_v41 = vshrl.u32 %v19006_v17, 16 }
 0x534   : > { %13529 = vmatprep.mubr.bf16.mxu1 %v14428_v9  ;;  %v9469_v27 = vshll.u32 %v18999_v13, 16  ;;  %v14434_v9 = vld [vmem:[#allocation2 + $0xc0] sm:$0xff]   ;;  %v9527_v63 = vrot.slane %v9525_v34, 5  ;;  %v9570_v4 = vshrl.u32 %v9374_v36, 16 }
 0x535   : > { %v9371_v13 = vld [vmem:[#allocation2 + $0x60] sm:$0xf]  ;;  %v9486_v30 = vsel %vm14776_vm2, %v9481_v35, %v18030_v55  ;;  %v14439_v55 = vld [vmem:[#allocation3 + $0x210] sm:$0xff]   ;;  %v14486_v35 = vld [vmem:[#allocation2 + $0x7c] sm:$0xf] }
 0x536   : > { %v9546_v19 = vshrl.u32 %v9371_v13, 16  ;;  %v9549_v20 = vshll.u32 %v9371_v13, 16  ;;  %v9528_v21 = vor.u32 %v9527_v63, %v9524_v42 }
 0x538   : > { %v9548_v54 = vrot.slane %v9546_v19, 4  ;;  %v9529_v19 = vrot.slane %v9528_v21, 4 }
 0x53b   : > { %13530 = vmatmul.mubr.bf16.gmra.mrb[20].mxu1 %v14429_v5  ;;  %v9466_v5 = vor.u32 %v9465_v2, %v18006_v49  ;;  %v9471_v2 = vrot.slane %v9469_v27, 5  ;;  %v9500_v27 = vrot.slane %v9498_v23, 4  ;;  %v9515_v23 = vrot.slane %v9514_v43, 4 }
 0x53c   : > { %13533 = vmatprep.mubr.bf16.mxu1 %v14431_v50  ;;  %v10281_v50 = vrot.slane %v18022_v48, 5  ;;  %v9496_v43 = vsel %vm14776_vm2, %v9491_v56, %v9495_v60  ;;  %v9603_v56 = vshll.u32 %v14486_v35, 16  ;;  %v9607_v60 = vshrl.u32 %v14486_v35, 16 }
 0x53d   : > { %v9467_v59 = vrot.slane %v9466_v5, 4 }
 0x53e   : > { %v18040_v33 = vsel %vm15106_vm5, %v10280_v14, %v10281_v50  ;;  %v9541_v14 = vshll.u32 %v19005_v1, 16  ;;  %v12192_v1 = vcombine.low %v9486_v30, %v9496_v43  ;;  %v18085_v30 = vrot.slane %v9603_v56, 5 }
 0x53f   : > { %v12244_v39 = vcombine.low %v18036_v16, %v18040_v33  ;;  %v12260_v16 = vld [vmem:[%s14741_s8 + $0x28] sm:$0xf] }
 0x540   : > { %v9543_v0 = vrot.slane %v9541_v14, 5 }
 0x543   : > { %13534 = vmatmul.mubr.bf16.gmra.mrb[24].mxu1 %v14432_v47  ;;  %v18042_v47 = vrot.slane %v9531_v11, 5  ;;  %v9517_v11 = vshll.u32 %v14484_v15, 16  ;;  %v9572_v15 = vrot.slane %v9570_v4, 4 }
 0x544   : > { %13537 = vmatprep.mubr.bf16.mxu1 %v14434_v9  ;;  %v9448_v9 = vsel %vm14776_vm2, %v9443_v62, %v18010_v45  ;;  %v19004_v45 = vld [vmem:[#allocation48_spill] sm:$0xff] }
 0x545   : > { %v9538_v50 = vor.u32 %v9537_v57, %v18042_v47  ;;  %v9555_v62 = vshll.u32 %v19004_v45, 16  ;;  %v9559_v22 = vshrl.u32 %v19004_v45, 16  ;;  %v12190_v5 = vcombine.low %v9438_v8, %v9448_v9  ;;  %v14438_v8 = vld [vmem:[#allocation3 + $0x208] sm:$0xff]  }
 0x546   : > { %v9551_v57 = vrot.slane %v9549_v20, 5 }
 0x547   : > { %v9539_v34 = vrot.slane %v9538_v50, 4  ;;  %v18061_v13 = vrot.slane %v9555_v62, 5  ;;  %v9561_v49 = vrot.slane %v9559_v22, 4  ;;  %v14485_v62 = vld [vmem:[#allocation2 + $0x68] sm:$0x1] }
 0x548   : > { %v9552_v20 = vor.u32 %v9551_v57, %v9548_v54  ;;  %v9565_v22 = vshll.u32 %v14485_v62, 16  ;;  %v9380_v57 = vld [vmem:[#allocation2 + $0x84] sm:$0xf] }
 0x549   : > { %v9544_v50 = vsel %vm14776_vm2, %v9539_v34, %v9543_v0  ;;  %v9562_v45 = vor.u32 %v9561_v49, %v18061_v13  ;;  %v14440_v34 = vld [vmem:[#allocation3 + $0x218] sm:$0xff]   ;;  %v9618_v0 = vshrl.u32 %v9380_v57, 16  ;;  %v9621_v4 = vshll.u32 %v9380_v57, 16  ;;  %v14442_v57 = vld [vmem:[#allocation3 + $0x228] sm:$0xff]  }
 0x54a   : > { %v9553_v54 = vrot.slane %v9552_v20, 4 }
 0x54b   : > { %13538 = vmatmul.mubr.bf16.gmra.mrb[28].mxu1 %v14435_v40  ;;  %v9504_v40 = vor.u32 %v9503_v26, %v9500_v27  ;;  %v9573_v27 = vshll.u32 %v9374_v36, 16  ;;  %v9377_v26 = vld [vmem:[#allocation2 + $0x78] sm:$0xf]  ;;  %v9567_v36 = vrot.slane %v9565_v22, 5  ;;  %v9563_v49 = vrot.slane %v9562_v45, 4 }
 0x54c   : > { %13557 = vmatprep.mubr.bf16.mxu1 %v12189_v51  ;;  %v9472_v51 = vsel %vm14776_vm2, %v9467_v59, %v9471_v2  ;;  %v9519_v2 = vrot.slane %v9517_v11, 5  ;;  %v9579_v59 = vshll.u32 %v19006_v17, 16  ;;  %v9558_v62 = vsel %vm14776_vm2, %v9553_v54, %v18061_v13 }
 0x54d   : > { %v12191_v9 = vcombine.low %v9462_v61, %v9472_v51  ;;  %v9505_v42 = vrot.slane %v9504_v40, 4  ;;  %v9594_v61 = vshrl.u32 %v9377_v26, 16  ;;  %v9597_v51 = vshll.u32 %v9377_v26, 16 }
 0x54e   : > { %v9520_v63 = vsel %vm14776_vm2, %v9515_v23, %v9519_v2  ;;  %v9575_v11 = vrot.slane %v9573_v27, 5  ;;  %v9534_v40 = vsel %vm14776_vm2, %v9529_v19, %v18042_v47  ;;  %v9609_v47 = vrot.slane %v9607_v60, 4  ;;  %v14488_v27 = vld [vmem:[#allocation2 + $0x88] sm:$0xf] }
 0x54f   : > { %v9510_v14 = vsel %vm14776_vm2, %v9505_v42, %v18032_v10  ;;  %v12194_v21 = vcombine.low %v9534_v40, %v9544_v50  ;;  %v9596_v2 = vrot.slane %v9594_v61, 4  ;;  %v9599_v17 = vrot.slane %v9597_v51, 5  ;;  %v14441_v42 = vld [vmem:[#allocation3 + $0x220] sm:$0xff]   ;;  %v14489_v50 = vld [vmem:[#allocation2 + $0x94] sm:$0xf] }
 0x550   : > { %v12193_v23 = vcombine.low %v9510_v14, %v9520_v63  ;;  %v9576_v10 = vor.u32 %v9575_v11, %v9572_v15  ;;  %v9627_v26 = vshll.u32 %v14488_v27, 16  ;;  %v9631_v43 = vshrl.u32 %v14488_v27, 16  ;;  %v14490_v11 = vld [vmem:[#allocation2 + $0x80] sm:$0x1]  ;;  %v9386_v40 = vld [vmem:[#allocation2 + $0x9c] sm:$0xf] }
 0x551   : > { %v9651_v20 = vshll.u32 %v14489_v50, 16  ;;  %v9655_v45 = vshrl.u32 %v14489_v50, 16  ;;  %v9568_v22 = vsel %vm14776_vm2, %v9563_v49, %v9567_v36  ;;  %v9610_v15 = vor.u32 %v9609_v47, %v18085_v30 }
 0x552   : > { %v9577_v61 = vrot.slane %v9576_v10, 4  ;;  %v9613_v35 = vshll.u32 %v14490_v11, 16  ;;  %v9620_v56 = vrot.slane %v9618_v0, 4  ;;  %v9623_v60 = vrot.slane %v9621_v4, 5 }
 0x553   : > { %13558 = vmatmul.mubr.bf16.vlgmr.msra.gmra.mrb[0].mxu1 %v12190_v5  ;;  %v18076_v5 = vrot.slane %v9579_v59, 5  ;;  %v9383_v59 = vld [vmem:[#allocation2 + $0x90] sm:$0xf]  ;;  %v9633_v14 = vrot.slane %v9631_v43, 4  ;;  %v18095_v54 = vrot.slane %v9651_v20, 5  ;;  %v9657_v36 = vrot.slane %v9655_v45, 4 }
 0x554   : > { %13561 = vmatprep.mubr.bf16.mxu1 %v12191_v9  ;;  %13590 = vmatpush3.bf16.msra.mxu1 %v17988_v53  ;;  %v9585_v53 = vrot.slane %v9583_v41, 4  ;;  %v9642_v63 = vshrl.u32 %v9383_v59, 16  ;;  %v9645_v19 = vshll.u32 %v9383_v59, 16  ;;  %v12195_v49 = vcombine.low %v9558_v62, %v9568_v22  ;;  %v9389_v20 = vld [vmem:[#allocation2 + $0xa8] sm:$0xf] }
 0x555   : > { %13591 = vmatprep.subr.bf16.mxu1 %v14438_v8  ;;  %v9624_v59 = vor.u32 %v9623_v60, %v9620_v56  ;;  %v9615_v0 = vrot.slane %v9613_v35, 5  ;;  %v9658_v27 = vor.u32 %v9657_v36, %v18095_v54  ;;  %v14493_v45 = vld [vmem:[#allocation2 + $0x98] sm:$0x1]  ;;  %v14494_v22 = vld [vmem:[#allocation2 + $0xac] sm:$0xf]  ;;  %v9690_v56 = vshrl.u32 %v9389_v20, 16 }
 0x556   : > { %v9586_v9 = vor.u32 %v9585_v53, %v18076_v5  ;;  %v9600_v53 = vor.u32 %v9599_v17, %v9596_v2  ;;  %v9644_v13 = vrot.slane %v9642_v63, 4  ;;  %v9611_v17 = vrot.slane %v9610_v15, 4  ;;  %v14492_v63 = vld [vmem:[#allocation2 + $0xa0] sm:$0xf] }
 0x557   : > { %v9679_v50 = vshrl.u32 %v14492_v63, 16  ;;  %v9661_v62 = vshll.u32 %v14493_v45, 16  ;;  %v9659_v35 = vrot.slane %v9658_v27, 4  ;;  %v9693_v60 = vshll.u32 %v9389_v20, 16 }
 0x558   : > { %13592 = vmatpush3.bf16.msra.mxu1 %v14438_v8  ;;  %v14487_v8 = vld [vmem:[#allocation2 + $0x74] sm:$0x1]  ;;  %v9601_v2 = vrot.slane %v9600_v53, 4  ;;  %v9703_v53 = vshrl.u32 %v14494_v22, 16 }
 0x559   : > { %13593 = vmatprep.subr.bf16.mxu1 %v14439_v55  ;;  %v9589_v41 = vshll.u32 %v14487_v8, 16  ;;  %v9666_v8 = vshrl.u32 %v9386_v40, 16  ;;  %v9681_v36 = vrot.slane %v9679_v50, 4  ;;  %v14497_v50 = vld [vmem:[#allocation2 + $0xc4] sm:$0xf] }
 0x55a   : > { %v9747_v20 = vshll.u32 %v14497_v50, 16 }
 0x55b   : > { %13562 = vmatmul.mubr.bf16.gmra.mrb[4].mxu1 %v12192_v1  ;;  %v9591_v51 = vrot.slane %v9589_v41, 5  ;;  %v18093_v1 = vrot.slane %v9627_v26, 5  ;;  %v9669_v41 = vshll.u32 %v9386_v40, 16  ;;  %v14443_v26 = vld [vmem:[#allocation3 + $0x230] sm:$0xff]   ;;  %v9668_v15 = vrot.slane %v9666_v8, 4 }
 0x55c   : > { %13565 = vmatprep.mubr.bf16.mxu1 %v12193_v23  ;;  %13594 = vmatpush3.bf16.msra.mxu1 %v14439_v55  ;;  %v9587_v55 = vrot.slane %v9586_v9, 4  ;;  %v9647_v23 = vrot.slane %v9645_v19, 5  ;;  %v9675_v19 = vshll.u32 %v14492_v63, 16  ;;  %v9395_v63 = vld [vmem:[#allocation2 + $0xc0] sm:$0xf] }
 0x55d   : > { %13595 = vmatprep.subr.bf16.mxu1 %v14440_v34  ;;  %v9634_v10 = vor.u32 %v9633_v14, %v18093_v1  ;;  %v9671_v11 = vrot.slane %v9669_v41, 5  ;;  %v14444_v14 = vld [vmem:[#allocation3 + $0x238] sm:$0xff]  }
 0x55e   : > { %v9592_v9 = vsel %vm14776_vm2, %v9587_v55, %v9591_v51  ;;  %v9648_v4 = vor.u32 %v9647_v23, %v9644_v13  ;;  %v9699_v55 = vshll.u32 %v14494_v22, 16  ;;  %v18109_v23 = vrot.slane %v9675_v19, 5 }
 0x55f   : > { %v9635_v51 = vrot.slane %v9634_v10, 4  ;;  %v14495_v10 = vld [vmem:[#allocation2 + $0xa4] sm:$0x1] }
 0x560   : > { %13596 = vmatpush3.bf16.msra.mxu1 %v14440_v34  ;;  %v9582_v34 = vsel %vm14776_vm2, %v9577_v61, %v18076_v5  ;;  %v14491_v5 = vld [vmem:[#allocation2 + $0x8c] sm:$0x1]  ;;  %v9625_v61 = vrot.slane %v9624_v59, 4  ;;  %v9672_v59 = vor.u32 %v9671_v11, %v9668_v15  ;;  %v9685_v8 = vshll.u32 %v14495_v10, 16 }
 0x561   : > { %13597 = vmatprep.subr.bf16.mxu1 %v14441_v42  ;;  %v12196_v47 = vcombine.low %v9582_v34, %v9592_v9  ;;  %v9637_v43 = vshll.u32 %v14491_v5, 16  ;;  %v18111_v9 = vrot.slane %v9699_v55, 5  ;;  %v9392_v34 = vld [vmem:[#allocation2 + $0xb4] sm:$0xf]  ;;  %v9682_v27 = vor.u32 %v9681_v36, %v18109_v23  ;;  %v9398_v11 = vld [vmem:[#allocation2 + $0xcc] sm:$0xf] }
 0x562   : > { %v9687_v22 = vrot.slane %v9685_v8, 5  ;;  %v9741_v15 = vshll.u32 %v9395_v63, 16  ;;  %v9749_v36 = vrot.slane %v9747_v20, 5  ;;  %v14500_v20 = vld [vmem:[#allocation2 + $0xc8] sm:$0x1] }
 0x563   : > { %13566 = vmatmul.mubr.bf16.gmra.mrb[8].mxu1 %v12194_v21  ;;  %v9606_v21 = vsel %vm14776_vm2, %v9601_v2, %v18085_v30  ;;  %v9649_v30 = vrot.slane %v9648_v4, 4  ;;  %v9639_v13 = vrot.slane %v9637_v43, 5  ;;  %v9705_v2 = vrot.slane %v9703_v53, 4  ;;  %v14498_v53 = vld [vmem:[#allocation2 + $0xb0] sm:$0x1] }
 0x564   : > { %13569 = vmatprep.mubr.bf16.mxu1 %v12195_v49  ;;  %13598 = vmatpush3.bf16.msra.mxu1 %v14441_v42  ;;  %v9616_v42 = vsel %vm14776_vm2, %v9611_v17, %v9615_v0  ;;  %v9663_v49 = vrot.slane %v9661_v62, 5  ;;  %v9692_v0 = vrot.slane %v9690_v56, 4  ;;  %v9695_v4 = vrot.slane %v9693_v60, 5 }
 0x565   : > { %13599 = vmatprep.subr.bf16.mxu1 %v14442_v57  ;;  %v12197_v40 = vcombine.low %v9606_v21, %v9616_v42  ;;  %v9640_v17 = vsel %vm14776_vm2, %v9635_v51, %v9639_v13  ;;  %v9654_v41 = vsel %vm14776_vm2, %v9649_v30, %v18095_v54  ;;  %v14496_v21 = vld [vmem:[#allocation2 + $0xb8] sm:$0xf]  ;;  %v9706_v19 = vor.u32 %v9705_v2, %v18111_v9 }
 0x566   : > { %v9723_v5 = vshll.u32 %v14496_v21, 16  ;;  %v9727_v43 = vshrl.u32 %v14496_v21, 16  ;;  %v9751_v42 = vshrl.u32 %v14497_v50, 16  ;;  %v9673_v62 = vrot.slane %v9672_v59, 4 }
 0x567   : > { %v9696_v55 = vor.u32 %v9695_v4, %v9692_v0  ;;  %v9738_v51 = vshrl.u32 %v9395_v63, 16  ;;  %v9683_v30 = vrot.slane %v9682_v27, 4  ;;  %v9762_v2 = vshrl.u32 %v9398_v11, 16 }
 0x568   : > { %13600 = vmatpush3.bf16.msra.mxu1 %v14442_v57  ;;  %v9630_v57 = vsel %vm14776_vm2, %v9625_v61, %v18093_v1  ;;  %v9714_v1 = vshrl.u32 %v9392_v34, 16  ;;  %v9709_v61 = vshll.u32 %v14498_v53, 16  ;;  %v9725_v56 = vrot.slane %v9723_v5, 5 }
 0x569   : > { %13601 = vmatprep.subr.bf16.mxu1 %v14443_v26  ;;  %v12198_v54 = vcombine.low %v9630_v57, %v9640_v17  ;;  %v9729_v60 = vrot.slane %v9727_v43, 4  ;;  %v9775_v57 = vshrl.u32 %v18020_v3, 16  ;;  %v9697_v17 = vrot.slane %v9696_v55, 4 }
 0x56a   : > { %v9711_v59 = vrot.slane %v9709_v61, 5  ;;  %v9740_v10 = vrot.slane %v9738_v51, 4  ;;  %v9743_v8 = vrot.slane %v9741_v15, 5  ;;  %v9781_v51 = vshll.u32 %v18022_v48, 16 }
 0x56b   : > { %13570 = vmatmul.mubr.bf16.gmra.mrb[12].mxu1 %v12196_v47  ;;  %v9664_v47 = vsel %vm14776_vm2, %v9659_v35, %v9663_v49  ;;  %v9716_v35 = vrot.slane %v9714_v1, 4  ;;  %v9753_v49 = vrot.slane %v9751_v42, 4  ;;  %v9730_v0 = vor.u32 %v9729_v60, %v9725_v56  ;;  %v14499_v1 = vld [vmem:[#allocation2 + $0xbc] sm:$0x1] }
 0x56c   : > { %13573 = vmatprep.mubr.bf16.mxu1 %v12197_v40  ;;  %13602 = vmatpush3.bf16.msra.mxu1 %v14443_v26  ;;  %v9717_v26 = vshll.u32 %v9392_v34, 16  ;;  %v12199_v45 = vcombine.low %v9654_v41, %v9664_v47  ;;  %v9707_v40 = vrot.slane %v9706_v19, 4  ;;  %v9765_v34 = vshll.u32 %v9398_v11, 16 }
 0x56d   : > { %13603 = vmatprep.subr.bf16.mxu1 %v14444_v14  ;;  %v9678_v41 = vsel %vm14776_vm2, %v9673_v62, %v18109_v23  ;;  %v9688_v47 = vsel %vm14776_vm2, %v9683_v30, %v9687_v22  ;;  %v9733_v21 = vshll.u32 %v14499_v1, 16  ;;  %v9754_v5 = vor.u32 %v9753_v49, %v9749_v36 }
 0x56e   : > { %v9719_v13 = vrot.slane %v9717_v26, 5  ;;  %v9712_v4 = vsel %vm14776_vm2, %v9707_v40, %v9711_v59  ;;  %v9767_v43 = vrot.slane %v9765_v34, 5  ;;  %v9777_v19 = vrot.slane %v9775_v57, 4 }
 0x56f   : > { %v12200_v26 = vcombine.low %v9678_v41, %v9688_v47  ;;  %v9702_v23 = vsel %vm14776_vm2, %v9697_v17, %v18111_v9  ;;  %v9744_v50 = vor.u32 %v9743_v8, %v9740_v10  ;;  %v9757_v42 = vshll.u32 %v14500_v20, 16  ;;  %v19007_v17 = vld [vmem:[#allocation40_spill] sm:$0xff]  ;;  %v19010_v10 = vld [vmem:[#allocation43_spill] sm:$0xff]  ;;  %v19014_v47 = vld [vmem:[#allocation49_spill] sm:$0xff] }
 0x570   : > { %13604 = vmatpush3.bf16.msra.mxu1 %v14444_v14  ;;  %v9771_v14 = vshll.u32 %v18020_v3, 16  ;;  %v9720_v27 = vor.u32 %v9719_v13, %v9716_v35  ;;  %v9764_v3 = vrot.slane %v9762_v2, 4  ;;  %v9735_v62 = vrot.slane %v9733_v21, 5  ;;  %v19011_v8 = vld [vmem:[#allocation44_spill] sm:$0xff]  ;;  %v19019_v21 = vld [vmem:[#allocation53_spill] sm:$0xff] }
 0x571   : > { %v9755_v22 = vrot.slane %v9754_v5, 4  ;;  %v9745_v15 = vrot.slane %v9744_v50, 4  ;;  %v9759_v11 = vrot.slane %v9757_v42, 5  ;;  %v9783_v13 = vrot.slane %v9781_v51, 5  ;;  %v19027_v50 = vld [vmem:[#allocation58_spill] sm:$0xff]  ;;  %v19029_v42 = vld [vmem:[#allocation59_spill] sm:$0xff] }
 0x572   : > { %v9773_v63 = vrot.slane %v9771_v14, 5  ;;  %v9721_v55 = vrot.slane %v9720_v27, 4  ;;  %v9768_v53 = vor.u32 %v9767_v43, %v9764_v3  ;;  %v19012_v41 = vcombine.low %v19010_v10, %v19011_v8  ;;  %v19017_v27 = vld [vmem:[#allocation52_spill] sm:$0xff]  ;;  %v19021_v3 = vld [vmem:[#allocation54_spill] sm:$0xff]  ;;  %v19022_v43 = vld [vmem:[#allocation55_spill] sm:$0xff] }
 0x573   : > { %13574 = vmatmul.mubr.bf16.gmra.mrb[16].mxu1 %v12198_v54  ;;  %v12201_v54 = vcombine.low %v9702_v23, %v9712_v4  ;;  %v9760_v9 = vsel %vm14776_vm2, %v9755_v22, %v9759_v11  ;;  %v9750_v2 = vsel %vm14776_vm2, %v9745_v15, %v9749_v36  ;;  %v19013_v36 = vld [vmem:[#allocation47_spill] sm:$0xff]  ;;  %v19016_v4 = vld [vmem:[#allocation50_spill] sm:$0xff]  ;;  %v19020_v5 = vcombine.low %v17719_v28, %v19019_v21  ;;  %v19026_v23 = vld [vmem:[#allocation57_spill] sm:$0xff] }
 0x574   : > { %13577 = vmatprep.mubr.bf16.mxu1 %v12199_v45  ;;  %v9731_v45 = vrot.slane %v9730_v0, 4  ;;  %v9778_v61 = vor.u32 %v9777_v19, %v9773_v63  ;;  %v9726_v35 = vsel %vm14776_vm2, %v9721_v55, %v9725_v56  ;;  %v9769_v60 = vrot.slane %v9768_v53, 4  ;;  %v19008_v56 = vld [vmem:[#allocation41_spill] sm:$0xff]  ;;  %v19024_v19 = vld [vmem:[#allocation56_spill] sm:$0xff]  ;;  %v19034_v22 = vld [vmem:[#allocation62_spill] sm:$0xff] }
 0x575   : > { %v12203_v34 = vcombine.low %v9750_v2, %v9760_v9  ;;  %v19009_v59 = vcombine.low %v19007_v17, %v19008_v56  ;;  %v19015_v0 = vcombine.low %v19013_v36, %v19014_v47  ;;  %v19018_v1 = vcombine.low %v19016_v4, %v19017_v27  ;;  %v19031_v28 = vld [vmem:[#allocation60_spill] sm:$0xff]  ;;  %v19035_v55 = vld [vmem:[#allocation63_spill] sm:$0xff]  ;;  %v12258_v11 = vld [vmem:[%s14741_s8 + $0x20] sm:$0x1] }
 0x576   : > { %v9736_v30 = vsel %vm14776_vm2, %v9731_v45, %v9735_v62  ;;  %v9779_v40 = vrot.slane %v9778_v61, 4  ;;  %v9774_v48 = vsel %vm14776_vm2, %v9769_v60, %v9773_v63  ;;  %v19023_v63 = vcombine.low %v19021_v3, %v19022_v43  ;;  %v19032_v45 = vld [vmem:[#allocation61_spill] sm:$0xff]  ;;  %v12263_v61 = vld [vmem:[%s14741_s8 + $0x34] sm:$0xf]  ;;  %v12261_v3 = vld [vmem:[%s14741_s8 + $0x2c] sm:$0x1] }
 0x577   : > { %v12202_v49 = vcombine.low %v9726_v35, %v9736_v30  ;;  %v19028_v20 = vcombine.low %v19026_v23, %v19027_v50  ;;  %v19033_v62 = vcombine.low %v19031_v28, %v19032_v45  ;;  %v19036_v53 = vcombine.low %v19034_v22, %v19035_v55  ;;  %v12255_v10 = vld [vmem:[%s14741_s8 + $0x14] sm:$0x1] }
 0x578   : > { %v9784_v14 = vsel %vm14776_vm2, %v9779_v40, %v9783_v13  ;;  %v10667_v51 = vshrl.u32 %v12254_v44, 16  ;;  %v10702_v35 = vshrl.u32 %v12259_v31, 16  ;;  %v10705_v60 = vshll.u32 %v12259_v31, 16 }
 0x579   : > { %v12204_v57 = vcombine.low %v9774_v48, %v9784_v14  ;;  %v10735_v40 = vshll.u32 %v12263_v61, 16  ;;  %v10739_v13 = vshrl.u32 %v12263_v61, 16  ;;  %v10715_v2 = vshrl.u32 %v12260_v16, 16 }
 0x57a   : > { %v10656_v48 = vrot.slane %v10654_v25, 4  ;;  %v10697_v56 = vshll.u32 %v12258_v11, 16  ;;  %v10704_v36 = vrot.slane %v10702_v35, 4  ;;  %v10707_v47 = vrot.slane %v10705_v60, 5  ;;  %v12266_v25 = vld [vmem:[%s14741_s8 + $0x40] sm:$0xf] }
 0x57b   : > { %13578 = vmatmul.mubr.bf16.gmra.mrb[20].mxu1 %v12200_v26  ;;  %v19025_v26 = vcombine.low %v17741_v24, %v19024_v19  ;;  %v12256_v24 = vld [vmem:[%s14741_s8 + $0x18] sm:$0xf]  ;;  %v10741_v27 = vrot.slane %v10739_v13, 4  ;;  %v10673_v19 = vshll.u32 %v12255_v10, 16  ;;  %v10759_v60 = vshll.u32 %v12266_v25, 16 }
 0x57c   : > { %13581 = vmatprep.mubr.bf16.mxu1 %v12201_v54  ;;  %v19030_v54 = vcombine.low %v17764_v7, %v19029_v42  ;;  %v12257_v7 = vld [vmem:[%s14741_s8 + $0x1c] sm:$0xf]  ;;  %v10678_v58 = vshrl.u32 %v12256_v24, 16  ;;  %v10681_v52 = vshll.u32 %v12256_v24, 16  ;;  %v10699_v50 = vrot.slane %v10697_v56, 5 }
 0x57d   : > { %v10691_v29 = vshrl.u32 %v12257_v7, 16  ;;  %v10708_v42 = vor.u32 %v10707_v47, %v10704_v36  ;;  %v12271_v56 = vld [vmem:[%s14741_s8 + $0x54] sm:$0xf]  ;;  %v12270_v36 = vld [vmem:[%s14741_s8 + $0x50] sm:$0x1] }
 0x57e   : > { %v10683_v18 = vrot.slane %v10681_v52, 5  ;;  %v12275_v47 = vld [vmem:[%s14741_s8 + $0x64] sm:$0xf] }
 0x57f   : > { %v10693_v15 = vrot.slane %v10691_v29, 4 }
 0x583   : > { %13582 = vmatmul.mubr.bf16.gmra.mrb[24].mxu1 %v12202_v49  ;;  %v10711_v49 = vshll.u32 %v12260_v16, 16 }
 0x584   : > { %13585 = vmatprep.mubr.bf16.mxu1 %v12203_v34 }
 0x585   : > { %v10713_v4 = vrot.slane %v10711_v49, 5 }
 0x58b   : > { %13586 = vmatmul.mubr.bf16.gmra.mrb[28].mxu1 %v12204_v57 }
 0x58c   : > { %13605 = vmatprep.mubr.bf16.mxu1 %v19009_v59  ;;  %v10669_v59 = vrot.slane %v10667_v51, 4 }
 0x593   : > { %13606 = vmatmul.mubr.bf16.vlgmr.msra.gmra.mrb[0].mxu1 %v19012_v41 }
 0x594   : > { %13609 = vmatprep.mubr.bf16.mxu1 %v19015_v0  ;;  %v10737_v0 = vrot.slane %v10735_v40, 5 }
 0x59b   : > { %13610 = vmatmul.mubr.bf16.gmra.mrb[4].mxu1 %v19018_v1  ;;  %v10717_v1 = vrot.slane %v10715_v2, 4 }
 0x59c   : > { %13613 = vmatprep.mubr.bf16.mxu1 %v19020_v5  ;;  %v12264_v5 = vld [vmem:[%s14741_s8 + $0x38] sm:$0x1] }
 0x59d   : > { %v10745_v28 = vshll.u32 %v12264_v5, 16  ;;  %v10718_v45 = vor.u32 %v10717_v1, %v10713_v4  ;;  %v12280_v5 = vld [vmem:[%s14741_s8 + $0x78] sm:$0xf] }
 0x5a3   : > { %13614 = vmatmul.mubr.bf16.gmra.mrb[8].mxu1 %v19023_v63 }
 0x5a4   : > { %13617 = vmatprep.mubr.bf16.mxu1 %v19025_v26  ;;  %v12268_v26 = vld [vmem:[%s14741_s8 + $0x48] sm:$0xf] }
 0x5a5   : > { %v10774_v55 = vshrl.u32 %v12268_v26, 16 }
 0x5a7   : > { %v10776_v61 = vrot.slane %v10774_v55, 4 }
 0x5ab   : > { %13618 = vmatmul.mubr.bf16.gmra.mrb[12].mxu1 %v19028_v20 }
 0x5ac   : > { %13621 = vmatprep.mubr.bf16.mxu1 %v19030_v54  ;;  %v10742_v54 = vor.u32 %v10741_v27, %v10737_v0  ;;  %v18256_v27 = vrot.slane %v10759_v60, 5 }
 0x5b3   : > { %13622 = vmatmul.mubr.bf16.gmra.mrb[16].mxu1 %v19033_v62  ;;  %v10721_v62 = vshll.u32 %v12261_v3, 16  ;;  %v12267_v3 = vld [vmem:[%s14741_s8 + $0x44] sm:$0x1] }
 0x5b4   : > { %13625 = vmatprep.mubr.bf16.mxu1 %v19036_v53  ;;  %v10777_v53 = vshll.u32 %v12268_v26, 16  ;;  %v10801_v26 = vshll.u32 %v12271_v56, 16 }
 0x5b5   : > { %v10723_v31 = vrot.slane %v10721_v62, 5  ;;  %v10873_v62 = vshll.u32 %v12280_v5, 16 }
 0x5b6   : > { %v10779_v16 = vrot.slane %v10777_v53, 5  ;;  %v10793_v53 = vshll.u32 %v12270_v36, 16 }
 0x5bb   : > { %13626 = vmatmul.mubr.bf16.gmra.mrb[20].mxu1 %v12240_v32  ;;  %v10687_v32 = vshll.u32 %v12257_v7, 16  ;;  %v10675_v7 = vrot.slane %v10673_v19, 5  ;;  %v10798_v19 = vshrl.u32 %v12271_v56, 16 }
 0x5bc   : > { %13629 = vmatprep.mubr.bf16.mxu1 %v12241_v38  ;;  %v10680_v38 = vrot.slane %v10678_v58, 4  ;;  %v12269_v58 = vld [vmem:[%s14741_s8 + $0x4c] sm:$0xf] }
 0x5bd   : > { %v18206_v33 = vrot.slane %v10687_v32, 5  ;;  %v10787_v35 = vshrl.u32 %v12269_v58, 16 }
 0x5be   : > { %v10684_v34 = vor.u32 %v10683_v18, %v10680_v38  ;;  %v10743_v38 = vrot.slane %v10742_v54, 4  ;;  %v10747_v18 = vrot.slane %v10745_v28, 5 }
 0x5bf   : > { %v10694_v17 = vor.u32 %v10693_v15, %v18206_v33  ;;  %v10789_v1 = vrot.slane %v10787_v35, 4 }
 0x5c0   : > { %v10685_v43 = vrot.slane %v10684_v34, 4  ;;  %v10748_v49 = vsel %vm14776_vm2, %v10743_v38, %v10747_v18  ;;  %v12276_v18 = vld [vmem:[%s14741_s8 + $0x68] sm:$0x1] }
 0x5c1   : > { %v10695_v23 = vrot.slane %v10694_v17, 4  ;;  %v12274_v17 = vld [vmem:[%s14741_s8 + $0x60] sm:$0xf] }
 0x5c2   : > { %v10690_v52 = vsel %vm14776_vm2, %v10685_v43, %v18206_v33  ;;  %v10822_v43 = vshrl.u32 %v12274_v17, 16 }
 0x5c3   : > { %13630 = vmatmul.mubr.bf16.gmra.mrb[24].mxu1 %v12242_v12  ;;  %v12262_v12 = vld [vmem:[%s14741_s8 + $0x30] sm:$0xf]  ;;  %v10700_v32 = vsel %vm14776_vm2, %v10695_v23, %v10699_v50  ;;  %v18224_v51 = vunpack.c.l.bf16 %v10690_v52  ;;  %v10800_v52 = vrot.slane %v10798_v19, 4 }
 0x5c4   : > { %13633 = vmatprep.mubr.bf16.mxu1 %v12243_v6  ;;  %v10657_v6 = vshll.u32 %v12253_v37, 16  ;;  %v10726_v30 = vshrl.u32 %v12262_v12, 16  ;;  %v10729_v9 = vshll.u32 %v12262_v12, 16  ;;  %v10709_v37 = vrot.slane %v10708_v42, 4 }
 0x5c5   : > { %v10719_v12 = vrot.slane %v10718_v45, 4  ;;  %v18234_v13 = vunpack.c.l.bf16 %v10700_v32  ;;  %v10835_v42 = vshrl.u32 %v12275_v47, 16  ;;  %v10870_v45 = vshrl.u32 %v12280_v5, 16 }
 0x5c6   : > { %v10659_v14 = vrot.slane %v10657_v6, 5  ;;  %v10728_v8 = vrot.slane %v10726_v30, 4  ;;  %v10731_v41 = vrot.slane %v10729_v9, 5  ;;  %v10714_v9 = vsel %vm14776_vm2, %v10709_v37, %v10713_v4 }
 0x5c7   : > { %v10724_v2 = vsel %vm14776_vm2, %v10719_v12, %v10723_v31  ;;  %v18248_v10 = vunpack.c.l.bf16 %v10714_v9  ;;  %v10803_v32 = vrot.slane %v10801_v26, 5  ;;  %v10837_v12 = vrot.slane %v10835_v42, 4  ;;  %v12286_v42 = vld [vmem:[%s14741_s8 + $0x90] sm:$0xf] }
 0x5c8   : > { %v10660_v21 = vor.u32 %v10659_v14, %v10656_v48  ;;  %v10732_v20 = vor.u32 %v10731_v41, %v10728_v8  ;;  %v10780_v48 = vor.u32 %v10779_v16, %v10776_v61  ;;  %v18254_v4 = vunpack.c.l.bf16 %v10724_v2  ;;  %v12278_v2 = vld [vmem:[%s14741_s8 + $0x70] sm:$0xf] }
 0x5c9   : > { %v10872_v61 = vrot.slane %v10870_v45, 4  ;;  %v10875_v16 = vrot.slane %v10873_v62, 5  ;;  %v10859_v5 = vshrl.u32 %v12278_v2, 16 }
 0x5ca   : > { %v10661_v22 = vrot.slane %v10660_v21, 4  ;;  %v10733_v29 = vrot.slane %v10732_v20, 4  ;;  %v12272_v21 = vld [vmem:[%s14741_s8 + $0x58] sm:$0xf]  ;;  %v10781_v23 = vrot.slane %v10780_v48, 4  ;;  %v10831_v20 = vshll.u32 %v12275_v47, 16 }
 0x5cb   : > { %13634 = vmatmul.mubr.bf16.gmra.mrb[28].mxu1 %v12244_v39  ;;  %v10663_v39 = vshll.u32 %v12254_v44, 16  ;;  %v12265_v44 = vld [vmem:[%s14741_s8 + $0x3c] sm:$0xf]  ;;  %v10807_v54 = vshll.u32 %v12272_v21, 16  ;;  %v10811_v28 = vshrl.u32 %v12272_v21, 16  ;;  %v10876_v36 = vor.u32 %v10875_v16, %v10872_v61 }
 0x5cc   : > { %v10750_v15 = vshrl.u32 %v12265_v44, 16  ;;  %v10753_v11 = vshll.u32 %v12265_v44, 16  ;;  %v10738_v30 = vsel %vm14776_vm2, %v10733_v29, %v10737_v0  ;;  %v18252_v0 = vunpack.c.l.bf16 %v10748_v49  ;;  %v12277_v29 = vld [vmem:[%s14741_s8 + $0x6c] sm:$0xf] }
 0x5cd   : > { %v10665_v57 = vrot.slane %v10663_v39, 5  ;;  %v10783_v39 = vshll.u32 %v12269_v58, 16  ;;  %v10833_v38 = vrot.slane %v10831_v20, 5  ;;  %v18268_v31 = vrot.slane %v10807_v54, 5 }
 0x5ce   : > { %v10752_v8 = vrot.slane %v10750_v15, 4  ;;  %v10755_v41 = vrot.slane %v10753_v11, 5  ;;  %v12273_v15 = vld [vmem:[%s14741_s8 + $0x5c] sm:$0x1]  ;;  %v10846_v11 = vshrl.u32 %v12277_v29, 16  ;;  %v10804_v49 = vor.u32 %v10803_v32, %v10800_v52 }
 0x5cf   : > { %v10670_v63 = vor.u32 %v10669_v59, %v10665_v57  ;;  %v10666_v6 = vsel %vm14776_vm2, %v10661_v22, %v10665_v57  ;;  %v18242_v14 = vrot.slane %v10783_v39, 5  ;;  %v10763_v57 = vshrl.u32 %v12266_v25, 16 }
 0x5d0   : > { %v18232_v40 = vunpack.c.l.bf16 %v10666_v6  ;;  %v18246_v59 = vunpack.c.l.bf16 %v10738_v30  ;;  %v10756_v22 = vor.u32 %v10755_v41, %v10752_v8  ;;  %v10813_v25 = vrot.slane %v10811_v28, 4  ;;  %v12281_v6 = vld [vmem:[%s14741_s8 + $0x7c] sm:$0xf] }
 0x5d1   : > { %v10671_v24 = vrot.slane %v10670_v63, 4  ;;  %v10825_v63 = vshll.u32 %v12274_v17, 16  ;;  %v10765_v50 = vrot.slane %v10763_v57, 4  ;;  %v10790_v55 = vor.u32 %v10789_v1, %v18242_v14 }
 0x5d2   : > { %v10786_v37 = vsel %vm14776_vm2, %v10781_v23, %v18242_v14  ;;  %v10757_v39 = vrot.slane %v10756_v22, 4  ;;  %v10849_v30 = vshll.u32 %v12277_v29, 16  ;;  %v10838_v48 = vor.u32 %v10837_v12, %v10833_v38  ;;  %v12282_v22 = vld [vmem:[%s14741_s8 + $0x80] sm:$0x1] }
 0x5d3   : > { %v10676_v33 = vsel %vm14776_vm2, %v10671_v24, %v10675_v7  ;;  %v10769_v24 = vshll.u32 %v12267_v3, 16  ;;  %v10824_v7 = vrot.slane %v10822_v43, 4  ;;  %v10827_v58 = vrot.slane %v10825_v63, 5 }
 0x5d4   : > { %v18240_v34 = vunpack.c.l.bf16 %v10676_v33  ;;  %v10766_v44 = vor.u32 %v10765_v50, %v18256_v27  ;;  %v10795_v33 = vrot.slane %v10793_v53, 5  ;;  %v10791_v9 = vrot.slane %v10790_v55, 4 }
 0x5d5   : > { %v10771_v35 = vrot.slane %v10769_v24, 5  ;;  %v10828_v60 = vor.u32 %v10827_v58, %v10824_v7  ;;  %v10841_v14 = vshll.u32 %v12276_v18, 16  ;;  %v10879_v57 = vshll.u32 %v12281_v6, 16  ;;  %v12279_v24 = vld [vmem:[%s14741_s8 + $0x74] sm:$0x1] }
 0x5d6   : > { %v10883_v17 = vshrl.u32 %v12281_v6, 16  ;;  %v10767_v56 = vrot.slane %v10766_v44, 4  ;;  %v10814_v8 = vor.u32 %v10813_v25, %v18268_v31  ;;  %v10817_v41 = vshll.u32 %v12273_v15, 16  ;;  %v18298_v25 = vld [vmem:[%s18608_s5] ss:$0 sm:$0xff] }
 0x5d7   : > { %v10848_v47 = vrot.slane %v10846_v11, 4  ;;  %v10851_v1 = vrot.slane %v10849_v30, 5  ;;  %v10855_v21 = vshll.u32 %v12278_v2, 16  ;;  %v18274_v3 = vunpack.c.l.bf16 %v10786_v37  ;;  %v18311_v11 = vld [vmem:[%s14741_s8 + $0x94] sm:$0xf] }
 0x5d8   : > { %v10762_v43 = vsel %vm14776_vm2, %v10757_v39, %v18256_v27  ;;  %v10829_v63 = vrot.slane %v10828_v60, 4  ;;  %v10805_v19 = vrot.slane %v10804_v49, 4  ;;  %v10839_v26 = vrot.slane %v10838_v48, 4 }
 0x5d9   : > { %v10843_v23 = vrot.slane %v10841_v14, 5  ;;  %v10881_v50 = vrot.slane %v10879_v57, 5  ;;  %v10885_v20 = vrot.slane %v10883_v17, 4  ;;  %v10796_v54 = vsel %vm14776_vm2, %v10791_v9, %v10795_v33  ;;  %v18317_v9 = vld [vmem:[%s18609_s6] ss:$0 sm:$0xff] }
 0x5da   : > { %v10772_v28 = vsel %vm14776_vm2, %v10767_v56, %v10771_v35  ;;  %v10815_v45 = vrot.slane %v10814_v8, 4  ;;  %v10819_v62 = vrot.slane %v10817_v41, 5  ;;  %v10877_v55 = vrot.slane %v10876_v36, 4 }
 0x5db   : > { %v10852_v53 = vor.u32 %v10851_v1, %v10848_v47  ;;  %v10857_v27 = vrot.slane %v10855_v21, 5  ;;  %v10861_v7 = vrot.slane %v10859_v5, 4  ;;  %v18286_v58 = vunpack.c.l.bf16 %v10762_v43  ;;  %v12283_v21 = vld [vmem:[%s14741_s8 + $0x84] sm:$0xf] }
 0x5dc   : > { %v10834_v52 = vsel %vm14776_vm2, %v10829_v63, %v10833_v38  ;;  %v10918_v32 = vshrl.u32 %v12286_v42, 16  ;;  %v10921_v29 = vshll.u32 %v12286_v42, 16  ;;  %v10810_v37 = vsel %vm14776_vm2, %v10805_v19, %v18268_v31 }
 0x5dd   : > { %v10844_v44 = vsel %vm14776_vm2, %v10839_v26, %v10843_v23  ;;  %v10886_v18 = vor.u32 %v10885_v20, %v10881_v50  ;;  %v10889_v12 = vshll.u32 %v12282_v22, 16  ;;  %v18300_v6 = vunpack.c.l.bf16 %v10796_v54 }
 0x5de   : > { %v18302_v38 = vunpack.c.l.bf16 %v10772_v28  ;;  %v10820_v61 = vsel %vm14776_vm2, %v10815_v45, %v10819_v62  ;;  %v10865_v16 = vshll.u32 %v12279_v24, 16  ;;  %v18306_v39 = vunpack.c.l.bf16 %v10834_v52  ;;  %v12284_v24 = vld [vmem:[%s14741_s8 + $0x88] sm:$0xf] }
 0x5df   : > { %v10882_v31 = vsel %vm14776_vm2, %v10877_v55, %v10881_v50  ;;  %v10853_v33 = vrot.slane %v10852_v53, 4  ;;  %v10862_v15 = vor.u32 %v10861_v7, %v10857_v27  ;;  %v18319_v35 = vunpack.c.l.bf16 %v10810_v37 }
 0x5e0   : > { %v18321_v60 = vunpack.c.l.bf16 %v10844_v44  ;;  %v10920_v49 = vrot.slane %v10918_v32, 4  ;;  %v10923_v2 = vrot.slane %v10921_v29, 5  ;;  %v18324_v57 = vunpack.c.l.bf16 %v10820_v61 }
 0x5e1   : > { %v10887_v17 = vrot.slane %v10886_v18, 4  ;;  %v10891_v56 = vrot.slane %v10889_v12, 5  ;;  %v18327_v36 = vunpack.c.l.bf16 %v10882_v31  ;;  %v10867_v47 = vrot.slane %v10865_v16, 5 }
 0x5e2   : > { %v10927_v1 = vshll.u32 %v18311_v11, 16  ;;  %v10858_v19 = vsel %vm14776_vm2, %v10853_v33, %v10857_v27  ;;  %v10863_v26 = vrot.slane %v10862_v15, 4  ;;  %v10924_v20 = vor.u32 %v10923_v2, %v10920_v49  ;;  %v12285_v2 = vld [vmem:[%s14741_s8 + $0x8c] sm:$0x1] }
 0x5e3   : > { %v10931_v42 = vshrl.u32 %v18311_v11, 16  ;;  %v10892_v45 = vsel %vm14776_vm2, %v10887_v17, %v10891_v56  ;;  %v10894_v62 = vshrl.u32 %v12283_v21, 16  ;;  %v18346_v53 = vunpack.c.l.bf16 %v10858_v19 }
 0x5e4   : > { %v18348_v27 = vrot.slane %v10927_v1, 5  ;;  %v10897_v32 = vshll.u32 %v12283_v21, 16  ;;  %v10925_v18 = vrot.slane %v10924_v20, 4  ;;  %v10903_v16 = vshll.u32 %v12284_v24, 16 }
 0x5e5   : > { %v10907_v31 = vshrl.u32 %v12284_v24, 16  ;;  %v10896_v49 = vrot.slane %v10894_v62, 4  ;;  %v10913_v20 = vshll.u32 %v12285_v2, 16 }
 0x5e6   : > { %v10899_v56 = vrot.slane %v10897_v32, 5  ;;  %v10930_v21 = vsel %vm14776_vm2, %v10925_v18, %v18348_v27  ;;  %v18379_v19 = vrot.slane %v10903_v16, 5 }
 0x5e7   : > { %v18386_v24 = vunpack.c.l.bf16 %v10930_v21 }
 0x666   : > { %v13607_v30 = vpop.f32.mrb[0].mxu1 }
 0x667   : > { %v11110_v48 = vmul.f32 %v13607_v30, %v18298_v25  ;;  %v10446_v14 = vpop.f32.mrb[1].mxu1 }
 0x668   : > { %v11108_v8 = vmul.f32 %v18298_v25, %v10446_v14  ;;  %v13608_v41 = vpop.f32.mrb[2].mxu1 }
 0x669   : > { %v11149_v5 = vadd.f32 %v18317_v9, %v11110_v48  ;;  %v11111_v43 = vmul.f32 %v13608_v41, %v18298_v25  ;;  %v10449_v63 = vpop.f32.mrb[3].mxu1  ;;  %v12292_v41 = vld [vmem:[%s14741_s8 + $0xa8] sm:$0xf] }
 0x66a   : > { %v11147_v23 = vadd.f32 %v18317_v9, %v11108_v8  ;;  %v11109_v50 = vmul.f32 %v18298_v25, %v10449_v63  ;;  %v10933_v8 = vrot.slane %v10931_v42, 4  ;;  %v10966_v42 = vshrl.u32 %v12292_v41, 16 }
 0x66b   : > { %v11181_v54 = vadd.f32 %v11149_v5, %v18224_v51  ;;  %v11150_v28 = vadd.f32 %v18317_v9, %v11111_v43  ;;  %v10868_v51 = vsel %vm14776_vm2, %v10863_v26, %v10867_v47  ;;  %v10909_v26 = vrot.slane %v10907_v31, 4 }
 0x66c   : > { %v11179_v22 = vadd.f32 %v11147_v23, %v18232_v40  ;;  %v11148_v55 = vadd.f32 %v18317_v9, %v11109_v50  ;;  %v18355_v40 = vunpack.c.l.bf16 %v10892_v45  ;;  %v18364_v30 = vunpack.c.l.bf16 %v10868_v51 }
 0x66d   : > { %v11213_v7 = vmax.f32 %v11181_v54, 0.0  ;;  %v11182_v52 = vadd.f32 %v11150_v28, %v18234_v13  ;;  %v10900_v45 = vor.u32 %v10899_v56, %v10896_v49  ;;  %v10968_v18 = vrot.slane %v10966_v42, 4 }
 0x66e   : > { %v11211_v29 = vmax.f32 %v11179_v22, 0.0  ;;  %v11180_v37 = vadd.f32 %v11148_v55, %v18240_v34  ;;  %v13611_v44 = vpop.f32.mrb[4].mxu1  ;;  %v12288_v34 = vld [vmem:[%s14741_s8 + $0x98] sm:$0x1] }
 0x66f   : > { %11245 = vst [vmem:[%s18357_s15 + $0x10] sm:$0xff] %v11213_v7  ;;  %v11214_v12 = vmax.f32 %v11182_v52, 0.0  ;;  %v11114_v13 = vmul.f32 %v13611_v44, %v18298_v25  ;;  %v10462_v61 = vpop.f32.mrb[5].mxu1  ;;  %v10937_v5 = vshll.u32 %v12288_v34, 16  ;;  %v10915_v44 = vrot.slane %v10913_v20, 5 }
 0x670   : > { %11243 = vst [vmem:[%s18357_s15] sm:$0xff] %v11211_v29  ;;  %v11212_v33 = vmax.f32 %v11180_v37, 0.0  ;;  %v11112_v15 = vmul.f32 %v18298_v25, %v10462_v61  ;;  %v13612_v11 = vpop.f32.mrb[6].mxu1  ;;  %v18392_v29 = vld [vmem:[%s14741_s8 + $0xac] sm:$0xf]  ;;  %v10901_v16 = vrot.slane %v10900_v45, 4 }
 0x671   : > { %11246 = vst [vmem:[%s18357_s15 + $0x18] sm:$0xff] %v11214_v12  ;;  %v11153_v48 = vadd.f32 %v18317_v9, %v11114_v13  ;;  %v11115_v14 = vmul.f32 %v13612_v11, %v18298_v25  ;;  %v10465_v17 = vpop.f32.mrb[7].mxu1  ;;  %v10939_v32 = vrot.slane %v10937_v5, 5  ;;  %v12289_v34 = vld [vmem:[%s14741_s8 + $0x9c] sm:$0xf]  ;;  %v10975_v49 = vshll.u32 %v18392_v29, 16 }
 0x672   : > { %11244 = vst [vmem:[%s18357_s15 + $0x8] sm:$0xff] %v11212_v33  ;;  %v11151_v47 = vadd.f32 %v18317_v9, %v11112_v15  ;;  %v11113_v1 = vmul.f32 %v18298_v25, %v10465_v17  ;;  %v10979_v17 = vshrl.u32 %v18392_v29, 16 }
 0x673   : > { %v11185_v43 = vadd.f32 %v11153_v48, %v18246_v59  ;;  %v11154_v63 = vadd.f32 %v18317_v9, %v11115_v14  ;;  %v10934_v59 = vor.u32 %v10933_v8, %v18348_v27 }
 0x674   : > { %v11183_v23 = vadd.f32 %v11151_v47, %v18248_v10  ;;  %v11152_v50 = vadd.f32 %v18317_v9, %v11113_v1  ;;  %v10969_v10 = vshll.u32 %v12292_v41, 16  ;;  %v12290_v41 = vld [vmem:[%s14741_s8 + $0xa0] sm:$0xf]  ;;  %v10942_v47 = vshrl.u32 %v12289_v34, 16 }
 0x675   : > { %v11217_v54 = vmax.f32 %v11185_v43, 0.0  ;;  %v11186_v28 = vadd.f32 %v11154_v63, %v18252_v0  ;;  %v10910_v0 = vor.u32 %v10909_v26, %v18379_v19  ;;  %v10935_v31 = vrot.slane %v10934_v59, 4 }
 0x676   : > { %v11215_v62 = vmax.f32 %v11183_v23, 0.0  ;;  %v11184_v22 = vadd.f32 %v11152_v50, %v18254_v4  ;;  %v13615_v55 = vpop.f32.mrb[8].mxu1  ;;  %v10971_v11 = vrot.slane %v10969_v10, 5  ;;  %v10945_v1 = vshll.u32 %v12289_v34, 16 }
 0x677   : > { %11249 = vst [vmem:[%s18357_s15 + $0x30] sm:$0xff] %v11217_v54  ;;  %v11218_v7 = vmax.f32 %v11186_v28, 0.0  ;;  %v11118_v52 = vmul.f32 %v13615_v55, %v18298_v25  ;;  %v10478_v51 = vpop.f32.mrb[9].mxu1  ;;  %v10911_v14 = vrot.slane %v10910_v0, 4  ;;  %v10940_v43 = vsel %vm14776_vm2, %v10935_v31, %v10939_v32 }
 0x678   : > { %11247 = vst [vmem:[%s18357_s15 + $0x20] sm:$0xff] %v11215_v62  ;;  %v11216_v27 = vmax.f32 %v11184_v22, 0.0  ;;  %v11116_v4 = vmul.f32 %v18298_v25, %v10478_v51  ;;  %v13616_v37 = vpop.f32.mrb[10].mxu1  ;;  %v10972_v23 = vor.u32 %v10971_v11, %v10968_v18  ;;  %v18417_v50 = vrot.slane %v10975_v49, 5 }
 0x679   : > { %11250 = vst [vmem:[%s18357_s15 + $0x38] sm:$0xff] %v11218_v7  ;;  %v11157_v12 = vadd.f32 %v18317_v9, %v11118_v52  ;;  %v11119_v13 = vmul.f32 %v13616_v37, %v18298_v25  ;;  %v10481_v61 = vpop.f32.mrb[11].mxu1  ;;  %v10951_v54 = vshll.u32 %v12290_v41, 16  ;;  %v10944_v59 = vrot.slane %v10942_v47, 4 }
 0x67a   : > { %11248 = vst [vmem:[%s18357_s15 + $0x28] sm:$0xff] %v11216_v27  ;;  %v11155_v33 = vadd.f32 %v18317_v9, %v11116_v4  ;;  %v11117_v15 = vmul.f32 %v18298_v25, %v10481_v61  ;;  %v10947_v62 = vrot.slane %v10945_v1, 5  ;;  %v18430_v52 = vunpack.c.l.bf16 %v10940_v43  ;;  %v12294_v27 = vld [vmem:[%s14741_s8 + $0xb0] sm:$0x1]  ;;  %v12291_v4 = vld [vmem:[%s14741_s8 + $0xa4] sm:$0x1] }
 0x67b   : > { %v11189_v2 = vadd.f32 %v11157_v12, %v18274_v3  ;;  %v11158_v48 = vadd.f32 %v18317_v9, %v11119_v13  ;;  %v10906_v3 = vsel %vm14776_vm2, %v10901_v16, %v18379_v19  ;;  %v10916_v19 = vsel %vm14776_vm2, %v10911_v14, %v10915_v44  ;;  %v12298_v13 = vld [vmem:[%s14741_s8 + $0xc0] sm:$0xf] }
 0x67c   : > { %v11187_v56 = vadd.f32 %v11155_v33, %v18286_v58  ;;  %v11156_v8 = vadd.f32 %v18317_v9, %v11117_v15  ;;  %v18428_v7 = vunpack.c.l.bf16 %v10906_v3  ;;  %v18435_v0 = vunpack.c.l.bf16 %v10916_v19 }
 0x67d   : > { %v11221_v21 = vmax.f32 %v11189_v2, 0.0  ;;  %v11190_v5 = vadd.f32 %v11158_v48, %v18300_v6  ;;  %v10973_v29 = vrot.slane %v10972_v23, 4  ;;  %v10955_v18 = vshrl.u32 %v12290_v41, 16 }
 0x67e   : > { %v11219_v63 = vmax.f32 %v11187_v56, 0.0  ;;  %v11188_v26 = vadd.f32 %v11156_v8, %v18302_v38  ;;  %v13619_v58 = vpop.f32.mrb[12].mxu1  ;;  %v10981_v12 = vrot.slane %v10979_v17, 4  ;;  %v10948_v31 = vor.u32 %v10947_v62, %v10944_v59 }
 0x67f   : > { %11253 = vst [vmem:[%s18357_s15 + $0x50] sm:$0xff] %v11221_v21  ;;  %v11222_v20 = vmax.f32 %v11190_v5, 0.0  ;;  %v11122_v42 = vmul.f32 %v13619_v58, %v18298_v25  ;;  %v10494_v6 = vpop.f32.mrb[13].mxu1  ;;  %v18444_v34 = vrot.slane %v10951_v54, 5  ;;  %v10985_v11 = vshll.u32 %v12294_v27, 16 }
 0x680   : > { %11251 = vst [vmem:[%s18357_s15 + $0x40] sm:$0xff] %v11219_v63  ;;  %v11220_v28 = vmax.f32 %v11188_v26, 0.0  ;;  %v11120_v38 = vmul.f32 %v18298_v25, %v10494_v6  ;;  %v13620_v45 = vpop.f32.mrb[14].mxu1  ;;  %v10961_v49 = vshll.u32 %v12291_v4, 16  ;;  %v11014_v14 = vshrl.u32 %v12298_v13, 16 }
 0x681   : > { %11254 = vst [vmem:[%s18357_s15 + $0x58] sm:$0xff] %v11222_v20  ;;  %v11161_v22 = vadd.f32 %v18317_v9, %v11122_v42  ;;  %v11123_v55 = vmul.f32 %v13620_v45, %v18298_v25  ;;  %v10497_v10 = vpop.f32.mrb[15].mxu1  ;;  %v10957_v41 = vrot.slane %v10955_v18, 4  ;;  %v10949_v21 = vrot.slane %v10948_v31, 4  ;;  %v12295_v6 = vld [vmem:[%s14741_s8 + $0xb4] sm:$0xf] }
 0x682   : > { %11252 = vst [vmem:[%s18357_s15 + $0x48] sm:$0xff] %v11220_v28  ;;  %v11159_v51 = vadd.f32 %v18317_v9, %v11120_v38  ;;  %v11121_v32 = vmul.f32 %v18298_v25, %v10497_v10  ;;  %v11017_v5 = vshll.u32 %v12298_v13, 16  ;;  %v18461_v58 = vrot.slane %v10985_v11, 5  ;;  %v12299_v45 = vld [vmem:[%s14741_s8 + $0xc4] sm:$0xf] }
 0x683   : > { %v11193_v37 = vadd.f32 %v11161_v22, %v18306_v39  ;;  %v11162_v44 = vadd.f32 %v18317_v9, %v11123_v55  ;;  %v18466_v20 = vrot.slane %v10961_v49, 5  ;;  %v18468_v42 = vrot.slane %v11014_v14, 4  ;;  %v12296_v10 = vld [vmem:[%s14741_s8 + $0xb8] sm:$0xf] }
 0x684   : > { %v11191_v61 = vadd.f32 %v11159_v51, %v18319_v35  ;;  %v11160_v16 = vadd.f32 %v18317_v9, %v11121_v32  ;;  %v10978_v35 = vsel %vm14776_vm2, %v10973_v29, %v18417_v50  ;;  %v10958_v38 = vor.u32 %v10957_v41, %v18444_v34  ;;  %v12300_v41 = vld [vmem:[%s14741_s8 + $0xc8] sm:$0x1] }
 0x685   : > { %v11225_v33 = vmax.f32 %v11193_v37, 0.0  ;;  %v11194_v15 = vadd.f32 %v11162_v44, %v18321_v60  ;;  %v10982_v60 = vor.u32 %v10981_v12, %v18417_v50  ;;  %v18459_v26 = vunpack.c.l.bf16 %v10978_v35 }
 0x686   : > { %v11223_v39 = vmax.f32 %v11191_v61, 0.0  ;;  %v11192_v2 = vadd.f32 %v11160_v16, %v18324_v57  ;;  %v13623_v48 = vpop.f32.mrb[16].mxu1  ;;  %v10954_v22 = vsel %vm14776_vm2, %v10949_v21, %v18444_v34  ;;  %v18482_v55 = vrot.slane %v11017_v5, 5 }
 0x687   : > { %11257 = vst [vmem:[%s18357_s15 + $0x70] sm:$0xff] %v11225_v33  ;;  %v11226_v17 = vmax.f32 %v11194_v15, 0.0  ;;  %v11126_v56 = vmul.f32 %v13623_v48, %v18298_v25  ;;  %v10510_v8 = vpop.f32.mrb[17].mxu1  ;;  %v18473_v28 = vrot.slane %v10982_v60, 4  ;;  %v10990_v32 = vshrl.u32 %v12295_v6, 16 }
 0x688   : > { %11255 = vst [vmem:[%s18357_s15 + $0x60] sm:$0xff] %v11223_v39  ;;  %v11224_v47 = vmax.f32 %v11192_v2, 0.0  ;;  %v11124_v57 = vmul.f32 %v18298_v25, %v10510_v8  ;;  %v13624_v1 = vpop.f32.mrb[18].mxu1  ;;  %v10993_v29 = vshll.u32 %v12295_v6, 16  ;;  %v11023_v37 = vshll.u32 %v12299_v45, 16 }
 0x689   : > { %11258 = vst [vmem:[%s18357_s15 + $0x78] sm:$0xff] %v11226_v17  ;;  %v11165_v3 = vadd.f32 %v18317_v9, %v11126_v56  ;;  %v11127_v43 = vmul.f32 %v13624_v1, %v18298_v25  ;;  %v10513_v63 = vpop.f32.mrb[19].mxu1  ;;  %v11027_v44 = vshrl.u32 %v12299_v45, 16  ;;  %v10999_v61 = vshll.u32 %v12296_v10, 16 }
 0x68a   : > { %11256 = vst [vmem:[%s18357_s15 + $0x68] sm:$0xff] %v11224_v47  ;;  %v11163_v23 = vadd.f32 %v18317_v9, %v11124_v57  ;;  %v11125_v50 = vmul.f32 %v18298_v25, %v10513_v63  ;;  %v11003_v16 = vshrl.u32 %v12296_v10, 16  ;;  %v11093_v33 = vunpack.c.l.bf16 %v10954_v22 }
 0x68b   : > { %v11197_v19 = vadd.f32 %v11165_v3, %v18327_v36  ;;  %v11166_v54 = vadd.f32 %v18317_v9, %v11127_v43  ;;  %v10992_v39 = vrot.slane %v10990_v32, 4  ;;  %v10995_v2 = vrot.slane %v10993_v29, 5  ;;  %v12297_v3 = vld [vmem:[%s14741_s8 + $0xbc] sm:$0x1]  ;;  %s12340_s8 = sshll.u32 %s14665_s28, 12  ;;  %s18562_s28 = scalar_lea.sflag [#allocation5], %s284_s20 }
 0x68c   : > { %v11195_v59 = vadd.f32 %v11163_v23, %v18346_v53  ;;  %v11164_v62 = vadd.f32 %v18317_v9, %v11125_v50  ;;  %v11025_v14 = vrot.slane %v11023_v37, 5  ;;  %v11029_v17 = vrot.slane %v11027_v44, 4  ;;  %s18553_s9 = scalar_lea.hbm %s18610_s7, %s12340_s8 }
 0x68d   : > { %v11229_v36 = vmax.f32 %v11197_v19, 0.0  ;;  %v11198_v51 = vadd.f32 %v11166_v54, %v18355_v40  ;;  %v11001_v60 = vrot.slane %v10999_v61, 5  ;;  %v11005_v47 = vrot.slane %v11003_v16, 4 }
 0x68e   : > { %v11227_v27 = vmax.f32 %v11195_v59, 0.0  ;;  %v11196_v4 = vadd.f32 %v11164_v62, %v18364_v30  ;;  %v13627_v53 = vpop.f32.mrb[20].mxu1  ;;  %v10959_v30 = vrot.slane %v10958_v38, 4  ;;  %v10988_v21 = vsel %vm14776_vm2, %v18473_v28, %v18461_v58 }
 0x68f   : > { %11261 = vst [vmem:[%s18357_s15 + $0x90] sm:$0xff] %v11229_v36  ;;  %v11230_v18 = vmax.f32 %v11198_v51, 0.0  ;;  %v11130_v12 = vmul.f32 %v13627_v53, %v18298_v25  ;;  %v10526_v13 = vpop.f32.mrb[21].mxu1  ;;  %v11020_v5 = vor.u32 %v18482_v55, %v18468_v42  ;;  %v11030_v19 = vor.u32 %v11029_v17, %v11025_v14 }
 0x690   : > { %11259 = vst [vmem:[%s18357_s15 + $0x80] sm:$0xff] %v11227_v27  ;;  %v11228_v31 = vmax.f32 %v11196_v4, 0.0  ;;  %v11128_v40 = vmul.f32 %v18298_v25, %v10526_v13  ;;  %v13628_v34 = vpop.f32.mrb[22].mxu1  ;;  %v10964_v63 = vsel %vm14776_vm2, %v10959_v30, %v18466_v20  ;;  %v11033_v58 = vshll.u32 %v12300_v41, 16 }
 0x691   : > { %11262 = vst [vmem:[%s18357_s15 + $0x98] sm:$0xff] %v11230_v18  ;;  %v11169_v15 = vadd.f32 %v18317_v9, %v11130_v12  ;;  %v11131_v11 = vmul.f32 %v13628_v34, %v18298_v25  ;;  %v10529_v49 = vpop.f32.mrb[23].mxu1  ;;  %v11006_v38 = vor.u32 %v11005_v47, %v11001_v60  ;;  %v11096_v62 = vunpack.c.l.bf16 %v10988_v21 }
 0x692   : > { %11260 = vst [vmem:[%s18357_s15 + $0x88] sm:$0xff] %v11228_v31  ;;  %v11167_v48 = vadd.f32 %v18317_v9, %v11128_v40  ;;  %v11129_v35 = vmul.f32 %v18298_v25, %v10529_v49  ;;  %v11021_v22 = vrot.slane %v11020_v5, 4  ;;  %v11094_v36 = vunpack.c.l.bf16 %v10964_v63 }
 0x693   : > { %v11201_v56 = vadd.f32 %v11169_v15, %v18386_v24  ;;  %v11170_v8 = vadd.f32 %v18317_v9, %v11131_v11  ;;  %v11031_v27 = vrot.slane %v11030_v19, 4  ;;  %v11035_v4 = vrot.slane %v11033_v58, 5 }
 0x694   : > { %v11199_v57 = vadd.f32 %v11167_v48, %v18428_v7  ;;  %v11168_v1 = vadd.f32 %v18317_v9, %v11129_v35  ;;  %v10996_v7 = vor.u32 %v10995_v2, %v10992_v39  ;;  %v11007_v44 = vrot.slane %v11006_v38, 4 }
 0x695   : > { %v11233_v24 = vmax.f32 %v11201_v56, 0.0  ;;  %v11202_v43 = vadd.f32 %v11170_v8, %v18430_v52  ;;  %v11009_v52 = vshll.u32 %v12297_v3, 16  ;;  %v11026_v61 = vsel %vm14776_vm2, %v11021_v22, %v11025_v14 }
 0x696   : > { %v11231_v23 = vmax.f32 %v11199_v57, 0.0  ;;  %v11200_v50 = vadd.f32 %v11168_v1, %v18435_v0  ;;  %v13631_v6 = vpop.f32.mrb[24].mxu1  ;;  %v10997_v51 = vrot.slane %v10996_v7, 4  ;;  %v11036_v15 = vsel %vm14776_vm2, %v11031_v27, %v11035_v4 }
 0x697   : > { %11265 = vst [vmem:[%s18357_s15 + $0xb0] sm:$0xff] %v11233_v24  ;;  %v11234_v54 = vmax.f32 %v11202_v43, 0.0  ;;  %v11134_v42 = vmul.f32 %v13631_v6, %v18298_v25  ;;  %v10542_v28 = vpop.f32.mrb[25].mxu1  ;;  %v11011_v18 = vrot.slane %v11009_v52, 5  ;;  %v11099_v11 = vunpack.c.l.bf16 %v11026_v61 }
 0x698   : > { %11263 = vst [vmem:[%s18357_s15 + $0xa0] sm:$0xff] %v11231_v23  ;;  %v11232_v45 = vmax.f32 %v11200_v50, 0.0  ;;  %v11132_v20 = vmul.f32 %v18298_v25, %v10542_v28  ;;  %v13632_v59 = vpop.f32.mrb[26].mxu1  ;;  %v11002_v40 = vsel %vm14776_vm2, %v10997_v51, %v11001_v60  ;;  %v11100_v8 = vunpack.c.l.bf16 %v11036_v15 }
 0x699   : > { %11266 = vst [vmem:[%s18357_s15 + $0xb8] sm:$0xff] %v11234_v54  ;;  %v11173_v0 = vadd.f32 %v18317_v9, %v11134_v42  ;;  %v11135_v55 = vmul.f32 %v13632_v59, %v18298_v25  ;;  %v10545_v10 = vpop.f32.mrb[27].mxu1  ;;  %v11012_v2 = vsel %vm14776_vm2, %v11007_v44, %v11011_v18  ;;  %v11097_v35 = vunpack.c.l.bf16 %v11002_v40 }
 0x69a   : > { %11264 = vst [vmem:[%s18357_s15 + $0xa8] sm:$0xff] %v11232_v45  ;;  %v11171_v32 = vadd.f32 %v18317_v9, %v11132_v20  ;;  %v11133_v29 = vmul.f32 %v18298_v25, %v10545_v10  ;;  %v11098_v47 = vunpack.c.l.bf16 %v11012_v2 }
 0x69b   : > { %v11205_v53 = vadd.f32 %v11173_v0, %v18459_v26  ;;  %v11174_v37 = vadd.f32 %v18317_v9, %v11135_v55 }
 0x69c   : > { %v11203_v12 = vadd.f32 %v11171_v32, %v11093_v33  ;;  %v11172_v13 = vadd.f32 %v18317_v9, %v11133_v29 }
 0x69d   : > { %v11237_v16 = vmax.f32 %v11205_v53, 0.0  ;;  %v11206_v31 = vadd.f32 %v11174_v37, %v11096_v62 }
 0x69e   : > { %v11235_v34 = vmax.f32 %v11203_v12, 0.0  ;;  %v11204_v30 = vadd.f32 %v11172_v13, %v11094_v36  ;;  %v13635_v26 = vpop.f32.mrb[28].mxu1 }
 0x69f   : > { %11269 = vst [vmem:[%s18357_s15 + $0xd0] sm:$0xff] %v11237_v16  ;;  %v11238_v33 = vmax.f32 %v11206_v31, 0.0  ;;  %v11138_v49 = vmul.f32 %v13635_v26, %v18298_v25  ;;  %v10558_v39 = vpop.f32.mrb[29].mxu1 }
 0x6a0   : > { %11267 = vst [vmem:[%s18357_s15 + $0xc0] sm:$0xff] %v11235_v34  ;;  %v11236_v48 = vmax.f32 %v11204_v30, 0.0  ;;  %v11136_v14 = vmul.f32 %v18298_v25, %v10558_v39  ;;  %v13636_v17 = vpop.f32.mrb[30].mxu1 }
 0x6a1   : > { %11270 = vst [vmem:[%s18357_s15 + $0xd8] sm:$0xff] %v11238_v33  ;;  %v11177_v56 = vadd.f32 %v18317_v9, %v11138_v49  ;;  %v11139_v60 = vmul.f32 %v13636_v17, %v18298_v25  ;;  %v10561_v41 = vpop.f32.mrb[31].mxu1 }
 0x6a2   : > { %11268 = vst [vmem:[%s18357_s15 + $0xc8] sm:$0xff] %v11236_v48  ;;  %v11175_v46 = vadd.f32 %v18317_v9, %v11136_v14  ;;  %v11137_v57 = vmul.f32 %v18298_v25, %v10561_v41 }
 0x6a3   : > { %v11209_v1 = vadd.f32 %v11177_v56, %v11099_v11  ;;  %v11178_v21 = vadd.f32 %v18317_v9, %v11139_v60 }
 0x6a4   : > { %v11207_v5 = vadd.f32 %v11175_v46, %v11097_v35  ;;  %v11176_v3 = vadd.f32 %v18317_v9, %v11137_v57 }
 0x6a5   : > { %v11241_v24 = vmax.f32 %v11209_v1, 0.0  ;;  %v11210_v43 = vadd.f32 %v11178_v21, %v11100_v8 }
 0x6a6   : > { %v11239_v63 = vmax.f32 %v11207_v5, 0.0  ;;  %v11208_v7 = vadd.f32 %v11176_v3, %v11098_v47 }
 0x6a7   : > { %11273 = vst [vmem:[%s18357_s15 + $0xf0] sm:$0xff] %v11241_v24  ;;  %v11242_v23 = vmax.f32 %v11210_v43, 0.0 }
 0x6a8   : > { %11271 = vst [vmem:[%s18357_s15 + $0xe0] sm:$0xff] %v11239_v63  ;;  %v11240_v25 = vmax.f32 %v11208_v7, 0.0 }
 0x6a9   : > { %11274 = vst [vmem:[%s18357_s15 + $0xf8] sm:$0xff] %v11242_v23 }
 0x6aa   : > { %11272 = vst [vmem:[%s18357_s15 + $0xe8] sm:$0xff] %v11240_v25 }
 0x6ab   : > { %14542 = shalt.err (!%p14539_p7)
}
 0x6ac   : > { %s14543_s20 = scalar_lea.hbm %s18553_s9, 4096  ;;  %s14547_s13 = scalar_lea.hbm %s18610_s7, 8192 }
 0x6ad   : > { %p14544_p8 = scmp.ne.s32.totalorder %s18553_s9, %s14543_s20  ;;  %p14548_p1 = scmp.lt.u32.totalorder %s18553_s9, %s18610_s7 }
 0x6ae   : > { %p14549_p0 = scmp.lt.u32.totalorder %s14547_s13, %s14543_s20  ;;  %p14551_p6 = scmp.lt.u32.totalorder %s14543_s20, %s18553_s9 }
 0x6af   : > { %p14545_p11 = pnand %p14544_p8, %p19037_p9 }
 0x6b0   : > { %p14550_p5 = por %p14549_p0, %p14548_p1 }
 0x6b1   : > { %p14546_p13 = pneg %p14545_p11 }
 0x6b2   : > { %p14552_p10 = por %p14551_p6, %p14550_p5 }
 0x6b4   : > { %p14553_p12 = pnand %p14552_p10, %p14546_p13 }
 0x6b6   : > { %14556 = shalt.err (!%p14553_p12)
}
 0x6b7   : > { %s14602_s23 = smov 128   ;;  %s14603_s29 = smov 8  }
 0x6b8   : > { %14154 = dma.vmem_to_hbm [thread:$0]  (%p19037_p9), %s18555_s22, 4096, %s18553_s9, %s18562_s28, %s14602_s23, %s14602_s23, %s14603_s29  }
 0x6b9 PF: > { %p14166_p2 = scmp.ge.s32.totalorder %s14595_s27, 2  ;;  %s11304_s14 = sand.u32 1, %s14583_s24  }
 0x6ba   : > { %p19038_p3 = scmp.ne.s32.totalorder %s18726_s12, 0  ;;  %s11305_s17 = scalar_lea.sflag [#allocation5], %s11304_s14 }
 0x6bc   : > { %p14161_p4 = pnand %p14166_p2, %p19038_p3 }
 0x6be   : > { %14578 = dma.done.wait (!%p14161_p4), %s11305_s17, 4096  }
 0x6bf   : > { %14580 = vsyncadd (!%p14161_p4), %s11305_s17, 4294963200  ;;  %p18_p7 = scmp.ge.s32.totalorder %s14669_s30, 4   ;;  %s19039_s24 = smov %s14587_s25 }
 0x6c0   : > { %s19040_s25 = smov %s14591_s26  ;;  %s19041_s26 = smov %s14680_s10 }
 0x6c1   : > { %s19042_s27 = smov %s14669_s30  ;;  %20 = sbr.rel (!%p18_p7) target bundleno = 4 (0x4), region = 108 }
 0x6c8   :  { %11310 = vsyncpa [#allocation4], 1 }
 0x6c9   :  { %11312 = vsyncpa [#allocation4 + $0x1], 1 }
 0x6ca   :  { %11313 = vsyncpa [#allocation5], 1 }
 0x6cb   :  { %11315 = vsyncpa [#allocation5 + $0x1], 1 }

</bundles_post_ra>
